<compile_context>
chip_gen: v5e
topology: v5e:2x2
jax: 0.10.0
libtpu: 0.0.40
codegen_flags: <defaults>
</compile_context>

<pallas_src>
import functools

import numpy as np
import jax
import jax.numpy as jnp
from jax import lax
from jax.experimental import pallas as pl
from jax.experimental.pallas import tpu as pltpu

LANE = 128       # TPU lane width
SUBLANE = 8      # sublane tile


def _round_up(x, m):
    return (x + m - 1) // m * m


# ------------------------------------------------------------------ Pallas kernel

def _multichain_kernel(x_ref, w0_ref, b0_ref, wl_ref, bl_ref, o_ref,
                       pad_ref, a0_ref, *,
                       kernel_sizes, depth, cout, kmax, W, HW, Bg, S, LM, AW):
    """One grid step: full multichain forward for `Bg` batch items.

    x_ref : (1, CP, SRC_W)                  input, channels padded to CP=8, lanes laid out as
                                            [LM zeros | item0 | gap | item1 | gap | ...]
    w0_ref: (kmax, nc*cout, CP)             layer-0 per-tap weights, chains stacked on rows
    b0_ref: (nc*cout, 1)
    wl_ref: (nc*(depth-1)*kmax, cout, cout) per-tap weights for layers 1..depth-1
    bl_ref: (nc*(depth-1), cout, 1)
    o_ref : (Bg, nc*cout, HW)
    pad_ref: (cout, SRC_W) VMEM scratch     padded activation (pads/gaps zeroed once)
    a0_ref : (nc*cout, AW) VMEM scratch     stacked layer-0 output
    """
    pad_max = (kmax - 1) // 2
    base = LM - pad_max * W            # lane offset of tap dk=0's shifted view

    # ---- layer 0: all chains at once (M = nc*cout = 64), one small matmul per tap.
    acc0 = None
    for dk in range(kmax):
        src = x_ref[0, :, base + dk * W: base + dk * W + AW]            # (CP, AW)
        part = jnp.dot(w0_ref[dk], src, preferred_element_type=jnp.float32)
        acc0 = part if acc0 is None else acc0 + part
    a0_ref[...] = jnp.maximum(acc0 + b0_ref[...], 0.0)

    # ---- zero the shared padded-activation scratch once; pad/gap lanes are never written
    #      again, so every later tap read sees correct 'same'-padding zeros.
    pad_ref[...] = jnp.zeros_like(pad_ref)

    # ---- layers 1..depth-1, per chain (static loop; only this chain's real taps issued).
    for c, k in enumerate(kernel_sizes):
        off = (kmax - k) // 2                          # centered tap offset (odd k only)
        a = a0_ref[c * cout:(c + 1) * cout, :]         # (cout, AW) chain c's layer-0 output
        for l in range(1, depth):
            # stage this layer's input into the padded scratch (128-aligned stores)
            for b in range(Bg):
                pad_ref[:, LM + b * S: LM + b * S + HW] = a[:, b * S: b * S + HW]
            li = c * (depth - 1) + (l - 1)
            acc = None
            for dk in range(off, off + k):
                src = pad_ref[:, base + dk * W: base + dk * W + AW]     # (cout, AW)
                part = jnp.dot(wl_ref[li * kmax + dk], src,
                               preferred_element_type=jnp.float32)
                acc = part if acc is None else acc + part
            a = jnp.maximum(acc + bl_ref[li], 0.0)
        # write this chain's output channels (lane-dense, unmasked stores)
        for b in range(Bg):
            o_ref[b, c * cout:(c + 1) * cout, :] = a[:, b * S: b * S + HW].astype(o_ref.dtype)


# ------------------------------------------------------------------ wrapper

def cnn1d_multichain(x_nchw, params, kernel_sizes, *, num_groups=1):
    """Fused forward. x: (B, Cin, H, W) -> (B, nc*Cout, H, W) (channel concat over chains).

    num_groups splits the batch over "parallel" grid steps: use 1 on v5e/v6e (single
    TensorCore), 2 on v7x so both TensorCores get a step.
    """
    w0, b0, wl, bl = params
    B, Cin, H, W = x_nchw.shape
    HW = H * W
    nc = len(kernel_sizes)
    kmax = max(kernel_sizes)
    cout = b0.shape[0] // nc
    depth = wl.shape[0] // (nc * kmax) + 1
    CP = w0.shape[-1]                              # input channels padded to a sublane tile

    assert HW % LANE == 0, "H*W must be a multiple of 128 for the lane-dense layout"
    assert B % num_groups == 0
    Bg = B // num_groups

    pad_max = (kmax - 1) // 2
    gap = _round_up(max(2 * pad_max * W, 1), LANE)   # zero lanes between batch items
    LM = _round_up(max(pad_max * W, 1), LANE)        # zero lanes before the first item
    S = HW + gap                                     # per-item lane stride
    SRC_W = LM + Bg * S                              # padded-source width per group
    AW = Bg * S - gap                                # matmul N: all items + inner gaps

    # Lay x out lane-dense & pre-padded: [LM zeros | item0 | gap | item1 | gap] per group.
    x = x_nchw.reshape(B, Cin, HW).astype(jnp.float32)
    x = jnp.pad(x, ((0, 0), (0, CP - Cin), (0, gap)))                        # (B, CP, S)
    x = x.reshape(num_groups, Bg, CP, S).transpose(0, 2, 1, 3)
    x = x.reshape(num_groups, CP, Bg * S)
    x = jnp.pad(x, ((0, 0), (0, 0), (LM, 0)))                                # (G, CP, SRC_W)

    kernel = functools.partial(
        _multichain_kernel, kernel_sizes=tuple(kernel_sizes), depth=depth, cout=cout,
        kmax=kmax, W=W, HW=HW, Bg=Bg, S=S, LM=LM, AW=AW)

    flops = 2 * B * HW * sum(k * cout * (Cin + (depth - 1) * cout) for k in kernel_sizes)
    bytes_accessed = 4 * (x.size + w0.size + b0.size + wl.size + bl.size
                          + B * nc * cout * HW)

    out = pl.pallas_call(
        kernel,
        out_shape=jax.ShapeDtypeStruct((B, nc * cout, HW), x_nchw.dtype),
        grid=(num_groups,),
        in_specs=[
            pl.BlockSpec((1, CP, SRC_W), lambda g: (g, 0, 0)),     # x: per-group slab
            pl.BlockSpec(w0.shape, lambda g: (0, 0, 0)),           # weights/biases: untiled,
            pl.BlockSpec(b0.shape, lambda g: (0, 0)),              #   constant block index
            pl.BlockSpec(wl.shape, lambda g: (0, 0, 0)),           #   -> fetched once
            pl.BlockSpec(bl.shape, lambda g: (0, 0, 0)),
        ],
        out_specs=pl.BlockSpec((Bg, nc * cout, HW), lambda g: (g, 0, 0)),
        scratch_shapes=[
            pltpu.VMEM((cout, SRC_W), jnp.float32),       # padded activation
            pltpu.VMEM((nc * cout, AW), jnp.float32),     # stacked layer-0 output
        ],
        compiler_params=pltpu.CompilerParams(dimension_semantics=("parallel",)),
        cost_estimate=pl.CostEstimate(flops=flops, transcendentals=0,
                                      bytes_accessed=bytes_accessed),
    )(x, w0, b0, wl, bl)

    return out.reshape(B, nc * cout, H, W)


# ------------------------------------------------------------------ params

def init_chain_params(key, depth=3, input_filters=2, output_filters=16,
                      kernel_sizes=(3, 5, 7, 9)):
    """Per-chain, per-layer weights in PyTorch-like layout: w (Cout, Cin, k), b (Cout,)."""
    chains = []
    for k in kernel_sizes:
        chain = []
        cins = [input_filters] + [output_filters] * (depth - 1)
        for i in range(depth):
            key, kw, kb = jax.random.split(key, 3)
            fan_in = cins[i] * k
            w = jax.random.normal(kw, (output_filters, cins[i], k),
                                  dtype=jnp.float32) / np.sqrt(fan_in)
            b = jax.random.normal(kb, (output_filters,), dtype=jnp.float32) * 0.01
            chain.append((w, b))
        chains.append(chain)
    return chains


def pack_params(chains, kernel_sizes, input_filters):
    """Pack PyTorch-layout weights (Cout, Cin, k) into the kernel's per-tap layout."""
    nc = len(chains)
    depth = len(chains[0])
    cout = chains[0][0][0].shape[0]
    kmax = max(kernel_sizes)
    assert all(k % 2 == 1 for k in kernel_sizes), "tap centering assumes odd kernel sizes"
    assert depth >= 2
    CP = _round_up(input_filters, SUBLANE)           # pad Cin (2) to one sublane tile (8)

    w0 = np.zeros((kmax, nc * cout, CP), np.float32)          # layer 0, chains stacked on rows
    b0 = np.zeros((nc * cout, 1), np.float32)
    wl = np.zeros((nc * (depth - 1) * kmax, cout, cout), np.float32)
    bl = np.zeros((nc * (depth - 1), cout, 1), np.float32)

    for c, k in enumerate(kernel_sizes):
        off = (kmax - k) // 2                                  # center taps inside kmax
        w, b = chains[c][0]
        w, b = np.asarray(w), np.asarray(b)
        for t in range(k):
            w0[off + t, c * cout:(c + 1) * cout, :input_filters] = w[:, :, t]
        b0[c * cout:(c + 1) * cout, 0] = b
        for l in range(1, depth):
            w, b = chains[c][l]
            w, b = np.asarray(w), np.asarray(b)
            li = c * (depth - 1) + (l - 1)
            for t in range(k):
                wl[li * kmax + off + t] = w[:, :, t]
            bl[li, :, 0] = b
    return (jnp.asarray(w0), jnp.asarray(b0), jnp.asarray(wl), jnp.asarray(bl))


# ------------------------------------------------------------------ pure-JAX reference

def _ref_conv_relu(x_nchw, w, b):
    """w: (Cout, Cin, k) -> Conv2d(kernel=(k,1), padding='same') + ReLU."""
    k = w.shape[-1]
    y = lax.conv_general_dilated(
        x_nchw, w[..., None], window_strides=(1, 1),
        padding=(((k - 1) // 2, (k - 1) // 2), (0, 0)),
        dimension_numbers=("NCHW", "OIHW", "NCHW"))
    return jax.nn.relu(y + b[None, :, None, None])


def cnn1d_multichain_ref(x_nchw, chains):
    outs = []
    for chain in chains:
        y = x_nchw
        for (w, b) in chain:
            y = _ref_conv_relu(y, w, b)
        outs.append(y)
    return jnp.concatenate(outs, axis=1)


# ------------------------------------------------------------------ main

if __name__ == "__main__":
    key = jax.random.PRNGKey(0)
    kx, kp = jax.random.split(key)

    B, Cin, H, W = 2, 2, 16, 16                     # NCHW, module defaults (input_filters=2)
    kernel_sizes = (3, 5, 7, 9)
    depth, Cout = 3, 16

    x = jax.random.normal(kx, (B, Cin, H, W), dtype=jnp.float32)
    chains = init_chain_params(kp, depth=depth, input_filters=Cin,
                               output_filters=Cout, kernel_sizes=kernel_sizes)
    params = pack_params(chains, kernel_sizes, input_filters=Cin)

    # num_groups=1: single grid step (best on v5e/v6e); use num_groups=2 on v7x megacore.
    out = cnn1d_multichain(x, params, kernel_sizes, num_groups=1)
    out = jax.block_until_ready(out)
    assert out.shape == (B, Cout * len(kernel_sizes), H, W), out.shape

    ref = jax.block_until_ready(cnn1d_multichain_ref(x, chains))
    max_err = float(jnp.max(jnp.abs(out - ref)))
    assert jnp.allclose(out, ref, atol=1e-3, rtol=1e-3), max_err

    print("KERNEL_OK")
</pallas_src>

<mosaic_0001>
module attributes {stable_mosaic.version = 11 : i64} {
  func.func @_multichain_kernel(%arg0: i32, %arg1: memref<1x8x896xf32, #tpu.memory_space<vmem>>, %arg2: memref<9x64x8xf32, #tpu.memory_space<vmem>>, %arg3: memref<64x1xf32, #tpu.memory_space<vmem>>, %arg4: memref<72x16x16xf32, #tpu.memory_space<vmem>>, %arg5: memref<8x16x1xf32, #tpu.memory_space<vmem>>, %arg6: memref<2x64x256xf32, #tpu.memory_space<vmem>>, %arg7: memref<16x896xf32, #tpu.memory_space<vmem>>, %arg8: memref<64x640xf32, #tpu.memory_space<vmem>>) attributes {dimension_semantics = [#tpu.dimension_semantics<parallel>], iteration_bounds = array<i64: 1>, scalar_prefetch = 0 : i64, scratch_operands = 2 : i64, tpu.core_type = #tpu.core_type<tc>, window_params = [{transform_indices = @transform_0, window_bounds = array<i64: 1, 8, 896>}, {pipeline_mode = #tpu.pipeline_mode<synchronous>, transform_indices = @transform_1, window_bounds = array<i64: 9, 64, 8>}, {pipeline_mode = #tpu.pipeline_mode<synchronous>, transform_indices = @transform_2, window_bounds = array<i64: 64, 1>}, {pipeline_mode = #tpu.pipeline_mode<synchronous>, transform_indices = @transform_3, window_bounds = array<i64: 72, 16, 16>}, {pipeline_mode = #tpu.pipeline_mode<synchronous>, transform_indices = @transform_4, window_bounds = array<i64: 8, 16, 1>}, {transform_indices = @transform_5, window_bounds = array<i64: 2, 64, 256>}]} {
    %c0 = arith.constant 0 : index
    %c0_0 = arith.constant 0 : index
    %c64 = arith.constant 64 : index
    %0 = vector.load %arg1[%c0, %c0_0, %c64] : memref<1x8x896xf32, #tpu.memory_space<vmem>>, vector<1x8x640xf32>
    %1 = vector.shape_cast %0 : vector<1x8x640xf32> to vector<8x640xf32>
    %c0_1 = arith.constant 0 : index
    %c0_2 = arith.constant 0 : index
    %c0_3 = arith.constant 0 : index
    %2 = vector.load %arg2[%c0_1, %c0_2, %c0_3] : memref<9x64x8xf32, #tpu.memory_space<vmem>>, vector<1x64x8xf32>
    %3 = vector.shape_cast %2 : vector<1x64x8xf32> to vector<64x8xf32>
    %cst = arith.constant dense<0.000000e+00> : vector<64x640xf32>
    %4 = tpu.matmul %3, %1, %cst {dimension_numbers = #tpu.dot_dimension_numbers<[1], [0], [0], [1], [0, 0, 1, 1], [], []>} : vector<64x8xf32>, vector<8x640xf32>, vector<64x640xf32> -> vector<64x640xf32>
    %c0_4 = arith.constant 0 : index
    %c0_5 = arith.constant 0 : index
    %c80 = arith.constant 80 : index
    %5 = vector.load %arg1[%c0_4, %c0_5, %c80] : memref<1x8x896xf32, #tpu.memory_space<vmem>>, vector<1x8x640xf32>
    %6 = vector.shape_cast %5 : vector<1x8x640xf32> to vector<8x640xf32>
    %c1 = arith.constant 1 : index
    %c0_6 = arith.constant 0 : index
    %c0_7 = arith.constant 0 : index
    %7 = vector.load %arg2[%c1, %c0_6, %c0_7] : memref<9x64x8xf32, #tpu.memory_space<vmem>>, vector<1x64x8xf32>
    %8 = vector.shape_cast %7 : vector<1x64x8xf32> to vector<64x8xf32>
    %cst_8 = arith.constant dense<0.000000e+00> : vector<64x640xf32>
    %9 = tpu.matmul %8, %6, %cst_8 {dimension_numbers = #tpu.dot_dimension_numbers<[1], [0], [0], [1], [0, 0, 1, 1], [], []>} : vector<64x8xf32>, vector<8x640xf32>, vector<64x640xf32> -> vector<64x640xf32>
    %10 = arith.addf %4, %9 : vector<64x640xf32>
    %c0_9 = arith.constant 0 : index
    %c0_10 = arith.constant 0 : index
    %c96 = arith.constant 96 : index
    %11 = vector.load %arg1[%c0_9, %c0_10, %c96] : memref<1x8x896xf32, #tpu.memory_space<vmem>>, vector<1x8x640xf32>
    %12 = vector.shape_cast %11 : vector<1x8x640xf32> to vector<8x640xf32>
    %c2 = arith.constant 2 : index
    %c0_11 = arith.constant 0 : index
    %c0_12 = arith.constant 0 : index
    %13 = vector.load %arg2[%c2, %c0_11, %c0_12] : memref<9x64x8xf32, #tpu.memory_space<vmem>>, vector<1x64x8xf32>
    %14 = vector.shape_cast %13 : vector<1x64x8xf32> to vector<64x8xf32>
    %cst_13 = arith.constant dense<0.000000e+00> : vector<64x640xf32>
    %15 = tpu.matmul %14, %12, %cst_13 {dimension_numbers = #tpu.dot_dimension_numbers<[1], [0], [0], [1], [0, 0, 1, 1], [], []>} : vector<64x8xf32>, vector<8x640xf32>, vector<64x640xf32> -> vector<64x640xf32>
    %16 = arith.addf %10, %15 : vector<64x640xf32>
    %c0_14 = arith.constant 0 : index
    %c0_15 = arith.constant 0 : index
    %c112 = arith.constant 112 : index
    %17 = vector.load %arg1[%c0_14, %c0_15, %c112] : memref<1x8x896xf32, #tpu.memory_space<vmem>>, vector<1x8x640xf32>
    %18 = vector.shape_cast %17 : vector<1x8x640xf32> to vector<8x640xf32>
    %c3 = arith.constant 3 : index
    %c0_16 = arith.constant 0 : index
    %c0_17 = arith.constant 0 : index
    %19 = vector.load %arg2[%c3, %c0_16, %c0_17] : memref<9x64x8xf32, #tpu.memory_space<vmem>>, vector<1x64x8xf32>
    %20 = vector.shape_cast %19 : vector<1x64x8xf32> to vector<64x8xf32>
    %cst_18 = arith.constant dense<0.000000e+00> : vector<64x640xf32>
    %21 = tpu.matmul %20, %18, %cst_18 {dimension_numbers = #tpu.dot_dimension_numbers<[1], [0], [0], [1], [0, 0, 1, 1], [], []>} : vector<64x8xf32>, vector<8x640xf32>, vector<64x640xf32> -> vector<64x640xf32>
    %22 = arith.addf %16, %21 : vector<64x640xf32>
    %c0_19 = arith.constant 0 : index
    %c0_20 = arith.constant 0 : index
    %c128 = arith.constant 128 : index
    %23 = vector.load %arg1[%c0_19, %c0_20, %c128] : memref<1x8x896xf32, #tpu.memory_space<vmem>>, vector<1x8x640xf32>
    %24 = vector.shape_cast %23 : vector<1x8x640xf32> to vector<8x640xf32>
    %c4 = arith.constant 4 : index
    %c0_21 = arith.constant 0 : index
    %c0_22 = arith.constant 0 : index
    %25 = vector.load %arg2[%c4, %c0_21, %c0_22] : memref<9x64x8xf32, #tpu.memory_space<vmem>>, vector<1x64x8xf32>
    %26 = vector.shape_cast %25 : vector<1x64x8xf32> to vector<64x8xf32>
    %cst_23 = arith.constant dense<0.000000e+00> : vector<64x640xf32>
    %27 = tpu.matmul %26, %24, %cst_23 {dimension_numbers = #tpu.dot_dimension_numbers<[1], [0], [0], [1], [0, 0, 1, 1], [], []>} : vector<64x8xf32>, vector<8x640xf32>, vector<64x640xf32> -> vector<64x640xf32>
    %28 = arith.addf %22, %27 : vector<64x640xf32>
    %c0_24 = arith.constant 0 : index
    %c0_25 = arith.constant 0 : index
    %c144 = arith.constant 144 : index
    %29 = vector.load %arg1[%c0_24, %c0_25, %c144] : memref<1x8x896xf32, #tpu.memory_space<vmem>>, vector<1x8x640xf32>
    %30 = vector.shape_cast %29 : vector<1x8x640xf32> to vector<8x640xf32>
    %c5 = arith.constant 5 : index
    %c0_26 = arith.constant 0 : index
    %c0_27 = arith.constant 0 : index
    %31 = vector.load %arg2[%c5, %c0_26, %c0_27] : memref<9x64x8xf32, #tpu.memory_space<vmem>>, vector<1x64x8xf32>
    %32 = vector.shape_cast %31 : vector<1x64x8xf32> to vector<64x8xf32>
    %cst_28 = arith.constant dense<0.000000e+00> : vector<64x640xf32>
    %33 = tpu.matmul %32, %30, %cst_28 {dimension_numbers = #tpu.dot_dimension_numbers<[1], [0], [0], [1], [0, 0, 1, 1], [], []>} : vector<64x8xf32>, vector<8x640xf32>, vector<64x640xf32> -> vector<64x640xf32>
    %34 = arith.addf %28, %33 : vector<64x640xf32>
    %c0_29 = arith.constant 0 : index
    %c0_30 = arith.constant 0 : index
    %c160 = arith.constant 160 : index
    %35 = vector.load %arg1[%c0_29, %c0_30, %c160] : memref<1x8x896xf32, #tpu.memory_space<vmem>>, vector<1x8x640xf32>
    %36 = vector.shape_cast %35 : vector<1x8x640xf32> to vector<8x640xf32>
    %c6 = arith.constant 6 : index
    %c0_31 = arith.constant 0 : index
    %c0_32 = arith.constant 0 : index
    %37 = vector.load %arg2[%c6, %c0_31, %c0_32] : memref<9x64x8xf32, #tpu.memory_space<vmem>>, vector<1x64x8xf32>
    %38 = vector.shape_cast %37 : vector<1x64x8xf32> to vector<64x8xf32>
    %cst_33 = arith.constant dense<0.000000e+00> : vector<64x640xf32>
    %39 = tpu.matmul %38, %36, %cst_33 {dimension_numbers = #tpu.dot_dimension_numbers<[1], [0], [0], [1], [0, 0, 1, 1], [], []>} : vector<64x8xf32>, vector<8x640xf32>, vector<64x640xf32> -> vector<64x640xf32>
    %40 = arith.addf %34, %39 : vector<64x640xf32>
    %c0_34 = arith.constant 0 : index
    %c0_35 = arith.constant 0 : index
    %c176 = arith.constant 176 : index
    %41 = vector.load %arg1[%c0_34, %c0_35, %c176] : memref<1x8x896xf32, #tpu.memory_space<vmem>>, vector<1x8x640xf32>
    %42 = vector.shape_cast %41 : vector<1x8x640xf32> to vector<8x640xf32>
    %c7 = arith.constant 7 : index
    %c0_36 = arith.constant 0 : index
    %c0_37 = arith.constant 0 : index
    %43 = vector.load %arg2[%c7, %c0_36, %c0_37] : memref<9x64x8xf32, #tpu.memory_space<vmem>>, vector<1x64x8xf32>
    %44 = vector.shape_cast %43 : vector<1x64x8xf32> to vector<64x8xf32>
    %cst_38 = arith.constant dense<0.000000e+00> : vector<64x640xf32>
    %45 = tpu.matmul %44, %42, %cst_38 {dimension_numbers = #tpu.dot_dimension_numbers<[1], [0], [0], [1], [0, 0, 1, 1], [], []>} : vector<64x8xf32>, vector<8x640xf32>, vector<64x640xf32> -> vector<64x640xf32>
    %46 = arith.addf %40, %45 : vector<64x640xf32>
    %c0_39 = arith.constant 0 : index
    %c0_40 = arith.constant 0 : index
    %c192 = arith.constant 192 : index
    %47 = vector.load %arg1[%c0_39, %c0_40, %c192] : memref<1x8x896xf32, #tpu.memory_space<vmem>>, vector<1x8x640xf32>
    %48 = vector.shape_cast %47 : vector<1x8x640xf32> to vector<8x640xf32>
    %c8 = arith.constant 8 : index
    %c0_41 = arith.constant 0 : index
    %c0_42 = arith.constant 0 : index
    %49 = vector.load %arg2[%c8, %c0_41, %c0_42] : memref<9x64x8xf32, #tpu.memory_space<vmem>>, vector<1x64x8xf32>
    %50 = vector.shape_cast %49 : vector<1x64x8xf32> to vector<64x8xf32>
    %cst_43 = arith.constant dense<0.000000e+00> : vector<64x640xf32>
    %51 = tpu.matmul %50, %48, %cst_43 {dimension_numbers = #tpu.dot_dimension_numbers<[1], [0], [0], [1], [0, 0, 1, 1], [], []>} : vector<64x8xf32>, vector<8x640xf32>, vector<64x640xf32> -> vector<64x640xf32>
    %52 = arith.addf %46, %51 : vector<64x640xf32>
    %c0_44 = arith.constant 0 : index
    %c0_45 = arith.constant 0 : index
    %53 = vector.load %arg3[%c0_44, %c0_45] : memref<64x1xf32, #tpu.memory_space<vmem>>, vector<64x1xf32>
    %54 = vector.broadcast %53 : vector<64x1xf32> to vector<64x640xf32>
    %55 = arith.addf %52, %54 : vector<64x640xf32>
    %cst_46 = arith.constant 0.000000e+00 : f32
    %56 = vector.broadcast %cst_46 : f32 to vector<64x640xf32>
    %57 = arith.maximumf %55, %56 : vector<64x640xf32>
    %c0_47 = arith.constant 0 : index
    %c0_48 = arith.constant 0 : index
    %58 = vector.load %arg8[%c0_47, %c0_48] : memref<64x640xf32, #tpu.memory_space<vmem>>, vector<64x640xf32>
    tpu.vector_store %arg8[%c0_47, %c0_48], %57 {strides = array<i32>} : memref<64x640xf32, #tpu.memory_space<vmem>>, vector<64x640xf32>,
    %cst_49 = arith.constant 0.000000e+00 : f32
    %59 = vector.broadcast %cst_49 : f32 to vector<16x896xf32>
    %c0_50 = arith.constant 0 : index
    %c0_51 = arith.constant 0 : index
    %60 = vector.load %arg7[%c0_50, %c0_51] : memref<16x896xf32, #tpu.memory_space<vmem>>, vector<16x896xf32>
    tpu.vector_store %arg7[%c0_50, %c0_51], %59 {strides = array<i32>} : memref<16x896xf32, #tpu.memory_space<vmem>>, vector<16x896xf32>,
    %c0_52 = arith.constant 0 : index
    %c0_53 = arith.constant 0 : index
    %61 = vector.load %arg8[%c0_52, %c0_53] : memref<64x640xf32, #tpu.memory_space<vmem>>, vector<16x640xf32>
    %62 = vector.extract_strided_slice %61 {offsets = [0, 0], sizes = [16, 256], strides = [1, 1]} : vector<16x640xf32> to vector<16x256xf32>
    %c0_54 = arith.constant 0 : index
    %c128_55 = arith.constant 128 : index
    %63 = vector.load %arg7[%c0_54, %c128_55] : memref<16x896xf32, #tpu.memory_space<vmem>>, vector<16x256xf32>
    tpu.vector_store %arg7[%c0_54, %c128_55], %62 {strides = array<i32>} : memref<16x896xf32, #tpu.memory_space<vmem>>, vector<16x256xf32>,
    %64 = vector.extract_strided_slice %61 {offsets = [0, 384], sizes = [16, 256], strides = [1, 1]} : vector<16x640xf32> to vector<16x256xf32>
    %c0_56 = arith.constant 0 : index
    %c512 = arith.constant 512 : index
    %65 = vector.load %arg7[%c0_56, %c512] : memref<16x896xf32, #tpu.memory_space<vmem>>, vector<16x256xf32>
    tpu.vector_store %arg7[%c0_56, %c512], %64 {strides = array<i32>} : memref<16x896xf32, #tpu.memory_space<vmem>>, vector<16x256xf32>,
    %c0_57 = arith.constant 0 : index
    %c112_58 = arith.constant 112 : index
    %66 = vector.load %arg7[%c0_57, %c112_58] : memref<16x896xf32, #tpu.memory_space<vmem>>, vector<16x640xf32>
    %c3_59 = arith.constant 3 : index
    %c0_60 = arith.constant 0 : index
    %c0_61 = arith.constant 0 : index
    %67 = vector.load %arg4[%c3_59, %c0_60, %c0_61] : memref<72x16x16xf32, #tpu.memory_space<vmem>>, vector<1x16x16xf32>
    %68 = vector.shape_cast %67 : vector<1x16x16xf32> to vector<16x16xf32>
    %cst_62 = arith.constant dense<0.000000e+00> : vector<16x640xf32>
    %69 = tpu.matmul %68, %66, %cst_62 {dimension_numbers = #tpu.dot_dimension_numbers<[1], [0], [0], [1], [0, 0, 1, 1], [], []>} : vector<16x16xf32>, vector<16x640xf32>, vector<16x640xf32> -> vector<16x640xf32>
    %c0_63 = arith.constant 0 : index
    %c128_64 = arith.constant 128 : index
    %70 = vector.load %arg7[%c0_63, %c128_64] : memref<16x896xf32, #tpu.memory_space<vmem>>, vector<16x640xf32>
    %c4_65 = arith.constant 4 : index
    %c0_66 = arith.constant 0 : index
    %c0_67 = arith.constant 0 : index
    %71 = vector.load %arg4[%c4_65, %c0_66, %c0_67] : memref<72x16x16xf32, #tpu.memory_space<vmem>>, vector<1x16x16xf32>
    %72 = vector.shape_cast %71 : vector<1x16x16xf32> to vector<16x16xf32>
    %cst_68 = arith.constant dense<0.000000e+00> : vector<16x640xf32>
    %73 = tpu.matmul %72, %70, %cst_68 {dimension_numbers = #tpu.dot_dimension_numbers<[1], [0], [0], [1], [0, 0, 1, 1], [], []>} : vector<16x16xf32>, vector<16x640xf32>, vector<16x640xf32> -> vector<16x640xf32>
    %74 = arith.addf %69, %73 : vector<16x640xf32>
    %c0_69 = arith.constant 0 : index
    %c144_70 = arith.constant 144 : index
    %75 = vector.load %arg7[%c0_69, %c144_70] : memref<16x896xf32, #tpu.memory_space<vmem>>, vector<16x640xf32>
    %c5_71 = arith.constant 5 : index
    %c0_72 = arith.constant 0 : index
    %c0_73 = arith.constant 0 : index
    %76 = vector.load %arg4[%c5_71, %c0_72, %c0_73] : memref<72x16x16xf32, #tpu.memory_space<vmem>>, vector<1x16x16xf32>
    %77 = vector.shape_cast %76 : vector<1x16x16xf32> to vector<16x16xf32>
    %cst_74 = arith.constant dense<0.000000e+00> : vector<16x640xf32>
    %78 = tpu.matmul %77, %75, %cst_74 {dimension_numbers = #tpu.dot_dimension_numbers<[1], [0], [0], [1], [0, 0, 1, 1], [], []>} : vector<16x16xf32>, vector<16x640xf32>, vector<16x640xf32> -> vector<16x640xf32>
    %79 = arith.addf %74, %78 : vector<16x640xf32>
    %c0_75 = arith.constant 0 : index
    %c0_76 = arith.constant 0 : index
    %c0_77 = arith.constant 0 : index
    %80 = vector.load %arg5[%c0_75, %c0_76, %c0_77] : memref<8x16x1xf32, #tpu.memory_space<vmem>>, vector<1x16x1xf32>
    %81 = vector.shape_cast %80 : vector<1x16x1xf32> to vector<16x1xf32>
    %82 = vector.broadcast %81 : vector<16x1xf32> to vector<16x640xf32>
    %83 = arith.addf %79, %82 : vector<16x640xf32>
    %cst_78 = arith.constant 0.000000e+00 : f32
    %84 = vector.broadcast %cst_78 : f32 to vector<16x640xf32>
    %85 = arith.maximumf %83, %84 : vector<16x640xf32>
    %86 = vector.extract_strided_slice %85 {offsets = [0, 0], sizes = [16, 256], strides = [1, 1]} : vector<16x640xf32> to vector<16x256xf32>
    %c0_79 = arith.constant 0 : index
    %c128_80 = arith.constant 128 : index
    %87 = vector.load %arg7[%c0_79, %c128_80] : memref<16x896xf32, #tpu.memory_space<vmem>>, vector<16x256xf32>
    tpu.vector_store %arg7[%c0_79, %c128_80], %86 {strides = array<i32>} : memref<16x896xf32, #tpu.memory_space<vmem>>, vector<16x256xf32>,
    %88 = vector.extract_strided_slice %85 {offsets = [0, 384], sizes = [16, 256], strides = [1, 1]} : vector<16x640xf32> to vector<16x256xf32>
    %c0_81 = arith.constant 0 : index
    %c512_82 = arith.constant 512 : index
    %89 = vector.load %arg7[%c0_81, %c512_82] : memref<16x896xf32, #tpu.memory_space<vmem>>, vector<16x256xf32>
    tpu.vector_store %arg7[%c0_81, %c512_82], %88 {strides = array<i32>} : memref<16x896xf32, #tpu.memory_space<vmem>>, vector<16x256xf32>,
    %c0_83 = arith.constant 0 : index
    %c112_84 = arith.constant 112 : index
    %90 = vector.load %arg7[%c0_83, %c112_84] : memref<16x896xf32, #tpu.memory_space<vmem>>, vector<16x640xf32>
    %c12 = arith.constant 12 : index
    %c0_85 = arith.constant 0 : index
    %c0_86 = arith.constant 0 : index
    %91 = vector.load %arg4[%c12, %c0_85, %c0_86] : memref<72x16x16xf32, #tpu.memory_space<vmem>>, vector<1x16x16xf32>
    %92 = vector.shape_cast %91 : vector<1x16x16xf32> to vector<16x16xf32>
    %cst_87 = arith.constant dense<0.000000e+00> : vector<16x640xf32>
    %93 = tpu.matmul %92, %90, %cst_87 {dimension_numbers = #tpu.dot_dimension_numbers<[1], [0], [0], [1], [0, 0, 1, 1], [], []>} : vector<16x16xf32>, vector<16x640xf32>, vector<16x640xf32> -> vector<16x640xf32>
    %c0_88 = arith.constant 0 : index
    %c128_89 = arith.constant 128 : index
    %94 = vector.load %arg7[%c0_88, %c128_89] : memref<16x896xf32, #tpu.memory_space<vmem>>, vector<16x640xf32>
    %c13 = arith.constant 13 : index
    %c0_90 = arith.constant 0 : index
    %c0_91 = arith.constant 0 : index
    %95 = vector.load %arg4[%c13, %c0_90, %c0_91] : memref<72x16x16xf32, #tpu.memory_space<vmem>>, vector<1x16x16xf32>
    %96 = vector.shape_cast %95 : vector<1x16x16xf32> to vector<16x16xf32>
    %cst_92 = arith.constant dense<0.000000e+00> : vector<16x640xf32>
    %97 = tpu.matmul %96, %94, %cst_92 {dimension_numbers = #tpu.dot_dimension_numbers<[1], [0], [0], [1], [0, 0, 1, 1], [], []>} : vector<16x16xf32>, vector<16x640xf32>, vector<16x640xf32> -> vector<16x640xf32>
    %98 = arith.addf %93, %97 : vector<16x640xf32>
    %c0_93 = arith.constant 0 : index
    %c144_94 = arith.constant 144 : index
    %99 = vector.load %arg7[%c0_93, %c144_94] : memref<16x896xf32, #tpu.memory_space<vmem>>, vector<16x640xf32>
    %c14 = arith.constant 14 : index
    %c0_95 = arith.constant 0 : index
    %c0_96 = arith.constant 0 : index
    %100 = vector.load %arg4[%c14, %c0_95, %c0_96] : memref<72x16x16xf32, #tpu.memory_space<vmem>>, vector<1x16x16xf32>
    %101 = vector.shape_cast %100 : vector<1x16x16xf32> to vector<16x16xf32>
    %cst_97 = arith.constant dense<0.000000e+00> : vector<16x640xf32>
    %102 = tpu.matmul %101, %99, %cst_97 {dimension_numbers = #tpu.dot_dimension_numbers<[1], [0], [0], [1], [0, 0, 1, 1], [], []>} : vector<16x16xf32>, vector<16x640xf32>, vector<16x640xf32> -> vector<16x640xf32>
    %103 = arith.addf %98, %102 : vector<16x640xf32>
    %c1_98 = arith.constant 1 : index
    %c0_99 = arith.constant 0 : index
    %c0_100 = arith.constant 0 : index
    %104 = vector.load %arg5[%c1_98, %c0_99, %c0_100] : memref<8x16x1xf32, #tpu.memory_space<vmem>>, vector<1x16x1xf32>
    %105 = vector.shape_cast %104 : vector<1x16x1xf32> to vector<16x1xf32>
    %106 = vector.broadcast %105 : vector<16x1xf32> to vector<16x640xf32>
    %107 = arith.addf %103, %106 : vector<16x640xf32>
    %cst_101 = arith.constant 0.000000e+00 : f32
    %108 = vector.broadcast %cst_101 : f32 to vector<16x640xf32>
    %109 = arith.maximumf %107, %108 : vector<16x640xf32>
    %110 = vector.extract_strided_slice %109 {offsets = [0, 0], sizes = [16, 256], strides = [1, 1]} : vector<16x640xf32> to vector<16x256xf32>
    %c0_102 = arith.constant 0 : index
    %c0_103 = arith.constant 0 : index
    %c0_104 = arith.constant 0 : index
    %111 = vector.load %arg6[%c0_102, %c0_103, %c0_104] : memref<2x64x256xf32, #tpu.memory_space<vmem>>, vector<1x16x256xf32>
    %112 = vector.shape_cast %111 : vector<1x16x256xf32> to vector<16x256xf32>
    %113 = vector.shape_cast %110 : vector<16x256xf32> to vector<1x16x256xf32>
    tpu.vector_store %arg6[%c0_102, %c0_103, %c0_104], %113 {strides = array<i32>} : memref<2x64x256xf32, #tpu.memory_space<vmem>>, vector<1x16x256xf32>,
    %114 = vector.extract_strided_slice %109 {offsets = [0, 384], sizes = [16, 256], strides = [1, 1]} : vector<16x640xf32> to vector<16x256xf32>
    %c1_105 = arith.constant 1 : index
    %c0_106 = arith.constant 0 : index
    %c0_107 = arith.constant 0 : index
    %115 = vector.load %arg6[%c1_105, %c0_106, %c0_107] : memref<2x64x256xf32, #tpu.memory_space<vmem>>, vector<1x16x256xf32>
    %116 = vector.shape_cast %115 : vector<1x16x256xf32> to vector<16x256xf32>
    %117 = vector.shape_cast %114 : vector<16x256xf32> to vector<1x16x256xf32>
    tpu.vector_store %arg6[%c1_105, %c0_106, %c0_107], %117 {strides = array<i32>} : memref<2x64x256xf32, #tpu.memory_space<vmem>>, vector<1x16x256xf32>,
    %c16 = arith.constant 16 : index
    %c0_108 = arith.constant 0 : index
    %118 = vector.load %arg8[%c16, %c0_108] : memref<64x640xf32, #tpu.memory_space<vmem>>, vector<16x640xf32>
    %119 = vector.extract_strided_slice %118 {offsets = [0, 0], sizes = [16, 256], strides = [1, 1]} : vector<16x640xf32> to vector<16x256xf32>
    %c0_109 = arith.constant 0 : index
    %c128_110 = arith.constant 128 : index
    %120 = vector.load %arg7[%c0_109, %c128_110] : memref<16x896xf32, #tpu.memory_space<vmem>>, vector<16x256xf32>
    tpu.vector_store %arg7[%c0_109, %c128_110], %119 {strides = array<i32>} : memref<16x896xf32, #tpu.memory_space<vmem>>, vector<16x256xf32>,
    %121 = vector.extract_strided_slice %118 {offsets = [0, 384], sizes = [16, 256], strides = [1, 1]} : vector<16x640xf32> to vector<16x256xf32>
    %c0_111 = arith.constant 0 : index
    %c512_112 = arith.constant 512 : index
    %122 = vector.load %arg7[%c0_111, %c512_112] : memref<16x896xf32, #tpu.memory_space<vmem>>, vector<16x256xf32>
    tpu.vector_store %arg7[%c0_111, %c512_112], %121 {strides = array<i32>} : memref<16x896xf32, #tpu.memory_space<vmem>>, vector<16x256xf32>,
    %c0_113 = arith.constant 0 : index
    %c96_114 = arith.constant 96 : index
    %123 = vector.load %arg7[%c0_113, %c96_114] : memref<16x896xf32, #tpu.memory_space<vmem>>, vector<16x640xf32>
    %c20 = arith.constant 20 : index
    %c0_115 = arith.constant 0 : index
    %c0_116 = arith.constant 0 : index
    %124 = vector.load %arg4[%c20, %c0_115, %c0_116] : memref<72x16x16xf32, #tpu.memory_space<vmem>>, vector<1x16x16xf32>
    %125 = vector.shape_cast %124 : vector<1x16x16xf32> to vector<16x16xf32>
    %cst_117 = arith.constant dense<0.000000e+00> : vector<16x640xf32>
    %126 = tpu.matmul %125, %123, %cst_117 {dimension_numbers = #tpu.dot_dimension_numbers<[1], [0], [0], [1], [0, 0, 1, 1], [], []>} : vector<16x16xf32>, vector<16x640xf32>, vector<16x640xf32> -> vector<16x640xf32>
    %c0_118 = arith.constant 0 : index
    %c112_119 = arith.constant 112 : index
    %127 = vector.load %arg7[%c0_118, %c112_119] : memref<16x896xf32, #tpu.memory_space<vmem>>, vector<16x640xf32>
    %c21 = arith.constant 21 : index
    %c0_120 = arith.constant 0 : index
    %c0_121 = arith.constant 0 : index
    %128 = vector.load %arg4[%c21, %c0_120, %c0_121] : memref<72x16x16xf32, #tpu.memory_space<vmem>>, vector<1x16x16xf32>
    %129 = vector.shape_cast %128 : vector<1x16x16xf32> to vector<16x16xf32>
    %cst_122 = arith.constant dense<0.000000e+00> : vector<16x640xf32>
    %130 = tpu.matmul %129, %127, %cst_122 {dimension_numbers = #tpu.dot_dimension_numbers<[1], [0], [0], [1], [0, 0, 1, 1], [], []>} : vector<16x16xf32>, vector<16x640xf32>, vector<16x640xf32> -> vector<16x640xf32>
    %131 = arith.addf %126, %130 : vector<16x640xf32>
    %c0_123 = arith.constant 0 : index
    %c128_124 = arith.constant 128 : index
    %132 = vector.load %arg7[%c0_123, %c128_124] : memref<16x896xf32, #tpu.memory_space<vmem>>, vector<16x640xf32>
    %c22 = arith.constant 22 : index
    %c0_125 = arith.constant 0 : index
    %c0_126 = arith.constant 0 : index
    %133 = vector.load %arg4[%c22, %c0_125, %c0_126] : memref<72x16x16xf32, #tpu.memory_space<vmem>>, vector<1x16x16xf32>
    %134 = vector.shape_cast %133 : vector<1x16x16xf32> to vector<16x16xf32>
    %cst_127 = arith.constant dense<0.000000e+00> : vector<16x640xf32>
    %135 = tpu.matmul %134, %132, %cst_127 {dimension_numbers = #tpu.dot_dimension_numbers<[1], [0], [0], [1], [0, 0, 1, 1], [], []>} : vector<16x16xf32>, vector<16x640xf32>, vector<16x640xf32> -> vector<16x640xf32>
    %136 = arith.addf %131, %135 : vector<16x640xf32>
    %c0_128 = arith.constant 0 : index
    %c144_129 = arith.constant 144 : index
    %137 = vector.load %arg7[%c0_128, %c144_129] : memref<16x896xf32, #tpu.memory_space<vmem>>, vector<16x640xf32>
    %c23 = arith.constant 23 : index
    %c0_130 = arith.constant 0 : index
    %c0_131 = arith.constant 0 : index
    %138 = vector.load %arg4[%c23, %c0_130, %c0_131] : memref<72x16x16xf32, #tpu.memory_space<vmem>>, vector<1x16x16xf32>
    %139 = vector.shape_cast %138 : vector<1x16x16xf32> to vector<16x16xf32>
    %cst_132 = arith.constant dense<0.000000e+00> : vector<16x640xf32>
    %140 = tpu.matmul %139, %137, %cst_132 {dimension_numbers = #tpu.dot_dimension_numbers<[1], [0], [0], [1], [0, 0, 1, 1], [], []>} : vector<16x16xf32>, vector<16x640xf32>, vector<16x640xf32> -> vector<16x640xf32>
    %141 = arith.addf %136, %140 : vector<16x640xf32>
    %c0_133 = arith.constant 0 : index
    %c160_134 = arith.constant 160 : index
    %142 = vector.load %arg7[%c0_133, %c160_134] : memref<16x896xf32, #tpu.memory_space<vmem>>, vector<16x640xf32>
    %c24 = arith.constant 24 : index
    %c0_135 = arith.constant 0 : index
    %c0_136 = arith.constant 0 : index
    %143 = vector.load %arg4[%c24, %c0_135, %c0_136] : memref<72x16x16xf32, #tpu.memory_space<vmem>>, vector<1x16x16xf32>
    %144 = vector.shape_cast %143 : vector<1x16x16xf32> to vector<16x16xf32>
    %cst_137 = arith.constant dense<0.000000e+00> : vector<16x640xf32>
    %145 = tpu.matmul %144, %142, %cst_137 {dimension_numbers = #tpu.dot_dimension_numbers<[1], [0], [0], [1], [0, 0, 1, 1], [], []>} : vector<16x16xf32>, vector<16x640xf32>, vector<16x640xf32> -> vector<16x640xf32>
    %146 = arith.addf %141, %145 : vector<16x640xf32>
    %c2_138 = arith.constant 2 : index
    %c0_139 = arith.constant 0 : index
    %c0_140 = arith.constant 0 : index
    %147 = vector.load %arg5[%c2_138, %c0_139, %c0_140] : memref<8x16x1xf32, #tpu.memory_space<vmem>>, vector<1x16x1xf32>
    %148 = vector.shape_cast %147 : vector<1x16x1xf32> to vector<16x1xf32>
    %149 = vector.broadcast %148 : vector<16x1xf32> to vector<16x640xf32>
    %150 = arith.addf %146, %149 : vector<16x640xf32>
    %cst_141 = arith.constant 0.000000e+00 : f32
    %151 = vector.broadcast %cst_141 : f32 to vector<16x640xf32>
    %152 = arith.maximumf %150, %151 : vector<16x640xf32>
    %153 = vector.extract_strided_slice %152 {offsets = [0, 0], sizes = [16, 256], strides = [1, 1]} : vector<16x640xf32> to vector<16x256xf32>
    %c0_142 = arith.constant 0 : index
    %c128_143 = arith.constant 128 : index
    %154 = vector.load %arg7[%c0_142, %c128_143] : memref<16x896xf32, #tpu.memory_space<vmem>>, vector<16x256xf32>
    tpu.vector_store %arg7[%c0_142, %c128_143], %153 {strides = array<i32>} : memref<16x896xf32, #tpu.memory_space<vmem>>, vector<16x256xf32>,
    %155 = vector.extract_strided_slice %152 {offsets = [0, 384], sizes = [16, 256], strides = [1, 1]} : vector<16x640xf32> to vector<16x256xf32>
    %c0_144 = arith.constant 0 : index
    %c512_145 = arith.constant 512 : index
    %156 = vector.load %arg7[%c0_144, %c512_145] : memref<16x896xf32, #tpu.memory_space<vmem>>, vector<16x256xf32>
    tpu.vector_store %arg7[%c0_144, %c512_145], %155 {strides = array<i32>} : memref<16x896xf32, #tpu.memory_space<vmem>>, vector<16x256xf32>,
    %c0_146 = arith.constant 0 : index
    %c96_147 = arith.constant 96 : index
    %157 = vector.load %arg7[%c0_146, %c96_147] : memref<16x896xf32, #tpu.memory_space<vmem>>, vector<16x640xf32>
    %c29 = arith.constant 29 : index
    %c0_148 = arith.constant 0 : index
    %c0_149 = arith.constant 0 : index
    %158 = vector.load %arg4[%c29, %c0_148, %c0_149] : memref<72x16x16xf32, #tpu.memory_space<vmem>>, vector<1x16x16xf32>
    %159 = vector.shape_cast %158 : vector<1x16x16xf32> to vector<16x16xf32>
    %cst_150 = arith.constant dense<0.000000e+00> : vector<16x640xf32>
    %160 = tpu.matmul %159, %157, %cst_150 {dimension_numbers = #tpu.dot_dimension_numbers<[1], [0], [0], [1], [0, 0, 1, 1], [], []>} : vector<16x16xf32>, vector<16x640xf32>, vector<16x640xf32> -> vector<16x640xf32>
    %c0_151 = arith.constant 0 : index
    %c112_152 = arith.constant 112 : index
    %161 = vector.load %arg7[%c0_151, %c112_152] : memref<16x896xf32, #tpu.memory_space<vmem>>, vector<16x640xf32>
    %c30 = arith.constant 30 : index
    %c0_153 = arith.constant 0 : index
    %c0_154 = arith.constant 0 : index
    %162 = vector.load %arg4[%c30, %c0_153, %c0_154] : memref<72x16x16xf32, #tpu.memory_space<vmem>>, vector<1x16x16xf32>
    %163 = vector.shape_cast %162 : vector<1x16x16xf32> to vector<16x16xf32>
    %cst_155 = arith.constant dense<0.000000e+00> : vector<16x640xf32>
    %164 = tpu.matmul %163, %161, %cst_155 {dimension_numbers = #tpu.dot_dimension_numbers<[1], [0], [0], [1], [0, 0, 1, 1], [], []>} : vector<16x16xf32>, vector<16x640xf32>, vector<16x640xf32> -> vector<16x640xf32>
    %165 = arith.addf %160, %164 : vector<16x640xf32>
    %c0_156 = arith.constant 0 : index
    %c128_157 = arith.constant 128 : index
    %166 = vector.load %arg7[%c0_156, %c128_157] : memref<16x896xf32, #tpu.memory_space<vmem>>, vector<16x640xf32>
    %c31 = arith.constant 31 : index
    %c0_158 = arith.constant 0 : index
    %c0_159 = arith.constant 0 : index
    %167 = vector.load %arg4[%c31, %c0_158, %c0_159] : memref<72x16x16xf32, #tpu.memory_space<vmem>>, vector<1x16x16xf32>
    %168 = vector.shape_cast %167 : vector<1x16x16xf32> to vector<16x16xf32>
    %cst_160 = arith.constant dense<0.000000e+00> : vector<16x640xf32>
    %169 = tpu.matmul %168, %166, %cst_160 {dimension_numbers = #tpu.dot_dimension_numbers<[1], [0], [0], [1], [0, 0, 1, 1], [], []>} : vector<16x16xf32>, vector<16x640xf32>, vector<16x640xf32> -> vector<16x640xf32>
    %170 = arith.addf %165, %169 : vector<16x640xf32>
    %c0_161 = arith.constant 0 : index
    %c144_162 = arith.constant 144 : index
    %171 = vector.load %arg7[%c0_161, %c144_162] : memref<16x896xf32, #tpu.memory_space<vmem>>, vector<16x640xf32>
    %c32 = arith.constant 32 : index
    %c0_163 = arith.constant 0 : index
    %c0_164 = arith.constant 0 : index
    %172 = vector.load %arg4[%c32, %c0_163, %c0_164] : memref<72x16x16xf32, #tpu.memory_space<vmem>>, vector<1x16x16xf32>
    %173 = vector.shape_cast %172 : vector<1x16x16xf32> to vector<16x16xf32>
    %cst_165 = arith.constant dense<0.000000e+00> : vector<16x640xf32>
    %174 = tpu.matmul %173, %171, %cst_165 {dimension_numbers = #tpu.dot_dimension_numbers<[1], [0], [0], [1], [0, 0, 1, 1], [], []>} : vector<16x16xf32>, vector<16x640xf32>, vector<16x640xf32> -> vector<16x640xf32>
    %175 = arith.addf %170, %174 : vector<16x640xf32>
    %c0_166 = arith.constant 0 : index
    %c160_167 = arith.constant 160 : index
    %176 = vector.load %arg7[%c0_166, %c160_167] : memref<16x896xf32, #tpu.memory_space<vmem>>, vector<16x640xf32>
    %c33 = arith.constant 33 : index
    %c0_168 = arith.constant 0 : index
    %c0_169 = arith.constant 0 : index
    %177 = vector.load %arg4[%c33, %c0_168, %c0_169] : memref<72x16x16xf32, #tpu.memory_space<vmem>>, vector<1x16x16xf32>
    %178 = vector.shape_cast %177 : vector<1x16x16xf32> to vector<16x16xf32>
    %cst_170 = arith.constant dense<0.000000e+00> : vector<16x640xf32>
    %179 = tpu.matmul %178, %176, %cst_170 {dimension_numbers = #tpu.dot_dimension_numbers<[1], [0], [0], [1], [0, 0, 1, 1], [], []>} : vector<16x16xf32>, vector<16x640xf32>, vector<16x640xf32> -> vector<16x640xf32>
    %180 = arith.addf %175, %179 : vector<16x640xf32>
    %c3_171 = arith.constant 3 : index
    %c0_172 = arith.constant 0 : index
    %c0_173 = arith.constant 0 : index
    %181 = vector.load %arg5[%c3_171, %c0_172, %c0_173] : memref<8x16x1xf32, #tpu.memory_space<vmem>>, vector<1x16x1xf32>
    %182 = vector.shape_cast %181 : vector<1x16x1xf32> to vector<16x1xf32>
    %183 = vector.broadcast %182 : vector<16x1xf32> to vector<16x640xf32>
    %184 = arith.addf %180, %183 : vector<16x640xf32>
    %cst_174 = arith.constant 0.000000e+00 : f32
    %185 = vector.broadcast %cst_174 : f32 to vector<16x640xf32>
    %186 = arith.maximumf %184, %185 : vector<16x640xf32>
    %187 = vector.extract_strided_slice %186 {offsets = [0, 0], sizes = [16, 256], strides = [1, 1]} : vector<16x640xf32> to vector<16x256xf32>
    %c0_175 = arith.constant 0 : index
    %c16_176 = arith.constant 16 : index
    %c0_177 = arith.constant 0 : index
    %188 = vector.load %arg6[%c0_175, %c16_176, %c0_177] : memref<2x64x256xf32, #tpu.memory_space<vmem>>, vector<1x16x256xf32>
    %189 = vector.shape_cast %188 : vector<1x16x256xf32> to vector<16x256xf32>
    %190 = vector.shape_cast %187 : vector<16x256xf32> to vector<1x16x256xf32>
    tpu.vector_store %arg6[%c0_175, %c16_176, %c0_177], %190 {strides = array<i32>} : memref<2x64x256xf32, #tpu.memory_space<vmem>>, vector<1x16x256xf32>,
    %191 = vector.extract_strided_slice %186 {offsets = [0, 384], sizes = [16, 256], strides = [1, 1]} : vector<16x640xf32> to vector<16x256xf32>
    %c1_178 = arith.constant 1 : index
    %c16_179 = arith.constant 16 : index
    %c0_180 = arith.constant 0 : index
    %192 = vector.load %arg6[%c1_178, %c16_179, %c0_180] : memref<2x64x256xf32, #tpu.memory_space<vmem>>, vector<1x16x256xf32>
    %193 = vector.shape_cast %192 : vector<1x16x256xf32> to vector<16x256xf32>
    %194 = vector.shape_cast %191 : vector<16x256xf32> to vector<1x16x256xf32>
    tpu.vector_store %arg6[%c1_178, %c16_179, %c0_180], %194 {strides = array<i32>} : memref<2x64x256xf32, #tpu.memory_space<vmem>>, vector<1x16x256xf32>,
    %c32_181 = arith.constant 32 : index
    %c0_182 = arith.constant 0 : index
    %195 = vector.load %arg8[%c32_181, %c0_182] : memref<64x640xf32, #tpu.memory_space<vmem>>, vector<16x640xf32>
    %196 = vector.extract_strided_slice %195 {offsets = [0, 0], sizes = [16, 256], strides = [1, 1]} : vector<16x640xf32> to vector<16x256xf32>
    %c0_183 = arith.constant 0 : index
    %c128_184 = arith.constant 128 : index
    %197 = vector.load %arg7[%c0_183, %c128_184] : memref<16x896xf32, #tpu.memory_space<vmem>>, vector<16x256xf32>
    tpu.vector_store %arg7[%c0_183, %c128_184], %196 {strides = array<i32>} : memref<16x896xf32, #tpu.memory_space<vmem>>, vector<16x256xf32>,
    %198 = vector.extract_strided_slice %195 {offsets = [0, 384], sizes = [16, 256], strides = [1, 1]} : vector<16x640xf32> to vector<16x256xf32>
    %c0_185 = arith.constant 0 : index
    %c512_186 = arith.constant 512 : index
    %199 = vector.load %arg7[%c0_185, %c512_186] : memref<16x896xf32, #tpu.memory_space<vmem>>, vector<16x256xf32>
    tpu.vector_store %arg7[%c0_185, %c512_186], %198 {strides = array<i32>} : memref<16x896xf32, #tpu.memory_space<vmem>>, vector<16x256xf32>,
    %c0_187 = arith.constant 0 : index
    %c80_188 = arith.constant 80 : index
    %200 = vector.load %arg7[%c0_187, %c80_188] : memref<16x896xf32, #tpu.memory_space<vmem>>, vector<16x640xf32>
    %c37 = arith.constant 37 : index
    %c0_189 = arith.constant 0 : index
    %c0_190 = arith.constant 0 : index
    %201 = vector.load %arg4[%c37, %c0_189, %c0_190] : memref<72x16x16xf32, #tpu.memory_space<vmem>>, vector<1x16x16xf32>
    %202 = vector.shape_cast %201 : vector<1x16x16xf32> to vector<16x16xf32>
    %cst_191 = arith.constant dense<0.000000e+00> : vector<16x640xf32>
    %203 = tpu.matmul %202, %200, %cst_191 {dimension_numbers = #tpu.dot_dimension_numbers<[1], [0], [0], [1], [0, 0, 1, 1], [], []>} : vector<16x16xf32>, vector<16x640xf32>, vector<16x640xf32> -> vector<16x640xf32>
    %c0_192 = arith.constant 0 : index
    %c96_193 = arith.constant 96 : index
    %204 = vector.load %arg7[%c0_192, %c96_193] : memref<16x896xf32, #tpu.memory_space<vmem>>, vector<16x640xf32>
    %c38 = arith.constant 38 : index
    %c0_194 = arith.constant 0 : index
    %c0_195 = arith.constant 0 : index
    %205 = vector.load %arg4[%c38, %c0_194, %c0_195] : memref<72x16x16xf32, #tpu.memory_space<vmem>>, vector<1x16x16xf32>
    %206 = vector.shape_cast %205 : vector<1x16x16xf32> to vector<16x16xf32>
    %cst_196 = arith.constant dense<0.000000e+00> : vector<16x640xf32>
    %207 = tpu.matmul %206, %204, %cst_196 {dimension_numbers = #tpu.dot_dimension_numbers<[1], [0], [0], [1], [0, 0, 1, 1], [], []>} : vector<16x16xf32>, vector<16x640xf32>, vector<16x640xf32> -> vector<16x640xf32>
    %208 = arith.addf %203, %207 : vector<16x640xf32>
    %c0_197 = arith.constant 0 : index
    %c112_198 = arith.constant 112 : index
    %209 = vector.load %arg7[%c0_197, %c112_198] : memref<16x896xf32, #tpu.memory_space<vmem>>, vector<16x640xf32>
    %c39 = arith.constant 39 : index
    %c0_199 = arith.constant 0 : index
    %c0_200 = arith.constant 0 : index
    %210 = vector.load %arg4[%c39, %c0_199, %c0_200] : memref<72x16x16xf32, #tpu.memory_space<vmem>>, vector<1x16x16xf32>
    %211 = vector.shape_cast %210 : vector<1x16x16xf32> to vector<16x16xf32>
    %cst_201 = arith.constant dense<0.000000e+00> : vector<16x640xf32>
    %212 = tpu.matmul %211, %209, %cst_201 {dimension_numbers = #tpu.dot_dimension_numbers<[1], [0], [0], [1], [0, 0, 1, 1], [], []>} : vector<16x16xf32>, vector<16x640xf32>, vector<16x640xf32> -> vector<16x640xf32>
    %213 = arith.addf %208, %212 : vector<16x640xf32>
    %c0_202 = arith.constant 0 : index
    %c128_203 = arith.constant 128 : index
    %214 = vector.load %arg7[%c0_202, %c128_203] : memref<16x896xf32, #tpu.memory_space<vmem>>, vector<16x640xf32>
    %c40 = arith.constant 40 : index
    %c0_204 = arith.constant 0 : index
    %c0_205 = arith.constant 0 : index
    %215 = vector.load %arg4[%c40, %c0_204, %c0_205] : memref<72x16x16xf32, #tpu.memory_space<vmem>>, vector<1x16x16xf32>
    %216 = vector.shape_cast %215 : vector<1x16x16xf32> to vector<16x16xf32>
    %cst_206 = arith.constant dense<0.000000e+00> : vector<16x640xf32>
    %217 = tpu.matmul %216, %214, %cst_206 {dimension_numbers = #tpu.dot_dimension_numbers<[1], [0], [0], [1], [0, 0, 1, 1], [], []>} : vector<16x16xf32>, vector<16x640xf32>, vector<16x640xf32> -> vector<16x640xf32>
    %218 = arith.addf %213, %217 : vector<16x640xf32>
    %c0_207 = arith.constant 0 : index
    %c144_208 = arith.constant 144 : index
    %219 = vector.load %arg7[%c0_207, %c144_208] : memref<16x896xf32, #tpu.memory_space<vmem>>, vector<16x640xf32>
    %c41 = arith.constant 41 : index
    %c0_209 = arith.constant 0 : index
    %c0_210 = arith.constant 0 : index
    %220 = vector.load %arg4[%c41, %c0_209, %c0_210] : memref<72x16x16xf32, #tpu.memory_space<vmem>>, vector<1x16x16xf32>
    %221 = vector.shape_cast %220 : vector<1x16x16xf32> to vector<16x16xf32>
    %cst_211 = arith.constant dense<0.000000e+00> : vector<16x640xf32>
    %222 = tpu.matmul %221, %219, %cst_211 {dimension_numbers = #tpu.dot_dimension_numbers<[1], [0], [0], [1], [0, 0, 1, 1], [], []>} : vector<16x16xf32>, vector<16x640xf32>, vector<16x640xf32> -> vector<16x640xf32>
    %223 = arith.addf %218, %222 : vector<16x640xf32>
    %c0_212 = arith.constant 0 : index
    %c160_213 = arith.constant 160 : index
    %224 = vector.load %arg7[%c0_212, %c160_213] : memref<16x896xf32, #tpu.memory_space<vmem>>, vector<16x640xf32>
    %c42 = arith.constant 42 : index
    %c0_214 = arith.constant 0 : index
    %c0_215 = arith.constant 0 : index
    %225 = vector.load %arg4[%c42, %c0_214, %c0_215] : memref<72x16x16xf32, #tpu.memory_space<vmem>>, vector<1x16x16xf32>
    %226 = vector.shape_cast %225 : vector<1x16x16xf32> to vector<16x16xf32>
    %cst_216 = arith.constant dense<0.000000e+00> : vector<16x640xf32>
    %227 = tpu.matmul %226, %224, %cst_216 {dimension_numbers = #tpu.dot_dimension_numbers<[1], [0], [0], [1], [0, 0, 1, 1], [], []>} : vector<16x16xf32>, vector<16x640xf32>, vector<16x640xf32> -> vector<16x640xf32>
    %228 = arith.addf %223, %227 : vector<16x640xf32>
    %c0_217 = arith.constant 0 : index
    %c176_218 = arith.constant 176 : index
    %229 = vector.load %arg7[%c0_217, %c176_218] : memref<16x896xf32, #tpu.memory_space<vmem>>, vector<16x640xf32>
    %c43 = arith.constant 43 : index
    %c0_219 = arith.constant 0 : index
    %c0_220 = arith.constant 0 : index
    %230 = vector.load %arg4[%c43, %c0_219, %c0_220] : memref<72x16x16xf32, #tpu.memory_space<vmem>>, vector<1x16x16xf32>
    %231 = vector.shape_cast %230 : vector<1x16x16xf32> to vector<16x16xf32>
    %cst_221 = arith.constant dense<0.000000e+00> : vector<16x640xf32>
    %232 = tpu.matmul %231, %229, %cst_221 {dimension_numbers = #tpu.dot_dimension_numbers<[1], [0], [0], [1], [0, 0, 1, 1], [], []>} : vector<16x16xf32>, vector<16x640xf32>, vector<16x640xf32> -> vector<16x640xf32>
    %233 = arith.addf %228, %232 : vector<16x640xf32>
    %c4_222 = arith.constant 4 : index
    %c0_223 = arith.constant 0 : index
    %c0_224 = arith.constant 0 : index
    %234 = vector.load %arg5[%c4_222, %c0_223, %c0_224] : memref<8x16x1xf32, #tpu.memory_space<vmem>>, vector<1x16x1xf32>
    %235 = vector.shape_cast %234 : vector<1x16x1xf32> to vector<16x1xf32>
    %236 = vector.broadcast %235 : vector<16x1xf32> to vector<16x640xf32>
    %237 = arith.addf %233, %236 : vector<16x640xf32>
    %cst_225 = arith.constant 0.000000e+00 : f32
    %238 = vector.broadcast %cst_225 : f32 to vector<16x640xf32>
    %239 = arith.maximumf %237, %238 : vector<16x640xf32>
    %240 = vector.extract_strided_slice %239 {offsets = [0, 0], sizes = [16, 256], strides = [1, 1]} : vector<16x640xf32> to vector<16x256xf32>
    %c0_226 = arith.constant 0 : index
    %c128_227 = arith.constant 128 : index
    %241 = vector.load %arg7[%c0_226, %c128_227] : memref<16x896xf32, #tpu.memory_space<vmem>>, vector<16x256xf32>
    tpu.vector_store %arg7[%c0_226, %c128_227], %240 {strides = array<i32>} : memref<16x896xf32, #tpu.memory_space<vmem>>, vector<16x256xf32>,
    %242 = vector.extract_strided_slice %239 {offsets = [0, 384], sizes = [16, 256], strides = [1, 1]} : vector<16x640xf32> to vector<16x256xf32>
    %c0_228 = arith.constant 0 : index
    %c512_229 = arith.constant 512 : index
    %243 = vector.load %arg7[%c0_228, %c512_229] : memref<16x896xf32, #tpu.memory_space<vmem>>, vector<16x256xf32>
    tpu.vector_store %arg7[%c0_228, %c512_229], %242 {strides = array<i32>} : memref<16x896xf32, #tpu.memory_space<vmem>>, vector<16x256xf32>,
    %c0_230 = arith.constant 0 : index
    %c80_231 = arith.constant 80 : index
    %244 = vector.load %arg7[%c0_230, %c80_231] : memref<16x896xf32, #tpu.memory_space<vmem>>, vector<16x640xf32>
    %c46 = arith.constant 46 : index
    %c0_232 = arith.constant 0 : index
    %c0_233 = arith.constant 0 : index
    %245 = vector.load %arg4[%c46, %c0_232, %c0_233] : memref<72x16x16xf32, #tpu.memory_space<vmem>>, vector<1x16x16xf32>
    %246 = vector.shape_cast %245 : vector<1x16x16xf32> to vector<16x16xf32>
    %cst_234 = arith.constant dense<0.000000e+00> : vector<16x640xf32>
    %247 = tpu.matmul %246, %244, %cst_234 {dimension_numbers = #tpu.dot_dimension_numbers<[1], [0], [0], [1], [0, 0, 1, 1], [], []>} : vector<16x16xf32>, vector<16x640xf32>, vector<16x640xf32> -> vector<16x640xf32>
    %c0_235 = arith.constant 0 : index
    %c96_236 = arith.constant 96 : index
    %248 = vector.load %arg7[%c0_235, %c96_236] : memref<16x896xf32, #tpu.memory_space<vmem>>, vector<16x640xf32>
    %c47 = arith.constant 47 : index
    %c0_237 = arith.constant 0 : index
    %c0_238 = arith.constant 0 : index
    %249 = vector.load %arg4[%c47, %c0_237, %c0_238] : memref<72x16x16xf32, #tpu.memory_space<vmem>>, vector<1x16x16xf32>
    %250 = vector.shape_cast %249 : vector<1x16x16xf32> to vector<16x16xf32>
    %cst_239 = arith.constant dense<0.000000e+00> : vector<16x640xf32>
    %251 = tpu.matmul %250, %248, %cst_239 {dimension_numbers = #tpu.dot_dimension_numbers<[1], [0], [0], [1], [0, 0, 1, 1], [], []>} : vector<16x16xf32>, vector<16x640xf32>, vector<16x640xf32> -> vector<16x640xf32>
    %252 = arith.addf %247, %251 : vector<16x640xf32>
    %c0_240 = arith.constant 0 : index
    %c112_241 = arith.constant 112 : index
    %253 = vector.load %arg7[%c0_240, %c112_241] : memref<16x896xf32, #tpu.memory_space<vmem>>, vector<16x640xf32>
    %c48 = arith.constant 48 : index
    %c0_242 = arith.constant 0 : index
    %c0_243 = arith.constant 0 : index
    %254 = vector.load %arg4[%c48, %c0_242, %c0_243] : memref<72x16x16xf32, #tpu.memory_space<vmem>>, vector<1x16x16xf32>
    %255 = vector.shape_cast %254 : vector<1x16x16xf32> to vector<16x16xf32>
    %cst_244 = arith.constant dense<0.000000e+00> : vector<16x640xf32>
    %256 = tpu.matmul %255, %253, %cst_244 {dimension_numbers = #tpu.dot_dimension_numbers<[1], [0], [0], [1], [0, 0, 1, 1], [], []>} : vector<16x16xf32>, vector<16x640xf32>, vector<16x640xf32> -> vector<16x640xf32>
    %257 = arith.addf %252, %256 : vector<16x640xf32>
    %c0_245 = arith.constant 0 : index
    %c128_246 = arith.constant 128 : index
    %258 = vector.load %arg7[%c0_245, %c128_246] : memref<16x896xf32, #tpu.memory_space<vmem>>, vector<16x640xf32>
    %c49 = arith.constant 49 : index
    %c0_247 = arith.constant 0 : index
    %c0_248 = arith.constant 0 : index
    %259 = vector.load %arg4[%c49, %c0_247, %c0_248] : memref<72x16x16xf32, #tpu.memory_space<vmem>>, vector<1x16x16xf32>
    %260 = vector.shape_cast %259 : vector<1x16x16xf32> to vector<16x16xf32>
    %cst_249 = arith.constant dense<0.000000e+00> : vector<16x640xf32>
    %261 = tpu.matmul %260, %258, %cst_249 {dimension_numbers = #tpu.dot_dimension_numbers<[1], [0], [0], [1], [0, 0, 1, 1], [], []>} : vector<16x16xf32>, vector<16x640xf32>, vector<16x640xf32> -> vector<16x640xf32>
    %262 = arith.addf %257, %261 : vector<16x640xf32>
    %c0_250 = arith.constant 0 : index
    %c144_251 = arith.constant 144 : index
    %263 = vector.load %arg7[%c0_250, %c144_251] : memref<16x896xf32, #tpu.memory_space<vmem>>, vector<16x640xf32>
    %c50 = arith.constant 50 : index
    %c0_252 = arith.constant 0 : index
    %c0_253 = arith.constant 0 : index
    %264 = vector.load %arg4[%c50, %c0_252, %c0_253] : memref<72x16x16xf32, #tpu.memory_space<vmem>>, vector<1x16x16xf32>
    %265 = vector.shape_cast %264 : vector<1x16x16xf32> to vector<16x16xf32>
    %cst_254 = arith.constant dense<0.000000e+00> : vector<16x640xf32>
    %266 = tpu.matmul %265, %263, %cst_254 {dimension_numbers = #tpu.dot_dimension_numbers<[1], [0], [0], [1], [0, 0, 1, 1], [], []>} : vector<16x16xf32>, vector<16x640xf32>, vector<16x640xf32> -> vector<16x640xf32>
    %267 = arith.addf %262, %266 : vector<16x640xf32>
    %c0_255 = arith.constant 0 : index
    %c160_256 = arith.constant 160 : index
    %268 = vector.load %arg7[%c0_255, %c160_256] : memref<16x896xf32, #tpu.memory_space<vmem>>, vector<16x640xf32>
    %c51 = arith.constant 51 : index
    %c0_257 = arith.constant 0 : index
    %c0_258 = arith.constant 0 : index
    %269 = vector.load %arg4[%c51, %c0_257, %c0_258] : memref<72x16x16xf32, #tpu.memory_space<vmem>>, vector<1x16x16xf32>
    %270 = vector.shape_cast %269 : vector<1x16x16xf32> to vector<16x16xf32>
    %cst_259 = arith.constant dense<0.000000e+00> : vector<16x640xf32>
    %271 = tpu.matmul %270, %268, %cst_259 {dimension_numbers = #tpu.dot_dimension_numbers<[1], [0], [0], [1], [0, 0, 1, 1], [], []>} : vector<16x16xf32>, vector<16x640xf32>, vector<16x640xf32> -> vector<16x640xf32>
    %272 = arith.addf %267, %271 : vector<16x640xf32>
    %c0_260 = arith.constant 0 : index
    %c176_261 = arith.constant 176 : index
    %273 = vector.load %arg7[%c0_260, %c176_261] : memref<16x896xf32, #tpu.memory_space<vmem>>, vector<16x640xf32>
    %c52 = arith.constant 52 : index
    %c0_262 = arith.constant 0 : index
    %c0_263 = arith.constant 0 : index
    %274 = vector.load %arg4[%c52, %c0_262, %c0_263] : memref<72x16x16xf32, #tpu.memory_space<vmem>>, vector<1x16x16xf32>
    %275 = vector.shape_cast %274 : vector<1x16x16xf32> to vector<16x16xf32>
    %cst_264 = arith.constant dense<0.000000e+00> : vector<16x640xf32>
    %276 = tpu.matmul %275, %273, %cst_264 {dimension_numbers = #tpu.dot_dimension_numbers<[1], [0], [0], [1], [0, 0, 1, 1], [], []>} : vector<16x16xf32>, vector<16x640xf32>, vector<16x640xf32> -> vector<16x640xf32>
    %277 = arith.addf %272, %276 : vector<16x640xf32>
    %c5_265 = arith.constant 5 : index
    %c0_266 = arith.constant 0 : index
    %c0_267 = arith.constant 0 : index
    %278 = vector.load %arg5[%c5_265, %c0_266, %c0_267] : memref<8x16x1xf32, #tpu.memory_space<vmem>>, vector<1x16x1xf32>
    %279 = vector.shape_cast %278 : vector<1x16x1xf32> to vector<16x1xf32>
    %280 = vector.broadcast %279 : vector<16x1xf32> to vector<16x640xf32>
    %281 = arith.addf %277, %280 : vector<16x640xf32>
    %cst_268 = arith.constant 0.000000e+00 : f32
    %282 = vector.broadcast %cst_268 : f32 to vector<16x640xf32>
    %283 = arith.maximumf %281, %282 : vector<16x640xf32>
    %284 = vector.extract_strided_slice %283 {offsets = [0, 0], sizes = [16, 256], strides = [1, 1]} : vector<16x640xf32> to vector<16x256xf32>
    %c0_269 = arith.constant 0 : index
    %c32_270 = arith.constant 32 : index
    %c0_271 = arith.constant 0 : index
    %285 = vector.load %arg6[%c0_269, %c32_270, %c0_271] : memref<2x64x256xf32, #tpu.memory_space<vmem>>, vector<1x16x256xf32>
    %286 = vector.shape_cast %285 : vector<1x16x256xf32> to vector<16x256xf32>
    %287 = vector.shape_cast %284 : vector<16x256xf32> to vector<1x16x256xf32>
    tpu.vector_store %arg6[%c0_269, %c32_270, %c0_271], %287 {strides = array<i32>} : memref<2x64x256xf32, #tpu.memory_space<vmem>>, vector<1x16x256xf32>,
    %288 = vector.extract_strided_slice %283 {offsets = [0, 384], sizes = [16, 256], strides = [1, 1]} : vector<16x640xf32> to vector<16x256xf32>
    %c1_272 = arith.constant 1 : index
    %c32_273 = arith.constant 32 : index
    %c0_274 = arith.constant 0 : index
    %289 = vector.load %arg6[%c1_272, %c32_273, %c0_274] : memref<2x64x256xf32, #tpu.memory_space<vmem>>, vector<1x16x256xf32>
    %290 = vector.shape_cast %289 : vector<1x16x256xf32> to vector<16x256xf32>
    %291 = vector.shape_cast %288 : vector<16x256xf32> to vector<1x16x256xf32>
    tpu.vector_store %arg6[%c1_272, %c32_273, %c0_274], %291 {strides = array<i32>} : memref<2x64x256xf32, #tpu.memory_space<vmem>>, vector<1x16x256xf32>,
    %c48_275 = arith.constant 48 : index
    %c0_276 = arith.constant 0 : index
    %292 = vector.load %arg8[%c48_275, %c0_276] : memref<64x640xf32, #tpu.memory_space<vmem>>, vector<16x640xf32>
    %293 = vector.extract_strided_slice %292 {offsets = [0, 0], sizes = [16, 256], strides = [1, 1]} : vector<16x640xf32> to vector<16x256xf32>
    %c0_277 = arith.constant 0 : index
    %c128_278 = arith.constant 128 : index
    %294 = vector.load %arg7[%c0_277, %c128_278] : memref<16x896xf32, #tpu.memory_space<vmem>>, vector<16x256xf32>
    tpu.vector_store %arg7[%c0_277, %c128_278], %293 {strides = array<i32>} : memref<16x896xf32, #tpu.memory_space<vmem>>, vector<16x256xf32>,
    %295 = vector.extract_strided_slice %292 {offsets = [0, 384], sizes = [16, 256], strides = [1, 1]} : vector<16x640xf32> to vector<16x256xf32>
    %c0_279 = arith.constant 0 : index
    %c512_280 = arith.constant 512 : index
    %296 = vector.load %arg7[%c0_279, %c512_280] : memref<16x896xf32, #tpu.memory_space<vmem>>, vector<16x256xf32>
    tpu.vector_store %arg7[%c0_279, %c512_280], %295 {strides = array<i32>} : memref<16x896xf32, #tpu.memory_space<vmem>>, vector<16x256xf32>,
    %c0_281 = arith.constant 0 : index
    %c64_282 = arith.constant 64 : index
    %297 = vector.load %arg7[%c0_281, %c64_282] : memref<16x896xf32, #tpu.memory_space<vmem>>, vector<16x640xf32>
    %c54 = arith.constant 54 : index
    %c0_283 = arith.constant 0 : index
    %c0_284 = arith.constant 0 : index
    %298 = vector.load %arg4[%c54, %c0_283, %c0_284] : memref<72x16x16xf32, #tpu.memory_space<vmem>>, vector<1x16x16xf32>
    %299 = vector.shape_cast %298 : vector<1x16x16xf32> to vector<16x16xf32>
    %cst_285 = arith.constant dense<0.000000e+00> : vector<16x640xf32>
    %300 = tpu.matmul %299, %297, %cst_285 {dimension_numbers = #tpu.dot_dimension_numbers<[1], [0], [0], [1], [0, 0, 1, 1], [], []>} : vector<16x16xf32>, vector<16x640xf32>, vector<16x640xf32> -> vector<16x640xf32>
    %c0_286 = arith.constant 0 : index
    %c80_287 = arith.constant 80 : index
    %301 = vector.load %arg7[%c0_286, %c80_287] : memref<16x896xf32, #tpu.memory_space<vmem>>, vector<16x640xf32>
    %c55 = arith.constant 55 : index
    %c0_288 = arith.constant 0 : index
    %c0_289 = arith.constant 0 : index
    %302 = vector.load %arg4[%c55, %c0_288, %c0_289] : memref<72x16x16xf32, #tpu.memory_space<vmem>>, vector<1x16x16xf32>
    %303 = vector.shape_cast %302 : vector<1x16x16xf32> to vector<16x16xf32>
    %cst_290 = arith.constant dense<0.000000e+00> : vector<16x640xf32>
    %304 = tpu.matmul %303, %301, %cst_290 {dimension_numbers = #tpu.dot_dimension_numbers<[1], [0], [0], [1], [0, 0, 1, 1], [], []>} : vector<16x16xf32>, vector<16x640xf32>, vector<16x640xf32> -> vector<16x640xf32>
    %305 = arith.addf %300, %304 : vector<16x640xf32>
    %c0_291 = arith.constant 0 : index
    %c96_292 = arith.constant 96 : index
    %306 = vector.load %arg7[%c0_291, %c96_292] : memref<16x896xf32, #tpu.memory_space<vmem>>, vector<16x640xf32>
    %c56 = arith.constant 56 : index
    %c0_293 = arith.constant 0 : index
    %c0_294 = arith.constant 0 : index
    %307 = vector.load %arg4[%c56, %c0_293, %c0_294] : memref<72x16x16xf32, #tpu.memory_space<vmem>>, vector<1x16x16xf32>
    %308 = vector.shape_cast %307 : vector<1x16x16xf32> to vector<16x16xf32>
    %cst_295 = arith.constant dense<0.000000e+00> : vector<16x640xf32>
    %309 = tpu.matmul %308, %306, %cst_295 {dimension_numbers = #tpu.dot_dimension_numbers<[1], [0], [0], [1], [0, 0, 1, 1], [], []>} : vector<16x16xf32>, vector<16x640xf32>, vector<16x640xf32> -> vector<16x640xf32>
    %310 = arith.addf %305, %309 : vector<16x640xf32>
    %c0_296 = arith.constant 0 : index
    %c112_297 = arith.constant 112 : index
    %311 = vector.load %arg7[%c0_296, %c112_297] : memref<16x896xf32, #tpu.memory_space<vmem>>, vector<16x640xf32>
    %c57 = arith.constant 57 : index
    %c0_298 = arith.constant 0 : index
    %c0_299 = arith.constant 0 : index
    %312 = vector.load %arg4[%c57, %c0_298, %c0_299] : memref<72x16x16xf32, #tpu.memory_space<vmem>>, vector<1x16x16xf32>
    %313 = vector.shape_cast %312 : vector<1x16x16xf32> to vector<16x16xf32>
    %cst_300 = arith.constant dense<0.000000e+00> : vector<16x640xf32>
    %314 = tpu.matmul %313, %311, %cst_300 {dimension_numbers = #tpu.dot_dimension_numbers<[1], [0], [0], [1], [0, 0, 1, 1], [], []>} : vector<16x16xf32>, vector<16x640xf32>, vector<16x640xf32> -> vector<16x640xf32>
    %315 = arith.addf %310, %314 : vector<16x640xf32>
    %c0_301 = arith.constant 0 : index
    %c128_302 = arith.constant 128 : index
    %316 = vector.load %arg7[%c0_301, %c128_302] : memref<16x896xf32, #tpu.memory_space<vmem>>, vector<16x640xf32>
    %c58 = arith.constant 58 : index
    %c0_303 = arith.constant 0 : index
    %c0_304 = arith.constant 0 : index
    %317 = vector.load %arg4[%c58, %c0_303, %c0_304] : memref<72x16x16xf32, #tpu.memory_space<vmem>>, vector<1x16x16xf32>
    %318 = vector.shape_cast %317 : vector<1x16x16xf32> to vector<16x16xf32>
    %cst_305 = arith.constant dense<0.000000e+00> : vector<16x640xf32>
    %319 = tpu.matmul %318, %316, %cst_305 {dimension_numbers = #tpu.dot_dimension_numbers<[1], [0], [0], [1], [0, 0, 1, 1], [], []>} : vector<16x16xf32>, vector<16x640xf32>, vector<16x640xf32> -> vector<16x640xf32>
    %320 = arith.addf %315, %319 : vector<16x640xf32>
    %c0_306 = arith.constant 0 : index
    %c144_307 = arith.constant 144 : index
    %321 = vector.load %arg7[%c0_306, %c144_307] : memref<16x896xf32, #tpu.memory_space<vmem>>, vector<16x640xf32>
    %c59 = arith.constant 59 : index
    %c0_308 = arith.constant 0 : index
    %c0_309 = arith.constant 0 : index
    %322 = vector.load %arg4[%c59, %c0_308, %c0_309] : memref<72x16x16xf32, #tpu.memory_space<vmem>>, vector<1x16x16xf32>
    %323 = vector.shape_cast %322 : vector<1x16x16xf32> to vector<16x16xf32>
    %cst_310 = arith.constant dense<0.000000e+00> : vector<16x640xf32>
    %324 = tpu.matmul %323, %321, %cst_310 {dimension_numbers = #tpu.dot_dimension_numbers<[1], [0], [0], [1], [0, 0, 1, 1], [], []>} : vector<16x16xf32>, vector<16x640xf32>, vector<16x640xf32> -> vector<16x640xf32>
    %325 = arith.addf %320, %324 : vector<16x640xf32>
    %c0_311 = arith.constant 0 : index
    %c160_312 = arith.constant 160 : index
    %326 = vector.load %arg7[%c0_311, %c160_312] : memref<16x896xf32, #tpu.memory_space<vmem>>, vector<16x640xf32>
    %c60 = arith.constant 60 : index
    %c0_313 = arith.constant 0 : index
    %c0_314 = arith.constant 0 : index
    %327 = vector.load %arg4[%c60, %c0_313, %c0_314] : memref<72x16x16xf32, #tpu.memory_space<vmem>>, vector<1x16x16xf32>
    %328 = vector.shape_cast %327 : vector<1x16x16xf32> to vector<16x16xf32>
    %cst_315 = arith.constant dense<0.000000e+00> : vector<16x640xf32>
    %329 = tpu.matmul %328, %326, %cst_315 {dimension_numbers = #tpu.dot_dimension_numbers<[1], [0], [0], [1], [0, 0, 1, 1], [], []>} : vector<16x16xf32>, vector<16x640xf32>, vector<16x640xf32> -> vector<16x640xf32>
    %330 = arith.addf %325, %329 : vector<16x640xf32>
    %c0_316 = arith.constant 0 : index
    %c176_317 = arith.constant 176 : index
    %331 = vector.load %arg7[%c0_316, %c176_317] : memref<16x896xf32, #tpu.memory_space<vmem>>, vector<16x640xf32>
    %c61 = arith.constant 61 : index
    %c0_318 = arith.constant 0 : index
    %c0_319 = arith.constant 0 : index
    %332 = vector.load %arg4[%c61, %c0_318, %c0_319] : memref<72x16x16xf32, #tpu.memory_space<vmem>>, vector<1x16x16xf32>
    %333 = vector.shape_cast %332 : vector<1x16x16xf32> to vector<16x16xf32>
    %cst_320 = arith.constant dense<0.000000e+00> : vector<16x640xf32>
    %334 = tpu.matmul %333, %331, %cst_320 {dimension_numbers = #tpu.dot_dimension_numbers<[1], [0], [0], [1], [0, 0, 1, 1], [], []>} : vector<16x16xf32>, vector<16x640xf32>, vector<16x640xf32> -> vector<16x640xf32>
    %335 = arith.addf %330, %334 : vector<16x640xf32>
    %c0_321 = arith.constant 0 : index
    %c192_322 = arith.constant 192 : index
    %336 = vector.load %arg7[%c0_321, %c192_322] : memref<16x896xf32, #tpu.memory_space<vmem>>, vector<16x640xf32>
    %c62 = arith.constant 62 : index
    %c0_323 = arith.constant 0 : index
    %c0_324 = arith.constant 0 : index
    %337 = vector.load %arg4[%c62, %c0_323, %c0_324] : memref<72x16x16xf32, #tpu.memory_space<vmem>>, vector<1x16x16xf32>
    %338 = vector.shape_cast %337 : vector<1x16x16xf32> to vector<16x16xf32>
    %cst_325 = arith.constant dense<0.000000e+00> : vector<16x640xf32>
    %339 = tpu.matmul %338, %336, %cst_325 {dimension_numbers = #tpu.dot_dimension_numbers<[1], [0], [0], [1], [0, 0, 1, 1], [], []>} : vector<16x16xf32>, vector<16x640xf32>, vector<16x640xf32> -> vector<16x640xf32>
    %340 = arith.addf %335, %339 : vector<16x640xf32>
    %c6_326 = arith.constant 6 : index
    %c0_327 = arith.constant 0 : index
    %c0_328 = arith.constant 0 : index
    %341 = vector.load %arg5[%c6_326, %c0_327, %c0_328] : memref<8x16x1xf32, #tpu.memory_space<vmem>>, vector<1x16x1xf32>
    %342 = vector.shape_cast %341 : vector<1x16x1xf32> to vector<16x1xf32>
    %343 = vector.broadcast %342 : vector<16x1xf32> to vector<16x640xf32>
    %344 = arith.addf %340, %343 : vector<16x640xf32>
    %cst_329 = arith.constant 0.000000e+00 : f32
    %345 = vector.broadcast %cst_329 : f32 to vector<16x640xf32>
    %346 = arith.maximumf %344, %345 : vector<16x640xf32>
    %347 = vector.extract_strided_slice %346 {offsets = [0, 0], sizes = [16, 256], strides = [1, 1]} : vector<16x640xf32> to vector<16x256xf32>
    %c0_330 = arith.constant 0 : index
    %c128_331 = arith.constant 128 : index
    %348 = vector.load %arg7[%c0_330, %c128_331] : memref<16x896xf32, #tpu.memory_space<vmem>>, vector<16x256xf32>
    tpu.vector_store %arg7[%c0_330, %c128_331], %347 {strides = array<i32>} : memref<16x896xf32, #tpu.memory_space<vmem>>, vector<16x256xf32>,
    %349 = vector.extract_strided_slice %346 {offsets = [0, 384], sizes = [16, 256], strides = [1, 1]} : vector<16x640xf32> to vector<16x256xf32>
    %c0_332 = arith.constant 0 : index
    %c512_333 = arith.constant 512 : index
    %350 = vector.load %arg7[%c0_332, %c512_333] : memref<16x896xf32, #tpu.memory_space<vmem>>, vector<16x256xf32>
    tpu.vector_store %arg7[%c0_332, %c512_333], %349 {strides = array<i32>} : memref<16x896xf32, #tpu.memory_space<vmem>>, vector<16x256xf32>,
    %c0_334 = arith.constant 0 : index
    %c64_335 = arith.constant 64 : index
    %351 = vector.load %arg7[%c0_334, %c64_335] : memref<16x896xf32, #tpu.memory_space<vmem>>, vector<16x640xf32>
    %c63 = arith.constant 63 : index
    %c0_336 = arith.constant 0 : index
    %c0_337 = arith.constant 0 : index
    %352 = vector.load %arg4[%c63, %c0_336, %c0_337] : memref<72x16x16xf32, #tpu.memory_space<vmem>>, vector<1x16x16xf32>
    %353 = vector.shape_cast %352 : vector<1x16x16xf32> to vector<16x16xf32>
    %cst_338 = arith.constant dense<0.000000e+00> : vector<16x640xf32>
    %354 = tpu.matmul %353, %351, %cst_338 {dimension_numbers = #tpu.dot_dimension_numbers<[1], [0], [0], [1], [0, 0, 1, 1], [], []>} : vector<16x16xf32>, vector<16x640xf32>, vector<16x640xf32> -> vector<16x640xf32>
    %c0_339 = arith.constant 0 : index
    %c80_340 = arith.constant 80 : index
    %355 = vector.load %arg7[%c0_339, %c80_340] : memref<16x896xf32, #tpu.memory_space<vmem>>, vector<16x640xf32>
    %c64_341 = arith.constant 64 : index
    %c0_342 = arith.constant 0 : index
    %c0_343 = arith.constant 0 : index
    %356 = vector.load %arg4[%c64_341, %c0_342, %c0_343] : memref<72x16x16xf32, #tpu.memory_space<vmem>>, vector<1x16x16xf32>
    %357 = vector.shape_cast %356 : vector<1x16x16xf32> to vector<16x16xf32>
    %cst_344 = arith.constant dense<0.000000e+00> : vector<16x640xf32>
    %358 = tpu.matmul %357, %355, %cst_344 {dimension_numbers = #tpu.dot_dimension_numbers<[1], [0], [0], [1], [0, 0, 1, 1], [], []>} : vector<16x16xf32>, vector<16x640xf32>, vector<16x640xf32> -> vector<16x640xf32>
    %359 = arith.addf %354, %358 : vector<16x640xf32>
    %c0_345 = arith.constant 0 : index
    %c96_346 = arith.constant 96 : index
    %360 = vector.load %arg7[%c0_345, %c96_346] : memref<16x896xf32, #tpu.memory_space<vmem>>, vector<16x640xf32>
    %c65 = arith.constant 65 : index
    %c0_347 = arith.constant 0 : index
    %c0_348 = arith.constant 0 : index
    %361 = vector.load %arg4[%c65, %c0_347, %c0_348] : memref<72x16x16xf32, #tpu.memory_space<vmem>>, vector<1x16x16xf32>
    %362 = vector.shape_cast %361 : vector<1x16x16xf32> to vector<16x16xf32>
    %cst_349 = arith.constant dense<0.000000e+00> : vector<16x640xf32>
    %363 = tpu.matmul %362, %360, %cst_349 {dimension_numbers = #tpu.dot_dimension_numbers<[1], [0], [0], [1], [0, 0, 1, 1], [], []>} : vector<16x16xf32>, vector<16x640xf32>, vector<16x640xf32> -> vector<16x640xf32>
    %364 = arith.addf %359, %363 : vector<16x640xf32>
    %c0_350 = arith.constant 0 : index
    %c112_351 = arith.constant 112 : index
    %365 = vector.load %arg7[%c0_350, %c112_351] : memref<16x896xf32, #tpu.memory_space<vmem>>, vector<16x640xf32>
    %c66 = arith.constant 66 : index
    %c0_352 = arith.constant 0 : index
    %c0_353 = arith.constant 0 : index
    %366 = vector.load %arg4[%c66, %c0_352, %c0_353] : memref<72x16x16xf32, #tpu.memory_space<vmem>>, vector<1x16x16xf32>
    %367 = vector.shape_cast %366 : vector<1x16x16xf32> to vector<16x16xf32>
    %cst_354 = arith.constant dense<0.000000e+00> : vector<16x640xf32>
    %368 = tpu.matmul %367, %365, %cst_354 {dimension_numbers = #tpu.dot_dimension_numbers<[1], [0], [0], [1], [0, 0, 1, 1], [], []>} : vector<16x16xf32>, vector<16x640xf32>, vector<16x640xf32> -> vector<16x640xf32>
    %369 = arith.addf %364, %368 : vector<16x640xf32>
    %c0_355 = arith.constant 0 : index
    %c128_356 = arith.constant 128 : index
    %370 = vector.load %arg7[%c0_355, %c128_356] : memref<16x896xf32, #tpu.memory_space<vmem>>, vector<16x640xf32>
    %c67 = arith.constant 67 : index
    %c0_357 = arith.constant 0 : index
    %c0_358 = arith.constant 0 : index
    %371 = vector.load %arg4[%c67, %c0_357, %c0_358] : memref<72x16x16xf32, #tpu.memory_space<vmem>>, vector<1x16x16xf32>
    %372 = vector.shape_cast %371 : vector<1x16x16xf32> to vector<16x16xf32>
    %cst_359 = arith.constant dense<0.000000e+00> : vector<16x640xf32>
    %373 = tpu.matmul %372, %370, %cst_359 {dimension_numbers = #tpu.dot_dimension_numbers<[1], [0], [0], [1], [0, 0, 1, 1], [], []>} : vector<16x16xf32>, vector<16x640xf32>, vector<16x640xf32> -> vector<16x640xf32>
    %374 = arith.addf %369, %373 : vector<16x640xf32>
    %c0_360 = arith.constant 0 : index
    %c144_361 = arith.constant 144 : index
    %375 = vector.load %arg7[%c0_360, %c144_361] : memref<16x896xf32, #tpu.memory_space<vmem>>, vector<16x640xf32>
    %c68 = arith.constant 68 : index
    %c0_362 = arith.constant 0 : index
    %c0_363 = arith.constant 0 : index
    %376 = vector.load %arg4[%c68, %c0_362, %c0_363] : memref<72x16x16xf32, #tpu.memory_space<vmem>>, vector<1x16x16xf32>
    %377 = vector.shape_cast %376 : vector<1x16x16xf32> to vector<16x16xf32>
    %cst_364 = arith.constant dense<0.000000e+00> : vector<16x640xf32>
    %378 = tpu.matmul %377, %375, %cst_364 {dimension_numbers = #tpu.dot_dimension_numbers<[1], [0], [0], [1], [0, 0, 1, 1], [], []>} : vector<16x16xf32>, vector<16x640xf32>, vector<16x640xf32> -> vector<16x640xf32>
    %379 = arith.addf %374, %378 : vector<16x640xf32>
    %c0_365 = arith.constant 0 : index
    %c160_366 = arith.constant 160 : index
    %380 = vector.load %arg7[%c0_365, %c160_366] : memref<16x896xf32, #tpu.memory_space<vmem>>, vector<16x640xf32>
    %c69 = arith.constant 69 : index
    %c0_367 = arith.constant 0 : index
    %c0_368 = arith.constant 0 : index
    %381 = vector.load %arg4[%c69, %c0_367, %c0_368] : memref<72x16x16xf32, #tpu.memory_space<vmem>>, vector<1x16x16xf32>
    %382 = vector.shape_cast %381 : vector<1x16x16xf32> to vector<16x16xf32>
    %cst_369 = arith.constant dense<0.000000e+00> : vector<16x640xf32>
    %383 = tpu.matmul %382, %380, %cst_369 {dimension_numbers = #tpu.dot_dimension_numbers<[1], [0], [0], [1], [0, 0, 1, 1], [], []>} : vector<16x16xf32>, vector<16x640xf32>, vector<16x640xf32> -> vector<16x640xf32>
    %384 = arith.addf %379, %383 : vector<16x640xf32>
    %c0_370 = arith.constant 0 : index
    %c176_371 = arith.constant 176 : index
    %385 = vector.load %arg7[%c0_370, %c176_371] : memref<16x896xf32, #tpu.memory_space<vmem>>, vector<16x640xf32>
    %c70 = arith.constant 70 : index
    %c0_372 = arith.constant 0 : index
    %c0_373 = arith.constant 0 : index
    %386 = vector.load %arg4[%c70, %c0_372, %c0_373] : memref<72x16x16xf32, #tpu.memory_space<vmem>>, vector<1x16x16xf32>
    %387 = vector.shape_cast %386 : vector<1x16x16xf32> to vector<16x16xf32>
    %cst_374 = arith.constant dense<0.000000e+00> : vector<16x640xf32>
    %388 = tpu.matmul %387, %385, %cst_374 {dimension_numbers = #tpu.dot_dimension_numbers<[1], [0], [0], [1], [0, 0, 1, 1], [], []>} : vector<16x16xf32>, vector<16x640xf32>, vector<16x640xf32> -> vector<16x640xf32>
    %389 = arith.addf %384, %388 : vector<16x640xf32>
    %c0_375 = arith.constant 0 : index
    %c192_376 = arith.constant 192 : index
    %390 = vector.load %arg7[%c0_375, %c192_376] : memref<16x896xf32, #tpu.memory_space<vmem>>, vector<16x640xf32>
    %c71 = arith.constant 71 : index
    %c0_377 = arith.constant 0 : index
    %c0_378 = arith.constant 0 : index
    %391 = vector.load %arg4[%c71, %c0_377, %c0_378] : memref<72x16x16xf32, #tpu.memory_space<vmem>>, vector<1x16x16xf32>
    %392 = vector.shape_cast %391 : vector<1x16x16xf32> to vector<16x16xf32>
    %cst_379 = arith.constant dense<0.000000e+00> : vector<16x640xf32>
    %393 = tpu.matmul %392, %390, %cst_379 {dimension_numbers = #tpu.dot_dimension_numbers<[1], [0], [0], [1], [0, 0, 1, 1], [], []>} : vector<16x16xf32>, vector<16x640xf32>, vector<16x640xf32> -> vector<16x640xf32>
    %394 = arith.addf %389, %393 : vector<16x640xf32>
    %c7_380 = arith.constant 7 : index
    %c0_381 = arith.constant 0 : index
    %c0_382 = arith.constant 0 : index
    %395 = vector.load %arg5[%c7_380, %c0_381, %c0_382] : memref<8x16x1xf32, #tpu.memory_space<vmem>>, vector<1x16x1xf32>
    %396 = vector.shape_cast %395 : vector<1x16x1xf32> to vector<16x1xf32>
    %397 = vector.broadcast %396 : vector<16x1xf32> to vector<16x640xf32>
    %398 = arith.addf %394, %397 : vector<16x640xf32>
    %cst_383 = arith.constant 0.000000e+00 : f32
    %399 = vector.broadcast %cst_383 : f32 to vector<16x640xf32>
    %400 = arith.maximumf %398, %399 : vector<16x640xf32>
    %401 = vector.extract_strided_slice %400 {offsets = [0, 0], sizes = [16, 256], strides = [1, 1]} : vector<16x640xf32> to vector<16x256xf32>
    %c0_384 = arith.constant 0 : index
    %c48_385 = arith.constant 48 : index
    %c0_386 = arith.constant 0 : index
    %402 = vector.load %arg6[%c0_384, %c48_385, %c0_386] : memref<2x64x256xf32, #tpu.memory_space<vmem>>, vector<1x16x256xf32>
    %403 = vector.shape_cast %402 : vector<1x16x256xf32> to vector<16x256xf32>
    %404 = vector.shape_cast %401 : vector<16x256xf32> to vector<1x16x256xf32>
    tpu.vector_store %arg6[%c0_384, %c48_385, %c0_386], %404 {strides = array<i32>} : memref<2x64x256xf32, #tpu.memory_space<vmem>>, vector<1x16x256xf32>,
    %405 = vector.extract_strided_slice %400 {offsets = [0, 384], sizes = [16, 256], strides = [1, 1]} : vector<16x640xf32> to vector<16x256xf32>
    %c1_387 = arith.constant 1 : index
    %c48_388 = arith.constant 48 : index
    %c0_389 = arith.constant 0 : index
    %406 = vector.load %arg6[%c1_387, %c48_388, %c0_389] : memref<2x64x256xf32, #tpu.memory_space<vmem>>, vector<1x16x256xf32>
    %407 = vector.shape_cast %406 : vector<1x16x256xf32> to vector<16x256xf32>
    %408 = vector.shape_cast %405 : vector<16x256xf32> to vector<1x16x256xf32>
    tpu.vector_store %arg6[%c1_387, %c48_388, %c0_389], %408 {strides = array<i32>} : memref<2x64x256xf32, #tpu.memory_space<vmem>>, vector<1x16x256xf32>,
    return
  }
  func.func @transform_0(%arg0: i32) -> (i32, i32, i32) {
    %c0_i32 = arith.constant 0 : i32
    %c0_i32_0 = arith.constant 0 : i32
    %c0_i32_1 = arith.constant 0 : i32
    return %arg0, %c0_i32, %c0_i32_0 : i32, i32, i32
  }
  func.func @transform_1(%arg0: i32) -> (i32, i32, i32) {
    %c0_i32 = arith.constant 0 : i32
    %c0_i32_0 = arith.constant 0 : i32
    %c0_i32_1 = arith.constant 0 : i32
    %c0_i32_2 = arith.constant 0 : i32
    return %c0_i32, %c0_i32_0, %c0_i32_1 : i32, i32, i32
  }
  func.func @transform_2(%arg0: i32) -> (i32, i32) {
    %c0_i32 = arith.constant 0 : i32
    %c0_i32_0 = arith.constant 0 : i32
    %c0_i32_1 = arith.constant 0 : i32
    return %c0_i32, %c0_i32_0 : i32, i32
  }
  func.func @transform_3(%arg0: i32) -> (i32, i32, i32) {
    %c0_i32 = arith.constant 0 : i32
    %c0_i32_0 = arith.constant 0 : i32
    %c0_i32_1 = arith.constant 0 : i32
    %c0_i32_2 = arith.constant 0 : i32
    return %c0_i32, %c0_i32_0, %c0_i32_1 : i32, i32, i32
  }
  func.func @transform_4(%arg0: i32) -> (i32, i32, i32) {
    %c0_i32 = arith.constant 0 : i32
    %c0_i32_0 = arith.constant 0 : i32
    %c0_i32_1 = arith.constant 0 : i32
    %c0_i32_2 = arith.constant 0 : i32
    return %c0_i32, %c0_i32_0, %c0_i32_1 : i32, i32, i32
  }
  func.func @transform_5(%arg0: i32) -> (i32, i32, i32) {
    %c0_i32 = arith.constant 0 : i32
    %c0_i32_0 = arith.constant 0 : i32
    %c0_i32_1 = arith.constant 0 : i32
    return %arg0, %c0_i32, %c0_i32_0 : i32, i32, i32
  }
}

</mosaic_0001>

<bundles_post_ra>
// kernel: tpu_custom_call.1
= control target key start
LH: loop header
LB: loop body
LE: loop exit
PB: predicated region body
PF: predicated region fallthrough
CT: control target
= control target key end

     0   :  { %s17138_s0 = inlined_call_operand.vmem [shape: f32[1,8,896], index: 0, kind: input, shape index: {}]   ;;  %s17139_s1 = inlined_call_operand.vmem [shape: f32[9,64,8], index: 1, kind: input, shape index: {}]   ;;  %s17140_s2 = inlined_call_operand.vmem [shape: f32[64,1], index: 2, kind: input, shape index: {}]   ;;  %s17141_s3 = inlined_call_operand.vmem [shape: f32[72,16,16], index: 3, kind: input, shape index: {}]   ;;  %s17142_s4 = inlined_call_operand.vmem [shape: f32[8,16,1], index: 4, kind: input, shape index: {}]   ;;  %s17143_s5 = inlined_call_operand.hbm [shape: f32[2,64,256], index: 5, kind: output, shape index: {}]  }
   0x1   :  { %v12573_v0 = vld [vmem:[%s17138_s0 + $0x18] sm:$0xff]  ;;  %v12578_v1 = vld [vmem:[%s17138_s0 + $0x20] sm:$0xff]  ;;  %v12590_v4 = vld [vmem:[%s17138_s0 + $0x8] sm:$0xff] }
   0x2   :  { %v21_v2 = vld [vmem:[%s17138_s0] sm:$0xff]  ;;  %v12585_v3 = vpack.i.bf16 %v12578_v1, %v12573_v0 }
   0x3   :  { %v11227_v5 = vpack.i.bf16 %v12590_v4, %v21_v2 }
   0x4   :  { %10 = vsyncpa [#allocation5], 0  ;;  %s12529_s26 = smov 48   ;;  %s12530_s27 = smov 64   ;;  %v12600_v6 = vld [vmem:[%s17138_s0 + $0x10] sm:$0xff]  ;;  %v12605_v7 = vld [vmem:[%s17138_s0 + $0x28] sm:$0xff] }
   0x5   :  { %11233 = vrot.lane.b32.xlu1 %v12585_v3, %s12529_s26  ;;  %11228 = vrot.lane.b32.xlu0 %v11227_v5, %s12529_s26  ;;  %v12609_v8 = vpack.i.bf16 %v12573_v0, %v12600_v6  ;;  %s12531_s7 = smov 32   ;;  %s12532_s8 = smov 16   ;;  %vm62_vm0 = vcmask 392192   ;;  %v12633_v15 = vld [vmem:[%s17139_s1 + $0x40] sm:$0xff]  ;;  %vm73_vm1 = vcmask 64512   ;;  %v12641_v18 = vpack.i.bf16 %v12600_v6, %v12590_v4  ;;  %v12653_v24 = vld [vmem:[%s17139_s1 + $0x48] sm:$0xff] }
   0x6   :  { %11238 = vrot.lane.b32.xlu2 %v11227_v5, %s12530_s27  ;;  %v12667_v25 = vld [vmem:[%s17139_s1 + $0x50] sm:$0xff]  ;;  %v10301_v27 = vld [vmem:[%s17139_s1 + $0x58] sm:$0xff]  ;;  %vm315_vm2 = vcmask 523264   ;;  %v10302_v35 = vld [vmem:[%s17139_s1 + $0x60] sm:$0xff]  ;;  %vm576_vm3 = vcmask 261120   ;;  %v11257_v57 = vpack.i.bf16 %v12605_v7, %v12578_v1  ;;  %s12533_s24 = smov 112  }
   0x7   :  { %v10303_v38 = vld [vmem:[%s17139_s1 + $0x68] sm:$0xff]  ;;  %v10304_v42 = vld [vmem:[%s17139_s1 + $0x70] sm:$0xff]  ;;  %v10305_v43 = vld [vmem:[%s17139_s1 + $0x78] sm:$0xff]  ;;  %vm877_vm4 = vcmask 130048   ;;  %s12534_s20 = smov 96   ;;  %s12535_s13 = smov 80  }
   0x8   :  { %v12724_v44 = vld [vmem:[%s17139_s1] sm:$0xff]  ;;  %v12735_v45 = vld [vmem:[%s17139_s1 + $0x8] sm:$0xff]  ;;  %v12748_v46 = vld [vmem:[%s17139_s1 + $0x10] sm:$0xff]  ;;  %vm1468_vm5 = vcmask 916480   ;;  %vm1769_vm6 = vcmask 785408   ;;  %vm2070_vm7 = vcmask 654336  }
   0x9   :  { %v12761_v47 = vld [vmem:[%s17139_s1 + $0x18] sm:$0xff]  ;;  %v12773_v49 = vld [vmem:[%s17139_s1 + $0x20] sm:$0xff]  ;;  %v12786_v54 = vld [vmem:[%s17139_s1 + $0x28] sm:$0xff]  ;;  %s10286_s6 = sshll.u32 %s17143_s5, 4  ;;  %s12539_s9 = smov 256   ;;  %s10287_s6 = int_to_ptr.hbm [resolvable:$true] %s10286_s6 }
   0xa   :  { %v12803_v60 = vld [vmem:[%s17139_s1 + $0x30] sm:$0xff]  ;;  %v12816_v62 = vld [vmem:[%s17139_s1 + $0x38] sm:$0xff]  ;;  %v12828_v63 = vld [vmem:[%s17139_s1 + $0x80] sm:$0xff] }
   0xd   :  { %60 = vrot.lane.b32.xlu1 %v12605_v7, %s12529_s26  ;;  %54 = vrot.lane.b32.xlu0 %v12600_v6, %s12529_s26 }
   0xe   :  { %11243 = vrot.lane.b32.xlu2 %v12609_v8, %s12530_s27 }
  0x15   :  { %313 = vrot.lane.b32.xlu1 %v12605_v7, %s12530_s27  ;;  %311 = vrot.lane.b32.xlu0 %v12578_v1, %s12530_s27 }
  0x16   :  { %11248 = vrot.lane.b32.xlu2 %v12641_v18, %s12531_s7 }
  0x1d   :  { %572 = vrot.lane.b32.xlu1 %v12578_v1, %s12531_s7  ;;  %570 = vrot.lane.b32.xlu0 %v12573_v0, %s12531_s7 }
  0x1e   :  { %564 = vrot.lane.b32.xlu2 %v21_v2, %s12531_s7 }
  0x25   :  { %11253 = vrot.lane.b32.xlu0 %v11227_v5, %s12532_s8  ;;  %869 = vrot.lane.b32.xlu1 %v12600_v6, %s12532_s8 }
  0x26   :  { %871 = vrot.lane.b32.xlu2 %v12573_v0, %s12532_s8 }
  0x2d   :  { %574 = vrot.lane.b32.xlu0 %v12605_v7, %s12531_s7  ;;  %11258 = vrot.lane.b32.xlu1 %v11257_v57, %s12532_s8 }
  0x2e   :  { %11263 = vrot.lane.b32.xlu2 %v12641_v18, %s12533_s24 }
  0x35   :  { %11268 = vrot.lane.b32.xlu0 %v12585_v3, %s12533_s24  ;;  %1464 = vrot.lane.b32.xlu1 %v12605_v7, %s12533_s24 }
  0x3d   :  { %11273 = vrot.lane.b32.xlu0 %v12609_v8, %s12534_s20  ;;  %1763 = vrot.lane.b32.xlu1 %v12578_v1, %s12534_s20 }
  0x45   :  { %1757 = vrot.lane.b32.xlu0 %v12590_v4, %s12534_s20  ;;  %11278 = vrot.lane.b32.xlu1 %v12641_v18, %s12535_s13 }
  0x4d   :  { %2064 = vrot.lane.b32.xlu0 %v12578_v1, %s12535_s13 }
  0x55   :  { %11288 = vrot.lane.b32.xlu0 %v12641_v18, %s12530_s27 }
  0x60   :  { %v11239_v26 = vpop.permute.xlu2 %11238 }
  0x61   :  { %v11241_v28 = vunpack.i.h.bf16 %v11239_v26  ;;  %v11240_v29 = vunpack.i.l.bf16 %v11239_v26 }
  0x63   :  { %v316_v32 = vsel %vm315_vm2, %v11240_v29, %v11241_v28 }
  0x68   :  { %v11244_v30 = vpop.permute.xlu2 %11243 }
  0x69   :  { %v11245_v31 = vunpack.i.l.bf16 %v11244_v30  ;;  %v11246_v33 = vunpack.i.h.bf16 %v11244_v30  ;;  %v12911_v30 = vld [vmem:[%s17139_s1 + $0xa0] sm:$0xff] }
  0x6b   :  { %v317_v34 = vsel %vm315_vm2, %v11241_v28, %v11245_v31  ;;  %v318_v36 = vsel %vm315_vm2, %v11245_v31, %v11246_v33 }
  0x70   :  { %v11249_v48 = vpop.permute.xlu2 %11248 }
  0x71   :  { %v11251_v50 = vunpack.i.h.bf16 %v11249_v48  ;;  %v11250_v51 = vunpack.i.l.bf16 %v11249_v48 }
  0x73   :  { %v578_v52 = vsel %vm576_vm3, %v11250_v51, %v11251_v50 }
  0x77   :  { %v11234_v9 = vpop.permute.xlu1 %11233  ;;  %v11229_v12 = vpop.permute.xlu0 %11228 }
  0x78   :  { %v11236_v10 = vunpack.i.h.bf16 %v11234_v9  ;;  %v11235_v11 = vunpack.i.l.bf16 %v11234_v9  ;;  %v11231_v13 = vunpack.i.h.bf16 %v11229_v12  ;;  %v11230_v14 = vunpack.i.l.bf16 %v11229_v12  ;;  %v565_v53 = vpop.permute.xlu2 %564 }
  0x79   :  { %v577_v55 = vsel %vm576_vm3, %v565_v53, %v11250_v51 }
  0x7a   :  { %v66_v16 = vsel %vm62_vm0, %v11235_v11, %v11236_v10  ;;  %v63_v17 = vsel %vm62_vm0, %v11230_v14, %v11231_v13 }
  0x7b   :  { %236 = vmatpush.msra.mxu3 %v66_v16  ;;  %113 = vmatpush.msra.mxu0 %v63_v17 }
  0x7c   :  { %10330 = vmatmul.msk.f32.vlgmr.msra.gmra.mxu3 %vm73_vm1, %v12633_v15  ;;  %10306 = vmatmul.msk.f32.vlgmr.msra.gmra.mxu0 %vm73_vm1, %v12633_v15 }
  0x7d   :  { %447 = vmatpush.msrb.mxu3 %v318_v36  ;;  %v12931_v36 = vld [vmem:[%s17139_s1 + $0xa8] sm:$0xff] }
  0x7f   :  { %v61_v19 = vpop.permute.xlu1 %60  ;;  %v55_v20 = vpop.permute.xlu0 %54  ;;  %667 = vmatpush.msra.mxu3 %v578_v52 }
  0x80   :  { %v67_v21 = vsel %vm62_vm0, %v11236_v10, %v61_v19  ;;  %v64_v22 = vsel %vm62_vm0, %v11231_v13, %v55_v20  ;;  %v65_v23 = vsel %vm62_vm0, %v55_v20, %v11235_v11  ;;  %v12847_v10 = vld [vmem:[%s17139_s1 + $0x88] sm:$0xff] }
  0x81   :  { %277 = vmatpush.msrb.mxu0 %v67_v21  ;;  %154 = vmatpush.msra.mxu1 %v64_v22  ;;  %v12891_v21 = vld [vmem:[%s17139_s1 + $0x98] sm:$0xff] }
  0x82   :  { %195 = vmatpush.msra.mxu2 %v65_v23  ;;  %10314 = vmatmul.msk.f32.vlgmr.msra.gmra.mxu1 %vm73_vm1, %v12633_v15 }
  0x83   :  { %10322 = vmatmul.msk.f32.vlgmr.msra.gmra.mxu2 %vm73_vm1, %v12633_v15  ;;  %365 = vmatpush.msrb.mxu1 %v316_v32 }
  0x84   :  { %10331 = vmatmul.msk.f32.gmra.mxu3 %vm73_vm1, %v12653_v24  ;;  %10307 = vmatmul.msk.f32.gmra.mxu0 %vm73_vm1, %v12653_v24 }
  0x85   :  { %406 = vmatpush.msrb.mxu2 %v317_v34 }
  0x87   :  { %v312_v37 = vpop.permute.xlu0 %311  ;;  %v314_v40 = vpop.permute.xlu1 %313  ;;  %626 = vmatpush.msra.mxu2 %v577_v55  ;;  %v12993_v55 = vld [vmem:[%s17139_s1 + $0xc0] sm:$0xff] }
  0x88   :  { %v319_v39 = vsel %vm315_vm2, %v11246_v33, %v312_v37  ;;  %v320_v41 = vsel %vm315_vm2, %v312_v37, %v314_v40 }
  0x89   :  { %488 = vmatpush.msra.mxu0 %v319_v39  ;;  %529 = vmatpush.msra.mxu1 %v320_v41 }
  0x8a   :  { %10315 = vmatmul.msk.f32.gmra.mxu1 %vm73_vm1, %v12653_v24 }
  0x8b   :  { %10323 = vmatmul.msk.f32.gmra.mxu2 %vm73_vm1, %v12653_v24 }
  0x8c   :  { %10332 = vmatmul.msk.f32.gmra.mxu3 %vm73_vm1, %v12667_v25  ;;  %10308 = vmatmul.msk.f32.gmra.mxu0 %vm73_vm1, %v12667_v25 }
  0x8f   :  { %v571_v56 = vpop.permute.xlu0 %570  ;;  %v573_v59 = vpop.permute.xlu1 %572 }
  0x90   :  { %v579_v58 = vsel %vm576_vm3, %v11251_v50, %v571_v56  ;;  %v580_v61 = vsel %vm576_vm3, %v571_v56, %v573_v59  ;;  %v12974_v50 = vld [vmem:[%s17139_s1 + $0xb8] sm:$0xff] }
  0x92   :  { %10316 = vmatmul.msk.f32.gmra.mxu1 %vm73_vm1, %v12667_v25 }
  0x93   :  { %10324 = vmatmul.msk.f32.gmra.mxu2 %vm73_vm1, %v12667_v25 }
  0x94   :  { %10333 = vmatmul.msk.f32.gmra.mxu3 %vm73_vm1, %v10301_v27  ;;  %10309 = vmatmul.msk.f32.gmra.mxu0 %vm73_vm1, %v10301_v27 }
  0x97   :  { %v11254_v19 = vpop.permute.xlu0 %11253 }
  0x98   :  { %v11255_v26 = vunpack.i.l.bf16 %v11254_v19 }
  0x9a   :  { %10317 = vmatmul.msk.f32.gmra.mxu1 %vm73_vm1, %v10301_v27 }
  0x9b   :  { %10325 = vmatmul.msk.f32.gmra.mxu2 %vm73_vm1, %v10301_v27 }
  0x9c   :  { %10334 = vmatmul.msk.f32.gmra.mxu3 %vm73_vm1, %v10302_v35  ;;  %10310 = vmatmul.msk.f32.gmra.mxu0 %vm73_vm1, %v10302_v35 }
  0xa2   :  { %10318 = vmatmul.msk.f32.gmra.mxu1 %vm73_vm1, %v10302_v35 }
  0xa3   :  { %10326 = vmatmul.msk.f32.gmra.mxu2 %vm73_vm1, %v10302_v35 }
  0xa4   :  { %10335 = vmatmul.msk.f32.gmra.mxu3 %vm73_vm1, %v10303_v38  ;;  %10311 = vmatmul.msk.f32.gmra.mxu0 %vm73_vm1, %v10303_v38 }
  0xaa   :  { %10319 = vmatmul.msk.f32.gmra.mxu1 %vm73_vm1, %v10303_v38 }
  0xab   :  { %10327 = vmatmul.msk.f32.gmra.mxu2 %vm73_vm1, %v10303_v38 }
  0xac   :  { %10336 = vmatmul.msk.f32.gmra.mxu3 %vm73_vm1, %v10304_v42  ;;  %10312 = vmatmul.msk.f32.gmra.mxu0 %vm73_vm1, %v10304_v42 }
  0xb2   :  { %10320 = vmatmul.msk.f32.gmra.mxu1 %vm73_vm1, %v10304_v42 }
  0xb3   :  { %10328 = vmatmul.msk.f32.gmra.mxu2 %vm73_vm1, %v10304_v42 }
  0xb4   :  { %10337 = vmatmul.msk.f32.gmra.mxu3 %vm73_vm1, %v10305_v43  ;;  %10313 = vmatmul.msk.f32.gmra.mxu0 %vm73_vm1, %v10305_v43 }
  0xba   :  { %10321 = vmatmul.msk.f32.gmra.mxu1 %vm73_vm1, %v10305_v43 }
  0xbb   :  { %10329 = vmatmul.msk.f32.gmra.mxu2 %vm73_vm1, %v10305_v43 }
  0xbc   :  { %10362 = vmatmul.msk.f32.vlgmr.msrb.gmra.mxu3 %vm73_vm1, %v12724_v44  ;;  %10338 = vmatmul.msk.f32.vlgmr.msrb.gmra.mxu0 %vm73_vm1, %v12633_v15  ;;  %v12872_v15 = vld [vmem:[%s17139_s1 + $0x90] sm:$0xff] }
  0xbd   :  { %708 = vmatpush.msrb.mxu0 %v579_v58 }
  0xc2   :  { %10346 = vmatmul.msk.f32.vlgmr.msrb.gmra.mxu1 %vm73_vm1, %v12724_v44 }
  0xc3   :  { %10354 = vmatmul.msk.f32.vlgmr.msrb.gmra.mxu2 %vm73_vm1, %v12724_v44  ;;  %749 = vmatpush.msrb.mxu1 %v580_v61 }
  0xc4   :  { %10363 = vmatmul.msk.f32.gmra.mxu3 %vm73_vm1, %v12735_v45  ;;  %10339 = vmatmul.msk.f32.gmra.mxu0 %vm73_vm1, %v12653_v24 }
  0xca   :  { %10347 = vmatmul.msk.f32.gmra.mxu1 %vm73_vm1, %v12735_v45 }
  0xcb   :  { %10355 = vmatmul.msk.f32.gmra.mxu2 %vm73_vm1, %v12735_v45 }
  0xcc   :  { %10364 = vmatmul.msk.f32.gmra.mxu3 %vm73_vm1, %v12748_v46  ;;  %10340 = vmatmul.msk.f32.gmra.mxu0 %vm73_vm1, %v12667_v25  ;;  %v11256_v25 = vunpack.i.h.bf16 %v11254_v19 }
  0xce   :  { %v878_v32 = vsel %vm877_vm4, %v11255_v26, %v11256_v25 }
  0xcf   :  { %927 = vmatpush.msrb.mxu3 %v878_v32 }
  0xd2   :  { %10348 = vmatmul.msk.f32.gmra.mxu1 %vm73_vm1, %v12748_v46 }
  0xd3   :  { %10356 = vmatmul.msk.f32.gmra.mxu2 %vm73_vm1, %v12748_v46 }
  0xd4   :  { %10365 = vmatmul.msk.f32.gmra.mxu3 %vm73_vm1, %v12761_v47  ;;  %10341 = vmatmul.msk.f32.gmra.mxu0 %vm73_vm1, %v10301_v27  ;;  %v575_v27 = vpop.permute.xlu0 %574 }
  0xd5   :  { %v581_v29 = vsel %vm576_vm3, %v573_v59, %v575_v27 }
  0xd6   :  { %790 = vmatpush.msrb.mxu2 %v581_v29 }
  0xda   :  { %10349 = vmatmul.msk.f32.gmra.mxu1 %vm73_vm1, %v12761_v47 }
  0xdb   :  { %10357 = vmatmul.msk.f32.gmra.mxu2 %vm73_vm1, %v12761_v47 }
  0xdc   :  { %10366 = vmatmul.msk.f32.gmra.mxu3 %vm73_vm1, %v12773_v49  ;;  %10342 = vmatmul.msk.f32.gmra.mxu0 %vm73_vm1, %v10302_v35 }
  0xe2   :  { %10350 = vmatmul.msk.f32.gmra.mxu1 %vm73_vm1, %v12773_v49 }
  0xe3   :  { %10358 = vmatmul.msk.f32.gmra.mxu2 %vm73_vm1, %v12773_v49 }
  0xe4   :  { %10367 = vmatmul.msk.f32.gmra.mxu3 %vm73_vm1, %v12786_v54  ;;  %10343 = vmatmul.msk.f32.gmra.mxu0 %vm73_vm1, %v10303_v38  ;;  %v870_v38 = vpop.permute.xlu1 %869 }
  0xe5   :  { %v879_v39 = vsel %vm877_vm4, %v11256_v25, %v870_v38 }
  0xea   :  { %10351 = vmatmul.msk.f32.gmra.mxu1 %vm73_vm1, %v12786_v54 }
  0xeb   :  { %10359 = vmatmul.msk.f32.gmra.mxu2 %vm73_vm1, %v12786_v54 }
  0xec   :  { %10368 = vmatmul.msk.f32.gmra.mxu3 %vm73_vm1, %v12803_v60  ;;  %10344 = vmatmul.msk.f32.gmra.mxu0 %vm73_vm1, %v10304_v42  ;;  %v12946_v42 = vpop.permute.xlu2 %871  ;;  %v11259_v29 = vpop.permute.xlu1 %11258 }
  0xf2   :  { %10352 = vmatmul.msk.f32.gmra.mxu1 %vm73_vm1, %v12803_v60 }
  0xf3   :  { %10360 = vmatmul.msk.f32.gmra.mxu2 %vm73_vm1, %v12803_v60 }
  0xf4   :  { %10369 = vmatmul.msk.f32.gmra.mxu3 %vm73_vm1, %v12816_v62  ;;  %10345 = vmatmul.msk.f32.gmra.mxu0 %vm73_vm1, %v10305_v43 }
  0xf9   :  { %v12830_v2 = vpop.f32.mrf.mxu0 }
  0xfa   :  { %10353 = vmatmul.msk.f32.gmra.mxu1 %vm73_vm1, %v12816_v62 }
  0xfb   :  { %10361 = vmatmul.msk.f32.gmra.mxu2 %vm73_vm1, %v12816_v62 }
  0xfc   :  { %10402 = vmatmul.msk.f32.vlgmr.msra.gmra.mxu3 %vm73_vm1, %v12828_v63  ;;  %10370 = vmatmul.msk.f32.vlgmr.msra.gmra.mxu0 %vm73_vm1, %v12724_v44 }
  0xfd   :  { %968 = vmatpush.msra.mxu0 %v879_v39 }
  0xff   :  { %v12840_v5 = vpop.f32.mrf.mxu3  ;;  %v12842_v9 = vpop.f32.mrf.mxu1 }
 0x101   :  { %v12849_v11 = vpop.f32.mrf.mxu0 }
 0x102   :  { %10378 = vmatmul.msk.f32.vlgmr.msra.gmra.mxu1 %vm73_vm1, %v12724_v44  ;;  %v12953_v44 = vld [vmem:[%s17139_s1 + $0xb0] sm:$0xff] }
 0x103   :  { %10394 = vmatmul.msk.f32.vlgmr.msra.gmra.mxu2 %vm73_vm1, %v12828_v63 }
 0x104   :  { %10403 = vmatmul.msk.f32.gmra.mxu3 %vm73_vm1, %v12847_v10  ;;  %10371 = vmatmul.msk.f32.gmra.mxu0 %vm73_vm1, %v12735_v45 }
 0x106   :  { %v197_v12 = vpop.f32.mrf.mxu2 }
 0x107   :  { %v12865_v13 = vpop.f32.mrf.mxu3  ;;  %v12867_v14 = vpop.f32.mrf.mxu1 }
 0x109   :  { %v12874_v3 = vpop.f32.mrf.mxu0 }
 0x10a   :  { %10379 = vmatmul.msk.f32.gmra.mxu1 %vm73_vm1, %v12735_v45 }
 0x10b   :  { %10395 = vmatmul.msk.f32.gmra.mxu2 %vm73_vm1, %v12847_v10 }
 0x10c   :  { %10404 = vmatmul.msk.f32.gmra.mxu3 %vm73_vm1, %v12872_v15  ;;  %10372 = vmatmul.msk.f32.gmra.mxu0 %vm73_vm1, %v12748_v46 }
 0x10e   :  { %v200_v16 = vpop.f32.mrf.mxu2 }
 0x10f   :  { %v12884_v17 = vpop.f32.mrf.mxu3  ;;  %v12886_v20 = vpop.f32.mrf.mxu1 }
 0x111   :  { %v12893_v22 = vpop.f32.mrf.mxu0 }
 0x112   :  { %10380 = vmatmul.msk.f32.gmra.mxu1 %vm73_vm1, %v12748_v46  ;;  %v880_v46 = vsel %vm877_vm4, %v870_v38, %v12946_v42  ;;  %v11260_v38 = vunpack.i.l.bf16 %v11259_v29 }
 0x113   :  { %10396 = vmatmul.msk.f32.gmra.mxu2 %vm73_vm1, %v12872_v15  ;;  %1009 = vmatpush.msra.mxu1 %v880_v46 }
 0x114   :  { %10405 = vmatmul.msk.f32.gmra.mxu3 %vm73_vm1, %v12891_v21  ;;  %10373 = vmatmul.msk.f32.gmra.mxu0 %vm73_vm1, %v12761_v47 }
 0x116   :  { %v203_v23 = vpop.f32.mrf.mxu2 }
 0x117   :  { %v12903_v24 = vpop.f32.mrf.mxu3  ;;  %v12905_v28 = vpop.f32.mrf.mxu1 }
 0x119   :  { %v12913_v31 = vpop.f32.mrf.mxu0 }
 0x11a   :  { %10381 = vmatmul.msk.f32.gmra.mxu1 %vm73_vm1, %v12761_v47 }
 0x11b   :  { %10397 = vmatmul.msk.f32.gmra.mxu2 %vm73_vm1, %v12891_v21 }
 0x11c   :  { %10406 = vmatmul.msk.f32.gmra.mxu3 %vm73_vm1, %v12911_v30  ;;  %10374 = vmatmul.msk.f32.gmra.mxu0 %vm73_vm1, %v12773_v49 }
 0x11e   :  { %v206_v33 = vpop.f32.mrf.mxu2 }
 0x11f   :  { %v12924_v34 = vpop.f32.mrf.mxu3  ;;  %v12926_v35 = vpop.f32.mrf.mxu1  ;;  %v11261_v33 = vunpack.i.h.bf16 %v11259_v29  ;;  %v13143_v29 = vld [vmem:[%s17139_s1 + $0xf8] sm:$0xff] }
 0x121   :  { %v12933_v37 = vpop.f32.mrf.mxu0 }
 0x122   :  { %10382 = vmatmul.msk.f32.gmra.mxu1 %vm73_vm1, %v12773_v49 }
 0x123   :  { %10398 = vmatmul.msk.f32.gmra.mxu2 %vm73_vm1, %v12911_v30 }
 0x124   :  { %10407 = vmatmul.msk.f32.gmra.mxu3 %vm73_vm1, %v12931_v36  ;;  %10375 = vmatmul.msk.f32.gmra.mxu0 %vm73_vm1, %v12786_v54 }
 0x126   :  { %v209_v40 = vpop.f32.mrf.mxu2 }
 0x127   :  { %v12944_v41 = vpop.f32.mrf.mxu3  ;;  %v12948_v43 = vpop.f32.mrf.mxu1  ;;  %v882_v40 = vsel %vm877_vm4, %v11260_v38, %v11261_v33 }
 0x128   :  { %1091 = vmatpush.msra.mxu3 %v882_v40 }
 0x129   :  { %v12955_v45 = vpop.f32.mrf.mxu0 }
 0x12a   :  { %10383 = vmatmul.msk.f32.gmra.mxu1 %vm73_vm1, %v12786_v54 }
 0x12b   :  { %10399 = vmatmul.msk.f32.gmra.mxu2 %vm73_vm1, %v12931_v36 }
 0x12c   :  { %10408 = vmatmul.msk.f32.gmra.mxu3 %vm73_vm1, %v12953_v44  ;;  %10376 = vmatmul.msk.f32.gmra.mxu0 %vm73_vm1, %v12803_v60 }
 0x12e   :  { %v212_v47 = vpop.f32.mrf.mxu2 }
 0x12f   :  { %v12967_v48 = vpop.f32.mrf.mxu3  ;;  %v12969_v49 = vpop.f32.mrf.mxu1 }
 0x131   :  { %v12976_v51 = vpop.f32.mrf.mxu0 }
 0x132   :  { %10384 = vmatmul.msk.f32.gmra.mxu1 %vm73_vm1, %v12803_v60  ;;  %v13011_v60 = vld [vmem:[%s17139_s1 + $0xc8] sm:$0xff] }
 0x133   :  { %10400 = vmatmul.msk.f32.gmra.mxu2 %vm73_vm1, %v12953_v44 }
 0x134   :  { %10409 = vmatmul.msk.f32.gmra.mxu3 %vm73_vm1, %v12974_v50  ;;  %10377 = vmatmul.msk.f32.gmra.mxu0 %vm73_vm1, %v12816_v62 }
 0x136   :  { %v215_v52 = vpop.f32.mrf.mxu2 }
 0x137   :  { %v12986_v53 = vpop.f32.mrf.mxu3  ;;  %v12988_v54 = vpop.f32.mrf.mxu1  ;;  %v13103_v52 = vld [vmem:[%s17139_s1 + $0xe8] sm:$0xff] }
 0x139   :  { %v12995_v56 = vpop.f32.mrf.mxu0 }
 0x13a   :  { %10385 = vmatmul.msk.f32.gmra.mxu1 %vm73_vm1, %v12816_v62 }
 0x13b   :  { %10401 = vmatmul.msk.f32.gmra.mxu2 %vm73_vm1, %v12974_v50 }
 0x13c   :  { %10442 = vmatmul.msk.f32.vlgmr.msrb.gmra.mxu3 %vm73_vm1, %v12993_v55  ;;  %10410 = vmatmul.msk.f32.vlgmr.msrb.gmra.mxu0 %vm73_vm1, %v12828_v63 }
 0x13d   :  { %1205 = vmatpush.msrb.mxu0 %v12590_v4  ;;  %1328 = vmatpush.msrb.mxu3 %v12578_v1 }
 0x13e   :  { %v218_v57 = vpop.f32.mrf.mxu2 }
 0x13f   :  { %v449_v58 = vpop.f32.mrf.mxu3  ;;  %v13006_v59 = vpop.f32.mrf.mxu1 }
 0x140   :  { %v368_v1 = vadd.f32 %v13006_v59, %v12830_v2 }
 0x141   :  { %v13013_v61 = vpop.f32.mrf.mxu0 }
 0x142   :  { %10418 = vmatmul.msk.f32.vlgmr.msrb.gmra.mxu1 %vm73_vm1, %v12828_v63 }
 0x143   :  { %10426 = vmatmul.msk.f32.vlgmr.msrb.gmra.mxu2 %vm73_vm1, %v12828_v63  ;;  %1246 = vmatpush.msrb.mxu1 %v12600_v6  ;;  %v13036_v6 = vld [vmem:[%s17139_s1 + $0xd0] sm:$0xff] }
 0x144   :  { %10443 = vmatmul.msk.f32.gmra.mxu3 %vm73_vm1, %v13011_v60  ;;  %10411 = vmatmul.msk.f32.gmra.mxu0 %vm73_vm1, %v12847_v10 }
 0x146   :  { %v408_v62 = vpop.f32.mrf.mxu2 }
 0x147   :  { %v13029_v12 = vadd.f32 %v408_v62, %v12842_v9  ;;  %v452_v63 = vpop.f32.mrf.mxu3  ;;  %v13031_v16 = vpop.f32.mrf.mxu1 }
 0x148   :  { %v371_v2 = vadd.f32 %v13031_v16, %v12849_v11 }
 0x149   :  { %v13038_v19 = vpop.f32.mrf.mxu0 }
 0x14a   :  { %10419 = vmatmul.msk.f32.gmra.mxu1 %vm73_vm1, %v12847_v10 }
 0x14b   :  { %10427 = vmatmul.msk.f32.gmra.mxu2 %vm73_vm1, %v12847_v10  ;;  %v13058_v10 = vld [vmem:[%s17139_s1 + $0xd8] sm:$0xff] }
 0x14c   :  { %10444 = vmatmul.msk.f32.gmra.mxu3 %vm73_vm1, %v13036_v6  ;;  %10412 = vmatmul.msk.f32.gmra.mxu0 %vm73_vm1, %v12872_v15 }
 0x14e   :  { %v411_v8 = vpop.f32.mrf.mxu2 }
 0x14f   :  { %v13051_v9 = vadd.f32 %v411_v8, %v12867_v14  ;;  %v455_v23 = vpop.f32.mrf.mxu3  ;;  %v13053_v25 = vpop.f32.mrf.mxu1  ;;  %v13123_v8 = vld [vmem:[%s17139_s1 + $0xf0] sm:$0xff] }
 0x150   :  { %v374_v16 = vadd.f32 %v13053_v25, %v12874_v3 }
 0x151   :  { %v13060_v26 = vpop.f32.mrf.mxu0 }
 0x152   :  { %10420 = vmatmul.msk.f32.gmra.mxu1 %vm73_vm1, %v12872_v15 }
 0x153   :  { %10428 = vmatmul.msk.f32.gmra.mxu2 %vm73_vm1, %v12872_v15  ;;  %v13078_v15 = vld [vmem:[%s17139_s1 + $0xe0] sm:$0xff] }
 0x154   :  { %10445 = vmatmul.msk.f32.gmra.mxu3 %vm73_vm1, %v13058_v10  ;;  %10413 = vmatmul.msk.f32.gmra.mxu0 %vm73_vm1, %v12891_v21 }
 0x156   :  { %v414_v4 = vpop.f32.mrf.mxu2 }
 0x157   :  { %v13071_v14 = vadd.f32 %v414_v4, %v12886_v20  ;;  %v458_v27 = vpop.f32.mrf.mxu3  ;;  %v13073_v32 = vpop.f32.mrf.mxu1  ;;  %v881_v20 = vsel %vm877_vm4, %v12946_v42, %v11260_v38 }
 0x158   :  { %1050 = vmatpush.msra.mxu2 %v881_v20 }
 0x159   :  { %v13080_v39 = vpop.f32.mrf.mxu0 }
 0x15a   :  { %10421 = vmatmul.msk.f32.gmra.mxu1 %vm73_vm1, %v12891_v21  ;;  %1287 = vmatpush.msrb.mxu2 %v12573_v0 }
 0x15b   :  { %10429 = vmatmul.msk.f32.gmra.mxu2 %vm73_vm1, %v12891_v21 }
 0x15c   :  { %10446 = vmatmul.msk.f32.gmra.mxu3 %vm73_vm1, %v13078_v15  ;;  %10414 = vmatmul.msk.f32.gmra.mxu0 %vm73_vm1, %v12911_v30 }
 0x15e   :  { %v417_v46 = vpop.f32.mrf.mxu2 }
 0x15f   :  { %v13096_v21 = vadd.f32 %v417_v46, %v12905_v28  ;;  %v461_v47 = vpop.f32.mrf.mxu3  ;;  %v13098_v42 = vpop.f32.mrf.mxu1 }
 0x161   :  { %v13105_v57 = vpop.f32.mrf.mxu0 }
 0x162   :  { %10422 = vmatmul.msk.f32.gmra.mxu1 %vm73_vm1, %v12911_v30 }
 0x163   :  { %10430 = vmatmul.msk.f32.gmra.mxu2 %vm73_vm1, %v12911_v30 }
 0x164   :  { %10447 = vmatmul.msk.f32.gmra.mxu3 %vm73_vm1, %v13103_v52  ;;  %10415 = vmatmul.msk.f32.gmra.mxu0 %vm73_vm1, %v12931_v36 }
 0x166   :  { %v420_v28 = vpop.f32.mrf.mxu2 }
 0x167   :  { %v13116_v58 = vadd.f32 %v420_v28, %v12926_v35  ;;  %v464_v62 = vpop.f32.mrf.mxu3  ;;  %v13118_v63 = vpop.f32.mrf.mxu1 }
 0x169   :  { %v13125_v23 = vpop.f32.mrf.mxu0 }
 0x16a   :  { %10423 = vmatmul.msk.f32.gmra.mxu1 %vm73_vm1, %v12931_v36 }
 0x16b   :  { %10431 = vmatmul.msk.f32.gmra.mxu2 %vm73_vm1, %v12931_v36 }
 0x16c   :  { %10448 = vmatmul.msk.f32.gmra.mxu3 %vm73_vm1, %v13123_v8  ;;  %10416 = vmatmul.msk.f32.gmra.mxu0 %vm73_vm1, %v12953_v44 }
 0x16e   :  { %v423_v30 = vpop.f32.mrf.mxu2 }
 0x16f   :  { %v13136_v35 = vadd.f32 %v423_v30, %v12948_v43  ;;  %v467_v4 = vpop.f32.mrf.mxu3  ;;  %v13138_v27 = vpop.f32.mrf.mxu1 }
 0x171   :  { %v13145_v33 = vpop.f32.mrf.mxu0 }
 0x172   :  { %10424 = vmatmul.msk.f32.gmra.mxu1 %vm73_vm1, %v12953_v44 }
 0x173   :  { %10432 = vmatmul.msk.f32.gmra.mxu2 %vm73_vm1, %v12953_v44 }
 0x174   :  { %10449 = vmatmul.msk.f32.gmra.mxu3 %vm73_vm1, %v13143_v29  ;;  %10417 = vmatmul.msk.f32.gmra.mxu0 %vm73_vm1, %v12974_v50 }
 0x176   :  { %v426_v36 = vpop.f32.mrf.mxu2 }
 0x177   :  { %v13156_v43 = vadd.f32 %v426_v36, %v12969_v49  ;;  %v470_v38 = vpop.f32.mrf.mxu3  ;;  %v13158_v20 = vpop.f32.mrf.mxu1 }
 0x179   :  { %v13160_v40 = vpop.f32.mrf.mxu0 }
 0x17a   :  { %10425 = vmatmul.msk.f32.gmra.mxu1 %vm73_vm1, %v12974_v50 }
 0x17b   :  { %10433 = vmatmul.msk.f32.gmra.mxu2 %vm73_vm1, %v12974_v50 }
 0x17c   :  { %10474 = vmatmul.msk.f32.vlgmr.msra.gmra.mxu3 %vm73_vm1, %v12993_v55  ;;  %10450 = vmatmul.msk.f32.vlgmr.msra.gmra.mxu0 %vm73_vm1, %v12993_v55 }
 0x17d   :  { %1369 = vmatpush.msra.mxu0 %v12605_v7 }
 0x17e   :  { %v429_v44 = vpop.f32.mrf.mxu2 }
 0x17f   :  { %v13174_v49 = vadd.f32 %v429_v44, %v12988_v54  ;;  %v669_v46 = vpop.f32.mrf.mxu3  ;;  %v13176_v47 = vpop.f32.mrf.mxu1 }
 0x180   :  { %v13179_v50 = vadd.f32 %v669_v46, %v13029_v12 }
 0x181   :  { %v13181_v28 = vpop.f32.mrf.mxu0 }
 0x182   :  { %10458 = vmatmul.msk.f32.vlgmr.msra.gmra.mxu1 %vm73_vm1, %v12993_v55 }
 0x183   :  { %10466 = vmatmul.msk.f32.vlgmr.msra.gmra.mxu2 %vm73_vm1, %v12993_v55  ;;  %v13215_v55 = vld [vmem:[%s17138_s0 + $0x30] sm:$0xff] }
 0x184   :  { %10475 = vmatmul.msk.f32.gmra.mxu3 %vm73_vm1, %v13011_v60  ;;  %10451 = vmatmul.msk.f32.gmra.mxu0 %vm73_vm1, %v13011_v60 }
 0x185   :  { %1466 = vrot.lane.b32.xlu2 %v13215_v55, %s12533_s24  ;;  %1767 = vrot.lane.b32.xlu1 %v13215_v55, %s12534_s20 }
 0x186   :  { %v628_v54 = vpop.f32.mrf.mxu2  ;;  %2369 = vrot.lane.b32.xlu0 %v13215_v55, %s12530_s27 }
 0x187   :  { %v13193_v12 = vadd.f32 %v628_v54, %v368_v1  ;;  %v672_v62 = vpop.f32.mrf.mxu3  ;;  %v13195_v30 = vpop.f32.mrf.mxu1 }
 0x188   :  { %v13198_v4 = vadd.f32 %v672_v62, %v13051_v9 }
 0x189   :  { %v13200_v36 = vpop.f32.mrf.mxu0 }
 0x18a   :  { %10459 = vmatmul.msk.f32.gmra.mxu1 %vm73_vm1, %v13011_v60 }
 0x18b   :  { %10467 = vmatmul.msk.f32.gmra.mxu2 %vm73_vm1, %v13011_v60 }
 0x18c   :  { %10476 = vmatmul.msk.f32.gmra.mxu3 %vm73_vm1, %v13036_v6  ;;  %10452 = vmatmul.msk.f32.gmra.mxu0 %vm73_vm1, %v13036_v6 }
 0x18d   :  { %1765 = vrot.lane.b32.xlu2 %v12605_v7, %s12534_s20  ;;  %v377_v7 = vadd.f32 %v13073_v32, %v12893_v22 }
 0x18e   :  { %v631_v59 = vpop.f32.mrf.mxu2 }
 0x18f   :  { %v13219_v9 = vadd.f32 %v631_v59, %v371_v2  ;;  %v675_v60 = vpop.f32.mrf.mxu3  ;;  %v13221_v38 = vpop.f32.mrf.mxu1 }
 0x190   :  { %v13224_v44 = vadd.f32 %v675_v60, %v13071_v14 }
 0x191   :  { %v13226_v11 = vpop.f32.mrf.mxu0 }
 0x192   :  { %10460 = vmatmul.msk.f32.gmra.mxu1 %vm73_vm1, %v13036_v6 }
 0x193   :  { %10468 = vmatmul.msk.f32.gmra.mxu2 %vm73_vm1, %v13036_v6 }
 0x194   :  { %10477 = vmatmul.msk.f32.gmra.mxu3 %vm73_vm1, %v13058_v10  ;;  %10453 = vmatmul.msk.f32.gmra.mxu0 %vm73_vm1, %v13058_v10 }
 0x195   :  { %2062 = vrot.lane.b32.xlu2 %v12573_v0, %s12535_s13  ;;  %v380_v0 = vadd.f32 %v13098_v42, %v12913_v31  ;;  %v383_v31 = vadd.f32 %v13118_v63, %v12933_v37  ;;  %v386_v37 = vadd.f32 %v13138_v27, %v12955_v45  ;;  %v389_v45 = vadd.f32 %v13158_v20, %v12976_v51 }
 0x196   :  { %v634_v46 = vpop.f32.mrf.mxu2  ;;  %v532_v51 = vadd.f32 %v13176_v47, %v12995_v56  ;;  %v535_v56 = vadd.f32 %v13195_v30, %v13013_v61  ;;  %v538_v61 = vadd.f32 %v13221_v38, %v13038_v19  ;;  %v11264_v30 = vpop.permute.xlu2 %11263  ;;  %v13416_v19 = vld [vmem:[%s17139_s1 + $0x120] sm:$0xff] }
 0x197   :  { %v13240_v14 = vadd.f32 %v634_v46, %v374_v16  ;;  %v678_v1 = vpop.f32.mrf.mxu3  ;;  %v13242_v54 = vpop.f32.mrf.mxu1 }
 0x198   :  { %v13245_v6 = vadd.f32 %v678_v1, %v13096_v21 }
 0x199   :  { %v13247_v62 = vpop.f32.mrf.mxu0 }
 0x19a   :  { %10461 = vmatmul.msk.f32.gmra.mxu1 %vm73_vm1, %v13058_v10 }
 0x19b   :  { %10469 = vmatmul.msk.f32.gmra.mxu2 %vm73_vm1, %v13058_v10 }
 0x19c   :  { %10478 = vmatmul.msk.f32.gmra.mxu3 %vm73_vm1, %v13078_v15  ;;  %10454 = vmatmul.msk.f32.gmra.mxu0 %vm73_vm1, %v13078_v15 }
 0x19e   :  { %v637_v3 = vpop.f32.mrf.mxu2 }
 0x19f   :  { %v13261_v25 = vadd.f32 %v637_v3, %v377_v7  ;;  %v681_v21 = vpop.f32.mrf.mxu3  ;;  %v13263_v2 = vpop.f32.mrf.mxu1 }
 0x1a0   :  { %v13266_v10 = vadd.f32 %v681_v21, %v13116_v58 }
 0x1a1   :  { %v13268_v59 = vpop.f32.mrf.mxu0 }
 0x1a2   :  { %10462 = vmatmul.msk.f32.gmra.mxu1 %vm73_vm1, %v13078_v15 }
 0x1a3   :  { %10470 = vmatmul.msk.f32.gmra.mxu2 %vm73_vm1, %v13078_v15 }
 0x1a4   :  { %10479 = vmatmul.msk.f32.gmra.mxu3 %vm73_vm1, %v13103_v52  ;;  %10455 = vmatmul.msk.f32.gmra.mxu0 %vm73_vm1, %v13103_v52 }
 0x1a6   :  { %v640_v22 = vpop.f32.mrf.mxu2 }
 0x1a7   :  { %v13280_v32 = vadd.f32 %v640_v22, %v380_v0  ;;  %v684_v58 = vpop.f32.mrf.mxu3  ;;  %v13282_v60 = vpop.f32.mrf.mxu1 }
 0x1a8   :  { %v13285_v16 = vadd.f32 %v684_v58, %v13136_v35 }
 0x1a9   :  { %v13287_v46 = vpop.f32.mrf.mxu0 }
 0x1aa   :  { %10463 = vmatmul.msk.f32.gmra.mxu1 %vm73_vm1, %v13103_v52 }
 0x1ab   :  { %10471 = vmatmul.msk.f32.gmra.mxu2 %vm73_vm1, %v13103_v52 }
 0x1ac   :  { %10480 = vmatmul.msk.f32.gmra.mxu3 %vm73_vm1, %v13123_v8  ;;  %10456 = vmatmul.msk.f32.gmra.mxu0 %vm73_vm1, %v13123_v8 }
 0x1ae   :  { %v643_v15 = vpop.f32.mrf.mxu2 }
 0x1af   :  { %v13299_v42 = vadd.f32 %v643_v15, %v383_v31  ;;  %v687_v35 = vpop.f32.mrf.mxu3  ;;  %v13301_v1 = vpop.f32.mrf.mxu1 }
 0x1b0   :  { %v13304_v7 = vadd.f32 %v687_v35, %v13156_v43 }
 0x1b1   :  { %v13306_v3 = vpop.f32.mrf.mxu0 }
 0x1b2   :  { %10464 = vmatmul.msk.f32.gmra.mxu1 %vm73_vm1, %v13123_v8 }
 0x1b3   :  { %10472 = vmatmul.msk.f32.gmra.mxu2 %vm73_vm1, %v13123_v8  ;;  %v13328_v8 = vld [vmem:[%s17139_s1 + $0x100] sm:$0xff] }
 0x1b4   :  { %10481 = vmatmul.msk.f32.gmra.mxu3 %vm73_vm1, %v13143_v29  ;;  %10457 = vmatmul.msk.f32.gmra.mxu0 %vm73_vm1, %v13143_v29 }
 0x1b6   :  { %v646_v52 = vpop.f32.mrf.mxu2 }
 0x1b7   :  { %v13318_v63 = vadd.f32 %v646_v52, %v386_v37  ;;  %v690_v43 = vpop.f32.mrf.mxu3  ;;  %v13320_v21 = vpop.f32.mrf.mxu1 }
 0x1b8   :  { %v13323_v0 = vadd.f32 %v690_v43, %v13174_v49 }
 0x1b9   :  { %v710_v22 = vpop.f32.mrf.mxu0 }
 0x1ba   :  { %17151 = vst [vmem:[#allocation7_spill] sm:$0xff] %v13323_v0  ;;  %10465 = vmatmul.msk.f32.gmra.mxu1 %vm73_vm1, %v13143_v29  ;;  %v13372_v22 = vld [vmem:[%s17139_s1 + $0x110] sm:$0xff] }
 0x1bb   :  { %10473 = vmatmul.msk.f32.gmra.mxu2 %vm73_vm1, %v13143_v29  ;;  %v13350_v29 = vld [vmem:[%s17139_s1 + $0x108] sm:$0xff] }
 0x1bc   :  { %10514 = vmatmul.msk.f32.vlgmr.msrb.gmra.mxu3 %vm73_vm1, %v13328_v8  ;;  %10490 = vmatmul.msk.f32.vlgmr.msrb.gmra.mxu0 %vm73_vm1, %v13328_v8 }
 0x1be   :  { %v649_v27 = vpop.f32.mrf.mxu2 }
 0x1bf   :  { %v13340_v49 = vadd.f32 %v649_v27, %v389_v45  ;;  %v929_v58 = vpop.f32.mrf.mxu3  ;;  %v13342_v31 = vpop.f32.mrf.mxu1 }
 0x1c0   :  { %v13345_v15 = vadd.f32 %v929_v58, %v13193_v12 }
 0x1c1   :  { %v713_v35 = vpop.f32.mrf.mxu0 }
 0x1c2   :  { %17152 = vst [vmem:[#allocation8_spill] sm:$0xff] %v13345_v15  ;;  %10498 = vmatmul.msk.f32.vlgmr.msrb.gmra.mxu1 %vm73_vm1, %v13328_v8 }
 0x1c3   :  { %10506 = vmatmul.msk.f32.vlgmr.msrb.gmra.mxu2 %vm73_vm1, %v13328_v8 }
 0x1c4   :  { %10515 = vmatmul.msk.f32.gmra.mxu3 %vm73_vm1, %v13350_v29  ;;  %10491 = vmatmul.msk.f32.gmra.mxu0 %vm73_vm1, %v13350_v29 }
 0x1c6   :  { %v792_v20 = vpop.f32.mrf.mxu2 }
 0x1c7   :  { %v13362_v12 = vadd.f32 %v792_v20, %v532_v51  ;;  %v932_v37 = vpop.f32.mrf.mxu3  ;;  %v13364_v52 = vpop.f32.mrf.mxu1  ;;  %v13394_v51 = vld [vmem:[%s17139_s1 + $0x118] sm:$0xff] }
 0x1c8   :  { %v13367_v43 = vadd.f32 %v932_v37, %v13219_v9 }
 0x1c9   :  { %v716_v45 = vpop.f32.mrf.mxu0 }
 0x1ca   :  { %17153 = vst [vmem:[#allocation9_spill] sm:$0xff] %v13367_v43  ;;  %10499 = vmatmul.msk.f32.gmra.mxu1 %vm73_vm1, %v13350_v29 }
 0x1cb   :  { %10507 = vmatmul.msk.f32.gmra.mxu2 %vm73_vm1, %v13350_v29 }
 0x1cc   :  { %10516 = vmatmul.msk.f32.gmra.mxu3 %vm73_vm1, %v13372_v22  ;;  %10492 = vmatmul.msk.f32.gmra.mxu0 %vm73_vm1, %v13372_v22 }
 0x1ce   :  { %v795_v47 = vpop.f32.mrf.mxu2 }
 0x1cf   :  { %v13384_v9 = vadd.f32 %v795_v47, %v535_v56  ;;  %v935_v27 = vpop.f32.mrf.mxu3  ;;  %v13386_v58 = vpop.f32.mrf.mxu1  ;;  %v11266_v56 = vunpack.i.h.bf16 %v11264_v30  ;;  %v11265_v47 = vunpack.i.l.bf16 %v11264_v30 }
 0x1d0   :  { %v13389_v35 = vadd.f32 %v935_v27, %v13240_v14  ;;  %v11269_v27 = vpop.permute.xlu0 %11268 }
 0x1d1   :  { %v719_v20 = vpop.f32.mrf.mxu0  ;;  %v11271_v43 = vunpack.i.h.bf16 %v11269_v27  ;;  %v11270_v15 = vunpack.i.l.bf16 %v11269_v27 }
 0x1d2   :  { %17154 = vst [vmem:[#allocation10_spill] sm:$0xff] %v13389_v35  ;;  %10500 = vmatmul.msk.f32.gmra.mxu1 %vm73_vm1, %v13372_v22 }
 0x1d3   :  { %10508 = vmatmul.msk.f32.gmra.mxu2 %vm73_vm1, %v13372_v22  ;;  %v1471_v30 = vsel %vm1468_vm5, %v11270_v15, %v11271_v43 }
 0x1d4   :  { %10517 = vmatmul.msk.f32.gmra.mxu3 %vm73_vm1, %v13394_v51  ;;  %10493 = vmatmul.msk.f32.gmra.mxu0 %vm73_vm1, %v13394_v51 }
 0x1d5   :  { %1600 = vmatpush.msra.mxu3 %v1471_v30 }
 0x1d6   :  { %v798_v14 = vpop.f32.mrf.mxu2 }
 0x1d7   :  { %v13406_v37 = vadd.f32 %v798_v14, %v538_v61  ;;  %v938_v45 = vpop.f32.mrf.mxu3  ;;  %v13408_v20 = vpop.f32.mrf.mxu1  ;;  %v1469_v61 = vsel %vm1468_vm5, %v11265_v47, %v11266_v56  ;;  %v541_v14 = vadd.f32 %v13242_v54, %v13060_v26  ;;  %v13445_v54 = vld [vmem:[%s17139_s1 + $0x128] sm:$0xff] }
 0x1d8   :  { %v13411_v35 = vadd.f32 %v938_v45, %v13261_v25  ;;  %v1470_v25 = vsel %vm1468_vm5, %v11266_v56, %v11270_v15  ;;  %1518 = vmatpush.msra.mxu1 %v1469_v61  ;;  %v1465_v26 = vpop.permute.xlu1 %1464 }
 0x1d9   :  { %v722_v38 = vpop.f32.mrf.mxu0  ;;  %1559 = vmatpush.msra.mxu2 %v1470_v25  ;;  %v1472_v18 = vsel %vm1468_vm5, %v11271_v43, %v1465_v26 }
 0x1da   :  { %17155 = vst [vmem:[#allocation11_spill] sm:$0xff] %v13411_v35  ;;  %10501 = vmatmul.msk.f32.gmra.mxu1 %vm73_vm1, %v13394_v51  ;;  %1641 = vmatpush.msrb.mxu0 %v1472_v18  ;;  %v13625_v35 = vld [vmem:[%s17139_s1 + $0x168] sm:$0xff] }
 0x1db   :  { %10509 = vmatmul.msk.f32.gmra.mxu2 %vm73_vm1, %v13394_v51 }
 0x1dc   :  { %10518 = vmatmul.msk.f32.gmra.mxu3 %vm73_vm1, %v13416_v19  ;;  %10494 = vmatmul.msk.f32.gmra.mxu0 %vm73_vm1, %v13416_v19 }
 0x1de   :  { %v801_v45 = vpop.f32.mrf.mxu2 }
 0x1df   :  { %v13431_v27 = vadd.f32 %v801_v45, %v541_v14  ;;  %v941_v47 = vpop.f32.mrf.mxu3  ;;  %v13437_v15 = vpop.f32.mrf.mxu1 }
 0x1e0   :  { %v13440_v56 = vadd.f32 %v941_v47, %v13280_v32  ;;  %v544_v32 = vadd.f32 %v13263_v2, %v13080_v39  ;;  %v1467_v45 = vpop.permute.xlu2 %1466  ;;  %v13472_v39 = vld [vmem:[%s17139_s1 + $0x130] sm:$0xff] }
 0x1e1   :  { %v725_v38 = vpop.f32.mrf.mxu0  ;;  %v1473_v2 = vsel %vm1468_vm5, %v1465_v26, %v1467_v45  ;;  %v550_v45 = vadd.f32 %v13301_v1, %v13125_v23  ;;  %v553_v23 = vadd.f32 %v13320_v21, %v13145_v33 }
 0x1e2   :  { %17156 = vst [vmem:[#allocation12_spill] sm:$0xff] %v13440_v56  ;;  %10502 = vmatmul.msk.f32.gmra.mxu1 %vm73_vm1, %v13416_v19 }
 0x1e3   :  { %10510 = vmatmul.msk.f32.gmra.mxu2 %vm73_vm1, %v13416_v19  ;;  %1682 = vmatpush.msrb.mxu1 %v1473_v2 }
 0x1e4   :  { %10519 = vmatmul.msk.f32.gmra.mxu3 %vm73_vm1, %v13445_v54  ;;  %10495 = vmatmul.msk.f32.gmra.mxu0 %vm73_vm1, %v13445_v54 }
 0x1e6   :  { %v804_v61 = vpop.f32.mrf.mxu2 }
 0x1e7   :  { %v13458_v25 = vadd.f32 %v804_v61, %v544_v32  ;;  %v944_v30 = vpop.f32.mrf.mxu3  ;;  %v13464_v43 = vpop.f32.mrf.mxu1  ;;  %v12500_v32 = vld [vmem:[%s17138_s0 + $0x18] sm:$0xff] }
 0x1e8   :  { %v13467_v14 = vadd.f32 %v944_v30, %v13299_v42  ;;  %v547_v42 = vadd.f32 %v13282_v60, %v13105_v57  ;;  %2363 = vrot.lane.b32.xlu1 %v12500_v32, %s12530_s27  ;;  %v13499_v57 = vld [vmem:[%s17139_s1 + $0x138] sm:$0xff] }
 0x1e9   :  { %v728_v47 = vpop.f32.mrf.mxu0 }
 0x1ea   :  { %17157 = vst [vmem:[#allocation13_spill] sm:$0xff] %v13467_v14  ;;  %10503 = vmatmul.msk.f32.gmra.mxu1 %vm73_vm1, %v13445_v54 }
 0x1eb   :  { %10511 = vmatmul.msk.f32.gmra.mxu2 %vm73_vm1, %v13445_v54 }
 0x1ec   :  { %10520 = vmatmul.msk.f32.gmra.mxu3 %vm73_vm1, %v13472_v39  ;;  %10496 = vmatmul.msk.f32.gmra.mxu0 %vm73_vm1, %v13472_v39 }
 0x1ee   :  { %v807_v38 = vpop.f32.mrf.mxu2 }
 0x1ef   :  { %v13485_v18 = vadd.f32 %v807_v38, %v547_v42  ;;  %v947_v26 = vpop.f32.mrf.mxu3  ;;  %v13491_v61 = vpop.f32.mrf.mxu1 }
 0x1f0   :  { %v13494_v30 = vadd.f32 %v947_v26, %v13318_v63  ;;  %v13521_v26 = vld [vmem:[%s17139_s1 + $0x140] sm:$0xff] }
 0x1f1   :  { %v731_v60 = vpop.f32.mrf.mxu0 }
 0x1f2   :  { %17158 = vst [vmem:[#allocation14_spill] sm:$0xff] %v13494_v30  ;;  %10504 = vmatmul.msk.f32.gmra.mxu1 %vm73_vm1, %v13472_v39  ;;  %v13603_v30 = vld [vmem:[%s17139_s1 + $0x160] sm:$0xff] }
 0x1f3   :  { %10512 = vmatmul.msk.f32.gmra.mxu2 %vm73_vm1, %v13472_v39 }
 0x1f4   :  { %10521 = vmatmul.msk.f32.gmra.mxu3 %vm73_vm1, %v13499_v57  ;;  %10497 = vmatmul.msk.f32.gmra.mxu0 %vm73_vm1, %v13499_v57 }
 0x1f6   :  { %v810_v63 = vpop.f32.mrf.mxu2 }
 0x1f7   :  { %v13511_v2 = vadd.f32 %v810_v63, %v550_v45  ;;  %v950_v47 = vpop.f32.mrf.mxu3  ;;  %v13513_v42 = vpop.f32.mrf.mxu1 }
 0x1f8   :  { %v13516_v38 = vadd.f32 %v950_v47, %v13340_v49  ;;  %v13543_v47 = vld [vmem:[%s17139_s1 + $0x148] sm:$0xff] }
 0x1f9   :  { %v13523_v32 = vpop.f32.mrf.mxu0 }
 0x1fa   :  { %17159 = vst [vmem:[#allocation15_spill] sm:$0xff] %v13516_v38  ;;  %10505 = vmatmul.msk.f32.gmra.mxu1 %vm73_vm1, %v13499_v57 }
 0x1fb   :  { %10513 = vmatmul.msk.f32.gmra.mxu2 %vm73_vm1, %v13499_v57 }
 0x1fc   :  { %10554 = vmatmul.msk.f32.vlgmr.msra.gmra.mxu3 %vm73_vm1, %v13521_v26  ;;  %10522 = vmatmul.msk.f32.vlgmr.msra.gmra.mxu0 %vm73_vm1, %v13328_v8 }
 0x1fe   :  { %v813_v1 = vpop.f32.mrf.mxu2 }
 0x1ff   :  { %v13535_v49 = vadd.f32 %v813_v1, %v553_v23  ;;  %v1093_v60 = vpop.f32.mrf.mxu3  ;;  %v1011_v45 = vpop.f32.mrf.mxu1  ;;  %v13563_v23 = vld [vmem:[%s17139_s1 + $0x150] sm:$0xff] }
 0x200   :  { %v13538_v63 = vadd.f32 %v1093_v60, %v13362_v12 }
 0x201   :  { %v13545_v38 = vpop.f32.mrf.mxu0 }
 0x202   :  { %17160 = vst [vmem:[#allocation16_spill] sm:$0xff] %v13538_v63  ;;  %10538 = vmatmul.msk.f32.vlgmr.msra.gmra.mxu1 %vm73_vm1, %v13521_v26 }
 0x203   :  { %10546 = vmatmul.msk.f32.vlgmr.msra.gmra.mxu2 %vm73_vm1, %v13521_v26 }
 0x204   :  { %10555 = vmatmul.msk.f32.gmra.mxu3 %vm73_vm1, %v13543_v47  ;;  %10523 = vmatmul.msk.f32.gmra.mxu0 %vm73_vm1, %v13350_v29 }
 0x206   :  { %v13555_v33 = vpop.f32.mrf.mxu2 }
 0x207   :  { %v1096_v21 = vpop.f32.mrf.mxu3  ;;  %v1014_v8 = vpop.f32.mrf.mxu1 }
 0x208   :  { %v13558_v12 = vadd.f32 %v1096_v21, %v13384_v9  ;;  %v13583_v21 = vld [vmem:[%s17139_s1 + $0x158] sm:$0xff] }
 0x209   :  { %v13565_v1 = vpop.f32.mrf.mxu0 }
 0x20a   :  { %17161 = vst [vmem:[#allocation17_spill] sm:$0xff] %v13558_v12  ;;  %10539 = vmatmul.msk.f32.gmra.mxu1 %vm73_vm1, %v13543_v47 }
 0x20b   :  { %10547 = vmatmul.msk.f32.gmra.mxu2 %vm73_vm1, %v13543_v47 }
 0x20c   :  { %10556 = vmatmul.msk.f32.gmra.mxu3 %vm73_vm1, %v13563_v23  ;;  %10524 = vmatmul.msk.f32.gmra.mxu0 %vm73_vm1, %v13372_v22 }
 0x20e   :  { %v13575_v29 = vpop.f32.mrf.mxu2 }
 0x20f   :  { %v1099_v9 = vpop.f32.mrf.mxu3  ;;  %v1017_v60 = vpop.f32.mrf.mxu1 }
 0x210   :  { %v13578_v45 = vadd.f32 %v1099_v9, %v13406_v37  ;;  %v11274_v9 = vpop.permute.xlu0 %11273 }
 0x211   :  { %v13585_v8 = vpop.f32.mrf.mxu0  ;;  %v11276_v12 = vunpack.i.h.bf16 %v11274_v9  ;;  %v11275_v63 = vunpack.i.l.bf16 %v11274_v9 }
 0x212   :  { %17162 = vst [vmem:[#allocation18_spill] sm:$0xff] %v13578_v45  ;;  %10540 = vmatmul.msk.f32.gmra.mxu1 %vm73_vm1, %v13563_v23 }
 0x213   :  { %10548 = vmatmul.msk.f32.gmra.mxu2 %vm73_vm1, %v13563_v23 }
 0x214   :  { %10557 = vmatmul.msk.f32.gmra.mxu3 %vm73_vm1, %v13583_v21  ;;  %10525 = vmatmul.msk.f32.gmra.mxu0 %vm73_vm1, %v13394_v51  ;;  %v1771_v51 = vsel %vm1769_vm6, %v11275_v63, %v11276_v12 }
 0x215   :  { %1860 = vmatpush.msrb.mxu3 %v1771_v51 }
 0x216   :  { %v13595_v22 = vpop.f32.mrf.mxu2 }
 0x217   :  { %v1102_v37 = vpop.f32.mrf.mxu3  ;;  %v1020_v60 = vpop.f32.mrf.mxu1 }
 0x218   :  { %v13598_v45 = vadd.f32 %v1102_v37, %v13431_v27  ;;  %v1758_v9 = vpop.permute.xlu0 %1757 }
 0x219   :  { %v13605_v14 = vpop.f32.mrf.mxu0  ;;  %v1770_v56 = vsel %vm1769_vm6, %v1758_v9, %v11275_v63  ;;  %v13643_v9 = vpop.permute.xlu2 %1765 }
 0x21a   :  { %17163 = vst [vmem:[#allocation19_spill] sm:$0xff] %v13598_v45  ;;  %10541 = vmatmul.msk.f32.gmra.mxu1 %vm73_vm1, %v13583_v21  ;;  %1819 = vmatpush.msrb.mxu2 %v1770_v56 }
 0x21b   :  { %10549 = vmatmul.msk.f32.gmra.mxu2 %vm73_vm1, %v13583_v21 }
 0x21c   :  { %10558 = vmatmul.msk.f32.gmra.mxu3 %vm73_vm1, %v13603_v30  ;;  %10526 = vmatmul.msk.f32.gmra.mxu0 %vm73_vm1, %v13416_v19  ;;  %v1764_v19 = vpop.permute.xlu1 %1763 }
 0x21e   :  { %v13616_v27 = vpop.f32.mrf.mxu2 }
 0x21f   :  { %v1105_v37 = vpop.f32.mrf.mxu3  ;;  %v1023_v60 = vpop.f32.mrf.mxu1 }
 0x220   :  { %v13619_v45 = vadd.f32 %v1105_v37, %v13458_v25  ;;  %v1772_v25 = vsel %vm1769_vm6, %v11276_v12, %v1764_v19  ;;  %v13648_v12 = vld [vmem:[%s17139_s1 + $0x170] sm:$0xff] }
 0x221   :  { %v13627_v0 = vpop.f32.mrf.mxu0  ;;  %1901 = vmatpush.msra.mxu0 %v1772_v25 }
 0x222   :  { %17164 = vst [vmem:[#allocation20_spill] sm:$0xff] %v13619_v45  ;;  %10542 = vmatmul.msk.f32.gmra.mxu1 %vm73_vm1, %v13603_v30 }
 0x223   :  { %10550 = vmatmul.msk.f32.gmra.mxu2 %vm73_vm1, %v13603_v30 }
 0x224   :  { %10559 = vmatmul.msk.f32.gmra.mxu3 %vm73_vm1, %v13625_v35  ;;  %10527 = vmatmul.msk.f32.gmra.mxu0 %vm73_vm1, %v13445_v54  ;;  %v1773_v54 = vsel %vm1769_vm6, %v1764_v19, %v13643_v9 }
 0x225   :  { %1942 = vmatpush.msra.mxu1 %v1773_v54 }
 0x226   :  { %v13638_v63 = vpop.f32.mrf.mxu2 }
 0x227   :  { %v1108_v56 = vpop.f32.mrf.mxu3  ;;  %v1026_v51 = vpop.f32.mrf.mxu1 }
 0x228   :  { %v13641_v37 = vadd.f32 %v1108_v56, %v13485_v18 }
 0x229   :  { %v13650_v60 = vpop.f32.mrf.mxu0 }
 0x22a   :  { %17165 = vst [vmem:[#allocation21_spill] sm:$0xff] %v13641_v37  ;;  %10543 = vmatmul.msk.f32.gmra.mxu1 %vm73_vm1, %v13625_v35  ;;  %v13670_v37 = vld [vmem:[%s17139_s1 + $0x178] sm:$0xff] }
 0x22b   :  { %10551 = vmatmul.msk.f32.gmra.mxu2 %vm73_vm1, %v13625_v35 }
 0x22c   :  { %10560 = vmatmul.msk.f32.gmra.mxu3 %vm73_vm1, %v13648_v12  ;;  %10528 = vmatmul.msk.f32.gmra.mxu0 %vm73_vm1, %v13472_v39 }
 0x22e   :  { %v13662_v18 = vpop.f32.mrf.mxu2 }
 0x22f   :  { %v1111_v25 = vpop.f32.mrf.mxu3  ;;  %v1029_v56 = vpop.f32.mrf.mxu1 }
 0x230   :  { %v13665_v51 = vadd.f32 %v1111_v25, %v13511_v2  ;;  %v13690_v56 = vld [vmem:[%s17139_s1 + $0x180] sm:$0xff] }
 0x231   :  { %v13672_v19 = vpop.f32.mrf.mxu0 }
 0x232   :  { %17166 = vst [vmem:[#allocation22_spill] sm:$0xff] %v13665_v51  ;;  %10544 = vmatmul.msk.f32.gmra.mxu1 %vm73_vm1, %v13648_v12  ;;  %v491_v51 = vadd.f32 %v13160_v40, %v12840_v5 }
 0x233   :  { %10552 = vmatmul.msk.f32.gmra.mxu2 %vm73_vm1, %v13648_v12 }
 0x234   :  { %10561 = vmatmul.msk.f32.gmra.mxu3 %vm73_vm1, %v13670_v37  ;;  %10529 = vmatmul.msk.f32.gmra.mxu0 %vm73_vm1, %v13499_v57  ;;  %v13703_v57 = vld [vmem:[%s17138_s0 + $0x28] sm:$0xff] }
 0x236   :  { %v13682_v39 = vpop.f32.mrf.mxu2 }
 0x237   :  { %v1114_v2 = vpop.f32.mrf.mxu3  ;;  %v1032_v54 = vpop.f32.mrf.mxu1 }
 0x238   :  { %v13685_v25 = vadd.f32 %v1114_v2, %v13535_v49  ;;  %v11282_v49 = vpack.i.bf16 %v13215_v55, %v13703_v57  ;;  %v819_v2 = vadd.f32 %v13342_v31, %v491_v51  ;;  %v13723_v55 = vld [vmem:[%s17139_s1 + $0x188] sm:$0xff]  ;;  %v494_v31 = vadd.f32 %v13181_v28, %v12865_v13 }
 0x239   :  { %v13694_v45 = vpop.f32.mrf.mxu0 }
 0x23a   :  { %17167 = vst [vmem:[#allocation23_spill] sm:$0xff] %v13685_v25  ;;  %10545 = vmatmul.msk.f32.gmra.mxu1 %vm73_vm1, %v13670_v37  ;;  %11283 = vrot.lane.b32.xlu2 %v11282_v49, %s12535_s13  ;;  %v1120_v5 = vadd.f32 %v13555_v33, %v819_v2  ;;  %v824_v33 = vadd.f32 %v13364_v52, %v494_v31 }
 0x23b   :  { %17168 = vst [vmem:[#allocation24_spill] sm:$0xff] %v13694_v45  ;;  %10553 = vmatmul.msk.f32.gmra.mxu2 %vm73_vm1, %v13670_v37  ;;  %v497_v52 = vadd.f32 %v13200_v36, %v12884_v17 }
 0x23c   :  { %10594 = vmatmul.msk.f32.vlgmr.msrb.gmra.mxu3 %vm73_vm1, %v13690_v56  ;;  %10562 = vmatmul.msk.f32.vlgmr.msrb.gmra.mxu0 %vm73_vm1, %v13521_v26  ;;  %v1125_v49 = vadd.f32 %v13575_v29, %v824_v33 }
 0x23d   :  { %v829_v29 = vadd.f32 %v13386_v58, %v497_v52  ;;  %v11279_v58 = vpop.permute.xlu1 %11278 }
 0x23e   :  { %v13714_v40 = vpop.f32.mrf.mxu2 }
 0x23f   :  { %v1330_v54 = vpop.f32.mrf.mxu3  ;;  %v13716_v25 = vpop.f32.mrf.mxu1  ;;  %v1130_v31 = vadd.f32 %v13595_v22, %v829_v29 }
 0x240   :  { %v13718_v45 = vadd.f32 %v1330_v54, %v1120_v5 }
 0x241   :  { %v13727_v51 = vpop.f32.mrf.mxu0 }
 0x242   :  { %10570 = vmatmul.msk.f32.vlgmr.msrb.gmra.mxu1 %vm73_vm1, %v13521_v26  ;;  %v13746_v26 = vld [vmem:[%s17139_s1 + $0x190] sm:$0xff] }
 0x243   :  { %10586 = vmatmul.msk.f32.vlgmr.msrb.gmra.mxu2 %vm73_vm1, %v13690_v56 }
 0x244   :  { %10595 = vmatmul.msk.f32.gmra.mxu3 %vm73_vm1, %v13723_v55  ;;  %10563 = vmatmul.msk.f32.gmra.mxu0 %vm73_vm1, %v13543_v47 }
 0x246   :  { %v1289_v2 = vpop.f32.mrf.mxu2 }
 0x247   :  { %v1333_v13 = vpop.f32.mrf.mxu3  ;;  %v13739_v28 = vpop.f32.mrf.mxu1  ;;  %v500_v2 = vadd.f32 %v13226_v11, %v12903_v24  ;;  %v11281_v11 = vunpack.i.h.bf16 %v11279_v58 }
 0x248   :  { %v13741_v5 = vadd.f32 %v1333_v13, %v1125_v49 }
 0x249   :  { %v13750_v54 = vpop.f32.mrf.mxu0  ;;  %v834_v22 = vadd.f32 %v13408_v20, %v500_v2  ;;  %v13792_v20 = vld [vmem:[%s17139_s1 + $0x1a0] sm:$0xff]  ;;  %v503_v2 = vadd.f32 %v13247_v62, %v12924_v34 }
 0x24a   :  { %10571 = vmatmul.msk.f32.gmra.mxu1 %vm73_vm1, %v13543_v47  ;;  %v13769_v47 = vld [vmem:[%s17139_s1 + $0x198] sm:$0xff] }
 0x24b   :  { %10587 = vmatmul.msk.f32.gmra.mxu2 %vm73_vm1, %v13723_v55  ;;  %v1135_v52 = vadd.f32 %v13616_v27, %v834_v22  ;;  %v839_v22 = vadd.f32 %v13437_v15, %v503_v2  ;;  %v13818_v15 = vld [vmem:[%s17139_s1 + $0x1a8] sm:$0xff] }
 0x24c   :  { %10596 = vmatmul.msk.f32.gmra.mxu3 %vm73_vm1, %v13746_v26  ;;  %10564 = vmatmul.msk.f32.gmra.mxu0 %vm73_vm1, %v13563_v23 }
 0x24d   :  { %v1140_v34 = vadd.f32 %v13638_v63, %v839_v22 }
 0x24e   :  { %v1292_v33 = vpop.f32.mrf.mxu2 }
 0x24f   :  { %v1336_v17 = vpop.f32.mrf.mxu3  ;;  %v13762_v36 = vpop.f32.mrf.mxu1 }
 0x250   :  { %v13764_v49 = vadd.f32 %v1336_v17, %v1130_v31  ;;  %v11280_v31 = vunpack.i.l.bf16 %v11279_v58  ;;  %v1768_v17 = vpop.permute.xlu1 %1767 }
 0x251   :  { %v13773_v13 = vpop.f32.mrf.mxu0  ;;  %v1774_v27 = vsel %vm1769_vm6, %v13643_v9, %v1768_v17 }
 0x252   :  { %17169 = vst [vmem:[#allocation25_spill] sm:$0xff] %v13764_v49  ;;  %10572 = vmatmul.msk.f32.gmra.mxu1 %vm73_vm1, %v13563_v23  ;;  %v2071_v58 = vsel %vm2070_vm7, %v11280_v31, %v11281_v11  ;;  %1983 = vmatpush.msra.mxu2 %v1774_v27  ;;  %v2063_v31 = vpop.permute.xlu2 %2062 }
 0x253   :  { %10588 = vmatmul.msk.f32.gmra.mxu2 %vm73_vm1, %v13746_v26  ;;  %2120 = vmatpush.msra.mxu3 %v2071_v58  ;;  %v2072_v63 = vsel %vm2070_vm7, %v11281_v11, %v2063_v31  ;;  %v13839_v58 = vpop.permute.xlu0 %2064  ;;  %v509_v11 = vadd.f32 %v13287_v46, %v12967_v48 }
 0x254   :  { %10597 = vmatmul.msk.f32.gmra.mxu3 %vm73_vm1, %v13769_v47  ;;  %10565 = vmatmul.msk.f32.gmra.mxu0 %vm73_vm1, %v13583_v21 }
 0x255   :  { %2161 = vmatpush.msrb.mxu0 %v2072_v63 }
 0x256   :  { %v1295_v29 = vpop.f32.mrf.mxu2 }
 0x257   :  { %v1339_v24 = vpop.f32.mrf.mxu3  ;;  %v13785_v33 = vpop.f32.mrf.mxu1  ;;  %v506_v29 = vadd.f32 %v13268_v59, %v12944_v41 }
 0x258   :  { %v13787_v23 = vadd.f32 %v1339_v24, %v1135_v52 }
 0x259   :  { %v13796_v49 = vpop.f32.mrf.mxu0  ;;  %v844_v17 = vadd.f32 %v13464_v43, %v506_v29  ;;  %v13844_v43 = vld [vmem:[%s17139_s1 + $0x1b0] sm:$0xff]  ;;  %v13869_v29 = vld [vmem:[%s17139_s1 + $0x1b8] sm:$0xff] }
 0x25a   :  { %10573 = vmatmul.msk.f32.gmra.mxu1 %vm73_vm1, %v13583_v21 }
 0x25b   :  { %10589 = vmatmul.msk.f32.gmra.mxu2 %vm73_vm1, %v13769_v47  ;;  %v1145_v41 = vadd.f32 %v13662_v18, %v844_v17  ;;  %v2073_v18 = vsel %vm2070_vm7, %v2063_v31, %v13839_v58 }
 0x25c   :  { %10598 = vmatmul.msk.f32.gmra.mxu3 %vm73_vm1, %v13792_v20  ;;  %10566 = vmatmul.msk.f32.gmra.mxu0 %vm73_vm1, %v13603_v30 }
 0x25d   :  { %2202 = vmatpush.msrb.mxu1 %v2073_v18  ;;  %v13914_v18 = vld [vmem:[%s17139_s1 + $0x1c8] sm:$0xff] }
 0x25e   :  { %v1298_v62 = vpop.f32.mrf.mxu2 }
 0x25f   :  { %v1342_v9 = vpop.f32.mrf.mxu3  ;;  %v13811_v21 = vpop.f32.mrf.mxu1 }
 0x260   :  { %v13813_v52 = vadd.f32 %v1342_v9, %v1140_v34  ;;  %v849_v34 = vadd.f32 %v13491_v61, %v509_v11  ;;  %v512_v61 = vadd.f32 %v13306_v3, %v12986_v53 }
 0x261   :  { %v13822_v24 = vpop.f32.mrf.mxu0 }
 0x262   :  { %17170 = vst [vmem:[#allocation26_spill] sm:$0xff] %v13813_v52  ;;  %10574 = vmatmul.msk.f32.gmra.mxu1 %vm73_vm1, %v13603_v30  ;;  %v1150_v48 = vadd.f32 %v13682_v39, %v849_v34  ;;  %v854_v39 = vadd.f32 %v13513_v42, %v512_v61 }
 0x263   :  { %10590 = vmatmul.msk.f32.gmra.mxu2 %vm73_vm1, %v13792_v20 }
 0x264   :  { %10599 = vmatmul.msk.f32.gmra.mxu3 %vm73_vm1, %v13818_v15  ;;  %10567 = vmatmul.msk.f32.gmra.mxu0 %vm73_vm1, %v13625_v35  ;;  %v1155_v63 = vadd.f32 %v13714_v40, %v854_v39  ;;  %v12502_v40 = vld [vmem:[%s17138_s0 + $0x20] sm:$0xff] }
 0x266   :  { %v1301_v59 = vpop.f32.mrf.mxu2 }
 0x267   :  { %v1345_v2 = vpop.f32.mrf.mxu3  ;;  %v13835_v27 = vpop.f32.mrf.mxu1  ;;  %v11292_v59 = vpack.i.bf16 %v13703_v57, %v12502_v40  ;;  %v1118_v57 = vadd.f32 %v13523_v32, %v13179_v50  ;;  %v13936_v50 = vld [vmem:[%s17139_s1 + $0x1d0] sm:$0xff] }
 0x268   :  { %v13837_v30 = vadd.f32 %v1345_v2, %v1145_v41 }
 0x269   :  { %v13848_v22 = vpop.f32.mrf.mxu0  ;;  %11293 = vrot.lane.b32.xlu2 %v11292_v59, %s12530_s27 }
 0x26a   :  { %17171 = vst [vmem:[#allocation27_spill] sm:$0xff] %v13837_v30  ;;  %10575 = vmatmul.msk.f32.gmra.mxu1 %vm73_vm1, %v13625_v35 }
 0x26b   :  { %10591 = vmatmul.msk.f32.gmra.mxu2 %vm73_vm1, %v13818_v15 }
 0x26c   :  { %10600 = vmatmul.msk.f32.gmra.mxu3 %vm73_vm1, %v13844_v43  ;;  %10568 = vmatmul.msk.f32.gmra.mxu0 %vm73_vm1, %v13648_v12 }
 0x26e   :  { %v1304_v46 = vpop.f32.mrf.mxu2 }
 0x26f   :  { %v1348_v62 = vpop.f32.mrf.mxu3  ;;  %v13862_v35 = vpop.f32.mrf.mxu1 }
 0x270   :  { %v13864_v9 = vadd.f32 %v1348_v62, %v1150_v48  ;;  %v1396_v48 = vadd.f32 %v13716_v25, %v1118_v57 }
 0x271   :  { %v13873_v31 = vpop.f32.mrf.mxu0 }
 0x272   :  { %17172 = vst [vmem:[#allocation28_spill] sm:$0xff] %v13864_v9  ;;  %10576 = vmatmul.msk.f32.gmra.mxu1 %vm73_vm1, %v13648_v12  ;;  %v13892_v12 = vld [vmem:[%s17139_s1 + $0x1c0] sm:$0xff] }
 0x273   :  { %10592 = vmatmul.msk.f32.gmra.mxu2 %vm73_vm1, %v13844_v43 }
 0x274   :  { %10601 = vmatmul.msk.f32.gmra.mxu3 %vm73_vm1, %v13869_v29  ;;  %10569 = vmatmul.msk.f32.gmra.mxu0 %vm73_vm1, %v13670_v37 }
 0x276   :  { %v1307_v17 = vpop.f32.mrf.mxu2 }
 0x277   :  { %v1351_v53 = vpop.f32.mrf.mxu3  ;;  %v13885_v3 = vpop.f32.mrf.mxu1 }
 0x278   :  { %v13887_v41 = vadd.f32 %v1351_v53, %v1155_v63 }
 0x279   :  { %v13894_v42 = vpop.f32.mrf.mxu0 }
 0x27a   :  { %17173 = vst [vmem:[#allocation29_spill] sm:$0xff] %v13887_v41  ;;  %10577 = vmatmul.msk.f32.gmra.mxu1 %vm73_vm1, %v13670_v37 }
 0x27b   :  { %10593 = vmatmul.msk.f32.gmra.mxu2 %vm73_vm1, %v13869_v29 }
 0x27c   :  { %10634 = vmatmul.msk.f32.vlgmr.msra.gmra.mxu3 %vm73_vm1, %v13892_v12  ;;  %10602 = vmatmul.msk.f32.vlgmr.msra.gmra.mxu0 %vm73_vm1, %v13690_v56 }
 0x27e   :  { %v1310_v2 = vpop.f32.mrf.mxu2 }
 0x27f   :  { %v1602_v11 = vpop.f32.mrf.mxu3  ;;  %v13909_v37 = vpop.f32.mrf.mxu1 }
 0x281   :  { %v13916_v34 = vpop.f32.mrf.mxu0 }
 0x282   :  { %10610 = vmatmul.msk.f32.vlgmr.msra.gmra.mxu1 %vm73_vm1, %v13690_v56 }
 0x283   :  { %10618 = vmatmul.msk.f32.vlgmr.msra.gmra.mxu2 %vm73_vm1, %v13690_v56  ;;  %v1123_v56 = vadd.f32 %v13545_v38, %v13198_v4  ;;  %v13958_v4 = vld [vmem:[%s17139_s1 + $0x1d8] sm:$0xff] }
 0x284   :  { %10635 = vmatmul.msk.f32.gmra.mxu3 %vm73_vm1, %v13914_v18  ;;  %10603 = vmatmul.msk.f32.gmra.mxu0 %vm73_vm1, %v13723_v55 }
 0x285   :  { %v1401_v25 = vadd.f32 %v13739_v28, %v1123_v56 }
 0x286   :  { %v1561_v46 = vpop.f32.mrf.mxu2 }
 0x287   :  { %v13929_v62 = vadd.f32 %v1561_v46, %v1396_v48  ;;  %v1605_v61 = vpop.f32.mrf.mxu3  ;;  %v13931_v39 = vpop.f32.mrf.mxu1 }
 0x289   :  { %v13938_v32 = vpop.f32.mrf.mxu0 }
 0x28a   :  { %10611 = vmatmul.msk.f32.gmra.mxu1 %vm73_vm1, %v13723_v55 }
 0x28b   :  { %10619 = vmatmul.msk.f32.gmra.mxu2 %vm73_vm1, %v13723_v55  ;;  %v1128_v55 = vadd.f32 %v13565_v1, %v13224_v44 }
 0x28c   :  { %10636 = vmatmul.msk.f32.gmra.mxu3 %vm73_vm1, %v13936_v50  ;;  %10604 = vmatmul.msk.f32.gmra.mxu0 %vm73_vm1, %v13746_v26 }
 0x28d   :  { %v1406_v28 = vadd.f32 %v13762_v36, %v1128_v55  ;;  %v1133_v36 = vadd.f32 %v13585_v8, %v13245_v6 }
 0x28e   :  { %v1564_v63 = vpop.f32.mrf.mxu2 }
 0x28f   :  { %v13951_v17 = vadd.f32 %v1564_v63, %v1401_v25  ;;  %v1608_v53 = vpop.f32.mrf.mxu3  ;;  %v13953_v40 = vpop.f32.mrf.mxu1  ;;  %v1411_v25 = vadd.f32 %v13785_v33, %v1133_v36  ;;  %v1138_v33 = vadd.f32 %v13605_v14, %v13266_v10  ;;  %v1143_v36 = vadd.f32 %v13627_v0, %v13285_v16 }
 0x291   :  { %v13960_v38 = vpop.f32.mrf.mxu0  ;;  %v1416_v55 = vadd.f32 %v13811_v21, %v1138_v33 }
 0x292   :  { %10612 = vmatmul.msk.f32.gmra.mxu1 %vm73_vm1, %v13746_v26 }
 0x293   :  { %10620 = vmatmul.msk.f32.gmra.mxu2 %vm73_vm1, %v13746_v26  ;;  %v13980_v26 = vld [vmem:[%s17139_s1 + $0x1e0] sm:$0xff] }
 0x294   :  { %10637 = vmatmul.msk.f32.gmra.mxu3 %vm73_vm1, %v13958_v4  ;;  %10605 = vmatmul.msk.f32.gmra.mxu0 %vm73_vm1, %v13769_v47  ;;  %v11284_v57 = vpop.permute.xlu2 %11283 }
 0x295   :  { %v11286_v1 = vunpack.i.h.bf16 %v11284_v57  ;;  %v11285_v48 = vunpack.i.l.bf16 %v11284_v57 }
 0x296   :  { %v1567_v59 = vpop.f32.mrf.mxu2 }
 0x297   :  { %v13973_v2 = vadd.f32 %v1567_v59, %v1406_v28  ;;  %v1611_v11 = vpop.f32.mrf.mxu3  ;;  %v13975_v44 = vpop.f32.mrf.mxu1  ;;  %v2074_v61 = vsel %vm2070_vm7, %v13839_v58, %v11285_v48  ;;  %v2075_v56 = vsel %vm2070_vm7, %v11285_v48, %v11286_v1  ;;  %v14005_v58 = vld [vmem:[%s17139_s1 + $0x1e8] sm:$0xff] }
 0x298   :  { %2243 = vmatpush.msrb.mxu2 %v2074_v61  ;;  %2284 = vmatpush.msrb.mxu3 %v2075_v56  ;;  %v11289_v28 = vpop.permute.xlu0 %11288  ;;  %v14024_v48 = vpop.permute.xlu1 %2363 }
 0x299   :  { %v13982_v46 = vpop.f32.mrf.mxu0  ;;  %v11291_v10 = vunpack.i.h.bf16 %v11289_v28  ;;  %v11290_v14 = vunpack.i.l.bf16 %v11289_v28 }
 0x29a   :  { %17174 = vst [vmem:[#allocation30_spill] sm:$0xff] %v13982_v46  ;;  %10613 = vmatmul.msk.f32.gmra.mxu1 %vm73_vm1, %v13769_v47 }
 0x29b   :  { %10621 = vmatmul.msk.f32.gmra.mxu2 %vm73_vm1, %v13769_v47  ;;  %v2371_v61 = vsel %vm315_vm2, %v11290_v14, %v11291_v10  ;;  %v2372_v56 = vsel %vm315_vm2, %v11291_v10, %v14024_v48 }
 0x29c   :  { %10638 = vmatmul.msk.f32.gmra.mxu3 %vm73_vm1, %v13980_v26  ;;  %10606 = vmatmul.msk.f32.gmra.mxu0 %vm73_vm1, %v13792_v20 }
 0x29d   :  { %2420 = vmatpush.msra.mxu0 %v2371_v61  ;;  %2461 = vmatpush.msra.mxu1 %v2372_v56 }
 0x29e   :  { %v1570_v6 = vpop.f32.mrf.mxu2 }
 0x29f   :  { %v13998_v8 = vadd.f32 %v1570_v6, %v1411_v25  ;;  %v1614_v63 = vpop.f32.mrf.mxu3  ;;  %v14000_v47 = vpop.f32.mrf.mxu1  ;;  %v1421_v25 = vadd.f32 %v13835_v27, %v1143_v36  ;;  %v1148_v27 = vadd.f32 %v13650_v60, %v13304_v7  ;;  %v17178_v60 = vld [vmem:[#allocation7_spill] sm:$0xff] }
 0x2a0   :  { %v14054_v63 = vld [vmem:[%s17139_s1 + $0x1f8] sm:$0xff]  ;;  %v1153_v14 = vadd.f32 %v13672_v19, %v17178_v60 }
 0x2a1   :  { %v14007_v53 = vpop.f32.mrf.mxu0 }
 0x2a2   :  { %17175 = vst [vmem:[#allocation31_spill] sm:$0xff] %v14007_v53  ;;  %10614 = vmatmul.msk.f32.gmra.mxu1 %vm73_vm1, %v13792_v20 }
 0x2a3   :  { %10622 = vmatmul.msk.f32.gmra.mxu2 %vm73_vm1, %v13792_v20  ;;  %v14029_v20 = vld [vmem:[%s17139_s1 + $0x1f0] sm:$0xff] }
 0x2a4   :  { %10639 = vmatmul.msk.f32.gmra.mxu3 %vm73_vm1, %v14005_v58  ;;  %10607 = vmatmul.msk.f32.gmra.mxu0 %vm73_vm1, %v13818_v15 }
 0x2a6   :  { %v1573_v59 = vpop.f32.mrf.mxu2 }
 0x2a7   :  { %v14020_v11 = vadd.f32 %v1573_v59, %v1416_v55  ;;  %v1617_v57 = vpop.f32.mrf.mxu3  ;;  %v14022_v1 = vpop.f32.mrf.mxu1  ;;  %v1426_v55 = vadd.f32 %v13862_v35, %v1148_v27 }
 0x2a9   :  { %v14031_v21 = vpop.f32.mrf.mxu0 }
 0x2aa   :  { %17176 = vst [vmem:[#allocation32_spill] sm:$0xff] %v14031_v21  ;;  %10615 = vmatmul.msk.f32.gmra.mxu1 %vm73_vm1, %v13818_v15  ;;  %v10680_v21 = vld [vmem:[%s17139_s1 + $0x230] sm:$0xff] }
 0x2ab   :  { %10623 = vmatmul.msk.f32.gmra.mxu2 %vm73_vm1, %v13818_v15 }
 0x2ac   :  { %10640 = vmatmul.msk.f32.gmra.mxu3 %vm73_vm1, %v14029_v20  ;;  %10608 = vmatmul.msk.f32.gmra.mxu0 %vm73_vm1, %v13844_v43 }
 0x2ae   :  { %v1576_v16 = vpop.f32.mrf.mxu2 }
 0x2af   :  { %v14047_v0 = vadd.f32 %v1576_v16, %v1421_v25  ;;  %v1620_v6 = vpop.f32.mrf.mxu3  ;;  %v14049_v15 = vpop.f32.mrf.mxu1  ;;  %v17180_v16 = vld [vmem:[#allocation24_spill] sm:$0xff] }
 0x2b1   :  { %v14056_v33 = vpop.f32.mrf.mxu0 }
 0x2b2   :  { %17177 = vst [vmem:[#allocation33_spill] sm:$0xff] %v14056_v33  ;;  %10616 = vmatmul.msk.f32.gmra.mxu1 %vm73_vm1, %v13844_v43  ;;  %v10681_v33 = vld [vmem:[%s17139_s1 + $0x238] sm:$0xff] }
 0x2b3   :  { %10624 = vmatmul.msk.f32.gmra.mxu2 %vm73_vm1, %v13844_v43  ;;  %v1431_v43 = vadd.f32 %v13885_v3, %v1153_v14 }
 0x2b4   :  { %10641 = vmatmul.msk.f32.gmra.mxu3 %vm73_vm1, %v14054_v63  ;;  %10609 = vmatmul.msk.f32.gmra.mxu0 %vm73_vm1, %v13869_v29 }
 0x2b6   :  { %v1579_v28 = vpop.f32.mrf.mxu2 }
 0x2b7   :  { %v14069_v59 = vadd.f32 %v1579_v28, %v1426_v55  ;;  %v1623_v57 = vpop.f32.mrf.mxu3  ;;  %v14071_v10 = vpop.f32.mrf.mxu1 }
 0x2b9   :  { %v14073_v7 = vpop.f32.mrf.mxu0 }
 0x2ba   :  { %10617 = vmatmul.msk.f32.gmra.mxu1 %vm73_vm1, %v13869_v29 }
 0x2bb   :  { %10625 = vmatmul.msk.f32.gmra.mxu2 %vm73_vm1, %v13869_v29  ;;  %v17179_v29 = vld [vmem:[#allocation8_spill] sm:$0xff] }
 0x2bc   :  { %10666 = vmatmul.msk.f32.vlgmr.msrb.gmra.mxu3 %vm73_vm1, %v13892_v12  ;;  %10642 = vmatmul.msk.f32.vlgmr.msrb.gmra.mxu0 %vm73_vm1, %v13892_v12  ;;  %v1395_v6 = vadd.f32 %v17180_v16, %v17179_v29 }
 0x2be   :  { %v1582_v35 = vpop.f32.mrf.mxu2  ;;  %v1708_v3 = vadd.f32 %v13909_v37, %v1395_v6 }
 0x2bf   :  { %v14086_v36 = vadd.f32 %v1582_v35, %v1431_v43  ;;  %v1862_v61 = vpop.f32.mrf.mxu3  ;;  %v14088_v56 = vpop.f32.mrf.mxu1 }
 0x2c0   :  { %v14091_v19 = vadd.f32 %v1862_v61, %v13929_v62 }
 0x2c1   :  { %v14093_v25 = vpop.f32.mrf.mxu0 }
 0x2c2   :  { %10650 = vmatmul.msk.f32.vlgmr.msrb.gmra.mxu1 %vm73_vm1, %v13892_v12 }
 0x2c3   :  { %10658 = vmatmul.msk.f32.vlgmr.msrb.gmra.mxu2 %vm73_vm1, %v13892_v12  ;;  %v17181_v12 = vld [vmem:[#allocation9_spill] sm:$0xff] }
 0x2c4   :  { %10667 = vmatmul.msk.f32.gmra.mxu3 %vm73_vm1, %v13914_v18  ;;  %10643 = vmatmul.msk.f32.gmra.mxu0 %vm73_vm1, %v13914_v18  ;;  %v1400_v14 = vadd.f32 %v13727_v51, %v17181_v12 }
 0x2c6   :  { %v1821_v62 = vpop.f32.mrf.mxu2  ;;  %v1713_v37 = vadd.f32 %v13931_v39, %v1400_v14 }
 0x2c7   :  { %v14106_v27 = vadd.f32 %v1821_v62, %v1708_v3  ;;  %v1865_v55 = vpop.f32.mrf.mxu3  ;;  %v14108_v28 = vpop.f32.mrf.mxu1 }
 0x2c8   :  { %v14111_v57 = vadd.f32 %v1865_v55, %v13951_v17  ;;  %v11294_v62 = vpop.permute.xlu2 %11293 }
 0x2c9   :  { %v14113_v60 = vpop.f32.mrf.mxu0  ;;  %v11296_v12 = vunpack.i.h.bf16 %v11294_v62 }
 0x2ca   :  { %10651 = vmatmul.msk.f32.gmra.mxu1 %vm73_vm1, %v13914_v18 }
 0x2cb   :  { %10659 = vmatmul.msk.f32.gmra.mxu2 %vm73_vm1, %v13914_v18  ;;  %v17182_v18 = vld [vmem:[#allocation10_spill] sm:$0xff] }
 0x2cc   :  { %10668 = vmatmul.msk.f32.gmra.mxu3 %vm73_vm1, %v13936_v50  ;;  %10644 = vmatmul.msk.f32.gmra.mxu0 %vm73_vm1, %v13936_v50  ;;  %v1405_v16 = vadd.f32 %v13750_v54, %v17182_v18 }
 0x2ce   :  { %v1824_v17 = vpop.f32.mrf.mxu2  ;;  %v1718_v39 = vadd.f32 %v13953_v40, %v1405_v16 }
 0x2cf   :  { %v14126_v43 = vadd.f32 %v1824_v17, %v1713_v37  ;;  %v1868_v35 = vpop.f32.mrf.mxu3  ;;  %v14128_v61 = vpop.f32.mrf.mxu1  ;;  %v17184_v37 = vld [vmem:[#allocation11_spill] sm:$0xff] }
 0x2d0   :  { %v14131_v51 = vadd.f32 %v1868_v35, %v13973_v2  ;;  %v1410_v17 = vadd.f32 %v13773_v13, %v17184_v37 }
 0x2d1   :  { %v14133_v29 = vpop.f32.mrf.mxu0 }
 0x2d2   :  { %10652 = vmatmul.msk.f32.gmra.mxu1 %vm73_vm1, %v13936_v50 }
 0x2d3   :  { %10660 = vmatmul.msk.f32.gmra.mxu2 %vm73_vm1, %v13936_v50  ;;  %v11295_v50 = vunpack.i.l.bf16 %v11294_v62  ;;  %v17188_v62 = vld [vmem:[#allocation12_spill] sm:$0xff] }
 0x2d4   :  { %10669 = vmatmul.msk.f32.gmra.mxu3 %vm73_vm1, %v13958_v4  ;;  %10645 = vmatmul.msk.f32.gmra.mxu0 %vm73_vm1, %v13958_v4 }
 0x2d5   :  { %v2373_v40 = vsel %vm315_vm2, %v14024_v48, %v11295_v50  ;;  %v2374_v35 = vsel %vm315_vm2, %v11295_v50, %v11296_v12 }
 0x2d6   :  { %v1827_v2 = vpop.f32.mrf.mxu2  ;;  %2502 = vmatpush.msra.mxu2 %v2373_v40  ;;  %2543 = vmatpush.msra.mxu3 %v2374_v35 }
 0x2d7   :  { %v14146_v6 = vadd.f32 %v1827_v2, %v1718_v39  ;;  %v1871_v3 = vpop.f32.mrf.mxu3  ;;  %v14148_v54 = vpop.f32.mrf.mxu1 }
 0x2d8   :  { %v14151_v55 = vadd.f32 %v1871_v3, %v13998_v8  ;;  %v1723_v8 = vadd.f32 %v13975_v44, %v1410_v17  ;;  %v2370_v39 = vpop.permute.xlu0 %2369  ;;  %v1415_v44 = vadd.f32 %v13796_v49, %v17188_v62 }
 0x2d9   :  { %v14153_v14 = vpop.f32.mrf.mxu0  ;;  %v2375_v3 = vsel %vm315_vm2, %v11296_v12, %v2370_v39  ;;  %v12536_v39 = vmov 0  }
 0x2da   :  { %17183 = vst [vmem:[#allocation7_spill] sm:$0xff] %v14153_v14  ;;  %10653 = vmatmul.msk.f32.gmra.mxu1 %vm73_vm1, %v13958_v4  ;;  %2584 = vmatpush.msrb.mxu0 %v2375_v3  ;;  %v17198_v3 = vld [vmem:[#allocation14_spill] sm:$0xff] }
 0x2db   :  { %10661 = vmatmul.msk.f32.gmra.mxu2 %vm73_vm1, %v13958_v4  ;;  %11297 = vset.pattern.permute.xlu1 %v12536_v39  ;;  %v1425_v62 = vadd.f32 %v13848_v22, %v17198_v3 }
 0x2dc   :  { %10670 = vmatmul.msk.f32.gmra.mxu3 %vm73_vm1, %v13980_v26  ;;  %10646 = vmatmul.msk.f32.gmra.mxu0 %vm73_vm1, %v13980_v26 }
 0x2dd   :  { %11298 = vset.pattern.permute.xlu2 %v12536_v39  ;;  %11359 = vset.pattern.permute.xlu0 %v12536_v39  ;;  %v14265_v39 = vld [vmem:[%s17139_s1 + $0x208] sm:$0xff] }
 0x2de   :  { %v1830_v48 = vpop.f32.mrf.mxu2 }
 0x2df   :  { %v14169_v13 = vadd.f32 %v1830_v48, %v1723_v8  ;;  %v1874_v18 = vpop.f32.mrf.mxu3  ;;  %v14171_v16 = vpop.f32.mrf.mxu1 }
 0x2e0   :  { %17185 = vst [vmem:[#allocation8_spill] sm:$0xff] %v14171_v16  ;;  %v14174_v4 = vadd.f32 %v1874_v18, %v14020_v11  ;;  %v1728_v11 = vadd.f32 %v14000_v47, %v1415_v44 }
 0x2e1   :  { %v14176_v2 = vpop.f32.mrf.mxu0 }
 0x2e2   :  { %17186 = vst [vmem:[#allocation24_spill] sm:$0xff] %v14174_v4  ;;  %10654 = vmatmul.msk.f32.gmra.mxu1 %vm73_vm1, %v13980_v26 }
 0x2e3   :  { %17187 = vst [vmem:[#allocation9_spill] sm:$0xff] %v14176_v2  ;;  %10662 = vmatmul.msk.f32.gmra.mxu2 %vm73_vm1, %v13980_v26  ;;  %v17193_v26 = vld [vmem:[#allocation13_spill] sm:$0xff] }
 0x2e4   :  { %10671 = vmatmul.msk.f32.gmra.mxu3 %vm73_vm1, %v14005_v58  ;;  %10647 = vmatmul.msk.f32.gmra.mxu0 %vm73_vm1, %v14005_v58  ;;  %v1420_v35 = vadd.f32 %v13822_v24, %v17193_v26 }
 0x2e6   :  { %v1833_v50 = vpop.f32.mrf.mxu2  ;;  %v1733_v47 = vadd.f32 %v14022_v1, %v1420_v35  ;;  %v17202_v35 = vld [vmem:[#allocation15_spill] sm:$0xff] }
 0x2e7   :  { %v14190_v12 = vadd.f32 %v1833_v50, %v1728_v11  ;;  %v1877_v40 = vpop.f32.mrf.mxu3  ;;  %v14192_v49 = vpop.f32.mrf.mxu1 }
 0x2e8   :  { %17190 = vst [vmem:[#allocation11_spill] sm:$0xff] %v14192_v49  ;;  %v14195_v37 = vadd.f32 %v1877_v40, %v14047_v0 }
 0x2e9   :  { %17189 = vst [vmem:[#allocation10_spill] sm:$0xff] %v14190_v12  ;;  %v14197_v17 = vpop.f32.mrf.mxu0 }
 0x2ea   :  { %17191 = vst [vmem:[#allocation12_spill] sm:$0xff] %v14195_v37  ;;  %10655 = vmatmul.msk.f32.gmra.mxu1 %vm73_vm1, %v14005_v58 }
 0x2eb   :  { %17192 = vst [vmem:[#allocation34_spill] sm:$0xff] %v14197_v17  ;;  %10663 = vmatmul.msk.f32.gmra.mxu2 %vm73_vm1, %v14005_v58  ;;  %v2651_v58 = vld [vmem:[%s17140_s2 + $0x8] sm:$0xff] }
 0x2ec   :  { %10672 = vmatmul.msk.f32.gmra.mxu3 %vm73_vm1, %v14029_v20  ;;  %10648 = vmatmul.msk.f32.gmra.mxu0 %vm73_vm1, %v14029_v20 }
 0x2ed   :  { %2665 = vperm.xlu1 %11297, %v2651_v58  }
 0x2ee   :  { %v1836_v0 = vpop.f32.mrf.mxu2 }
 0x2ef   :  { %v14210_v8 = vadd.f32 %v1836_v0, %v1733_v47  ;;  %v1880_v48 = vpop.f32.mrf.mxu3  ;;  %v14212_v18 = vpop.f32.mrf.mxu1 }
 0x2f0   :  { %17195 = vst [vmem:[#allocation35_spill] sm:$0xff] %v14212_v18  ;;  %v14215_v24 = vadd.f32 %v1880_v48, %v14069_v59  ;;  %v1738_v59 = vadd.f32 %v14049_v15, %v1425_v62  ;;  %v1430_v15 = vadd.f32 %v13873_v31, %v17202_v35 }
 0x2f1   :  { %17194 = vst [vmem:[#allocation13_spill] sm:$0xff] %v14210_v8  ;;  %v14220_v1 = vpop.f32.mrf.mxu0 }
 0x2f2   :  { %17196 = vst [vmem:[#allocation36_spill] sm:$0xff] %v14215_v24  ;;  %10656 = vmatmul.msk.f32.gmra.mxu1 %vm73_vm1, %v14029_v20 }
 0x2f3   :  { %17197 = vst [vmem:[#allocation37_spill] sm:$0xff] %v14220_v1  ;;  %10664 = vmatmul.msk.f32.gmra.mxu2 %vm73_vm1, %v14029_v20  ;;  %v14243_v20 = vld [vmem:[%s17139_s1 + $0x200] sm:$0xff] }
 0x2f4   :  { %10673 = vmatmul.msk.f32.gmra.mxu3 %vm73_vm1, %v14054_v63  ;;  %10649 = vmatmul.msk.f32.gmra.mxu0 %vm73_vm1, %v14054_v63 }
 0x2f6   :  { %v1839_v44 = vpop.f32.mrf.mxu2 }
 0x2f7   :  { %v14233_v11 = vadd.f32 %v1839_v44, %v1738_v59  ;;  %v1883_v50 = vpop.f32.mrf.mxu3  ;;  %v14235_v40 = vpop.f32.mrf.mxu1  ;;  %v14287_v59 = vld [vmem:[%s17139_s1 + $0x210] sm:$0xff] }
 0x2f8   :  { %17200 = vst [vmem:[#allocation38_spill] sm:$0xff] %v14235_v40  ;;  %v14238_v22 = vadd.f32 %v1883_v50, %v14086_v36  ;;  %v1743_v36 = vadd.f32 %v14071_v10, %v1430_v15  ;;  %v14306_v15 = vld [vmem:[%s17139_s1 + $0x218] sm:$0xff] }
 0x2f9   :  { %17199 = vst [vmem:[#allocation14_spill] sm:$0xff] %v14233_v11  ;;  %v1903_v26 = vpop.f32.mrf.mxu0 }
 0x2fa   :  { %17201 = vst [vmem:[#allocation39_spill] sm:$0xff] %v14238_v22  ;;  %10657 = vmatmul.msk.f32.gmra.mxu1 %vm73_vm1, %v14054_v63 }
 0x2fb   :  { %10665 = vmatmul.msk.f32.gmra.mxu2 %vm73_vm1, %v14054_v63  ;;  %v2650_v63 = vld [vmem:[%s17140_s2] sm:$0xff] }
 0x2fc   :  { %10706 = vmatmul.msk.f32.vlgmr.msra.gmra.mxu3 %vm73_vm1, %v14243_v20  ;;  %10682 = vmatmul.msk.f32.vlgmr.msra.gmra.mxu0 %vm73_vm1, %v14243_v20 }
 0x2fd   :  { %2660 = vperm.xlu2 %11298, %v2650_v63  }
 0x2fe   :  { %v1842_v47 = vpop.f32.mrf.mxu2 }
 0x2ff   :  { %v14256_v0 = vadd.f32 %v1842_v47, %v1743_v36  ;;  %v14258_v48 = vpop.f32.mrf.mxu3  ;;  %v14260_v31 = vpop.f32.mrf.mxu1 }
 0x301   :  { %17203 = vst [vmem:[#allocation15_spill] sm:$0xff] %v14256_v0  ;;  %v1906_v10 = vpop.f32.mrf.mxu0 }
 0x302   :  { %10690 = vmatmul.msk.f32.vlgmr.msra.gmra.mxu1 %vm73_vm1, %v14243_v20 }
 0x303   :  { %10698 = vmatmul.msk.f32.vlgmr.msra.gmra.mxu2 %vm73_vm1, %v14243_v20 }
 0x304   :  { %10707 = vmatmul.msk.f32.gmra.mxu3 %vm73_vm1, %v14265_v39  ;;  %10683 = vmatmul.msk.f32.gmra.mxu0 %vm73_vm1, %v14265_v39 }
 0x306   :  { %v14278_v58 = vpop.f32.mrf.mxu2 }
 0x307   :  { %v14280_v3 = vpop.f32.mrf.mxu3  ;;  %v14282_v62 = vpop.f32.mrf.mxu1 }
 0x309   :  { %v1909_v44 = vpop.f32.mrf.mxu0 }
 0x30a   :  { %10691 = vmatmul.msk.f32.gmra.mxu1 %vm73_vm1, %v14265_v39  ;;  %v10678_v44 = vld [vmem:[%s17139_s1 + $0x220] sm:$0xff] }
 0x30b   :  { %10699 = vmatmul.msk.f32.gmra.mxu2 %vm73_vm1, %v14265_v39 }
 0x30c   :  { %10708 = vmatmul.msk.f32.gmra.mxu3 %vm73_vm1, %v14287_v59  ;;  %10684 = vmatmul.msk.f32.gmra.mxu0 %vm73_vm1, %v14287_v59 }
 0x30e   :  { %v14297_v50 = vpop.f32.mrf.mxu2 }
 0x30f   :  { %v14299_v26 = vpop.f32.mrf.mxu3  ;;  %v14301_v35 = vpop.f32.mrf.mxu1 }
 0x311   :  { %v1912_v36 = vpop.f32.mrf.mxu0 }
 0x312   :  { %10692 = vmatmul.msk.f32.gmra.mxu1 %vm73_vm1, %v14287_v59 }
 0x313   :  { %10700 = vmatmul.msk.f32.gmra.mxu2 %vm73_vm1, %v14287_v59 }
 0x314   :  { %10709 = vmatmul.msk.f32.gmra.mxu3 %vm73_vm1, %v14306_v15  ;;  %10685 = vmatmul.msk.f32.gmra.mxu0 %vm73_vm1, %v14306_v15 }
 0x316   :  { %v14316_v47 = vpop.f32.mrf.mxu2 }
 0x317   :  { %v14318_v63 = vpop.f32.mrf.mxu3  ;;  %v14320_v10 = vpop.f32.mrf.mxu1 }
 0x319   :  { %v1915_v36 = vpop.f32.mrf.mxu0 }
 0x31a   :  { %10693 = vmatmul.msk.f32.gmra.mxu1 %vm73_vm1, %v14306_v15  ;;  %v10679_v36 = vld [vmem:[%s17139_s1 + $0x228] sm:$0xff] }
 0x31b   :  { %10701 = vmatmul.msk.f32.gmra.mxu2 %vm73_vm1, %v14306_v15 }
 0x31c   :  { %10710 = vmatmul.msk.f32.gmra.mxu3 %vm73_vm1, %v10678_v44  ;;  %10686 = vmatmul.msk.f32.gmra.mxu0 %vm73_vm1, %v10678_v44 }
 0x31e   :  { %v14331_v24 = vpop.f32.mrf.mxu2 }
 0x31f   :  { %v14333_v11 = vpop.f32.mrf.mxu3  ;;  %v14335_v22 = vpop.f32.mrf.mxu1 }
 0x320   :  { %17204 = vst [vmem:[#allocation40_spill] sm:$0xff] %v14333_v11 }
 0x321   :  { %17205 = vst [vmem:[#allocation41_spill] sm:$0xff] %v14335_v22  ;;  %v1918_v0 = vpop.f32.mrf.mxu0 }
 0x322   :  { %10694 = vmatmul.msk.f32.gmra.mxu1 %vm73_vm1, %v10678_v44 }
 0x323   :  { %10702 = vmatmul.msk.f32.gmra.mxu2 %vm73_vm1, %v10678_v44 }
 0x324   :  { %10711 = vmatmul.msk.f32.gmra.mxu3 %vm73_vm1, %v10679_v36  ;;  %10687 = vmatmul.msk.f32.gmra.mxu0 %vm73_vm1, %v10679_v36 }
 0x326   :  { %v14344_v18 = vpop.f32.mrf.mxu2 }
 0x327   :  { %17206 = vst [vmem:[#allocation42_spill] sm:$0xff] %v14344_v18  ;;  %v14346_v17 = vpop.f32.mrf.mxu3  ;;  %v14348_v9 = vpop.f32.mrf.mxu1 }
 0x328   :  { %17207 = vst [vmem:[#allocation43_spill] sm:$0xff] %v14346_v17 }
 0x329   :  { %17208 = vst [vmem:[#allocation44_spill] sm:$0xff] %v14348_v9  ;;  %v1921_v40 = vpop.f32.mrf.mxu0 }
 0x32a   :  { %10695 = vmatmul.msk.f32.gmra.mxu1 %vm73_vm1, %v10679_v36 }
 0x32b   :  { %10703 = vmatmul.msk.f32.gmra.mxu2 %vm73_vm1, %v10679_v36 }
 0x32c   :  { %10712 = vmatmul.msk.f32.gmra.mxu3 %vm73_vm1, %v10680_v21  ;;  %10688 = vmatmul.msk.f32.gmra.mxu0 %vm73_vm1, %v10680_v21 }
 0x32e   :  { %v14357_v0 = vpop.f32.mrf.mxu2 }
 0x32f   :  { %17209 = vst [vmem:[#allocation45_spill] sm:$0xff] %v14357_v0  ;;  %v14359_v1 = vpop.f32.mrf.mxu3  ;;  %v14361_v41 = vpop.f32.mrf.mxu1 }
 0x330   :  { %17210 = vst [vmem:[#allocation46_spill] sm:$0xff] %v14359_v1 }
 0x331   :  { %17211 = vst [vmem:[#allocation47_spill] sm:$0xff] %v14361_v41  ;;  %v1924_v37 = vpop.f32.mrf.mxu0 }
 0x332   :  { %10696 = vmatmul.msk.f32.gmra.mxu1 %vm73_vm1, %v10680_v21 }
 0x333   :  { %10704 = vmatmul.msk.f32.gmra.mxu2 %vm73_vm1, %v10680_v21 }
 0x334   :  { %10713 = vmatmul.msk.f32.gmra.mxu3 %vm73_vm1, %v10681_v33  ;;  %10689 = vmatmul.msk.f32.gmra.mxu0 %vm73_vm1, %v10681_v33 }
 0x336   :  { %v14370_v40 = vpop.f32.mrf.mxu2 }
 0x337   :  { %17212 = vst [vmem:[#allocation48_spill] sm:$0xff] %v14370_v40  ;;  %v14372_v17 = vpop.f32.mrf.mxu3  ;;  %v14374_v1 = vpop.f32.mrf.mxu1 }
 0x338   :  { %17213 = vst [vmem:[#allocation49_spill] sm:$0xff] %v14372_v17 }
 0x339   :  { %17214 = vst [vmem:[#allocation50_spill] sm:$0xff] %v14374_v1  ;;  %v2163_v41 = vpop.f32.mrf.mxu0 }
 0x33a   :  { %10697 = vmatmul.msk.f32.gmra.mxu1 %vm73_vm1, %v10681_v33 }
 0x33b   :  { %10705 = vmatmul.msk.f32.gmra.mxu2 %vm73_vm1, %v10681_v33 }
 0x33c   :  { %10714 = vmatmul.msk.f32.vlgmr.msrb.gmra.mxu0 %vm73_vm1, %v14243_v20 }
 0x33e   :  { %v14380_v37 = vpop.f32.mrf.mxu2 }
 0x33f   :  { %17215 = vst [vmem:[#allocation51_spill] sm:$0xff] %v14380_v37  ;;  %v14382_v8 = vpop.f32.mrf.mxu3  ;;  %v2204_v0 = vpop.f32.mrf.mxu1 }
 0x341   :  { %v2166_v9 = vpop.f32.mrf.mxu0 }
 0x344   :  { %10715 = vmatmul.msk.f32.gmra.mxu0 %vm73_vm1, %v14265_v39 }
 0x346   :  { %v2245_v17 = vpop.f32.mrf.mxu2 }
 0x347   :  { %v14386_v40 = vpop.f32.mrf.mxu3  ;;  %v2207_v1 = vpop.f32.mrf.mxu1 }
 0x349   :  { %v14388_v49 = vpop.f32.mrf.mxu0 }
 0x34c   :  { %10716 = vmatmul.msk.f32.gmra.mxu0 %vm73_vm1, %v14287_v59 }
 0x34e   :  { %v2248_v2 = vpop.f32.mrf.mxu2 }
 0x34f   :  { %v14392_v20 = vpop.f32.mrf.mxu3  ;;  %v2210_v37 = vpop.f32.mrf.mxu1 }
 0x351   :  { %v14394_v30 = vpop.f32.mrf.mxu0 }
 0x354   :  { %10717 = vmatmul.msk.f32.gmra.mxu0 %vm73_vm1, %v14306_v15 }
 0x356   :  { %v14398_v0 = vpop.f32.mrf.mxu2 }
 0x357   :  { %v14400_v39 = vpop.f32.mrf.mxu3  ;;  %v2213_v53 = vpop.f32.mrf.mxu1 }
 0x359   :  { %v14402_v1 = vpop.f32.mrf.mxu0 }
 0x35a   :  { %17216 = vst [vmem:[#allocation52_spill] sm:$0xff] %v14402_v1 }
 0x35c   :  { %10718 = vmatmul.msk.f32.gmra.mxu0 %vm73_vm1, %v10678_v44 }
 0x35e   :  { %v14405_v11 = vpop.f32.mrf.mxu2 }
 0x35f   :  { %v14407_v59 = vpop.f32.mrf.mxu3  ;;  %v2216_v12 = vpop.f32.mrf.mxu1 }
 0x360   :  { %17217 = vst [vmem:[#allocation53_spill] sm:$0xff] %v14407_v59 }
 0x361   :  { %v14409_v37 = vpop.f32.mrf.mxu0 }
 0x362   :  { %17218 = vst [vmem:[#allocation54_spill] sm:$0xff] %v14409_v37 }
 0x364   :  { %10719 = vmatmul.msk.f32.gmra.mxu0 %vm73_vm1, %v10679_v36 }
 0x366   :  { %v14412_v4 = vpop.f32.mrf.mxu2 }
 0x367   :  { %17219 = vst [vmem:[#allocation55_spill] sm:$0xff] %v14412_v4  ;;  %v14414_v15 = vpop.f32.mrf.mxu3  ;;  %v2219_v18 = vpop.f32.mrf.mxu1 }
 0x368   :  { %17220 = vst [vmem:[#allocation56_spill] sm:$0xff] %v14414_v15  ;;  %v2310_v18 = vadd.f32 %v14258_v48, %v14106_v27  ;;  %v1716_v27 = vadd.f32 %v14093_v25, %v13741_v5  ;;  %v2316_v5 = vadd.f32 %v2166_v9, %v14111_v57 }
 0x369   :  { %v14416_v22 = vpop.f32.mrf.mxu0 }
 0x36a   :  { %17221 = vst [vmem:[#allocation57_spill] sm:$0xff] %v14416_v22 }
 0x36c   :  { %10720 = vmatmul.msk.f32.gmra.mxu0 %vm73_vm1, %v10680_v21  ;;  %v14432_v21 = vpop.permute.xlu2 %2660 }
 0x36e   :  { %v14419_v53 = vpop.f32.mrf.mxu2 }
 0x36f   :  { %17222 = vst [vmem:[#allocation58_spill] sm:$0xff] %v14419_v53  ;;  %v14421_v44 = vpop.f32.mrf.mxu3  ;;  %v2222_v1 = vpop.f32.mrf.mxu1 }
 0x370   :  { %17223 = vst [vmem:[#allocation59_spill] sm:$0xff] %v14421_v44  ;;  %v2311_v1 = vadd.f32 %v2163_v41, %v14091_v19 }
 0x371   :  { %v14423_v59 = vpop.f32.mrf.mxu0 }
 0x372   :  { %17224 = vst [vmem:[#allocation60_spill] sm:$0xff] %v14423_v59 }
 0x374   :  { %10721 = vmatmul.msk.f32.gmra.mxu0 %vm73_vm1, %v10681_v33  ;;  %v1711_v33 = vadd.f32 %v14073_v7, %v13718_v45  ;;  %v2017_v45 = vadd.f32 %v14282_v62, %v1716_v27 }
 0x376   :  { %v14426_v12 = vpop.f32.mrf.mxu2  ;;  %v2012_v48 = vadd.f32 %v14260_v31, %v1711_v33 }
 0x377   :  { %17225 = vst [vmem:[#allocation61_spill] sm:$0xff] %v14426_v12  ;;  %v14428_v36 = vpop.f32.mrf.mxu3  ;;  %v2225_v37 = vpop.f32.mrf.mxu1  ;;  %v2315_v12 = vadd.f32 %v14280_v3, %v14126_v43 }
 0x378   :  { %17226 = vst [vmem:[#allocation62_spill] sm:$0xff] %v14428_v36  ;;  %v2313_v7 = vadd.f32 %v2245_v17, %v2012_v48  ;;  %v17144_v17 = vmov 0.0  }
 0x379   :  { %v2422_v15 = vpop.f32.mrf.mxu0 }
 0x37a   :  { %v2610_v22 = vadd.f32 %v2422_v15, %v2310_v18  ;;  %v14445_v18 = vpop.permute.xlu1 %2665 }
 0x37c   :  { %v2698_v37 = vadd.f32 %v14432_v21, %v2610_v22  ;;  %v2318_v22 = vadd.f32 %v2248_v2, %v2017_v45 }
 0x37e   :  { %v14434_v53 = vpop.f32.mrf.mxu2  ;;  %v2738_v4 = vmax.f32 %v2698_v37, 0.0 }
 0x37f   :  { %17227 = vst [vmem:[#allocation63_spill] sm:$0xff] %v14434_v53  ;;  %v2545_v44 = vpop.f32.mrf.mxu3  ;;  %v2463_v59 = vpop.f32.mrf.mxu1 }
 0x380   :  { %v2611_v36 = vadd.f32 %v2463_v59, %v2311_v1  ;;  %v2613_v3 = vadd.f32 %v2545_v44, %v2313_v7 }
 0x381   :  { %v2425_v15 = vpop.f32.mrf.mxu0 }
 0x382   :  { %v2699_v41 = vadd.f32 %v14432_v21, %v2611_v36  ;;  %v2615_v19 = vadd.f32 %v2425_v15, %v2315_v12  ;;  %v2701_v2 = vadd.f32 %v14432_v21, %v2613_v3 }
 0x384   :  { %v2739_v53 = vmax.f32 %v2699_v41, 0.0  ;;  %v2703_v43 = vadd.f32 %v14445_v18, %v2615_v19  ;;  %v2741_v27 = vmax.f32 %v2701_v2, 0.0  ;;  %v17233_v2 = vld [vmem:[#allocation17_spill] sm:$0xff] }
 0x386   :  { %v2504_v59 = vpop.f32.mrf.mxu2  ;;  %v14451_v31 = vpack.i.bf16 %v2739_v53, %v2738_v4  ;;  %v2743_v1 = vmax.f32 %v2703_v43, 0.0 }
 0x387   :  { %v2548_v25 = vpop.f32.mrf.mxu3  ;;  %v2466_v33 = vpop.f32.mrf.mxu1 }
 0x388   :  { %v2618_v16 = vadd.f32 %v2548_v25, %v2318_v22  ;;  %v2616_v36 = vadd.f32 %v2466_v33, %v2316_v5  ;;  %11310 = vrot.lane.b32.xlu2 %v14451_v31, %s12532_s8  ;;  %2886 = vmatpush.msrb.mxu1 %v2743_v1  ;;  %v11299_v62 = vpack.i.bf16 %v2743_v1, %v17144_v17  ;;  %v17232_v5 = vld [vmem:[#allocation16_spill] sm:$0xff] }
 0x389   :  { %v14458_v12 = vpop.f32.mrf.mxu0  ;;  %v1399_v25 = vadd.f32 %v13894_v42, %v17232_v5  ;;  %v3288_v5 = vld [vmem:[%s17142_s4 + $0x8] sm:$0xff] }
 0x38a   :  { %v2706_v44 = vadd.f32 %v14445_v18, %v2618_v16  ;;  %v2704_v9 = vadd.f32 %v14445_v18, %v2616_v36  ;;  %11300 = vrot.lane.b32.xlu0 %v11299_v62, %s12532_s8  ;;  %2887 = vmatpush.msrb.mxu1 %v2738_v4 }
 0x38c   :  { %v2746_v57 = vmax.f32 %v2706_v44, 0.0  ;;  %v2744_v37 = vmax.f32 %v2704_v9, 0.0  ;;  %v1404_v44 = vadd.f32 %v13916_v34, %v17233_v2 }
 0x38e   :  { %2932 = vmatpush.msrb.mxu3 %v2746_v57  ;;  %v2507_v48 = vpop.f32.mrf.mxu2  ;;  %2909 = vmatpush.msrb.mxu2 %v2744_v37  ;;  %v11304_v15 = vpack.i.bf16 0.0, %v2744_v37  ;;  %v11314_v41 = vpack.i.bf16 %v2744_v37, %v2743_v1  ;;  %v1717_v37 = vadd.f32 %v14108_v28, %v1404_v44  ;;  %v11334_v28 = vpack.i.bf16 %v2741_v27, %v17144_v17 }
 0x390   :  { %2933 = vmatpush.msrb.mxu3 %v2741_v27  ;;  %11305 = vrot.lane.b32.xlu1 %v11304_v15, %s12532_s8 }
 0x391   :  { %2910 = vmatpush.msrb.mxu2 %v2739_v53  ;;  %v14463_v16 = vpop.f32.mrf.mxu0  ;;  %v1712_v53 = vadd.f32 %v14088_v56, %v1399_v25  ;;  %v10724_v25 = vld [vmem:[%s17141_s3 + $0x40] sm:$0xff] }
 0x392   :  { %10730 = vmatmul.msk.f32.vlgmr.msrb.gmra.mxu3 %vm877_vm4, %v10724_v25  ;;  %10728 = vmatmul.msk.f32.vlgmr.msrb.gmra.mxu2 %vm877_vm4, %v10724_v25 }
 0x393   :  { %v2013_v33 = vadd.f32 %v14278_v58, %v1712_v53  ;;  %10726 = vmatmul.msk.f32.vlgmr.msrb.gmra.mxu1 %vm877_vm4, %v10724_v25 }
 0x395   :  { %v2314_v36 = vadd.f32 %v14382_v8, %v2013_v33 }
 0x396   :  { %v2510_v19 = vpop.f32.mrf.mxu2 }
 0x398   :  { %11315 = vrot.lane.b32.xlu1 %v11314_v41, %s12533_s24  ;;  %v2018_v41 = vadd.f32 %v14297_v50, %v1717_v37  ;;  %v2653_v50 = vld [vmem:[%s17140_s2 + $0x18] sm:$0xff] }
 0x399   :  { %v14466_v45 = vpop.f32.mrf.mxu0 }
 0x39a   :  { %17228 = vst [vmem:[#allocation64_spill] sm:$0xff] %v14466_v45  ;;  %v2319_v56 = vadd.f32 %v14386_v40, %v2018_v41  ;;  %v2654_v40 = vld [vmem:[%s17140_s2 + $0x20] sm:$0xff] }
 0x39e   :  { %v2513_v4 = vpop.f32.mrf.mxu2 }
 0x3a1   :  { %v14468_v7 = vpop.f32.mrf.mxu0 }
 0x3a2   :  { %17229 = vst [vmem:[#allocation65_spill] sm:$0xff] %v14468_v7  ;;  %v17246_v7 = vmov 0.0  }
 0x3a6   :  { %v2516_v43 = vpop.f32.mrf.mxu2 }
 0x3a9   :  { %v14470_v22 = vpop.f32.mrf.mxu0 }
 0x3aa   :  { %17230 = vst [vmem:[#allocation66_spill] sm:$0xff] %v14470_v22 }
 0x3ae   :  { %v2519_v3 = vpop.f32.mrf.mxu2 }
 0x3af   :  { %v2657_v3 = vld [vmem:[%s17140_s2 + $0x38] sm:$0xff] }
 0x3b1   :  { %v14472_v59 = vpop.f32.mrf.mxu0 }
 0x3b2   :  { %17231 = vst [vmem:[#allocation67_spill] sm:$0xff] %v14472_v59 }
 0x3b6   :  { %v2522_v1 = vpop.f32.mrf.mxu2 }
 0x3b9   :  { %v2586_v62 = vpop.f32.mrf.mxu0 }
 0x3ba   :  { %v2614_v9 = vadd.f32 %v2586_v62, %v2314_v36  ;;  %v10725_v36 = vld [vmem:[%s17141_s3 + $0x48] sm:$0xff] }
 0x3bb   :  { %10729 = vmatmul.msk.f32.gmra.mxu2 %vm877_vm4, %v10725_v36  ;;  %10731 = vmatmul.msk.f32.gmra.mxu3 %vm877_vm4, %v10725_v36 }
 0x3bc   :  { %v2702_v48 = vadd.f32 %v14432_v21, %v2614_v9  ;;  %10727 = vmatmul.msk.f32.gmra.mxu1 %vm877_vm4, %v10725_v36 }
 0x3be   :  { %v2525_v15 = vpop.f32.mrf.mxu2  ;;  %v2742_v42 = vmax.f32 %v2702_v48, 0.0 }
 0x3c0   :  { %v11319_v19 = vpack.i.bf16 %v2742_v42, %v2741_v27  ;;  %v11339_v21 = vpack.i.bf16 0.0, %v2742_v42  ;;  %v3287_v27 = vld [vmem:[%s17142_s4] sm:$0xff] }
 0x3c1   :  { %v2589_v4 = vpop.f32.mrf.mxu0 }
 0x3c2   :  { %v2619_v58 = vadd.f32 %v2589_v4, %v2319_v56  ;;  %11320 = vrot.lane.b32.xlu2 %v11319_v19, %s12532_s8  ;;  %v10722_v56 = vld [vmem:[%s17141_s3 + $0x30] sm:$0xff] }
 0x3c4   :  { %v2707_v8 = vadd.f32 %v14445_v18, %v2619_v58  ;;  %v2655_v18 = vld [vmem:[%s17140_s2 + $0x28] sm:$0xff] }
 0x3c6   :  { %v2747_v43 = vmax.f32 %v2707_v8, 0.0 }
 0x3c8   :  { %2955 = vmatpush.msra.mxu1 %v2747_v43  ;;  %v11344_v34 = vpack.i.bf16 %v2747_v43, %v2746_v57  ;;  %v2656_v57 = vld [vmem:[%s17140_s2 + $0x30] sm:$0xff] }
 0x3ca   :  { %2956 = vmatpush.msra.mxu1 %v2742_v42  ;;  %11345 = vrot.lane.b32.xlu1 %v11344_v34, %s12533_s24 }
 0x3cb   :  { %11325 = vrot.lane.b32.xlu0 %v11344_v34, %s12532_s8  ;;  %11335 = vrot.lane.b32.xlu2 %v11334_v28, %s12533_s24  ;;  %v10723_v34 = vld [vmem:[%s17141_s3 + $0x38] sm:$0xff] }
 0x3cc   :  { %10732 = vmatmul.msk.f32.vlgmr.msra.gmra.mxu1 %vm877_vm4, %v10724_v25 }
 0x3d2   :  { %11350 = vrot.lane.b32.xlu1 %v17144_v17, %s12532_s8 }
 0x3d3   :  { %11330 = vrot.lane.b32.xlu0 %v14451_v31, %s12533_s24  ;;  %11355 = vrot.lane.b32.xlu2 %v17144_v17, %s12533_s24  ;;  %v2652_v31 = vld [vmem:[%s17140_s2 + $0x10] sm:$0xff] }
 0x3d4   :  { %10733 = vmatmul.msk.f32.gmra.mxu1 %vm877_vm4, %v10725_v36 }
 0x3da   :  { %2675 = vperm.xlu1 %11297, %v2653_v50  }
 0x3db   :  { %11340 = vrot.lane.b32.xlu0 %v11339_v21, %s12533_s24  ;;  %2680 = vperm.xlu2 %11298, %v2654_v40  }
 0x3e2   :  { %2685 = vperm.xlu1 %11297, %v2655_v18   ;;  %v11311_v2 = vpop.permute.xlu2 %11310 }
 0x3e3   :  { %2670 = vperm.xlu0 %11359, %v2652_v31   ;;  %2690 = vperm.xlu2 %11298, %v2656_v57   ;;  %v11313_v9 = vunpack.i.h.bf16 %v11311_v2  ;;  %v11312_v37 = vunpack.i.l.bf16 %v11311_v2 }
 0x3e5   :  { %v3001_v19 = vsel %vm877_vm4, %v11312_v37, %v11313_v9 }
 0x3ea   :  { %3291 = vperm.xlu1 %11297, %v3287_v27  }
 0x3eb   :  { %2695 = vperm.xlu0 %11359, %v2657_v3   ;;  %3296 = vperm.xlu2 %11298, %v3288_v5  }
 0x3fc   :  { %v11301_v53 = vpop.permute.xlu0 %11300 }
 0x3fd   :  { %v11303_v1 = vunpack.i.h.bf16 %v11301_v53  ;;  %v11302_v33 = vunpack.i.l.bf16 %v11301_v53 }
 0x3ff   :  { %v3004_v62 = vsel %vm877_vm4, %v11302_v33, %v11303_v1 }
 0x400   :  { %3036 = vmatpush.msra.mxu2 %v3004_v62 }
 0x402   :  { %v11306_v44 = vpop.permute.xlu1 %11305 }
 0x403   :  { %v11308_v48 = vunpack.i.h.bf16 %v11306_v44  ;;  %v11307_v15 = vunpack.i.l.bf16 %v11306_v44 }
 0x405   :  { %v3000_v41 = vsel %vm877_vm4, %v11308_v48, %v11312_v37  ;;  %v3005_v42 = vsel %vm877_vm4, %v11303_v1, %v11307_v15 }
 0x406   :  { %3037 = vmatpush.msra.mxu2 %v3000_v41  ;;  %3059 = vmatpush.msra.mxu3 %v3005_v42  ;;  %v10742_v41 = vld [vmem:[%s17141_s3 + $0x50] sm:$0xff] }
 0x407   :  { %10734 = vmatmul.msk.f32.vlgmr.msra.gmra.mxu2 %vm877_vm4, %v10722_v56 }
 0x408   :  { %3060 = vmatpush.msra.mxu3 %v3001_v19 }
 0x409   :  { %10736 = vmatmul.msk.f32.vlgmr.msra.gmra.mxu3 %vm877_vm4, %v10722_v56 }
 0x40a   :  { %v11316_v4 = vpop.permute.xlu1 %11315 }
 0x40b   :  { %v11318_v58 = vunpack.i.h.bf16 %v11316_v4  ;;  %v11317_v8 = vunpack.i.l.bf16 %v11316_v4 }
 0x40d   :  { %v3169_v43 = vsel %vm1468_vm5, %v11317_v8, %v11318_v58 }
 0x40e   :  { %3201 = vmatpush.msrb.mxu3 %v3169_v43 }
 0x40f   :  { %10735 = vmatmul.msk.f32.gmra.mxu2 %vm877_vm4, %v10723_v34 }
 0x411   :  { %10737 = vmatmul.msk.f32.gmra.mxu3 %vm877_vm4, %v10723_v34 }
 0x41c   :  { %v11321_v28 = vpop.permute.xlu2 %11320 }
 0x41d   :  { %v11323_v18 = vunpack.i.h.bf16 %v11321_v28  ;;  %v11322_v31 = vunpack.i.l.bf16 %v11321_v28 }
 0x41f   :  { %v3003_v53 = vsel %vm877_vm4, %v11322_v31, %v11323_v18 }
 0x425   :  { %v11336_v50 = vpop.permute.xlu2 %11335 }
 0x426   :  { %v11337_v42 = vunpack.i.l.bf16 %v11336_v50  ;;  %v11338_v18 = vunpack.i.h.bf16 %v11336_v50  ;;  %v14582_v50 = vpop.f32.mrf.mxu3 }
 0x42d   :  { %v11356_v1 = vpop.permute.xlu2 %11355 }
 0x42e   :  { %v11357_v48 = vunpack.i.l.bf16 %v11356_v1  ;;  %v11358_v4 = vunpack.i.h.bf16 %v11356_v1 }
 0x430   :  { %v3170_v28 = vsel %vm1468_vm5, %v11318_v58, %v11357_v48  ;;  %v14580_v58 = vpop.f32.mrf.mxu1 }
 0x431   :  { %17234 = vst [vmem:[#allocation16_spill] sm:$0xff] %v14580_v58 }
 0x43c   :  { %v11346_v40 = vpop.permute.xlu1 %11345 }
 0x43d   :  { %v11326_v21 = vpop.permute.xlu0 %11325  ;;  %v11348_v3 = vunpack.i.h.bf16 %v11346_v40  ;;  %v11347_v5 = vunpack.i.l.bf16 %v11346_v40 }
 0x43e   :  { %v11328_v57 = vunpack.i.h.bf16 %v11326_v21  ;;  %v11327_v27 = vunpack.i.l.bf16 %v11326_v21 }
 0x43f   :  { %v3171_v33 = vsel %vm1468_vm5, %v11347_v5, %v11348_v3  ;;  %v3172_v43 = vsel %vm1468_vm5, %v11348_v3, %v11337_v42  ;;  %v14584_v5 = vpop.f32.mrf.mxu1 }
 0x440   :  { %v3007_v25 = vsel %vm877_vm4, %v11327_v27, %v11328_v57 }
 0x441   :  { %3105 = vmatpush.msrb.mxu2 %v3007_v25  ;;  %v14586_v25 = vpop.f32.mrf.mxu3 }
 0x443   :  { %3106 = vmatpush.msrb.mxu2 %v3003_v53 }
 0x444   :  { %10740 = vmatmul.msk.f32.vlgmr.msrb.gmra.mxu2 %vm877_vm4, %v10722_v56  ;;  %v11351_v36 = vpop.permute.xlu1 %11350 }
 0x445   :  { %3247 = vmatpush.msra.mxu2 %v3171_v33  ;;  %v11353_v62 = vunpack.i.h.bf16 %v11351_v36  ;;  %v11352_v2 = vunpack.i.l.bf16 %v11351_v36  ;;  %v11331_v44 = vpop.permute.xlu0 %11330 }
 0x446   :  { %v11333_v9 = vunpack.i.h.bf16 %v11331_v44  ;;  %v11332_v37 = vunpack.i.l.bf16 %v11331_v44 }
 0x447   :  { %v3006_v15 = vsel %vm877_vm4, %v11352_v2, %v11327_v27  ;;  %v3002_v8 = vsel %vm877_vm4, %v11353_v62, %v11322_v31  ;;  %v10743_v31 = vld [vmem:[%s17141_s3 + $0x58] sm:$0xff] }
 0x448   :  { %3082 = vmatpush.msrb.mxu1 %v3006_v15  ;;  %v3165_v19 = vsel %vm1468_vm5, %v11332_v37, %v11333_v9  ;;  %v3166_v21 = vsel %vm1468_vm5, %v11333_v9, %v11358_v4  ;;  %v2912_v37 = vpop.f32.mrf.mxu2 }
 0x449   :  { %3202 = vmatpush.msrb.mxu3 %v3165_v19  ;;  %v14590_v53 = vpop.f32.mrf.mxu3 }
 0x44a   :  { %10744 = vmatmul.msk.f32.vlgmr.msrb.gmra.mxu3 %vm877_vm4, %v10742_v41  ;;  %3083 = vmatpush.msrb.mxu1 %v3002_v8  ;;  %17236 = vst [vmem:[#allocation68_spill] sm:$0xff] %v14590_v53 }
 0x44b   :  { %3270 = vmatpush.msra.mxu3 %v3172_v43  ;;  %10738 = vmatmul.msk.f32.vlgmr.msrb.gmra.mxu1 %vm877_vm4, %v10722_v56 }
 0x44c   :  { %10741 = vmatmul.msk.f32.gmra.mxu2 %vm877_vm4, %v10723_v34  ;;  %3224 = vmatpush.msra.mxu1 %v3170_v28  ;;  %v14604_v8 = vpop.permute.xlu1 %2675 }
 0x44d   :  { %v11341_v40 = vpop.permute.xlu0 %11340 }
 0x44e   :  { %v11343_v57 = vunpack.i.h.bf16 %v11341_v40  ;;  %v11342_v27 = vunpack.i.l.bf16 %v11341_v40  ;;  %3225 = vmatpush.msra.mxu1 %v3166_v21  ;;  %v14606_v21 = vpop.permute.xlu2 %2680 }
 0x44f   :  { %17243 = vst [vmem:[#allocation75_spill] sm:$0xff] %v14606_v21 }
 0x450   :  { %v3167_v3 = vsel %vm1468_vm5, %v11338_v18, %v11342_v27  ;;  %v3168_v56 = vsel %vm1468_vm5, %v11342_v27, %v11343_v57 }
 0x451   :  { %3248 = vmatpush.msra.mxu2 %v3167_v3  ;;  %3271 = vmatpush.msra.mxu3 %v3168_v56  ;;  %v14594_v33 = vpop.f32.mrf.mxu3 }
 0x452   :  { %10745 = vmatmul.msk.f32.gmra.mxu3 %vm877_vm4, %v10743_v31  ;;  %17238 = vst [vmem:[#allocation70_spill] sm:$0xff] %v14594_v33 }
 0x453   :  { %10739 = vmatmul.msk.f32.gmra.mxu1 %vm877_vm4, %v10723_v34  ;;  %v14588_v34 = vpop.f32.mrf.mxu1 }
 0x454   :  { %10748 = vmatmul.msk.f32.vlgmr.msra.gmra.mxu2 %vm877_vm4, %v10742_v41  ;;  %17235 = vst [vmem:[#allocation17_spill] sm:$0xff] %v14588_v34  ;;  %v14608_v18 = vpop.permute.xlu1 %2685 }
 0x455   :  { %17244 = vst [vmem:[#allocation76_spill] sm:$0xff] %v14608_v18 }
 0x456   :  { %v14610_v56 = vpop.permute.xlu2 %2690 }
 0x457   :  { %17245 = vst [vmem:[#allocation77_spill] sm:$0xff] %v14610_v56 }
 0x459   :  { %v14598_v62 = vpop.f32.mrf.mxu3 }
 0x45a   :  { %10750 = vmatmul.msk.f32.vlgmr.msra.gmra.mxu3 %vm877_vm4, %v10742_v41  ;;  %17240 = vst [vmem:[#allocation72_spill] sm:$0xff] %v14598_v62 }
 0x45b   :  { %10746 = vmatmul.msk.f32.vlgmr.msra.gmra.mxu1 %vm877_vm4, %v10742_v41  ;;  %v14592_v1 = vpop.f32.mrf.mxu1  ;;  %v2915_v41 = vpop.f32.mrf.mxu2 }
 0x45c   :  { %10749 = vmatmul.msk.f32.gmra.mxu2 %vm877_vm4, %v10743_v31  ;;  %17237 = vst [vmem:[#allocation69_spill] sm:$0xff] %v14592_v1  ;;  %v3292_v22 = vpop.permute.xlu1 %3291 }
 0x45e   :  { %v3297_v18 = vpop.permute.xlu2 %3296 }
 0x461   :  { %v14602_v44 = vpop.f32.mrf.mxu3 }
 0x462   :  { %10751 = vmatmul.msk.f32.gmra.mxu3 %vm877_vm4, %v10743_v31  ;;  %17242 = vst [vmem:[#allocation74_spill] sm:$0xff] %v14602_v44 }
 0x463   :  { %10747 = vmatmul.msk.f32.gmra.mxu1 %vm877_vm4, %v10743_v31  ;;  %v14596_v36 = vpop.f32.mrf.mxu1 }
 0x464   :  { %17239 = vst [vmem:[#allocation71_spill] sm:$0xff] %v14596_v36 }
 0x469   :  { %v2935_v48 = vpop.f32.mrf.mxu3 }
 0x46b   :  { %v14600_v2 = vpop.f32.mrf.mxu1 }
 0x46c   :  { %17241 = vst [vmem:[#allocation73_spill] sm:$0xff] %v14600_v2 }
 0x471   :  { %v2938_v42 = vpop.f32.mrf.mxu3 }
 0x473   :  { %v2889_v9 = vpop.f32.mrf.mxu1 }
 0x47b   :  { %v2892_v15 = vpop.f32.mrf.mxu1 }
 0x483   :  { %v2958_v19 = vpop.f32.mrf.mxu1 }
 0x48a   :  { %v3039_v4 = vpop.f32.mrf.mxu2 }
 0x48b   :  { %v2961_v28 = vpop.f32.mrf.mxu1  ;;  %v3040_v3 = vadd.f32 %v3039_v4, %v2889_v9 }
 0x48c   :  { %v3062_v43 = vpop.f32.mrf.mxu3 }
 0x48d   :  { %v3063_v45 = vadd.f32 %v3062_v43, %v2912_v37 }
 0x492   :  { %v3042_v40 = vpop.f32.mrf.mxu2 }
 0x493   :  { %v3043_v1 = vadd.f32 %v3042_v40, %v2892_v15 }
 0x494   :  { %v3065_v57 = vpop.f32.mrf.mxu3 }
 0x4c7   :  { %v3108_v27 = vpop.f32.mrf.mxu2 }
 0x4c8   :  { %v3085_v31 = vpop.f32.mrf.mxu1 }
 0x4c9   :  { %v3086_v9 = vadd.f32 %v3085_v31, %v2935_v48 }
 0x4cd   :  { %v3204_v17 = vpop.f32.mrf.mxu3 }
 0x4ce   :  { %v3279_v36 = vadd.f32 %v3204_v17, %v3040_v3 }
 0x4cf   :  { %v3111_v2 = vpop.f32.mrf.mxu2 }
 0x4d0   :  { %v3299_v59 = vadd.f32 %v3292_v22, %v3279_v36  ;;  %v3088_v62 = vpop.f32.mrf.mxu1  ;;  %v3109_v36 = vadd.f32 %v3108_v27, %v2958_v19  ;;  %v2592_v27 = vpop.f32.mrf.mxu0 }
 0x4d1   :  { %v3089_v40 = vadd.f32 %v3088_v62, %v2938_v42  ;;  %v3112_v62 = vadd.f32 %v3111_v2, %v2961_v28 }
 0x4d2   :  { %v3307_v44 = vmax.f32 %v3299_v59, 0.0 }
 0x4d4   :  { %v11360_v33 = vpack.i.bf16 %v3307_v44, %v17246_v7 }
 0x4d5   :  { %v3207_v53 = vpop.f32.mrf.mxu3 }
 0x4d6   :  { %v3283_v21 = vadd.f32 %v3207_v53, %v3043_v1  ;;  %11361 = vrot.lane.b32.xlu0 %v11360_v33, %s12532_s8  ;;  %v3066_v53 = vadd.f32 %v3065_v57, %v2915_v41 }
 0x4d7   :  { %v3250_v34 = vpop.f32.mrf.mxu2 }
 0x4d8   :  { %v3303_v4 = vadd.f32 %v3297_v18, %v3283_v21  ;;  %v3227_v56 = vpop.f32.mrf.mxu1  ;;  %v3281_v3 = vadd.f32 %v3250_v34, %v3086_v9 }
 0x4d9   :  { %v3280_v14 = vadd.f32 %v3227_v56, %v3063_v45  ;;  %v17247_v56 = vld [vmem:[#allocation19_spill] sm:$0xff] }
 0x4da   :  { %v3311_v17 = vmax.f32 %v3303_v4, 0.0  ;;  %v3301_v46 = vadd.f32 %v3292_v22, %v3281_v3  ;;  %v1414_v9 = vadd.f32 %v13960_v38, %v17247_v56  ;;  %v17248_v4 = vld [vmem:[#allocation25_spill] sm:$0xff] }
 0x4db   :  { %v3300_v52 = vadd.f32 %v3292_v22, %v3280_v14  ;;  %v1721_v3 = vadd.f32 %v14113_v60, %v17248_v4  ;;  %v2595_v60 = vpop.f32.mrf.mxu0  ;;  %v10754_v4 = vld [vmem:[%s17141_s3 + $0xd0] sm:$0xff] }
 0x4dc   :  { %3361 = vmatpush.msra.mxu0 %v3311_v17  ;;  %v3309_v14 = vmax.f32 %v3301_v46, 0.0 }
 0x4dd   :  { %v3308_v59 = vmax.f32 %v3300_v52, 0.0  ;;  %v3273_v15 = vpop.f32.mrf.mxu3 }
 0x4de   :  { %v3282_v58 = vadd.f32 %v3273_v15, %v3109_v36  ;;  %3362 = vmatpush.msra.mxu0 %v3307_v44  ;;  %v1727_v36 = vadd.f32 %v14148_v54, %v1414_v9  ;;  %v2671_v54 = vpop.permute.xlu0 %2670 }
 0x4df   :  { %v3253_v1 = vpop.f32.mrf.mxu2  ;;  %v11370_v33 = vpack.i.bf16 %v3308_v59, %v3307_v44  ;;  %v11365_v37 = vpack.i.bf16 0.0, %v3308_v59  ;;  %10756 = vmatmul.msk.f32.vlgmr.msra.gmra.mxu0 %vm877_vm4, %v10754_v4 }
 0x4e0   :  { %v3302_v43 = vadd.f32 %v3292_v22, %v3282_v58  ;;  %v3285_v48 = vadd.f32 %v3253_v1, %v3089_v40  ;;  %v3230_v21 = vpop.f32.mrf.mxu1  ;;  %v11375_v22 = vpack.i.bf16 %v3311_v17, %v17246_v7  ;;  %v2022_v40 = vadd.f32 %v14301_v35, %v1721_v3  ;;  %v10755_v3 = vld [vmem:[%s17141_s3 + $0xd8] sm:$0xff] }
 0x4e1   :  { %v3284_v31 = vadd.f32 %v3230_v21, %v3066_v53  ;;  %11371 = vrot.lane.b32.xlu0 %v11370_v33, %s12533_s24  ;;  %11366 = vrot.lane.b32.xlu1 %v11365_v37, %s12532_s8  ;;  %v2028_v38 = vadd.f32 %v14331_v24, %v1727_v36  ;;  %v10782_v24 = vld [vmem:[%s17142_s4 + $0x10] sm:$0xff] }
 0x4e2   :  { %v3310_v45 = vmax.f32 %v3302_v43, 0.0  ;;  %v3305_v52 = vadd.f32 %v3297_v18, %v3285_v48  ;;  %v2323_v1 = vadd.f32 %v14398_v0, %v2022_v40  ;;  %v10783_v0 = vld [vmem:[%s17142_s4 + $0x18] sm:$0xff] }
 0x4e3   :  { %v3304_v34 = vadd.f32 %v3297_v18, %v3284_v31 }
 0x4e4   :  { %v14616_v42 = vmax.f32 %v3305_v52, 0.0  ;;  %v11385_v19 = vpack.i.bf16 %v3310_v45, %v3309_v14  ;;  %v2623_v33 = vadd.f32 %v14582_v50, %v2323_v1  ;;  %v17249_v50 = vld [vmem:[#allocation18_spill] sm:$0xff] }
 0x4e5   :  { %v3312_v41 = vmax.f32 %v3304_v34, 0.0  ;;  %v3276_v57 = vpop.f32.mrf.mxu3 }
 0x4e6   :  { %v3286_v44 = vadd.f32 %v3276_v57, %v3112_v62  ;;  %3407 = vmatpush.msrb.mxu2 %v14616_v42  ;;  %11386 = vrot.lane.b32.xlu2 %v11385_v19, %s12532_s8  ;;  %v2711_v37 = vadd.f32 %v2671_v54, %v2623_v33  ;;  %v14753_v40 = vpop.permute.xlu0 %2695  ;;  %v10752_v33 = vld [vmem:[%s17141_s3 + $0xc0] sm:$0xff] }
 0x4e7   :  { %3384 = vmatpush.msrb.mxu1 %v3312_v41  ;;  %v11380_v58 = vpack.i.bf16 0.0, %v3312_v41  ;;  %v11405_v15 = vpack.i.bf16 %v3312_v41, %v3311_v17  ;;  %v11400_v17 = vpack.i.bf16 0.0, %v3310_v45  ;;  %10757 = vmatmul.msk.f32.gmra.mxu0 %vm877_vm4, %v10755_v3  ;;  %17251 = vst [vmem:[#allocation19_spill] sm:$0xff] %v14753_v40 }
 0x4e8   :  { %v3306_v46 = vadd.f32 %v3297_v18, %v3286_v44  ;;  %3408 = vmatpush.msrb.mxu2 %v3309_v14  ;;  %v1726_v18 = vadd.f32 %v14133_v29, %v13787_v23  ;;  %v2329_v23 = vadd.f32 %v14400_v39, %v2028_v38  ;;  %v14658_v21 = vmax.f32 %v2711_v37, 0.0 }
 0x4e9   :  { %11376 = vrot.lane.b32.xlu0 %v11375_v22, %s12532_s8  ;;  %11381 = vrot.lane.b32.xlu1 %v11380_v58, %s12532_s8  ;;  %v17250_v58 = vld [vmem:[#allocation16_spill] sm:$0xff] }
 0x4ea   :  { %v3314_v2 = vmax.f32 %v3306_v46, 0.0  ;;  %3385 = vmatpush.msrb.mxu1 %v3308_v59  ;;  %v11390_v59 = vpack.i.bf16 %v3309_v14, %v17246_v7  ;;  %v2027_v53 = vadd.f32 %v14320_v10, %v1726_v18  ;;  %v2629_v10 = vadd.f32 %v2595_v60, %v2329_v23  ;;  %10760 = vmatmul.msk.f32.vlgmr.msrb.gmra.mxu2 %vm877_vm4, %v10754_v4 }
 0x4eb   :  { %v11425_v34 = vpack.i.bf16 %v14658_v21, %v17246_v7  ;;  %10758 = vmatmul.msk.f32.vlgmr.msrb.gmra.mxu1 %vm877_vm4, %v10754_v4 }
 0x4ec   :  { %3430 = vmatpush.msrb.mxu3 %v3314_v2  ;;  %v11395_v28 = vpack.i.bf16 %v3314_v2, %v14616_v42  ;;  %v2328_v29 = vadd.f32 %v14405_v11, %v2027_v53  ;;  %v2717_v11 = vadd.f32 %v14604_v8, %v2629_v10  ;;  %v11410_v14 = vpack.i.bf16 0.0, %v3314_v2  ;;  %v10834_v53 = vld [vmem:[%s17142_s4 + $0x20] sm:$0xff] }
 0x4ee   :  { %11396 = vrot.lane.b32.xlu2 %v11395_v28, %s12532_s8  ;;  %3431 = vmatpush.msrb.mxu3 %v3310_v45  ;;  %v2628_v35 = vadd.f32 %v14586_v25, %v2328_v29  ;;  %v1409_v25 = vadd.f32 %v13938_v32, %v17249_v50  ;;  %v14656_v48 = vmax.f32 %v2717_v11, 0.0 }
 0x4ef   :  { %10762 = vmatmul.msk.f32.vlgmr.msrb.gmra.mxu3 %vm877_vm4, %v10754_v4 }
 0x4f0   :  { %v2716_v39 = vadd.f32 %v14604_v8, %v2628_v35  ;;  %v1722_v31 = vadd.f32 %v14128_v61, %v1409_v25  ;;  %v2325_v61 = vadd.f32 %v14318_v63, %v14169_v13  ;;  %v11440_v13 = vpack.i.bf16 %v14616_v42, %v17246_v7 }
 0x4f1   :  { %11406 = vrot.lane.b32.xlu0 %v11405_v15, %s12533_s24  ;;  %11391 = vrot.lane.b32.xlu1 %v11390_v59, %s12533_s24  ;;  %v10835_v15 = vld [vmem:[%s17142_s4 + $0x28] sm:$0xff] }
 0x4f2   :  { %v14654_v43 = vmax.f32 %v2716_v39, 0.0  ;;  %v2023_v45 = vadd.f32 %v14316_v47, %v1722_v31  ;;  %v2326_v47 = vadd.f32 %v14394_v30, %v14151_v55  ;;  %v2625_v41 = vadd.f32 %v14463_v16, %v2325_v61  ;;  %10761 = vmatmul.msk.f32.gmra.mxu2 %vm877_vm4, %v10755_v3  ;;  %v10753_v39 = vld [vmem:[%s17141_s3 + $0xc8] sm:$0xff] }
 0x4f3   :  { %v2320_v30 = vadd.f32 %v14299_v26, %v14146_v6  ;;  %v2321_v55 = vadd.f32 %v14388_v49, %v14131_v51  ;;  %v11445_v26 = vpack.i.bf16 0.0, %v14656_v48  ;;  %10759 = vmatmul.msk.f32.gmra.mxu1 %vm877_vm4, %v10755_v3 }
 0x4f4   :  { %v11420_v52 = vpack.i.bf16 %v14656_v48, %v14654_v43  ;;  %v2324_v32 = vadd.f32 %v14392_v20, %v2023_v45  ;;  %v2626_v57 = vadd.f32 %v14584_v5, %v2326_v47  ;;  %v2713_v20 = vadd.f32 %v14604_v8, %v2625_v41  ;;  %v14784_v41 = vld [vmem:[%s17141_s3 + $0xe0] sm:$0xff] }
 0x4f5   :  { %v11435_v22 = vpack.i.bf16 %v14654_v43, %v17246_v7  ;;  %v2620_v42 = vadd.f32 %v14458_v12, %v2320_v30 }
 0x4f6   :  { %11401 = vrot.lane.b32.xlu2 %v11400_v17, %s12533_s24  ;;  %v2624_v62 = vadd.f32 %v2592_v27, %v2324_v32  ;;  %v2714_v44 = vadd.f32 %v14604_v8, %v2626_v57  ;;  %v14692_v16 = vmax.f32 %v2713_v20, 0.0  ;;  %v2621_v27 = vadd.f32 %v17250_v58, %v2321_v55 }
 0x4f7   :  { %v2708_v46 = vadd.f32 %v2671_v54, %v2620_v42  ;;  %10763 = vmatmul.msk.f32.gmra.mxu3 %vm877_vm4, %v10755_v3 }
 0x4f8   :  { %v2712_v19 = vadd.f32 %v2671_v54, %v2624_v62  ;;  %v14694_v5 = vmax.f32 %v2714_v44, 0.0  ;;  %v2709_v2 = vadd.f32 %v2671_v54, %v2621_v27  ;;  %v11465_v9 = vpack.i.bf16 %v14692_v16, %v17246_v7 }
 0x4f9   :  { %3767 = vperm.xlu0 %11359, %v10782_v24   ;;  %3772 = vperm.xlu1 %11297, %v10783_v0   ;;  %v14705_v51 = vmax.f32 %v2708_v46, 0.0 }
 0x4fa   :  { %v14684_v63 = vmax.f32 %v2712_v19, 0.0  ;;  %v11455_v6 = vpack.i.bf16 %v14694_v5, %v14692_v16  ;;  %v14707_v49 = vmax.f32 %v2709_v2, 0.0  ;;  %v11470_v28 = vpack.i.bf16 0.0, %v14694_v5 }
 0x4fb   :  { %v11515_v18 = vpack.i.bf16 %v14705_v51, %v17246_v7 }
 0x4fc   :  { %v11430_v8 = vpack.i.bf16 0.0, %v14684_v63  ;;  %v11450_v12 = vpack.i.bf16 %v14684_v63, %v14658_v21  ;;  %v11460_v56 = vpack.i.bf16 %v14707_v49, %v14705_v51  ;;  %v11520_v36 = vpack.i.bf16 0.0, %v14707_v49 }
 0x4fe   :  { %11411 = vrot.lane.b32.xlu2 %v11410_v14, %s12533_s24 }
 0x501   :  { %11421 = vrot.lane.b32.xlu0 %v11420_v52, %s12532_s8  ;;  %11426 = vrot.lane.b32.xlu1 %v11425_v34, %s12532_s8 }
 0x506   :  { %11416 = vrot.lane.b32.xlu2 %v17246_v7, %s12532_s8 }
 0x509   :  { %11436 = vrot.lane.b32.xlu0 %v11435_v22, %s12531_s7  ;;  %11441 = vrot.lane.b32.xlu1 %v11440_v13, %s12533_s24 }
 0x50e   :  { %11431 = vrot.lane.b32.xlu2 %v11430_v8, %s12532_s8 }
 0x511   :  { %11456 = vrot.lane.b32.xlu0 %v11455_v6, %s12532_s8  ;;  %11446 = vrot.lane.b32.xlu1 %v11445_v26, %s12531_s7 }
 0x516   :  { %11451 = vrot.lane.b32.xlu2 %v11450_v12, %s12531_s7 }
 0x519   :  { %11471 = vrot.lane.b32.xlu0 %v11470_v28, %s12531_s7  ;;  %11461 = vrot.lane.b32.xlu1 %v11460_v56, %s12532_s8  ;;  %v14806_v28 = vld [vmem:[%s17141_s3 + $0xe8] sm:$0xff] }
 0x51e   :  { %11466 = vrot.lane.b32.xlu2 %v11465_v9, %s12531_s7 }
 0x521   :  { %11486 = vrot.lane.b32.xlu0 %v11425_v34, %s12533_s24  ;;  %11476 = vrot.lane.b32.xlu1 %v11460_v56, %s12531_s7 }
 0x526   :  { %11481 = vrot.lane.b32.xlu2 %v11420_v52, %s12533_s24 }
 0x529   :  { %11501 = vrot.lane.b32.xlu0 %v11425_v34, %s12534_s20  ;;  %11491 = vrot.lane.b32.xlu1 %v11430_v8, %s12533_s24 }
 0x52e   :  { %11496 = vrot.lane.b32.xlu2 %v11420_v52, %s12534_s20 }
 0x531   :  { %11516 = vrot.lane.b32.xlu0 %v11515_v18, %s12533_s24  ;;  %11506 = vrot.lane.b32.xlu1 %v11430_v8, %s12534_s20 }
 0x536   :  { %11511 = vrot.lane.b32.xlu2 %v11455_v6, %s12533_s24 }
 0x539   :  { %11531 = vrot.lane.b32.xlu0 %v11515_v18, %s12534_s20  ;;  %11521 = vrot.lane.b32.xlu1 %v11520_v36, %s12533_s24 }
 0x53e   :  { %11526 = vrot.lane.b32.xlu2 %v11455_v6, %s12534_s20 }
 0x540   :  { %v11387_v59 = vpop.permute.xlu2 %11386 }
 0x541   :  { %4563 = vperm.xlu0 %11359, %v10835_v15   ;;  %11536 = vrot.lane.b32.xlu1 %v11520_v36, %s12534_s20  ;;  %v11389_v60 = vunpack.i.h.bf16 %v11387_v59  ;;  %v11388_v1 = vunpack.i.l.bf16 %v11387_v59 }
 0x543   :  { %v3478_v35 = vsel %vm877_vm4, %v11388_v1, %v11389_v60 }
 0x546   :  { %4558 = vperm.xlu2 %11298, %v10834_v53  }
 0x548   :  { %v11397_v38 = vpop.permute.xlu2 %11396  ;;  %v11362_v54 = vpop.permute.xlu0 %11361 }
 0x549   :  { %v11399_v23 = vunpack.i.h.bf16 %v11397_v38  ;;  %v11398_v29 = vunpack.i.l.bf16 %v11397_v38  ;;  %v11364_v14 = vunpack.i.h.bf16 %v11362_v54  ;;  %v11363_v45 = vunpack.i.l.bf16 %v11362_v54 }
 0x54b   :  { %v3482_v17 = vsel %vm877_vm4, %v11398_v29, %v11399_v23  ;;  %v3475_v8 = vsel %vm877_vm4, %v11363_v45, %v11364_v14 }
 0x54c   :  { %3580 = vmatpush.msra.mxu3 %v3482_v17 }
 0x54e   :  { %3581 = vmatpush.msra.mxu3 %v3478_v35 }
 0x54f   :  { %10770 = vmatmul.msk.f32.vlgmr.msra.gmra.mxu3 %vm877_vm4, %v10752_v33 }
 0x550   :  { %v14764_v10 = vpop.permute.xlu2 %11401 }
 0x551   :  { %v11404_v37 = vunpack.i.h.bf16 %v14764_v10  ;;  %v11403_v50 = vunpack.i.l.bf16 %v14764_v10 }
 0x553   :  { %v14766_v24 = vpop.permute.xlu0 %11371  ;;  %v11367_v0 = vpop.permute.xlu1 %11366  ;;  %v3643_v44 = vsel %vm1468_vm5, %v11403_v50, %v11404_v37 }
 0x554   :  { %v11369_v57 = vunpack.i.h.bf16 %v11367_v0  ;;  %v11368_v20 = vunpack.i.l.bf16 %v11367_v0  ;;  %v11374_v2 = vunpack.i.h.bf16 %v14766_v24  ;;  %v11373_v6 = vunpack.i.l.bf16 %v14766_v24 }
 0x556   :  { %v3476_v42 = vsel %vm877_vm4, %v11364_v14, %v11368_v20  ;;  %v3477_v58 = vsel %vm877_vm4, %v11369_v57, %v11388_v1  ;;  %v3640_v4 = vsel %vm1468_vm5, %v11373_v6, %v11374_v2 }
 0x557   :  { %10771 = vmatmul.msk.f32.gmra.mxu3 %vm877_vm4, %v10753_v39 }
 0x558   :  { %v14772_v11 = vpop.permute.xlu2 %11411 }
 0x559   :  { %v11414_v25 = vunpack.i.h.bf16 %v14772_v11  ;;  %v11413_v31 = vunpack.i.l.bf16 %v14772_v11 }
 0x55b   :  { %v3647_v52 = vsel %vm1468_vm5, %v11413_v31, %v11414_v25  ;;  %v11377_v34 = vpop.permute.xlu0 %11376  ;;  %v11382_v32 = vpop.permute.xlu1 %11381 }
 0x55c   :  { %3745 = vmatpush.msrb.mxu3 %v3647_v52  ;;  %v11379_v62 = vunpack.i.h.bf16 %v11377_v34  ;;  %v11378_v61 = vunpack.i.l.bf16 %v11377_v34  ;;  %v11384_v47 = vunpack.i.h.bf16 %v11382_v32  ;;  %v11383_v19 = vunpack.i.l.bf16 %v11382_v32 }
 0x55e   :  { %3746 = vmatpush.msrb.mxu3 %v3643_v44  ;;  %v3479_v22 = vsel %vm877_vm4, %v11378_v61, %v11379_v62  ;;  %v3480_v13 = vsel %vm877_vm4, %v11379_v62, %v11383_v19  ;;  %v3481_v30 = vsel %vm877_vm4, %v11384_v47, %v11398_v29  ;;  %v14831_v29 = vld [vmem:[%s17141_s3 + $0x150] sm:$0xff]  ;;  %v14852_v62 = vld [vmem:[%s17141_s3 + $0x158] sm:$0xff] }
 0x55f   :  { %10780 = vmatmul.msk.f32.vlgmr.msrb.gmra.mxu3 %vm877_vm4, %v14784_v41  ;;  %3511 = vmatpush.msrb.mxu0 %v3479_v22 }
 0x560   :  { %v14794_v55 = vpop.permute.xlu2 %11416  ;;  %3534 = vmatpush.msra.mxu1 %v3480_v13  ;;  %3557 = vmatpush.msra.mxu2 %v3481_v30 }
 0x561   :  { %3512 = vmatpush.msrb.mxu0 %v3475_v8  ;;  %v11419_v25 = vunpack.i.h.bf16 %v14794_v55 }
 0x562   :  { %3535 = vmatpush.msra.mxu1 %v3476_v42  ;;  %3558 = vmatpush.msra.mxu2 %v3477_v58 }
 0x563   :  { %10764 = vmatmul.msk.f32.vlgmr.msrb.gmra.mxu0 %vm877_vm4, %v10752_v33  ;;  %10768 = vmatmul.msk.f32.vlgmr.msra.gmra.mxu2 %vm877_vm4, %v10752_v33  ;;  %v11407_v27 = vpop.permute.xlu0 %11406  ;;  %v11392_v46 = vpop.permute.xlu1 %11391 }
 0x564   :  { %v11409_v26 = vunpack.i.h.bf16 %v11407_v27  ;;  %v11408_v12 = vunpack.i.l.bf16 %v11407_v27  ;;  %10766 = vmatmul.msk.f32.vlgmr.msra.gmra.mxu1 %vm877_vm4, %v10752_v33  ;;  %v11394_v24 = vunpack.i.h.bf16 %v11392_v46  ;;  %v11393_v0 = vunpack.i.l.bf16 %v11392_v46 }
 0x566   :  { %v3644_v56 = vsel %vm1468_vm5, %v11408_v12, %v11409_v26  ;;  %v3641_v34 = vsel %vm1468_vm5, %v11374_v2, %v11393_v0  ;;  %v3642_v32 = vsel %vm1468_vm5, %v11394_v24, %v11403_v50  ;;  %v14875_v2 = vld [vmem:[%s17141_s3 + $0x140] sm:$0xff] }
 0x567   :  { %10781 = vmatmul.msk.f32.gmra.mxu3 %vm877_vm4, %v14806_v28  ;;  %3676 = vmatpush.msra.mxu0 %v3644_v56 }
 0x568   :  { %v14812_v9 = vpop.permute.xlu2 %11431 }
 0x569   :  { %3677 = vmatpush.msra.mxu0 %v3640_v4  ;;  %v11433_v1 = vunpack.i.l.bf16 %v14812_v9  ;;  %v11434_v10 = vunpack.i.h.bf16 %v14812_v9 }
 0x56b   :  { %10765 = vmatmul.msk.f32.gmra.mxu0 %vm877_vm4, %v10753_v39  ;;  %10769 = vmatmul.msk.f32.gmra.mxu2 %vm877_vm4, %v10753_v39  ;;  %v14817_v3 = vpop.permute.xlu0 %3767  ;;  %v14819_v18 = vpop.permute.xlu1 %3772 }
 0x56c   :  { %10767 = vmatmul.msk.f32.gmra.mxu1 %vm877_vm4, %v10753_v39 }
 0x570   :  { %v14822_v36 = vpop.permute.xlu2 %11451 }
 0x571   :  { %v11453_v50 = vunpack.i.l.bf16 %v14822_v36  ;;  %v11454_v30 = vunpack.i.h.bf16 %v14822_v36 }
 0x573   :  { %10774 = vmatmul.msk.f32.vlgmr.msra.gmra.mxu0 %vm877_vm4, %v14784_v41  ;;  %v11422_v15 = vpop.permute.xlu0 %11421  ;;  %v11427_v59 = vpop.permute.xlu1 %11426  ;;  %v4011_v6 = vsel %vm576_vm3, %v11453_v50, %v11454_v30 }
 0x574   :  { %v11424_v53 = vunpack.i.h.bf16 %v11422_v15  ;;  %v11423_v38 = vunpack.i.l.bf16 %v11422_v15  ;;  %v11429_v60 = vunpack.i.h.bf16 %v11427_v59  ;;  %v11428_v52 = vunpack.i.l.bf16 %v11427_v59 }
 0x576   :  { %v3877_v23 = vsel %vm877_vm4, %v11423_v38, %v11424_v53  ;;  %v3873_v54 = vsel %vm877_vm4, %v11429_v60, %v11433_v1  ;;  %v3876_v11 = vsel %vm877_vm4, %v11419_v25, %v11423_v38  ;;  %v3872_v57 = vsel %vm877_vm4, %v11428_v52, %v11429_v60  ;;  %v14900_v60 = vld [vmem:[%s17141_s3 + $0x148] sm:$0xff] }
 0x577   :  { %3975 = vmatpush.msra.mxu3 %v3877_v23 }
 0x578   :  { %v14834_v17 = vpop.permute.xlu2 %11466 }
 0x579   :  { %3976 = vmatpush.msra.mxu3 %v3873_v54  ;;  %v11469_v12 = vunpack.i.h.bf16 %v14834_v17  ;;  %v11468_v4 = vunpack.i.l.bf16 %v14834_v17 }
 0x57a   :  { %10794 = vmatmul.msk.f32.vlgmr.msra.gmra.mxu3 %vm877_vm4, %v14831_v29 }
 0x57b   :  { %10775 = vmatmul.msk.f32.gmra.mxu0 %vm877_vm4, %v14806_v28  ;;  %v11437_v33 = vpop.permute.xlu0 %11436  ;;  %v11442_v35 = vpop.permute.xlu1 %11441 }
 0x57c   :  { %v11444_v39 = vunpack.i.h.bf16 %v11442_v35  ;;  %v11443_v37 = vunpack.i.l.bf16 %v11442_v35  ;;  %v11439_v61 = vunpack.i.h.bf16 %v11437_v33  ;;  %v11438_v47 = vunpack.i.l.bf16 %v11437_v33 }
 0x57e   :  { %v3645_v14 = vsel %vm1468_vm5, %v11409_v26, %v11443_v37  ;;  %v3646_v45 = vsel %vm1468_vm5, %v11444_v39, %v11413_v31  ;;  %v4014_v8 = vsel %vm576_vm3, %v11438_v47, %v11439_v61  ;;  %v11418_v26 = vunpack.i.l.bf16 %v14794_v55 }
 0x57f   :  { %3699 = vmatpush.msrb.mxu1 %v3645_v14  ;;  %3722 = vmatpush.msrb.mxu2 %v3646_v45 }
 0x580   :  { %v14864_v20 = vpop.permute.xlu2 %11481 }
 0x581   :  { %3700 = vmatpush.msrb.mxu1 %v3641_v34  ;;  %3723 = vmatpush.msrb.mxu2 %v3642_v32 }
 0x582   :  { %10776 = vmatmul.msk.f32.vlgmr.msrb.gmra.mxu1 %vm877_vm4, %v14784_v41  ;;  %10778 = vmatmul.msk.f32.vlgmr.msrb.gmra.mxu2 %vm877_vm4, %v14784_v41 }
 0x583   :  { %3952 = vmatpush.msra.mxu2 %v3876_v11  ;;  %10795 = vmatmul.msk.f32.gmra.mxu3 %vm877_vm4, %v14852_v62  ;;  %v11457_v31 = vpop.permute.xlu0 %11456  ;;  %v11447_v19 = vpop.permute.xlu1 %11446 }
 0x584   :  { %v11459_v44 = vunpack.i.h.bf16 %v11457_v31  ;;  %v11458_v22 = vunpack.i.l.bf16 %v11457_v31  ;;  %v11449_v13 = vunpack.i.h.bf16 %v11447_v19  ;;  %v11448_v41 = vunpack.i.l.bf16 %v11447_v19 }
 0x585   :  { %3953 = vmatpush.msra.mxu2 %v3872_v57 }
 0x586   :  { %v3874_v42 = vsel %vm877_vm4, %v11434_v10, %v11458_v22  ;;  %v3875_v58 = vsel %vm877_vm4, %v11458_v22, %v11459_v44  ;;  %v4010_v27 = vsel %vm576_vm3, %v11449_v13, %v11453_v50  ;;  %v4015_v46 = vsel %vm576_vm3, %v11439_v61, %v11448_v41  ;;  %v10814_v41 = vld [vmem:[%s17141_s3 + $0x170] sm:$0xff] }
 0x587   :  { %4090 = vmatpush.msrb.mxu2 %v4014_v8  ;;  %3906 = vmatpush.msrb.mxu0 %v3874_v42 }
 0x588   :  { %3929 = vmatpush.msra.mxu1 %v3875_v58  ;;  %4113 = vmatpush.msrb.mxu3 %v4015_v46  ;;  %v14888_v53 = vpop.permute.xlu2 %11496 }
 0x589   :  { %4091 = vmatpush.msrb.mxu2 %v4010_v27 }
 0x58a   :  { %4114 = vmatpush.msrb.mxu3 %v4011_v6  ;;  %10777 = vmatmul.msk.f32.gmra.mxu1 %vm877_vm4, %v14806_v28 }
 0x58b   :  { %10779 = vmatmul.msk.f32.gmra.mxu2 %vm877_vm4, %v14806_v28  ;;  %10802 = vmatmul.msk.f32.vlgmr.msrb.gmra.mxu3 %vm877_vm4, %v14875_v2  ;;  %v11472_v56 = vpop.permute.xlu0 %11471  ;;  %v11462_v9 = vpop.permute.xlu1 %11461 }
 0x58c   :  { %4214 = vmatpush.msra.mxu3 %v14656_v48  ;;  %v11473_v36 = vunpack.i.l.bf16 %v11472_v56  ;;  %v11464_v15 = vunpack.i.h.bf16 %v11462_v9  ;;  %v11463_v59 = vunpack.i.l.bf16 %v11462_v9  ;;  %v4012_v48 = vsel %vm576_vm3, %v11468_v4, %v11469_v12 }
 0x58d   :  { %v11474_v54 = vunpack.i.h.bf16 %v11472_v56  ;;  %v11498_v56 = vunpack.i.l.bf16 %v14888_v53 }
 0x58e   :  { %4215 = vmatpush.msra.mxu3 %v14684_v63  ;;  %v3870_v55 = vsel %vm877_vm4, %v11418_v26, %v11463_v59  ;;  %v3871_v28 = vsel %vm877_vm4, %v11463_v59, %v11464_v15  ;;  %v4013_v38 = vsel %vm576_vm3, %v11469_v12, %v11473_v36  ;;  %v11484_v63 = vunpack.i.h.bf16 %v14864_v20  ;;  %v10815_v36 = vld [vmem:[%s17141_s3 + $0x178] sm:$0xff] }
 0x58f   :  { %3907 = vmatpush.msrb.mxu0 %v3870_v55  ;;  %3930 = vmatpush.msra.mxu1 %v3871_v28 }
 0x590   :  { %10788 = vmatmul.msk.f32.vlgmr.msrb.gmra.mxu0 %vm877_vm4, %v14831_v29 }
 0x591   :  { %4067 = vmatpush.msrb.mxu1 %v4013_v38  ;;  %4044 = vmatpush.msra.mxu0 %v4012_v48 }
 0x592   :  { %10790 = vmatmul.msk.f32.vlgmr.msra.gmra.mxu1 %vm877_vm4, %v14831_v29 }
 0x593   :  { %10792 = vmatmul.msk.f32.vlgmr.msra.gmra.mxu2 %vm877_vm4, %v14831_v29  ;;  %10803 = vmatmul.msk.f32.gmra.mxu3 %vm877_vm4, %v14900_v60  ;;  %v11487_v1 = vpop.permute.xlu0 %11486  ;;  %v11477_v23 = vpop.permute.xlu1 %11476 }
 0x594   :  { %4191 = vmatpush.msra.mxu2 %v14654_v43  ;;  %v11488_v17 = vunpack.i.l.bf16 %v11487_v1  ;;  %v11479_v33 = vunpack.i.h.bf16 %v11477_v23  ;;  %v11478_v35 = vunpack.i.l.bf16 %v11477_v23  ;;  %v11512_v29 = vpop.permute.xlu2 %11511  ;;  %v14921_v43 = vld [vmem:[%s17141_s3 + $0x160] sm:$0xff]  ;;  %v11489_v61 = vunpack.i.h.bf16 %v11487_v1 }
 0x595   :  { %v11514_v37 = vunpack.i.h.bf16 %v11512_v29 }
 0x596   :  { %4192 = vmatpush.msra.mxu2 %v14658_v21  ;;  %v4008_v24 = vsel %vm576_vm3, %v11474_v54, %v11478_v35  ;;  %v4009_v0 = vsel %vm576_vm3, %v11478_v35, %v11479_v33  ;;  %v4289_v39 = vsel %vm1468_vm5, %v11484_v63, %v11488_v17  ;;  %v11499_v21 = vunpack.i.h.bf16 %v14888_v53  ;;  %v10824_v53 = vld [vmem:[%s17141_s3 + $0x180] sm:$0xff]  ;;  %v3433_v17 = vpop.f32.mrf.mxu3  ;;  %v10825_v33 = vld [vmem:[%s17141_s3 + $0x188] sm:$0xff] }
 0x597   :  { %4045 = vmatpush.msra.mxu0 %v4008_v24  ;;  %4068 = vmatpush.msrb.mxu1 %v4009_v0 }
 0x598   :  { %4387 = vmatpush.msrb.mxu3 %v4289_v39  ;;  %10789 = vmatmul.msk.f32.gmra.mxu0 %vm877_vm4, %v14852_v62  ;;  %v4437_v55 = vsel %vm1769_vm6, %v11498_v56, %v11499_v21 }
 0x599   :  { %4145 = vmatpush.msrb.mxu0 %v14692_v16  ;;  %4168 = vmatpush.msra.mxu1 %v14694_v5  ;;  %v11513_v5 = vunpack.i.l.bf16 %v11512_v29 }
 0x59a   :  { %10791 = vmatmul.msk.f32.gmra.mxu1 %vm877_vm4, %v14852_v62 }
 0x59b   :  { %10793 = vmatmul.msk.f32.gmra.mxu2 %vm877_vm4, %v14852_v62  ;;  %4146 = vmatpush.msrb.mxu0 %v14705_v51  ;;  %v14929_v25 = vpop.permute.xlu0 %11501  ;;  %v11492_v16 = vpop.permute.xlu1 %11491  ;;  %v11483_v51 = vunpack.i.l.bf16 %v14864_v20  ;;  %v14946_v62 = vld [vmem:[%s17141_s3 + $0x168] sm:$0xff] }
 0x59c   :  { %4169 = vmatpush.msra.mxu1 %v14707_v49  ;;  %10812 = vmatmul.msk.f32.vlgmr.msra.gmra.mxu3 %vm877_vm4, %v14921_v43  ;;  %v11503_v14 = vunpack.i.l.bf16 %v14929_v25  ;;  %v11494_v45 = vunpack.i.h.bf16 %v11492_v16  ;;  %v11493_v52 = vunpack.i.l.bf16 %v11492_v16  ;;  %v4286_v49 = vsel %vm1468_vm5, %v11513_v5, %v11514_v37  ;;  %v14956_v20 = vpop.f32.mrf.mxu0  ;;  %v11527_v13 = vpop.permute.xlu2 %11526 }
 0x59d   :  { %v4288_v47 = vsel %vm1468_vm5, %v11483_v51, %v11484_v63  ;;  %v11529_v30 = vunpack.i.h.bf16 %v11527_v13  ;;  %v11528_v58 = vunpack.i.l.bf16 %v11527_v13  ;;  %v11504_v59 = vunpack.i.h.bf16 %v14929_v25  ;;  %v3410_v25 = vpop.f32.mrf.mxu2 }
 0x59e   :  { %v4285_v34 = vsel %vm1468_vm5, %v11493_v52, %v11494_v45  ;;  %v4438_v32 = vsel %vm1769_vm6, %v11499_v21, %v11503_v14  ;;  %v4284_v57 = vsel %vm1468_vm5, %v11489_v61, %v11493_v52  ;;  %v3436_v24 = vpop.f32.mrf.mxu3 }
 0x59f   :  { %4388 = vmatpush.msrb.mxu3 %v4285_v34  ;;  %v4435_v4 = vsel %vm1769_vm6, %v11528_v58, %v11529_v30 }
 0x5a0   :  { %10796 = vmatmul.msk.f32.vlgmr.msra.gmra.mxu0 %vm877_vm4, %v14875_v2 }
 0x5a1   :  { %4536 = vmatpush.msra.mxu3 %v4438_v32  ;;  %4318 = vmatpush.msra.mxu0 %v4286_v49 }
 0x5a2   :  { %10798 = vmatmul.msk.f32.vlgmr.msrb.gmra.mxu1 %vm877_vm4, %v14875_v2 }
 0x5a3   :  { %10800 = vmatmul.msk.f32.vlgmr.msrb.gmra.mxu2 %vm877_vm4, %v14875_v2  ;;  %v11517_v11 = vpop.permute.xlu0 %11516  ;;  %v11507_v10 = vpop.permute.xlu1 %11506 }
 0x5a4   :  { %10813 = vmatmul.msk.f32.gmra.mxu3 %vm877_vm4, %v14946_v62  ;;  %4364 = vmatpush.msrb.mxu2 %v4288_v47  ;;  %v11518_v50 = vunpack.i.l.bf16 %v11517_v11  ;;  %v11509_v31 = vunpack.i.h.bf16 %v11507_v10  ;;  %v11508_v19 = vunpack.i.l.bf16 %v11507_v10  ;;  %v11519_v27 = vunpack.i.h.bf16 %v11517_v11  ;;  %v14973_v9 = vpop.f32.mrf.mxu0 }
 0x5a5   :  { %v3413_v49 = vpop.f32.mrf.mxu2 }
 0x5a6   :  { %4365 = vmatpush.msrb.mxu2 %v4284_v57  ;;  %v4287_v44 = vsel %vm1468_vm5, %v11514_v37, %v11518_v50  ;;  %v4434_v22 = vsel %vm1769_vm6, %v11508_v19, %v11509_v31  ;;  %v4433_v63 = vsel %vm1769_vm6, %v11504_v59, %v11508_v19 }
 0x5a7   :  { %4341 = vmatpush.msrb.mxu1 %v4287_v44  ;;  %4537 = vmatpush.msra.mxu3 %v4434_v22 }
 0x5a8   :  { %10797 = vmatmul.msk.f32.gmra.mxu0 %vm877_vm4, %v14900_v60 }
 0x5aa   :  { %10799 = vmatmul.msk.f32.gmra.mxu1 %vm877_vm4, %v14900_v60 }
 0x5ab   :  { %10801 = vmatmul.msk.f32.gmra.mxu2 %vm877_vm4, %v14900_v60  ;;  %v11532_v8 = vpop.permute.xlu0 %11531  ;;  %v11522_v42 = vpop.permute.xlu1 %11521 }
 0x5ac   :  { %10822 = vmatmul.msk.f32.vlgmr.msrb.gmra.mxu3 %vm877_vm4, %v10814_v41  ;;  %v11524_v46 = vunpack.i.h.bf16 %v11522_v42  ;;  %v11523_v2 = vunpack.i.l.bf16 %v11522_v42  ;;  %v11533_v6 = vunpack.i.l.bf16 %v11532_v8  ;;  %v11534_v38 = vunpack.i.h.bf16 %v11532_v8  ;;  %v14999_v54 = vpop.f32.mrf.mxu0 }
 0x5ad   :  { %17252 = vst [vmem:[#allocation25_spill] sm:$0xff] %v14999_v54 }
 0x5ae   :  { %v4282_v26 = vsel %vm1468_vm5, %v11519_v27, %v11523_v2  ;;  %v4283_v12 = vsel %vm1468_vm5, %v11523_v2, %v11524_v46  ;;  %v4436_v15 = vsel %vm1769_vm6, %v11529_v30, %v11533_v6 }
 0x5af   :  { %4319 = vmatpush.msra.mxu0 %v4282_v26  ;;  %4342 = vmatpush.msrb.mxu1 %v4283_v12 }
 0x5b0   :  { %10806 = vmatmul.msk.f32.vlgmr.msrb.gmra.mxu0 %vm877_vm4, %v14921_v43 }
 0x5b1   :  { %4467 = vmatpush.msrb.mxu0 %v4435_v4 }
 0x5b2   :  { %10808 = vmatmul.msk.f32.vlgmr.msra.gmra.mxu1 %vm877_vm4, %v14921_v43 }
 0x5b3   :  { %10810 = vmatmul.msk.f32.vlgmr.msra.gmra.mxu2 %vm877_vm4, %v14921_v43  ;;  %4490 = vmatpush.msra.mxu1 %v4436_v15  ;;  %v11537_v28 = vpop.permute.xlu1 %11536  ;;  %v3387_v43 = vpop.f32.mrf.mxu1 }
 0x5b4   :  { %10823 = vmatmul.msk.f32.gmra.mxu3 %vm877_vm4, %v10815_v36  ;;  %4513 = vmatpush.msra.mxu2 %v4437_v55  ;;  %v11539_v48 = vunpack.i.h.bf16 %v11537_v28  ;;  %v11538_v60 = vunpack.i.l.bf16 %v11537_v28  ;;  %v15012_v35 = vpop.f32.mrf.mxu0 }
 0x5b5   :  { %17253 = vst [vmem:[#allocation18_spill] sm:$0xff] %v15012_v35 }
 0x5b6   :  { %4514 = vmatpush.msra.mxu2 %v4433_v63  ;;  %v4431_v1 = vsel %vm1769_vm6, %v11534_v38, %v11538_v60  ;;  %v4432_v23 = vsel %vm1769_vm6, %v11538_v60, %v11539_v48 }
 0x5b7   :  { %4468 = vmatpush.msrb.mxu0 %v4431_v1  ;;  %4491 = vmatpush.msra.mxu1 %v4432_v23 }
 0x5b8   :  { %10807 = vmatmul.msk.f32.gmra.mxu0 %vm877_vm4, %v14946_v62 }
 0x5ba   :  { %10809 = vmatmul.msk.f32.gmra.mxu1 %vm877_vm4, %v14946_v62 }
 0x5bb   :  { %10811 = vmatmul.msk.f32.gmra.mxu2 %vm877_vm4, %v14946_v62  ;;  %v3390_v5 = vpop.f32.mrf.mxu1 }
 0x5bc   :  { %10832 = vmatmul.msk.f32.vlgmr.msra.gmra.mxu3 %vm877_vm4, %v10824_v53  ;;  %v3364_v0 = vpop.f32.mrf.mxu0 }
 0x5c0   :  { %10816 = vmatmul.msk.f32.vlgmr.msra.gmra.mxu0 %vm877_vm4, %v10814_v41 }
 0x5c2   :  { %10818 = vmatmul.msk.f32.vlgmr.msrb.gmra.mxu1 %vm877_vm4, %v10814_v41 }
 0x5c3   :  { %10820 = vmatmul.msk.f32.vlgmr.msrb.gmra.mxu2 %vm877_vm4, %v10814_v41 }
 0x5c4   :  { %10833 = vmatmul.msk.f32.gmra.mxu3 %vm877_vm4, %v10825_v33  ;;  %v3367_v29 = vpop.f32.mrf.mxu0 }
 0x5c8   :  { %10817 = vmatmul.msk.f32.gmra.mxu0 %vm877_vm4, %v10815_v36 }
 0x5ca   :  { %10819 = vmatmul.msk.f32.gmra.mxu1 %vm877_vm4, %v10815_v36 }
 0x5cb   :  { %10821 = vmatmul.msk.f32.gmra.mxu2 %vm877_vm4, %v10815_v36 }
 0x5d0   :  { %10826 = vmatmul.msk.f32.vlgmr.msrb.gmra.mxu0 %vm877_vm4, %v10824_v53 }
 0x5d2   :  { %v3583_v39 = vpop.f32.mrf.mxu3  ;;  %10828 = vmatmul.msk.f32.vlgmr.msra.gmra.mxu1 %vm877_vm4, %v10824_v53 }
 0x5d3   :  { %10830 = vmatmul.msk.f32.vlgmr.msra.gmra.mxu2 %vm877_vm4, %v10824_v53  ;;  %v3584_v37 = vadd.f32 %v3583_v39, %v3433_v17 }
 0x5d8   :  { %10827 = vmatmul.msk.f32.gmra.mxu0 %vm877_vm4, %v10825_v33 }
 0x5da   :  { %v3586_v21 = vpop.f32.mrf.mxu3  ;;  %10829 = vmatmul.msk.f32.gmra.mxu1 %vm877_vm4, %v10825_v33 }
 0x5db   :  { %10831 = vmatmul.msk.f32.gmra.mxu2 %vm877_vm4, %v10825_v33  ;;  %v3587_v34 = vadd.f32 %v3586_v21, %v3436_v24 }
 0x5e0   :  { %v3514_v16 = vpop.f32.mrf.mxu0 }
 0x5e1   :  { %v3537_v47 = vpop.f32.mrf.mxu1  ;;  %v3515_v10 = vadd.f32 %v3514_v16, %v3364_v0 }
 0x5e2   :  { %v3748_v14 = vpop.f32.mrf.mxu3  ;;  %v3538_v46 = vadd.f32 %v3537_v47, %v3387_v43 }
 0x5e3   :  { %v3757_v45 = vadd.f32 %v3748_v14, %v3584_v37 }
 0x5e5   :  { %v3778_v52 = vadd.f32 %v14817_v3, %v3757_v45 }
 0x5e6   :  { %v3560_v57 = vpop.f32.mrf.mxu2 }
 0x5e7   :  { %v3786_v32 = vmax.f32 %v3778_v52, 0.0  ;;  %v3561_v56 = vadd.f32 %v3560_v57, %v3410_v25 }
 0x5e8   :  { %v3517_v51 = vpop.f32.mrf.mxu0 }
 0x5e9   :  { %3797 = vst [vmem:[#allocation4 + $0x88] sm:$0xff] %v3786_v32  ;;  %v3540_v13 = vpop.f32.mrf.mxu1  ;;  %v3518_v41 = vadd.f32 %v3517_v51, %v3367_v29 }
 0x5ea   :  { %v3751_v62 = vpop.f32.mrf.mxu3  ;;  %v3541_v15 = vadd.f32 %v3540_v13, %v3390_v5 }
 0x5eb   :  { %v3761_v61 = vadd.f32 %v3751_v62, %v3587_v34 }
 0x5ed   :  { %v3782_v11 = vadd.f32 %v14819_v18, %v3761_v61 }
 0x5ee   :  { %v3563_v58 = vpop.f32.mrf.mxu2 }
 0x5ef   :  { %v3790_v50 = vmax.f32 %v3782_v11, 0.0  ;;  %v3564_v23 = vadd.f32 %v3563_v58, %v3413_v49 }
 0x5f0   :  { %v3679_v31 = vpop.f32.mrf.mxu0 }
 0x5f1   :  { %3799 = vst [vmem:[#allocation4 + $0x98] sm:$0xff] %v3790_v50  ;;  %v3754_v19 = vadd.f32 %v3679_v31, %v3515_v10 }
 0x5f3   :  { %v3775_v44 = vadd.f32 %v14817_v3, %v3754_v19 }
 0x5f5   :  { %v3783_v22 = vmax.f32 %v3775_v44, 0.0 }
 0x5f7   :  { %3791 = vst [vmem:[#allocation4] sm:$0xff] %v3783_v22 }
 0x5f8   :  { %v3682_v30 = vpop.f32.mrf.mxu0 }
 0x5f9   :  { %v3758_v8 = vadd.f32 %v3682_v30, %v3518_v41 }
 0x5fb   :  { %v3779_v42 = vadd.f32 %v14819_v18, %v3758_v8 }
 0x5fd   :  { %v3787_v27 = vmax.f32 %v3779_v42, 0.0  ;;  %v3978_v2 = vpop.f32.mrf.mxu3 }
 0x5ff   :  { %3793 = vst [vmem:[#allocation4 + $0x10] sm:$0xff] %v3787_v27  ;;  %v3702_v6 = vpop.f32.mrf.mxu1 }
 0x600   :  { %v3755_v26 = vadd.f32 %v3702_v6, %v3538_v46 }
 0x602   :  { %v3776_v12 = vadd.f32 %v14817_v3, %v3755_v26 }
 0x604   :  { %v3784_v4 = vmax.f32 %v3776_v12, 0.0 }
 0x605   :  { %v3725_v36 = vpop.f32.mrf.mxu2 }
 0x606   :  { %3792 = vst [vmem:[#allocation4 + $0x8] sm:$0xff] %v3784_v4  ;;  %v3756_v59 = vadd.f32 %v3725_v36, %v3561_v56  ;;  %v15030_v38 = vpop.f32.mrf.mxu3  ;;  %v4559_v56 = vpop.permute.xlu2 %4558 }
 0x607   :  { %v3705_v55 = vpop.f32.mrf.mxu1 }
 0x608   :  { %v3777_v28 = vadd.f32 %v14817_v3, %v3756_v59  ;;  %v3759_v48 = vadd.f32 %v3705_v55, %v3541_v15 }
 0x60a   :  { %v3785_v60 = vmax.f32 %v3777_v28, 0.0  ;;  %v3780_v63 = vadd.f32 %v14819_v18, %v3759_v48 }
 0x60c   :  { %3796 = vst [vmem:[#allocation4 + $0x80] sm:$0xff] %v3785_v60  ;;  %v3788_v1 = vmax.f32 %v3780_v63, 0.0 }
 0x60d   :  { %v3909_v53 = vpop.f32.mrf.mxu0 }
 0x60e   :  { %3794 = vst [vmem:[#allocation4 + $0x18] sm:$0xff] %v3788_v1  ;;  %v3728_v17 = vpop.f32.mrf.mxu2  ;;  %v4116_v39 = vpop.f32.mrf.mxu3 }
 0x60f   :  { %v3760_v33 = vadd.f32 %v3728_v17, %v3564_v23  ;;  %v3932_v24 = vpop.f32.mrf.mxu1  ;;  %v4117_v58 = vadd.f32 %v4116_v39, %v3978_v2 }
 0x611   :  { %v3781_v0 = vadd.f32 %v14819_v18, %v3760_v33 }
 0x613   :  { %v3789_v29 = vmax.f32 %v3781_v0, 0.0 }
 0x615   :  { %3798 = vst [vmem:[#allocation4 + $0x90] sm:$0xff] %v3789_v29  ;;  %v3912_v3 = vpop.f32.mrf.mxu0 }
 0x616   :  { %v3955_v43 = vpop.f32.mrf.mxu2  ;;  %v4119_v37 = vpop.f32.mrf.mxu3 }
 0x617   :  { %v3935_v21 = vpop.f32.mrf.mxu1 }
 0x61d   :  { %v4047_v25 = vpop.f32.mrf.mxu0 }
 0x61e   :  { %v15034_v16 = vpop.f32.mrf.mxu2  ;;  %v4048_v13 = vadd.f32 %v4047_v25, %v3909_v53 }
 0x61f   :  { %v4070_v5 = vpop.f32.mrf.mxu1  ;;  %v4217_v45 = vpop.f32.mrf.mxu3 }
 0x620   :  { %v4071_v41 = vadd.f32 %v4070_v5, %v3932_v24  ;;  %v4226_v4 = vadd.f32 %v4217_v45, %v4117_v58  ;;  %v4120_v24 = vadd.f32 %v4119_v37, %v15030_v38 }
 0x625   :  { %v4050_v14 = vpop.f32.mrf.mxu0 }
 0x626   :  { %v4093_v52 = vpop.f32.mrf.mxu2  ;;  %v4051_v48 = vadd.f32 %v4050_v14, %v3912_v3 }
 0x627   :  { %v4073_v34 = vpop.f32.mrf.mxu1  ;;  %v4220_v62 = vpop.f32.mrf.mxu3  ;;  %v4094_v55 = vadd.f32 %v4093_v52, %v3955_v43 }
 0x628   :  { %v4074_v53 = vadd.f32 %v4073_v34, %v3935_v21  ;;  %v4230_v5 = vadd.f32 %v4220_v62, %v4120_v24  ;;  %v17261_v24 = vld [vmem:[#allocation24_spill] sm:$0xff] }
 0x62d   :  { %v4148_v32 = vpop.f32.mrf.mxu0 }
 0x62e   :  { %v4096_v51 = vpop.f32.mrf.mxu2  ;;  %v4223_v30 = vadd.f32 %v4148_v32, %v4048_v13 }
 0x62f   :  { %v4171_v49 = vpop.f32.mrf.mxu1  ;;  %v4390_v11 = vpop.f32.mrf.mxu3  ;;  %v4097_v38 = vadd.f32 %v4096_v51, %v15034_v16 }
 0x630   :  { %v4224_v8 = vadd.f32 %v4171_v49, %v4071_v41  ;;  %v4399_v28 = vadd.f32 %v4390_v11, %v4226_v4 }
 0x635   :  { %v4151_v18 = vpop.f32.mrf.mxu0 }
 0x636   :  { %v4194_v61 = vpop.f32.mrf.mxu2  ;;  %v4227_v2 = vadd.f32 %v4151_v18, %v4051_v48 }
 0x637   :  { %v4174_v47 = vpop.f32.mrf.mxu1  ;;  %v4393_v19 = vpop.f32.mrf.mxu3  ;;  %v4225_v1 = vadd.f32 %v4194_v61, %v4094_v55  ;;  %v17256_v55 = vld [vmem:[#allocation26_spill] sm:$0xff] }
 0x638   :  { %v4228_v29 = vadd.f32 %v4174_v47, %v4074_v53  ;;  %v4403_v37 = vadd.f32 %v4393_v19, %v4230_v5  ;;  %v4564_v61 = vpop.permute.xlu0 %4563 }
 0x63d   :  { %v4321_v10 = vpop.f32.mrf.mxu0 }
 0x63e   :  { %v4197_v50 = vpop.f32.mrf.mxu2  ;;  %v4396_v42 = vadd.f32 %v4321_v10, %v4223_v30 }
 0x63f   :  { %v4344_v31 = vpop.f32.mrf.mxu1  ;;  %v4539_v46 = vpop.f32.mrf.mxu3  ;;  %v4229_v47 = vadd.f32 %v4197_v50, %v4097_v38 }
 0x640   :  { %v4397_v6 = vadd.f32 %v4344_v31, %v4224_v8  ;;  %v4548_v23 = vadd.f32 %v4539_v46, %v4399_v28  ;;  %v17257_v28 = vld [vmem:[#allocation7_spill] sm:$0xff] }
 0x641   :  { %v1731_v48 = vadd.f32 %v17257_v28, %v17256_v55  ;;  %v17281_v28 = vld [vmem:[#allocation12_spill] sm:$0xff] }
 0x642   :  { %v4569_v14 = vadd.f32 %v4559_v56, %v4548_v23  ;;  %v17259_v23 = vld [vmem:[#allocation41_spill] sm:$0xff] }
 0x643   :  { %v2032_v53 = vadd.f32 %v17259_v23, %v1731_v48  ;;  %v17282_v48 = vld [vmem:[#allocation54_spill] sm:$0xff]  ;;  %v17283_v23 = vld [vmem:[#allocation56_spill] sm:$0xff] }
 0x644   :  { %v15047_v11 = vmax.f32 %v4569_v14, 0.0  ;;  %v17266_v14 = vld [vmem:[#allocation55_spill] sm:$0xff] }
 0x645   :  { %v4324_v57 = vpop.f32.mrf.mxu0 }
 0x646   :  { %v4367_v44 = vpop.f32.mrf.mxu2  ;;  %v4400_v43 = vadd.f32 %v4324_v57, %v4227_v2  ;;  %v17260_v2 = vld [vmem:[#allocation42_spill] sm:$0xff] }
 0x647   :  { %v4347_v22 = vpop.f32.mrf.mxu1  ;;  %v4398_v0 = vadd.f32 %v4367_v44, %v4225_v1  ;;  %v4542_v52 = vpop.f32.mrf.mxu3 }
 0x648   :  { %v4401_v34 = vadd.f32 %v4347_v22, %v4228_v29  ;;  %v4552_v10 = vadd.f32 %v4542_v52, %v4403_v37  ;;  %v17263_v29 = vld [vmem:[#allocation10_spill] sm:$0xff]  ;;  %v17270_v37 = vld [vmem:[#allocation64_spill] sm:$0xff] }
 0x64a   :  { %v4573_v16 = vadd.f32 %v4564_v61, %v4552_v10 }
 0x64c   :  { %v15060_v30 = vmax.f32 %v4573_v16, 0.0 }
 0x64d   :  { %v4470_v27 = vpop.f32.mrf.mxu0 }
 0x64e   :  { %v4370_v26 = vpop.f32.mrf.mxu2  ;;  %v4545_v12 = vadd.f32 %v4470_v27, %v4396_v42 }
 0x64f   :  { %v4493_v36 = vpop.f32.mrf.mxu1  ;;  %v4402_v57 = vadd.f32 %v4370_v26, %v4229_v47  ;;  %v17272_v47 = vld [vmem:[#allocation9_spill] sm:$0xff] }
 0x650   :  { %v4566_v15 = vadd.f32 %v4559_v56, %v4545_v12  ;;  %v4546_v59 = vadd.f32 %v4493_v36, %v4397_v6  ;;  %v11610_v12 = vpack.i.bf16 0.0, %v15047_v11  ;;  %v17254_v36 = vld [vmem:[#allocation20_spill] sm:$0xff] }
 0x652   :  { %v15036_v60 = vmax.f32 %v4566_v15, 0.0  ;;  %v4567_v63 = vadd.f32 %v4559_v56, %v4546_v59  ;;  %v17255_v15 = vld [vmem:[#allocation30_spill] sm:$0xff] }
 0x653   :  { %v1419_v59 = vadd.f32 %v17255_v15, %v17254_v36  ;;  %v17279_v15 = vld [vmem:[#allocation13_spill] sm:$0xff] }
 0x654   :  { %v15038_v17 = vmax.f32 %v4567_v63, 0.0  ;;  %v11540_v33 = vpack.i.bf16 %v15036_v60, %v17246_v7  ;;  %v17258_v63 = vld [vmem:[#allocation8_spill] sm:$0xff] }
 0x655   :  { %v4473_v39 = vpop.f32.mrf.mxu0  ;;  %v1732_v1 = vadd.f32 %v17258_v63, %v1419_v59  ;;  %v17280_v59 = vld [vmem:[#allocation43_spill] sm:$0xff]  ;;  %v2336_v63 = vadd.f32 %v17282_v48, %v17281_v28 }
 0x656   :  { %v4516_v25 = vpop.f32.mrf.mxu2  ;;  %11541 = vrot.lane.b32.xlu1 %v11540_v33, %s12532_s8  ;;  %v11545_v3 = vpack.i.bf16 0.0, %v15038_v17  ;;  %v4549_v32 = vadd.f32 %v4473_v39, %v4400_v43  ;;  %v11600_v46 = vpack.i.bf16 %v15038_v17, %v15036_v60  ;;  %v17264_v43 = vld [vmem:[#allocation40_spill] sm:$0xff]  ;;  %v2335_v55 = vadd.f32 %v17280_v59, %v17279_v15 }
 0x657   :  { %v4547_v21 = vadd.f32 %v4516_v25, %v4398_v0  ;;  %v4496_v45 = vpop.f32.mrf.mxu1  ;;  %v17262_v0 = vld [vmem:[#allocation52_spill] sm:$0xff]  ;;  %v2330_v25 = vadd.f32 %v17264_v43, %v17263_v29  ;;  %v17286_v29 = vld [vmem:[#allocation69_spill] sm:$0xff] }
 0x658   :  { %11546 = vrot.lane.b32.xlu2 %v11545_v3, %s12532_s8  ;;  %v4550_v18 = vadd.f32 %v4496_v45, %v4401_v34  ;;  %v4570_v62 = vadd.f32 %v4564_v61, %v4549_v32  ;;  %v2331_v39 = vadd.f32 %v17262_v0, %v17261_v24  ;;  %v17267_v45 = vld [vmem:[#allocation17_spill] sm:$0xff]  ;;  %v17269_v32 = vld [vmem:[#allocation31_spill] sm:$0xff]  ;;  %v2636_v43 = vadd.f32 %v17286_v29, %v2336_v63 }
 0x659   :  { %v4568_v49 = vadd.f32 %v4559_v56, %v4547_v21  ;;  %v11635_v56 = vpack.i.bf16 0.0, %v15060_v30  ;;  %v2333_v21 = vadd.f32 %v17266_v14, %v2032_v53  ;;  %v17268_v34 = vld [vmem:[#allocation21_spill] sm:$0xff] }
 0x65a   :  { %v4571_v22 = vadd.f32 %v4564_v61, %v4550_v18  ;;  %v15055_v19 = vmax.f32 %v4570_v62, 0.0  ;;  %v2631_v52 = vadd.f32 %v17267_v45, %v2331_v39  ;;  %v1424_v38 = vadd.f32 %v17269_v32, %v17268_v34  ;;  %v10886_v18 = vld [vmem:[%s17142_s4 + $0x30] sm:$0xff]  ;;  %v17273_v62 = vld [vmem:[#allocation68_spill] sm:$0xff] }
 0x65b   :  { %v15049_v31 = vmax.f32 %v4568_v49, 0.0  ;;  %v2630_v49 = vadd.f32 %v17270_v37, %v2330_v25  ;;  %v17285_v0 = vld [vmem:[#allocation65_spill] sm:$0xff] }
 0x65c   :  { %v15058_v41 = vmax.f32 %v4571_v22, 0.0  ;;  %v11560_v42 = vpack.i.bf16 %v15055_v19, %v17246_v7  ;;  %v17274_v22 = vld [vmem:[#allocation75_spill] sm:$0xff]  ;;  %v2635_v39 = vadd.f32 %v17285_v0, %v2335_v55 }
 0x65d   :  { %v11570_v44 = vpack.i.bf16 %v15047_v11, %v15049_v31  ;;  %v11605_v6 = vpack.i.bf16 %v15049_v31, %v17246_v7  ;;  %v2718_v16 = vadd.f32 %v17274_v22, %v2630_v49 }
 0x65e   :  { %v4519_v13 = vpop.f32.mrf.mxu2  ;;  %11551 = vrot.lane.b32.xlu1 %v11540_v33, %s12531_s7  ;;  %v11565_v27 = vpack.i.bf16 0.0, %v15058_v41  ;;  %v11615_v26 = vpack.i.bf16 %v15058_v41, %v15055_v19  ;;  %v2033_v33 = vadd.f32 %v17260_v2, %v1732_v1  ;;  %v17284_v2 = vld [vmem:[#allocation70_spill] sm:$0xff] }
 0x65f   :  { %v4551_v51 = vadd.f32 %v4519_v13, %v4402_v57  ;;  %11571 = vrot.lane.b32.xlu0 %v11570_v44, %s12532_s8  ;;  %v2633_v57 = vadd.f32 %v17273_v62, %v2333_v21  ;;  %v2719_v13 = vadd.f32 %v17274_v22, %v2631_v52  ;;  %v15139_v1 = vmax.f32 %v2718_v16, 0.0 }
 0x660   :  { %11556 = vrot.lane.b32.xlu2 %v11545_v3, %s12531_s7  ;;  %v17265_v3 = vld [vmem:[#allocation53_spill] sm:$0xff] }
 0x661   :  { %v4572_v50 = vadd.f32 %v4564_v61, %v4551_v51  ;;  %v2334_v5 = vadd.f32 %v17265_v3, %v2033_v33  ;;  %v17271_v61 = vld [vmem:[#allocation27_spill] sm:$0xff]  ;;  %v10887_v51 = vld [vmem:[%s17142_s4 + $0x38] sm:$0xff]  ;;  %v15133_v36 = vmax.f32 %v2719_v13, 0.0  ;;  %v17287_v3 = vld [vmem:[#allocation76_spill] sm:$0xff]  ;;  %v15157_v45 = vpack.i.bf16 %v15139_v1, %v17246_v7 }
 0x662   :  { %v1736_v10 = vadd.f32 %v17272_v47, %v17271_v61  ;;  %v2723_v21 = vadd.f32 %v17287_v3, %v2635_v39  ;;  %v2724_v52 = vadd.f32 %v17287_v3, %v2636_v43 }
 0x663   :  { %v15062_v8 = vmax.f32 %v4572_v50, 0.0  ;;  %v17275_v50 = vld [vmem:[#allocation11_spill] sm:$0xff]  ;;  %v15152_v14 = vpack.i.bf16 0.0, %v15133_v36  ;;  %v11745_v16 = vpack.i.bf16 %v15133_v36, %v15139_v1 }
 0x664   :  { %v15172_v37 = vmax.f32 %v2724_v52, 0.0 }
 0x665   :  { %v11575_v58 = vpack.i.bf16 %v15060_v30, %v15062_v8  ;;  %v11630_v4 = vpack.i.bf16 %v15062_v8, %v17246_v7 }
 0x666   :  { %11561 = vrot.lane.b32.xlu1 %v11560_v42, %s12532_s8  ;;  %v11740_v13 = vpack.i.bf16 0.0, %v15172_v37 }
 0x667   :  { %11576 = vrot.lane.b32.xlu0 %v11575_v58, %s12532_s8 }
 0x668   :  { %11566 = vrot.lane.b32.xlu2 %v11565_v27, %s12532_s8 }
 0x66e   :  { %11586 = vrot.lane.b32.xlu1 %v11560_v42, %s12531_s7  ;;  %v1737_v42 = vadd.f32 %v17275_v50, %v1424_v38  ;;  %v15170_v38 = vmax.f32 %v2723_v21, 0.0 }
 0x66f   :  { %11581 = vrot.lane.b32.xlu0 %v11570_v44, %s12531_s7  ;;  %v2634_v44 = vadd.f32 %v14956_v20, %v2334_v5  ;;  %v17277_v20 = vld [vmem:[#allocation45_spill] sm:$0xff] }
 0x670   :  { %11591 = vrot.lane.b32.xlu2 %v11565_v27, %s12531_s7  ;;  %v11675_v61 = vpack.i.bf16 %v15170_v38, %v17246_v7 }
 0x676   :  { %11601 = vrot.lane.b32.xlu1 %v11600_v46, %s12533_s24 }
 0x677   :  { %11596 = vrot.lane.b32.xlu0 %v11575_v58, %s12531_s7  ;;  %v17276_v58 = vld [vmem:[#allocation44_spill] sm:$0xff] }
 0x678   :  { %11606 = vrot.lane.b32.xlu2 %v11605_v6, %s12533_s24  ;;  %v2037_v27 = vadd.f32 %v17276_v58, %v1736_v10 }
 0x67e   :  { %11616 = vrot.lane.b32.xlu1 %v11615_v26, %s12533_s24 }
 0x67f   :  { %11611 = vrot.lane.b32.xlu0 %v11610_v12, %s12533_s24 }
 0x680   :  { %11626 = vrot.lane.b32.xlu2 %v11605_v6, %s12534_s20  ;;  %v2722_v6 = vadd.f32 %v17274_v22, %v2634_v44  ;;  %v11725_v44 = vpack.i.bf16 %v15133_v36, %v15172_v37 }
 0x682   :  { %v15145_v24 = vmax.f32 %v2722_v6, 0.0 }
 0x686   :  { %11621 = vrot.lane.b32.xlu1 %v11600_v46, %s12534_s20  ;;  %v2721_v46 = vadd.f32 %v17274_v22, %v2633_v57 }
 0x687   :  { %11636 = vrot.lane.b32.xlu0 %v11635_v56, %s12533_s24 }
 0x688   :  { %11631 = vrot.lane.b32.xlu2 %v11630_v4, %s12533_s24 }
 0x68e   :  { %11646 = vrot.lane.b32.xlu1 %v11615_v26, %s12534_s20  ;;  %v2038_v26 = vadd.f32 %v17277_v20, %v1737_v42 }
 0x68f   :  { %11641 = vrot.lane.b32.xlu0 %v11610_v12, %s12534_s20  ;;  %v17278_v12 = vld [vmem:[#allocation58_spill] sm:$0xff] }
 0x690   :  { %11651 = vrot.lane.b32.xlu2 %v11630_v4, %s12534_s20  ;;  %v2338_v4 = vadd.f32 %v17278_v12, %v2037_v27  ;;  %v2339_v53 = vadd.f32 %v17283_v23, %v2038_v26  ;;  %v15221_v27 = vpack.i.bf16 0.0, %v15145_v24  ;;  %v15235_v26 = vpack.i.bf16 %v15172_v37, %v15170_v38 }
 0x692   :  { %v2638_v33 = vadd.f32 %v17284_v2, %v2338_v4  ;;  %v2639_v25 = vadd.f32 %v14973_v9, %v2339_v53 }
 0x694   :  { %v2726_v5 = vadd.f32 %v17287_v3, %v2638_v33  ;;  %v2727_v34 = vadd.f32 %v17287_v3, %v2639_v25 }
 0x696   :  { %5332 = vperm.xlu1 %11297, %v10886_v18   ;;  %v15167_v32 = vmax.f32 %v2726_v5, 0.0  ;;  %v15174_v49 = vmax.f32 %v2727_v34, 0.0  ;;  %v10838_v34 = vld [vmem:[%s17141_s3 + $0x1e0] sm:$0xff] }
 0x697   :  { %11656 = vrot.lane.b32.xlu0 %v11635_v56, %s12534_s20  ;;  %v15143_v56 = vmax.f32 %v2721_v46, 0.0 }
 0x698   :  { %5337 = vperm.xlu2 %11298, %v10887_v51   ;;  %v11680_v18 = vpack.i.bf16 %v15167_v32, %v17246_v7  ;;  %v11685_v47 = vpack.i.bf16 %v15172_v37, %v15174_v49  ;;  %v11700_v10 = vpack.i.bf16 0.0, %v15174_v49  ;;  %v15216_v58 = vpack.i.bf16 %v15174_v49, %v15167_v32 }
 0x699   :  { %v11670_v9 = vpack.i.bf16 %v15145_v24, %v15143_v56  ;;  %v15212_v42 = vpack.i.bf16 %v15143_v56, %v17246_v7 }
 0x69e   :  { %11666 = vrot.lane.b32.xlu1 %v15152_v14, %s12531_s7 }
 0x69f   :  { %11661 = vrot.lane.b32.xlu0 %v15157_v45, %s12531_s7 }
 0x6a0   :  { %11671 = vrot.lane.b32.xlu2 %v11670_v9, %s12531_s7 }
 0x6a6   :  { %11681 = vrot.lane.b32.xlu1 %v11680_v18, %s12531_s7 }
 0x6a7   :  { %11676 = vrot.lane.b32.xlu0 %v11675_v61, %s12531_s7 }
 0x6a8   :  { %11686 = vrot.lane.b32.xlu2 %v11685_v47, %s12531_s7 }
 0x6ae   :  { %11696 = vrot.lane.b32.xlu1 %v11680_v18, %s12529_s26 }
 0x6af   :  { %11691 = vrot.lane.b32.xlu0 %v15157_v45, %s12529_s26 }
 0x6b0   :  { %11701 = vrot.lane.b32.xlu2 %v11700_v10, %s12529_s26 }
 0x6b2   :  { %v15190_v62 = vpop.permute.xlu2 %11546 }
 0x6b3   :  { %v11549_v3 = vunpack.i.h.bf16 %v15190_v62  ;;  %v11548_v5 = vunpack.i.l.bf16 %v15190_v62 }
 0x6b6   :  { %11711 = vrot.lane.b32.xlu1 %v11680_v18, %s12532_s8 }
 0x6b7   :  { %11706 = vrot.lane.b32.xlu0 %v11670_v9, %s12529_s26 }
 0x6b8   :  { %11716 = vrot.lane.b32.xlu2 %v11700_v10, %s12532_s8 }
 0x6ba   :  { %v15195_v57 = vpop.permute.xlu2 %11556 }
 0x6be   :  { %11726 = vrot.lane.b32.xlu1 %v11725_v44, %s12529_s26 }
 0x6bf   :  { %11721 = vrot.lane.b32.xlu0 %v11675_v61, %s12529_s26 }
 0x6c0   :  { %11731 = vrot.lane.b32.xlu2 %v11670_v9, %s12532_s8 }
 0x6c2   :  { %v11567_v22 = vpop.permute.xlu2 %11566 }
 0x6c3   :  { %v11569_v12 = vunpack.i.h.bf16 %v11567_v22  ;;  %v11568_v4 = vunpack.i.l.bf16 %v11567_v22 }
 0x6c6   :  { %11741 = vrot.lane.b32.xlu1 %v11740_v13, %s12532_s8 }
 0x6c7   :  { %11736 = vrot.lane.b32.xlu0 %v11675_v61, %s12532_s8 }
 0x6c8   :  { %v11542_v51 = vpop.permute.xlu1 %11541  ;;  %11746 = vrot.lane.b32.xlu2 %v11745_v16, %s12532_s8 }
 0x6c9   :  { %v11544_v59 = vunpack.i.h.bf16 %v11542_v51  ;;  %v11543_v55 = vunpack.i.l.bf16 %v11542_v51 }
 0x6ca   :  { %v15208_v50 = vpop.permute.xlu2 %11591 }
 0x6cb   :  { %v4644_v21 = vsel %vm877_vm4, %v11543_v55, %v11544_v59  ;;  %v4645_v9 = vsel %vm877_vm4, %v11544_v59, %v11548_v5  ;;  %v11593_v61 = vunpack.i.l.bf16 %v15208_v50  ;;  %v11594_v55 = vunpack.i.h.bf16 %v15208_v50 }
 0x6cc   :  { %v11559_v50 = vunpack.i.h.bf16 %v15195_v57 }
 0x6ce   :  { %11756 = vrot.lane.b32.xlu1 %v15212_v42, %s12533_s24 }
 0x6cf   :  { %11751 = vrot.lane.b32.xlu0 %v15216_v58, %s12533_s24 }
 0x6d0   :  { %v15225_v46 = vpop.permute.xlu1 %11551  ;;  %11761 = vrot.lane.b32.xlu2 %v15221_v27, %s12533_s24 }
 0x6d1   :  { %v11572_v6 = vpop.permute.xlu0 %11571  ;;  %v11554_v10 = vunpack.i.h.bf16 %v15225_v46  ;;  %v11553_v62 = vunpack.i.l.bf16 %v15225_v46 }
 0x6d2   :  { %v15229_v20 = vpop.permute.xlu2 %11606  ;;  %v11574_v23 = vunpack.i.h.bf16 %v11572_v6  ;;  %v11573_v53 = vunpack.i.l.bf16 %v11572_v6  ;;  %v11558_v6 = vunpack.i.l.bf16 %v15195_v57 }
 0x6d3   :  { %v11608_v5 = vunpack.i.l.bf16 %v15229_v20 }
 0x6d4   :  { %v4647_v52 = vsel %vm877_vm4, %v11573_v53, %v11574_v23  ;;  %v4646_v18 = vsel %vm877_vm4, %v11549_v3, %v11573_v53 }
 0x6d6   :  { %11771 = vrot.lane.b32.xlu1 %v15212_v42, %s12534_s20 }
 0x6d7   :  { %11766 = vrot.lane.b32.xlu0 %v15216_v58, %s12534_s20 }
 0x6d8   :  { %v11562_v15 = vpop.permute.xlu1 %11561  ;;  %11776 = vrot.lane.b32.xlu2 %v15235_v26, %s12533_s24 }
 0x6d9   :  { %v11564_v28 = vunpack.i.h.bf16 %v11562_v15  ;;  %v11563_v48 = vunpack.i.l.bf16 %v11562_v15  ;;  %v11577_v63 = vpop.permute.xlu0 %11576  ;;  %v10839_v15 = vld [vmem:[%s17141_s3 + $0x1e8] sm:$0xff] }
 0x6da   :  { %v11579_v2 = vunpack.i.h.bf16 %v11577_v63  ;;  %v11578_v33 = vunpack.i.l.bf16 %v11577_v63  ;;  %v15241_v0 = vpop.permute.xlu2 %11626 }
 0x6db   :  { %v4648_v39 = vsel %vm877_vm4, %v11563_v48, %v11564_v28  ;;  %v4649_v29 = vsel %vm877_vm4, %v11564_v28, %v11568_v4  ;;  %v4783_v4 = vsel %vm576_vm3, %v11554_v10, %v11558_v6 }
 0x6dc   :  { %4680 = vmatpush.msra.mxu0 %v4648_v39  ;;  %4703 = vmatpush.msrb.mxu1 %v4649_v29  ;;  %v4650_v43 = vsel %vm877_vm4, %v11569_v12, %v11578_v33  ;;  %v4651_v25 = vsel %vm877_vm4, %v11578_v33, %v11579_v2  ;;  %v4782_v12 = vsel %vm576_vm3, %v11553_v62, %v11554_v10  ;;  %v10836_v2 = vld [vmem:[%s17141_s3 + $0x1d0] sm:$0xff] }
 0x6dd   :  { %4726 = vmatpush.msrb.mxu2 %v4650_v43  ;;  %4749 = vmatpush.msrb.mxu3 %v4651_v25 }
 0x6de   :  { %4681 = vmatpush.msra.mxu0 %v4644_v21  ;;  %11786 = vrot.lane.b32.xlu1 %v15221_v27, %s12534_s20 }
 0x6df   :  { %11781 = vrot.lane.b32.xlu0 %v15157_v45, %s12533_s24  ;;  %4750 = vmatpush.msrb.mxu3 %v4647_v52  ;;  %v10837_v52 = vld [vmem:[%s17141_s3 + $0x1d8] sm:$0xff] }
 0x6e0   :  { %4704 = vmatpush.msrb.mxu1 %v4645_v9  ;;  %4727 = vmatpush.msrb.mxu2 %v4646_v18  ;;  %v11587_v47 = vpop.permute.xlu1 %11586 }
 0x6e1   :  { %10840 = vmatmul.msk.f32.vlgmr.msra.gmra.mxu0 %vm877_vm4, %v10838_v34  ;;  %10842 = vmatmul.msk.f32.vlgmr.msrb.gmra.mxu1 %vm877_vm4, %v10838_v34  ;;  %v11589_v44 = vunpack.i.h.bf16 %v11587_v47  ;;  %v11588_v22 = vunpack.i.l.bf16 %v11587_v47  ;;  %v11582_v13 = vpop.permute.xlu0 %11581  ;;  %v10959_v47 = vld [vmem:[%s17142_s4 + $0x48] sm:$0xff] }
 0x6e2   :  { %10844 = vmatmul.msk.f32.vlgmr.msrb.gmra.mxu2 %vm877_vm4, %v10838_v34  ;;  %10846 = vmatmul.msk.f32.vlgmr.msrb.gmra.mxu3 %vm877_vm4, %v10838_v34  ;;  %v15267_v16 = vpop.permute.xlu2 %11631  ;;  %v11584_v28 = vunpack.i.h.bf16 %v11582_v13  ;;  %v11583_v48 = vunpack.i.l.bf16 %v11582_v13  ;;  %v10856_v13 = vld [vmem:[%s17141_s3 + $0x1f0] sm:$0xff] }
 0x6e3   :  { %11791 = vrot.lane.b32.xlu2 %v15152_v14, %s12533_s24  ;;  %v4786_v51 = vsel %vm576_vm3, %v11588_v22, %v11589_v44  ;;  %v4787_v46 = vsel %vm576_vm3, %v11589_v44, %v11593_v61  ;;  %v10958_v44 = vld [vmem:[%s17142_s4 + $0x40] sm:$0xff]  ;;  %v11609_v22 = vunpack.i.h.bf16 %v15229_v20 }
 0x6e4   :  { %4818 = vmatpush.msrb.mxu0 %v4786_v51  ;;  %4841 = vmatpush.msra.mxu1 %v4787_v46  ;;  %v4785_v53 = vsel %vm576_vm3, %v11583_v48, %v11584_v28 }
 0x6e6   :  { %4819 = vmatpush.msrb.mxu0 %v4782_v12  ;;  %11801 = vrot.lane.b32.xlu1 %v15212_v42, %s12535_s13 }
 0x6e7   :  { %11796 = vrot.lane.b32.xlu0 %v15216_v58, %s12535_s13  ;;  %4842 = vmatpush.msra.mxu1 %v4783_v4 }
 0x6e8   :  { %4919 = vmatpush.msra.mxu0 %v15055_v19  ;;  %v11602_v59 = vpop.permute.xlu1 %11601 }
 0x6e9   :  { %4942 = vmatpush.msrb.mxu1 %v15058_v41  ;;  %10841 = vmatmul.msk.f32.gmra.mxu0 %vm877_vm4, %v10839_v15  ;;  %v11597_v42 = vpop.permute.xlu0 %11596  ;;  %v11604_v33 = vunpack.i.h.bf16 %v11602_v59  ;;  %v11603_v39 = vunpack.i.l.bf16 %v11602_v59  ;;  %v11628_v59 = vunpack.i.l.bf16 %v15241_v0 }
 0x6ea   :  { %10843 = vmatmul.msk.f32.gmra.mxu1 %vm877_vm4, %v10839_v15  ;;  %10845 = vmatmul.msk.f32.gmra.mxu2 %vm877_vm4, %v10839_v15  ;;  %v11599_v58 = vunpack.i.h.bf16 %v11597_v42  ;;  %v11598_v63 = vunpack.i.l.bf16 %v11597_v42  ;;  %v15290_v23 = vpop.permute.xlu2 %11651 }
 0x6eb   :  { %10847 = vmatmul.msk.f32.gmra.mxu3 %vm877_vm4, %v10839_v15  ;;  %11806 = vrot.lane.b32.xlu2 %v15235_v26, %s12534_s20  ;;  %v5056_v21 = vsel %vm1468_vm5, %v11603_v39, %v11604_v33  ;;  %v11653_v51 = vunpack.i.l.bf16 %v15290_v23 }
 0x6ec   :  { %4920 = vmatpush.msra.mxu0 %v15036_v60  ;;  %4943 = vmatpush.msrb.mxu1 %v15038_v17  ;;  %v4788_v19 = vsel %vm576_vm3, %v11594_v55, %v11598_v63  ;;  %v4789_v41 = vsel %vm576_vm3, %v11598_v63, %v11599_v58  ;;  %v4784_v60 = vsel %vm576_vm3, %v11559_v50, %v11583_v48  ;;  %v11633_v17 = vunpack.i.l.bf16 %v15267_v16  ;;  %v10857_v63 = vld [vmem:[%s17141_s3 + $0x1f8] sm:$0xff] }
 0x6ed   :  { %4864 = vmatpush.msra.mxu2 %v4788_v19  ;;  %4887 = vmatpush.msra.mxu3 %v4789_v41  ;;  %v11654_v41 = vunpack.i.h.bf16 %v15290_v23 }
 0x6ee   :  { %11816 = vrot.lane.b32.xlu1 %v15221_v27, %s12535_s13 }
 0x6ef   :  { %11811 = vrot.lane.b32.xlu0 %v15157_v45, %s12534_s20  ;;  %4888 = vmatpush.msra.mxu3 %v4785_v53 }
 0x6f0   :  { %4865 = vmatpush.msra.mxu2 %v4784_v60  ;;  %v11617_v57 = vpop.permute.xlu1 %11616 }
 0x6f1   :  { %4988 = vmatpush.msrb.mxu3 %v15060_v30  ;;  %10848 = vmatmul.msk.f32.vlgmr.msrb.gmra.mxu0 %vm877_vm4, %v10836_v2  ;;  %v11612_v27 = vpop.permute.xlu0 %11611  ;;  %v11619_v29 = vunpack.i.h.bf16 %v11617_v57  ;;  %v11618_v43 = vunpack.i.l.bf16 %v11617_v57  ;;  %v11629_v57 = vunpack.i.h.bf16 %v15241_v0 }
 0x6f2   :  { %10850 = vmatmul.msk.f32.vlgmr.msra.gmra.mxu1 %vm877_vm4, %v10836_v2  ;;  %10852 = vmatmul.msk.f32.vlgmr.msra.gmra.mxu2 %vm877_vm4, %v10836_v2  ;;  %v15314_v25 = vpop.permute.xlu2 %5337  ;;  %v11613_v9 = vunpack.i.l.bf16 %v11612_v27 }
 0x6f3   :  { %10854 = vmatmul.msk.f32.vlgmr.msra.gmra.mxu3 %vm877_vm4, %v10836_v2  ;;  %4965 = vmatpush.msrb.mxu2 %v15062_v8  ;;  %v5060_v30 = vsel %vm1468_vm5, %v11618_v43, %v11619_v29  ;;  %v5061_v3 = vsel %vm1468_vm5, %v11619_v29, %v11633_v17  ;;  %v5057_v8 = vsel %vm1468_vm5, %v11604_v33, %v11608_v5  ;;  %v10866_v29 = vld [vmem:[%s17141_s3 + $0x200] sm:$0xff] }
 0x6f4   :  { %11821 = vrot.lane.b32.xlu2 %v15152_v14, %s12534_s20  ;;  %4989 = vmatpush.msrb.mxu3 %v15047_v11 }
 0x6f5   :  { %5092 = vmatpush.msrb.mxu0 %v5060_v30  ;;  %4966 = vmatpush.msrb.mxu2 %v15049_v31  ;;  %v11634_v31 = vunpack.i.h.bf16 %v15267_v16  ;;  %v5058_v16 = vsel %vm1468_vm5, %v11609_v22, %v11613_v9 }
 0x6f6   :  { %5115 = vmatpush.msra.mxu1 %v5061_v3  ;;  %11831 = vrot.lane.b32.xlu1 %v15157_v45, %s12535_s13  ;;  %v11614_v45 = vunpack.i.h.bf16 %v11612_v27  ;;  %v10867_v3 = vld [vmem:[%s17141_s3 + $0x208] sm:$0xff] }
 0x6f7   :  { %5093 = vmatpush.msrb.mxu0 %v5056_v21  ;;  %11826 = vrot.lane.b32.xlu0 %v15235_v26, %s12535_s13 }
 0x6f8   :  { %5116 = vmatpush.msra.mxu1 %v5057_v8  ;;  %v11622_v11 = vpop.permute.xlu1 %11621 }
 0x6f9   :  { %10849 = vmatmul.msk.f32.gmra.mxu0 %vm877_vm4, %v10837_v52  ;;  %v11637_v34 = vpop.permute.xlu0 %11636  ;;  %v11624_v6 = vunpack.i.h.bf16 %v11622_v11  ;;  %v11623_v12 = vunpack.i.l.bf16 %v11622_v11 }
 0x6fa   :  { %10851 = vmatmul.msk.f32.gmra.mxu1 %vm877_vm4, %v10837_v52  ;;  %10853 = vmatmul.msk.f32.gmra.mxu2 %vm877_vm4, %v10837_v52  ;;  %v11639_v18 = vunpack.i.h.bf16 %v11637_v34  ;;  %v11638_v61 = vunpack.i.l.bf16 %v11637_v34  ;;  %v15340_v26 = vpop.permute.xlu2 %11671 }
 0x6fb   :  { %10855 = vmatmul.msk.f32.gmra.mxu3 %vm877_vm4, %v10837_v52  ;;  %v5205_v48 = vsel %vm1769_vm6, %v11623_v12, %v11624_v6  ;;  %v5206_v58 = vsel %vm1769_vm6, %v11624_v6, %v11628_v59  ;;  %v11674_v5 = vunpack.i.h.bf16 %v15340_v26  ;;  %v11673_v21 = vunpack.i.l.bf16 %v15340_v26  ;;  %v10876_v12 = vld [vmem:[%s17141_s3 + $0x210] sm:$0xff] }
 0x6fc   :  { %11836 = vrot.lane.b32.xlu2 %v15152_v14, %s12535_s13  ;;  %v5062_v10 = vsel %vm1468_vm5, %v11634_v31, %v11638_v61  ;;  %v5063_v62 = vsel %vm1468_vm5, %v11638_v61, %v11639_v18  ;;  %v5059_v14 = vsel %vm1468_vm5, %v11613_v9, %v11614_v45 }
 0x6fd   :  { %5138 = vmatpush.msra.mxu2 %v5062_v10  ;;  %5161 = vmatpush.msra.mxu3 %v5063_v62 }
 0x6fe   :  { %6425 = vperm.xlu1 %11297, %v10959_v47  }
 0x6ff   :  { %6420 = vperm.xlu0 %11359, %v10958_v44   ;;  %5162 = vmatpush.msra.mxu3 %v5059_v14 }
 0x700   :  { %5139 = vmatpush.msra.mxu2 %v5058_v16  ;;  %v11647_v46 = vpop.permute.xlu1 %11646 }
 0x701   :  { %10858 = vmatmul.msk.f32.vlgmr.msra.gmra.mxu0 %vm877_vm4, %v10856_v13  ;;  %v11642_v20 = vpop.permute.xlu0 %11641  ;;  %v11649_v4 = vunpack.i.h.bf16 %v11647_v46  ;;  %v11648_v15 = vunpack.i.l.bf16 %v11647_v46 }
 0x702   :  { %10860 = vmatmul.msk.f32.vlgmr.msrb.gmra.mxu1 %vm877_vm4, %v10856_v13  ;;  %10862 = vmatmul.msk.f32.vlgmr.msrb.gmra.mxu2 %vm877_vm4, %v10856_v13  ;;  %v11687_v28 = vpop.permute.xlu2 %11686  ;;  %v11644_v53 = vunpack.i.h.bf16 %v11642_v20  ;;  %v11643_v2 = vunpack.i.l.bf16 %v11642_v20 }
 0x703   :  { %10864 = vmatmul.msk.f32.vlgmr.msrb.gmra.mxu3 %vm877_vm4, %v10856_v13  ;;  %v5209_v55 = vsel %vm1769_vm6, %v11648_v15, %v11649_v4  ;;  %v5210_v42 = vsel %vm1769_vm6, %v11649_v4, %v11653_v51  ;;  %v11689_v8 = vunpack.i.h.bf16 %v11687_v28  ;;  %v11688_v52 = vunpack.i.l.bf16 %v11687_v28 }
 0x704   :  { %5241 = vmatpush.msra.mxu0 %v5209_v55  ;;  %5264 = vmatpush.msrb.mxu1 %v5210_v42  ;;  %v5207_v23 = vsel %vm1769_vm6, %v11629_v57, %v11643_v2  ;;  %v5208_v27 = vsel %vm1769_vm6, %v11643_v2, %v11644_v53  ;;  %v5437_v51 = vsel %vm576_vm3, %v11673_v21, %v11674_v5 }
 0x706   :  { %5242 = vmatpush.msra.mxu0 %v5205_v48  ;;  %5265 = vmatpush.msrb.mxu1 %v5206_v58  ;;  %v10877_v58 = vld [vmem:[%s17141_s3 + $0x218] sm:$0xff] }
 0x708   :  { %v15369_v19 = vpop.permute.xlu1 %5332 }
 0x709   :  { %10859 = vmatmul.msk.f32.gmra.mxu0 %vm877_vm4, %v10857_v63  ;;  %v11657_v50 = vpop.permute.xlu0 %11656 }
 0x70a   :  { %10861 = vmatmul.msk.f32.gmra.mxu1 %vm877_vm4, %v10857_v63  ;;  %10863 = vmatmul.msk.f32.gmra.mxu2 %vm877_vm4, %v10857_v63  ;;  %v11659_v60 = vunpack.i.h.bf16 %v11657_v50  ;;  %v11658_v17 = vunpack.i.l.bf16 %v11657_v50  ;;  %v15384_v43 = vpop.permute.xlu2 %11701 }
 0x70b   :  { %10865 = vmatmul.msk.f32.gmra.mxu3 %vm877_vm4, %v10857_v63  ;;  %v11703_v4 = vunpack.i.l.bf16 %v15384_v43  ;;  %v11704_v50 = vunpack.i.h.bf16 %v15384_v43 }
 0x70c   :  { %v5211_v33 = vsel %vm1769_vm6, %v11654_v41, %v11658_v17  ;;  %v5212_v39 = vsel %vm1769_vm6, %v11658_v17, %v11659_v60 }
 0x70d   :  { %5287 = vmatpush.msrb.mxu2 %v5211_v33  ;;  %5310 = vmatpush.msrb.mxu3 %v5212_v39 }
 0x70f   :  { %5288 = vmatpush.msrb.mxu2 %v5207_v23  ;;  %5311 = vmatpush.msrb.mxu3 %v5208_v27  ;;  %v10890_v23 = vld [vmem:[%s17141_s3 + $0x260] sm:$0xff] }
 0x710   :  { %v11667_v30 = vpop.permute.xlu1 %11666 }
 0x711   :  { %10868 = vmatmul.msk.f32.vlgmr.msrb.gmra.mxu0 %vm877_vm4, %v10866_v29  ;;  %v11662_v0 = vpop.permute.xlu0 %11661  ;;  %v11669_v31 = vunpack.i.h.bf16 %v11667_v30  ;;  %v11668_v34 = vunpack.i.l.bf16 %v11667_v30 }
 0x712   :  { %10870 = vmatmul.msk.f32.vlgmr.msra.gmra.mxu1 %vm877_vm4, %v10866_v29  ;;  %10872 = vmatmul.msk.f32.vlgmr.msra.gmra.mxu2 %vm877_vm4, %v10866_v29  ;;  %v15395_v45 = vpop.permute.xlu2 %11716  ;;  %v11664_v47 = vunpack.i.h.bf16 %v11662_v0  ;;  %v11663_v10 = vunpack.i.l.bf16 %v11662_v0 }
 0x713   :  { %10874 = vmatmul.msk.f32.vlgmr.msra.gmra.mxu3 %vm877_vm4, %v10866_v29  ;;  %v5436_v16 = vsel %vm576_vm3, %v11669_v31, %v11673_v21  ;;  %v11718_v27 = vunpack.i.l.bf16 %v15395_v45  ;;  %v11719_v0 = vunpack.i.h.bf16 %v15395_v45 }
 0x714   :  { %v5434_v46 = vsel %vm576_vm3, %v11663_v10, %v11664_v47  ;;  %v5435_v6 = vsel %vm576_vm3, %v11664_v47, %v11668_v34  ;;  %v10891_v10 = vld [vmem:[%s17141_s3 + $0x268] sm:$0xff] }
 0x718   :  { %v11682_v11 = vpop.permute.xlu1 %11681 }
 0x719   :  { %10869 = vmatmul.msk.f32.gmra.mxu0 %vm877_vm4, %v10867_v3  ;;  %v11677_v9 = vpop.permute.xlu0 %11676  ;;  %v11684_v18 = vunpack.i.h.bf16 %v11682_v11  ;;  %v11683_v61 = vunpack.i.l.bf16 %v11682_v11 }
 0x71a   :  { %10871 = vmatmul.msk.f32.gmra.mxu1 %vm877_vm4, %v10867_v3  ;;  %10873 = vmatmul.msk.f32.gmra.mxu2 %vm877_vm4, %v10867_v3  ;;  %v11679_v26 = vunpack.i.h.bf16 %v11677_v9  ;;  %v11678_v62 = vunpack.i.l.bf16 %v11677_v9  ;;  %v11732_v42 = vpop.permute.xlu2 %11731 }
 0x71b   :  { %10875 = vmatmul.msk.f32.gmra.mxu3 %vm877_vm4, %v10867_v3  ;;  %v5440_v44 = vsel %vm576_vm3, %v11683_v61, %v11684_v18  ;;  %v5441_v22 = vsel %vm576_vm3, %v11684_v18, %v11688_v52  ;;  %v11734_v29 = vunpack.i.h.bf16 %v11732_v42  ;;  %v11733_v43 = vunpack.i.l.bf16 %v11732_v42 }
 0x71c   :  { %v5438_v14 = vsel %vm576_vm3, %v11678_v62, %v11679_v26  ;;  %v5439_v13 = vsel %vm576_vm3, %v11679_v26, %v11689_v8  ;;  %5516 = vmatpush.msra.mxu2 %v5440_v44  ;;  %5539 = vmatpush.msra.mxu3 %v5441_v22 }
 0x71d   :  { %5470 = vmatpush.msrb.mxu0 %v5438_v14  ;;  %5493 = vmatpush.msra.mxu1 %v5439_v13  ;;  %v5715_v9 = vsel %vm877_vm4, %v11719_v0, %v11733_v43  ;;  %v5716_v18 = vsel %vm877_vm4, %v11733_v43, %v11734_v29 }
 0x71e   :  { %5517 = vmatpush.msra.mxu2 %v5436_v16  ;;  %5540 = vmatpush.msra.mxu3 %v5437_v51 }
 0x71f   :  { %5471 = vmatpush.msrb.mxu0 %v5434_v46  ;;  %5494 = vmatpush.msra.mxu1 %v5435_v6 }
 0x720   :  { %v11697_v20 = vpop.permute.xlu1 %11696 }
 0x721   :  { %10878 = vmatmul.msk.f32.vlgmr.msra.gmra.mxu0 %vm877_vm4, %v10876_v12  ;;  %v11692_v15 = vpop.permute.xlu0 %11691  ;;  %v11699_v59 = vunpack.i.h.bf16 %v11697_v20  ;;  %v11698_v55 = vunpack.i.l.bf16 %v11697_v20 }
 0x722   :  { %10880 = vmatmul.msk.f32.vlgmr.msrb.gmra.mxu1 %vm877_vm4, %v10876_v12  ;;  %10882 = vmatmul.msk.f32.vlgmr.msrb.gmra.mxu2 %vm877_vm4, %v10876_v12  ;;  %v11747_v57 = vpop.permute.xlu2 %11746  ;;  %v11694_v31 = vunpack.i.h.bf16 %v11692_v15  ;;  %v11693_v34 = vunpack.i.l.bf16 %v11692_v15 }
 0x723   :  { %10884 = vmatmul.msk.f32.vlgmr.msrb.gmra.mxu3 %vm877_vm4, %v10876_v12  ;;  %v5578_v28 = vsel %vm62_vm0, %v11698_v55, %v11699_v59  ;;  %v5579_v48 = vsel %vm62_vm0, %v11699_v59, %v11703_v4  ;;  %v11749_v14 = vunpack.i.h.bf16 %v11747_v57  ;;  %v11748_v51 = vunpack.i.l.bf16 %v11747_v57  ;;  %v10888_v55 = vld [vmem:[%s17141_s3 + $0x250] sm:$0xff] }
 0x724   :  { %5654 = vmatpush.msrb.mxu2 %v5578_v28  ;;  %5677 = vmatpush.msrb.mxu3 %v5579_v48  ;;  %v5572_v62 = vsel %vm62_vm0, %v11693_v34, %v11694_v31 }
 0x725   :  { %v5714_v59 = vsel %vm877_vm4, %v11748_v51, %v11749_v14 }
 0x728   :  { %v11712_v63 = vpop.permute.xlu1 %11711 }
 0x729   :  { %10879 = vmatmul.msk.f32.gmra.mxu0 %vm877_vm4, %v10877_v58  ;;  %v11707_v41 = vpop.permute.xlu0 %11706  ;;  %v11714_v33 = vunpack.i.h.bf16 %v11712_v63  ;;  %v11713_v39 = vunpack.i.l.bf16 %v11712_v63 }
 0x72a   :  { %10881 = vmatmul.msk.f32.gmra.mxu1 %vm877_vm4, %v10877_v58  ;;  %10883 = vmatmul.msk.f32.gmra.mxu2 %vm877_vm4, %v10877_v58  ;;  %v11709_v53 = vunpack.i.h.bf16 %v11707_v41  ;;  %v11708_v2 = vunpack.i.l.bf16 %v11707_v41  ;;  %v15447_v26 = vpop.permute.xlu2 %11761 }
 0x72b   :  { %10885 = vmatmul.msk.f32.gmra.mxu3 %vm877_vm4, %v10877_v58  ;;  %v5719_v21 = vsel %vm877_vm4, %v11713_v39, %v11714_v33  ;;  %v5720_v8 = vsel %vm877_vm4, %v11714_v33, %v11718_v27  ;;  %v10889_v58 = vld [vmem:[%s17141_s3 + $0x258] sm:$0xff] }
 0x72c   :  { %v5574_v60 = vsel %vm62_vm0, %v11704_v50, %v11708_v2  ;;  %v5575_v17 = vsel %vm62_vm0, %v11708_v2, %v11709_v53  ;;  %v11764_v53 = vunpack.i.h.bf16 %v15447_v26  ;;  %v11763_v2 = vunpack.i.l.bf16 %v15447_v26 }
 0x72d   :  { %5655 = vmatpush.msrb.mxu2 %v5574_v60  ;;  %5678 = vmatpush.msrb.mxu3 %v5575_v17 }
 0x730   :  { %v11727_v30 = vpop.permute.xlu1 %11726 }
 0x731   :  { %10892 = vmatmul.msk.f32.vlgmr.msrb.gmra.mxu0 %vm877_vm4, %v10890_v23  ;;  %v11722_v3 = vpop.permute.xlu0 %11721  ;;  %v11728_v5 = vunpack.i.l.bf16 %v11727_v30  ;;  %v11729_v45 = vunpack.i.h.bf16 %v11727_v30 }
 0x732   :  { %10894 = vmatmul.msk.f32.vlgmr.msra.gmra.mxu1 %vm877_vm4, %v10890_v23  ;;  %10896 = vmatmul.msk.f32.vlgmr.msra.gmra.mxu2 %vm877_vm4, %v10890_v23  ;;  %v11724_v52 = vunpack.i.h.bf16 %v11722_v3  ;;  %v11723_v11 = vunpack.i.l.bf16 %v11722_v3  ;;  %v11777_v28 = vpop.permute.xlu2 %11776 }
 0x733   :  { %10898 = vmatmul.msk.f32.vlgmr.msra.gmra.mxu3 %vm877_vm4, %v10890_v23  ;;  %5795 = vmatpush.msra.mxu2 %v5719_v21  ;;  %v5573_v44 = vsel %vm62_vm0, %v11694_v31, %v11729_v45  ;;  %v10909_v21 = vld [vmem:[%s17141_s3 + $0x278] sm:$0xff] }
 0x734   :  { %5818 = vmatpush.msra.mxu3 %v5720_v8  ;;  %v5576_v61 = vsel %vm62_vm0, %v11723_v11, %v11724_v52  ;;  %v5577_v47 = vsel %vm62_vm0, %v11724_v52, %v11728_v5  ;;  %v5998_v5 = vsel %vm1468_vm5, %v11763_v2, %v11764_v53 }
 0x735   :  { %5796 = vmatpush.msra.mxu2 %v5715_v9  ;;  %5608 = vmatpush.msra.mxu0 %v5576_v61 }
 0x736   :  { %5819 = vmatpush.msra.mxu3 %v5716_v18  ;;  %5631 = vmatpush.msrb.mxu1 %v5577_v47  ;;  %v10918_v47 = vld [vmem:[%s17141_s3 + $0x280] sm:$0xff] }
 0x737   :  { %5609 = vmatpush.msra.mxu0 %v5572_v62 }
 0x738   :  { %5632 = vmatpush.msrb.mxu1 %v5573_v44  ;;  %v11742_v22 = vpop.permute.xlu1 %11741 }
 0x739   :  { %10893 = vmatmul.msk.f32.gmra.mxu0 %vm877_vm4, %v10891_v10  ;;  %v11737_v13 = vpop.permute.xlu0 %11736  ;;  %v11743_v16 = vunpack.i.l.bf16 %v11742_v22  ;;  %v11744_v12 = vunpack.i.h.bf16 %v11742_v22 }
 0x73a   :  { %10895 = vmatmul.msk.f32.gmra.mxu1 %vm877_vm4, %v10891_v10  ;;  %10897 = vmatmul.msk.f32.gmra.mxu2 %vm877_vm4, %v10891_v10  ;;  %v11739_v46 = vunpack.i.h.bf16 %v11737_v13  ;;  %v11738_v6 = vunpack.i.l.bf16 %v11737_v13 }
 0x73b   :  { %10899 = vmatmul.msk.f32.gmra.mxu3 %vm877_vm4, %v10891_v10  ;;  %v5713_v15 = vsel %vm877_vm4, %v11744_v12, %v11748_v51 }
 0x73c   :  { %v5717_v20 = vsel %vm877_vm4, %v11738_v6, %v11739_v46  ;;  %v5718_v4 = vsel %vm877_vm4, %v11739_v46, %v11743_v16 }
 0x73d   :  { %5749 = vmatpush.msrb.mxu0 %v5717_v20  ;;  %5772 = vmatpush.msra.mxu1 %v5718_v4 }
 0x73f   :  { %5750 = vmatpush.msrb.mxu0 %v5713_v15  ;;  %5773 = vmatpush.msra.mxu1 %v5714_v59 }
 0x740   :  { %v11757_v42 = vpop.permute.xlu1 %11756 }
 0x741   :  { %10900 = vmatmul.msk.f32.vlgmr.msra.gmra.mxu0 %vm877_vm4, %v10888_v55  ;;  %v11752_v48 = vpop.permute.xlu0 %11751  ;;  %v11759_v41 = vunpack.i.h.bf16 %v11757_v42 }
 0x742   :  { %10902 = vmatmul.msk.f32.vlgmr.msrb.gmra.mxu1 %vm877_vm4, %v10888_v55  ;;  %10904 = vmatmul.msk.f32.vlgmr.msrb.gmra.mxu2 %vm877_vm4, %v10888_v55 }
 0x743   :  { %10906 = vmatmul.msk.f32.vlgmr.msrb.gmra.mxu3 %vm877_vm4, %v10888_v55  ;;  %5858 = vmatpush.msra.mxu0 %v15170_v38  ;;  %v11753_v38 = vunpack.i.l.bf16 %v11752_v48  ;;  %v5997_v43 = vsel %vm1468_vm5, %v11759_v41, %v11763_v2 }
 0x744   :  { %5881 = vmatpush.msrb.mxu1 %v15172_v37  ;;  %5904 = vmatpush.msrb.mxu2 %v15167_v32  ;;  %v10908_v37 = vld [vmem:[%s17141_s3 + $0x270] sm:$0xff] }
 0x745   :  { %5927 = vmatpush.msrb.mxu3 %v15174_v49  ;;  %5859 = vmatpush.msra.mxu0 %v15139_v1  ;;  %v11779_v1 = vunpack.i.h.bf16 %v11777_v28  ;;  %v11758_v49 = vunpack.i.l.bf16 %v11757_v42 }
 0x746   :  { %5882 = vmatpush.msrb.mxu1 %v15133_v36  ;;  %5905 = vmatpush.msrb.mxu2 %v15143_v56  ;;  %v11792_v36 = vpop.permute.xlu2 %11791  ;;  %v11778_v56 = vunpack.i.l.bf16 %v11777_v28 }
 0x747   :  { %5928 = vmatpush.msrb.mxu3 %v15145_v24  ;;  %v11754_v24 = vunpack.i.h.bf16 %v11752_v48  ;;  %v11793_v57 = vunpack.i.l.bf16 %v11792_v36  ;;  %v11794_v27 = vunpack.i.h.bf16 %v11792_v36 }
 0x748   :  { %v15477_v63 = vpop.permute.xlu1 %11771  ;;  %v5999_v60 = vsel %vm1468_vm5, %v11778_v56, %v11779_v1 }
 0x749   :  { %10901 = vmatmul.msk.f32.gmra.mxu0 %vm877_vm4, %v10889_v58  ;;  %v15481_v32 = vpop.permute.xlu0 %11766  ;;  %v6001_v33 = vsel %vm1468_vm5, %v11753_v38, %v11754_v24  ;;  %v6002_v29 = vsel %vm1468_vm5, %v11754_v24, %v11758_v49  ;;  %v5996_v8 = vsel %vm1468_vm5, %v11793_v57, %v11794_v27  ;;  %v11773_v10 = vunpack.i.l.bf16 %v15477_v63 }
 0x74a   :  { %10903 = vmatmul.msk.f32.gmra.mxu1 %vm877_vm4, %v10889_v58  ;;  %10905 = vmatmul.msk.f32.gmra.mxu2 %vm877_vm4, %v10889_v58  ;;  %v11769_v45 = vunpack.i.h.bf16 %v15481_v32  ;;  %v11768_v9 = vunpack.i.l.bf16 %v15481_v32  ;;  %v11774_v44 = vunpack.i.h.bf16 %v15477_v63  ;;  %v10919_v32 = vld [vmem:[%s17141_s3 + $0x288] sm:$0xff] }
 0x74b   :  { %10907 = vmatmul.msk.f32.gmra.mxu3 %vm877_vm4, %v10889_v58 }
 0x74c   :  { %v6150_v46 = vsel %vm1769_vm6, %v11768_v9, %v11769_v45  ;;  %v6151_v4 = vsel %vm1769_vm6, %v11769_v45, %v11773_v10  ;;  %v10929_v10 = vld [vmem:[%s17141_s3 + $0x298] sm:$0xff] }
 0x74e   :  { %v11807_v3 = vpop.permute.xlu2 %11806 }
 0x74f   :  { %v11809_v31 = vunpack.i.h.bf16 %v11807_v3  ;;  %v11808_v34 = vunpack.i.l.bf16 %v11807_v3 }
 0x750   :  { %v15488_v50 = vpop.permute.xlu1 %11786 }
 0x751   :  { %10910 = vmatmul.msk.f32.vlgmr.msrb.gmra.mxu0 %vm877_vm4, %v10908_v37  ;;  %v11782_v17 = vpop.permute.xlu0 %11781  ;;  %v11788_v62 = vunpack.i.l.bf16 %v15488_v50  ;;  %v11789_v22 = vunpack.i.h.bf16 %v15488_v50  ;;  %v6148_v14 = vsel %vm1769_vm6, %v11808_v34, %v11809_v31 }
 0x752   :  { %10912 = vmatmul.msk.f32.vlgmr.msra.gmra.mxu1 %vm877_vm4, %v10908_v37  ;;  %10914 = vmatmul.msk.f32.vlgmr.msra.gmra.mxu2 %vm877_vm4, %v10908_v37  ;;  %v11784_v39 = vunpack.i.h.bf16 %v11782_v17  ;;  %v11783_v23 = vunpack.i.l.bf16 %v11782_v17 }
 0x753   :  { %10916 = vmatmul.msk.f32.vlgmr.msra.gmra.mxu3 %vm877_vm4, %v10908_v37  ;;  %6031 = vmatpush.msrb.mxu0 %v5999_v60  ;;  %v6146_v15 = vsel %vm1769_vm6, %v11774_v44, %v11788_v62  ;;  %v6147_v42 = vsel %vm1769_vm6, %v11788_v62, %v11789_v22  ;;  %v10928_v60 = vld [vmem:[%s17141_s3 + $0x290] sm:$0xff] }
 0x754   :  { %6077 = vmatpush.msra.mxu2 %v6001_v33  ;;  %6100 = vmatpush.msra.mxu3 %v6002_v29  ;;  %v5995_v30 = vsel %vm1468_vm5, %v11784_v39, %v11793_v57  ;;  %v6000_v0 = vsel %vm1468_vm5, %v11779_v1, %v11783_v23 }
 0x755   :  { %6032 = vmatpush.msrb.mxu0 %v5995_v30  ;;  %6054 = vmatpush.msra.mxu1 %v6000_v0 }
 0x756   :  { %6078 = vmatpush.msra.mxu2 %v5997_v43  ;;  %6101 = vmatpush.msra.mxu3 %v5998_v5  ;;  %v11822_v26 = vpop.permute.xlu2 %11821 }
 0x757   :  { %6055 = vmatpush.msra.mxu1 %v5996_v8  ;;  %v11823_v51 = vunpack.i.l.bf16 %v11822_v26  ;;  %v11824_v20 = vunpack.i.h.bf16 %v11822_v26 }
 0x758   :  { %v15507_v52 = vpop.permute.xlu1 %11801 }
 0x759   :  { %10911 = vmatmul.msk.f32.gmra.mxu0 %vm877_vm4, %v10909_v21  ;;  %v15511_v11 = vpop.permute.xlu0 %11796  ;;  %v6145_v36 = vsel %vm1769_vm6, %v11823_v51, %v11824_v20  ;;  %v11803_v33 = vunpack.i.l.bf16 %v15507_v52  ;;  %v11804_v3 = vunpack.i.h.bf16 %v15507_v52 }
 0x75a   :  { %10913 = vmatmul.msk.f32.gmra.mxu1 %vm877_vm4, %v10909_v21  ;;  %10915 = vmatmul.msk.f32.gmra.mxu2 %vm877_vm4, %v10909_v21  ;;  %v11799_v17 = vunpack.i.h.bf16 %v15511_v11  ;;  %v11798_v57 = vunpack.i.l.bf16 %v15511_v11 }
 0x75b   :  { %10917 = vmatmul.msk.f32.gmra.mxu3 %vm877_vm4, %v10909_v21 }
 0x75c   :  { %v6299_v5 = vsel %vm2070_vm7, %v11798_v57, %v11799_v17  ;;  %v6300_v21 = vsel %vm2070_vm7, %v11799_v17, %v11803_v33 }
 0x75e   :  { %v15517_v18 = vpop.f32.mrf.mxu0  ;;  %v15519_v61 = vpop.f32.mrf.mxu1 }
 0x75f   :  { %v11837_v24 = vpop.permute.xlu2 %11836 }
 0x760   :  { %v15531_v16 = vpop.permute.xlu1 %11816  ;;  %v11839_v39 = vunpack.i.h.bf16 %v11837_v24  ;;  %v11838_v23 = vunpack.i.l.bf16 %v11837_v24 }
 0x761   :  { %10920 = vmatmul.msk.f32.vlgmr.msra.gmra.mxu0 %vm877_vm4, %v10918_v47  ;;  %v11812_v13 = vpop.permute.xlu0 %11811  ;;  %v11819_v29 = vunpack.i.h.bf16 %v15531_v16  ;;  %v11818_v43 = vunpack.i.l.bf16 %v15531_v16 }
 0x762   :  { %10922 = vmatmul.msk.f32.vlgmr.msrb.gmra.mxu1 %vm877_vm4, %v10918_v47  ;;  %10924 = vmatmul.msk.f32.vlgmr.msrb.gmra.mxu2 %vm877_vm4, %v10918_v47  ;;  %v11814_v6 = vunpack.i.h.bf16 %v11812_v13  ;;  %v11813_v12 = vunpack.i.l.bf16 %v11812_v13  ;;  %v6294_v11 = vsel %vm2070_vm7, %v11838_v23, %v11839_v39 }
 0x763   :  { %10926 = vmatmul.msk.f32.vlgmr.msrb.gmra.mxu3 %vm877_vm4, %v10918_v47  ;;  %6180 = vmatpush.msra.mxu0 %v6148_v14  ;;  %v6296_v34 = vsel %vm2070_vm7, %v11818_v43, %v11819_v29  ;;  %v10938_v14 = vld [vmem:[%s17141_s3 + $0x2a0] sm:$0xff] }
 0x764   :  { %6226 = vmatpush.msrb.mxu2 %v6150_v46  ;;  %6249 = vmatpush.msrb.mxu3 %v6151_v4  ;;  %v6144_v59 = vsel %vm1769_vm6, %v11814_v6, %v11823_v51  ;;  %v6149_v55 = vsel %vm1769_vm6, %v11809_v31, %v11813_v12  ;;  %v6295_v31 = vsel %vm2070_vm7, %v11804_v3, %v11818_v43  ;;  %v10939_v6 = vld [vmem:[%s17141_s3 + $0x2a8] sm:$0xff] }
 0x765   :  { %v15541_v28 = vpop.f32.mrf.mxu2  ;;  %v15543_v48 = vpop.f32.mrf.mxu3  ;;  %6181 = vmatpush.msra.mxu0 %v6144_v59  ;;  %6203 = vmatpush.msrb.mxu1 %v6149_v55  ;;  %v10948_v59 = vld [vmem:[%s17141_s3 + $0x2b0] sm:$0xff] }
 0x766   :  { %6227 = vmatpush.msrb.mxu2 %v6146_v15  ;;  %6250 = vmatpush.msrb.mxu3 %v6147_v42  ;;  %v15545_v58 = vpop.f32.mrf.mxu0 }
 0x767   :  { %v15547_v63 = vpop.f32.mrf.mxu1  ;;  %6204 = vmatpush.msrb.mxu1 %v6145_v36 }
 0x768   :  { %v11832_v56 = vpop.permute.xlu1 %11831 }
 0x769   :  { %10921 = vmatmul.msk.f32.gmra.mxu0 %vm877_vm4, %v10919_v32  ;;  %v11827_v1 = vpop.permute.xlu0 %11826  ;;  %v11833_v50 = vunpack.i.l.bf16 %v11832_v56  ;;  %v11834_v27 = vunpack.i.h.bf16 %v11832_v56  ;;  %v10949_v56 = vld [vmem:[%s17141_s3 + $0x2b8] sm:$0xff] }
 0x76a   :  { %10923 = vmatmul.msk.f32.gmra.mxu1 %vm877_vm4, %v10919_v32  ;;  %10925 = vmatmul.msk.f32.gmra.mxu2 %vm877_vm4, %v10919_v32  ;;  %v11829_v49 = vunpack.i.h.bf16 %v11827_v1  ;;  %v11828_v41 = vunpack.i.l.bf16 %v11827_v1 }
 0x76b   :  { %10927 = vmatmul.msk.f32.gmra.mxu3 %vm877_vm4, %v10919_v32  ;;  %v6293_v8 = vsel %vm2070_vm7, %v11834_v27, %v11838_v23 }
 0x76c   :  { %v6297_v30 = vsel %vm2070_vm7, %v11828_v41, %v11829_v49  ;;  %v6298_v0 = vsel %vm2070_vm7, %v11829_v49, %v11833_v50 }
 0x76d   :  { %v15557_v38 = vpop.f32.mrf.mxu2 }
 0x76e   :  { %v15559_v37 = vpop.f32.mrf.mxu3  ;;  %v15561_v53 = vpop.f32.mrf.mxu0 }
 0x76f   :  { %v15563_v2 = vpop.f32.mrf.mxu1  ;;  %v4822_v55 = vadd.f32 %v15561_v53, %v15517_v18 }
 0x770   :  { %v4845_v24 = vadd.f32 %v15563_v2, %v15519_v61 }
 0x771   :  { %10930 = vmatmul.msk.f32.vlgmr.msrb.gmra.mxu0 %vm877_vm4, %v10928_v60 }
 0x772   :  { %10932 = vmatmul.msk.f32.vlgmr.msra.gmra.mxu1 %vm877_vm4, %v10928_v60  ;;  %10934 = vmatmul.msk.f32.vlgmr.msra.gmra.mxu2 %vm877_vm4, %v10928_v60 }
 0x773   :  { %10936 = vmatmul.msk.f32.vlgmr.msra.gmra.mxu3 %vm877_vm4, %v10928_v60  ;;  %6329 = vmatpush.msrb.mxu0 %v6297_v30 }
 0x774   :  { %6352 = vmatpush.msra.mxu1 %v6298_v0  ;;  %6375 = vmatpush.msra.mxu2 %v6299_v5 }
 0x775   :  { %6398 = vmatpush.msra.mxu3 %v6300_v21  ;;  %6330 = vmatpush.msrb.mxu0 %v6293_v8  ;;  %v4867_v45 = vpop.f32.mrf.mxu2 }
 0x776   :  { %6353 = vmatpush.msra.mxu1 %v6294_v11  ;;  %v4890_v52 = vpop.f32.mrf.mxu3  ;;  %6376 = vmatpush.msra.mxu2 %v6295_v31  ;;  %v4824_v9 = vpop.f32.mrf.mxu0  ;;  %v4868_v2 = vadd.f32 %v4867_v45, %v15541_v28 }
 0x777   :  { %6399 = vmatpush.msra.mxu3 %v6296_v34  ;;  %v4847_v47 = vpop.f32.mrf.mxu1  ;;  %v4825_v41 = vadd.f32 %v4824_v9, %v15545_v58  ;;  %v4891_v23 = vadd.f32 %v4890_v52, %v15543_v48 }
 0x778   :  { %v4848_v27 = vadd.f32 %v4847_v47, %v15547_v63 }
 0x779   :  { %10931 = vmatmul.msk.f32.gmra.mxu0 %vm877_vm4, %v10929_v10 }
 0x77a   :  { %10933 = vmatmul.msk.f32.gmra.mxu1 %vm877_vm4, %v10929_v10  ;;  %10935 = vmatmul.msk.f32.gmra.mxu2 %vm877_vm4, %v10929_v10 }
 0x77b   :  { %10937 = vmatmul.msk.f32.gmra.mxu3 %vm877_vm4, %v10929_v10 }
 0x77d   :  { %v15593_v26 = vpop.f32.mrf.mxu2 }
 0x77e   :  { %v15595_v62 = vpop.f32.mrf.mxu3  ;;  %v4922_v44 = vpop.f32.mrf.mxu0 }
 0x77f   :  { %v4945_v22 = vpop.f32.mrf.mxu1  ;;  %v4997_v49 = vadd.f32 %v4922_v44, %v4822_v55  ;;  %v4871_v44 = vadd.f32 %v15593_v26, %v15557_v38 }
 0x780   :  { %v4998_v18 = vadd.f32 %v4945_v22, %v4845_v24  ;;  %v4894_v22 = vadd.f32 %v15595_v62, %v15559_v37 }
 0x781   :  { %10940 = vmatmul.msk.f32.vlgmr.msra.gmra.mxu0 %vm877_vm4, %v10938_v14 }
 0x782   :  { %10942 = vmatmul.msk.f32.vlgmr.msrb.gmra.mxu1 %vm877_vm4, %v10938_v14  ;;  %10944 = vmatmul.msk.f32.vlgmr.msrb.gmra.mxu2 %vm877_vm4, %v10938_v14 }
 0x783   :  { %10946 = vmatmul.msk.f32.vlgmr.msrb.gmra.mxu3 %vm877_vm4, %v10938_v14 }
 0x785   :  { %v4968_v13 = vpop.f32.mrf.mxu2 }
 0x786   :  { %v4991_v16 = vpop.f32.mrf.mxu3  ;;  %v4925_v51 = vpop.f32.mrf.mxu0  ;;  %v4999_v58 = vadd.f32 %v4968_v13, %v4868_v2 }
 0x787   :  { %v4948_v46 = vpop.f32.mrf.mxu1  ;;  %v5001_v29 = vadd.f32 %v4925_v51, %v4825_v41  ;;  %v5000_v0 = vadd.f32 %v4991_v16, %v4891_v23 }
 0x788   :  { %v5002_v3 = vadd.f32 %v4948_v46, %v4848_v27 }
 0x789   :  { %10941 = vmatmul.msk.f32.gmra.mxu0 %vm877_vm4, %v10939_v6 }
 0x78a   :  { %10943 = vmatmul.msk.f32.gmra.mxu1 %vm877_vm4, %v10939_v6  ;;  %10945 = vmatmul.msk.f32.gmra.mxu2 %vm877_vm4, %v10939_v6 }
 0x78b   :  { %10947 = vmatmul.msk.f32.gmra.mxu3 %vm877_vm4, %v10939_v6 }
 0x78d   :  { %v4971_v12 = vpop.f32.mrf.mxu2 }
 0x78e   :  { %v4994_v20 = vpop.f32.mrf.mxu3  ;;  %v5095_v4 = vpop.f32.mrf.mxu0  ;;  %v5003_v46 = vadd.f32 %v4971_v12, %v4871_v44 }
 0x78f   :  { %v5118_v15 = vpop.f32.mrf.mxu1  ;;  %v5170_v50 = vadd.f32 %v5095_v4, %v4997_v49  ;;  %v5004_v6 = vadd.f32 %v4994_v20, %v4894_v22 }
 0x790   :  { %v5171_v53 = vadd.f32 %v5118_v15, %v4998_v18 }
 0x791   :  { %10950 = vmatmul.msk.f32.vlgmr.msrb.gmra.mxu0 %vm877_vm4, %v10948_v59 }
 0x792   :  { %10952 = vmatmul.msk.f32.vlgmr.msra.gmra.mxu1 %vm877_vm4, %v10948_v59  ;;  %10954 = vmatmul.msk.f32.vlgmr.msra.gmra.mxu2 %vm877_vm4, %v10948_v59 }
 0x793   :  { %10956 = vmatmul.msk.f32.vlgmr.msra.gmra.mxu3 %vm877_vm4, %v10948_v59 }
 0x795   :  { %v5141_v42 = vpop.f32.mrf.mxu2 }
 0x796   :  { %v5164_v32 = vpop.f32.mrf.mxu3  ;;  %v5098_v36 = vpop.f32.mrf.mxu0  ;;  %v5172_v8 = vadd.f32 %v5141_v42, %v4999_v58 }
 0x797   :  { %v5121_v1 = vpop.f32.mrf.mxu1  ;;  %v5173_v11 = vadd.f32 %v5164_v32, %v5000_v0  ;;  %v5174_v31 = vadd.f32 %v5098_v36, %v5001_v29 }
 0x798   :  { %v5175_v34 = vadd.f32 %v5121_v1, %v5002_v3 }
 0x799   :  { %10951 = vmatmul.msk.f32.gmra.mxu0 %vm877_vm4, %v10949_v56 }
 0x79a   :  { %10953 = vmatmul.msk.f32.gmra.mxu1 %vm877_vm4, %v10949_v56  ;;  %10955 = vmatmul.msk.f32.gmra.mxu2 %vm877_vm4, %v10949_v56 }
 0x79b   :  { %10957 = vmatmul.msk.f32.gmra.mxu3 %vm877_vm4, %v10949_v56 }
 0x79d   :  { %v5144_v60 = vpop.f32.mrf.mxu2 }
 0x79e   :  { %v5167_v17 = vpop.f32.mrf.mxu3  ;;  %v5244_v57 = vpop.f32.mrf.mxu0  ;;  %v5176_v42 = vadd.f32 %v5144_v60, %v5003_v46 }
 0x79f   :  { %v5267_v33 = vpop.f32.mrf.mxu1  ;;  %v5319_v39 = vadd.f32 %v5244_v57, %v5170_v50  ;;  %v5177_v32 = vadd.f32 %v5167_v17, %v5004_v6 }
 0x7a0   :  { %v5320_v61 = vadd.f32 %v5267_v33, %v5171_v53 }
 0x7a1   :  { %v5340_v43 = vadd.f32 %v15369_v19, %v5319_v39 }
 0x7a2   :  { %v5341_v30 = vadd.f32 %v15369_v19, %v5320_v61 }
 0x7a3   :  { %v5348_v5 = vmax.f32 %v5340_v43, 0.0 }
 0x7a4   :  { %v5349_v21 = vmax.f32 %v5341_v30, 0.0 }
 0x7a5   :  { %5356 = vst [vmem:[#allocation4 + $0x20] sm:$0xff] %v5348_v5  ;;  %v5290_v28 = vpop.f32.mrf.mxu2 }
 0x7a6   :  { %v5313_v45 = vpop.f32.mrf.mxu3  ;;  %5357 = vst [vmem:[#allocation4 + $0x28] sm:$0xff] %v5349_v21  ;;  %v5321_v48 = vadd.f32 %v5290_v28, %v5172_v8  ;;  %v5247_v52 = vpop.f32.mrf.mxu0 }
 0x7a7   :  { %v5322_v63 = vadd.f32 %v5313_v45, %v5173_v11  ;;  %v5270_v9 = vpop.f32.mrf.mxu1  ;;  %v5323_v47 = vadd.f32 %v5247_v52, %v5174_v31 }
 0x7a8   :  { %v5324_v10 = vadd.f32 %v5270_v9, %v5175_v34  ;;  %v5342_v14 = vadd.f32 %v15369_v19, %v5321_v48 }
 0x7a9   :  { %v5343_v13 = vadd.f32 %v15369_v19, %v5322_v63  ;;  %v5344_v16 = vadd.f32 %v15314_v25, %v5323_v47 }
 0x7aa   :  { %v5345_v51 = vadd.f32 %v15314_v25, %v5324_v10  ;;  %v5350_v4 = vmax.f32 %v5342_v14, 0.0 }
 0x7ab   :  { %v5351_v15 = vmax.f32 %v5343_v13, 0.0  ;;  %v5352_v59 = vmax.f32 %v5344_v16, 0.0 }
 0x7ac   :  { %v5353_v55 = vmax.f32 %v5345_v51, 0.0  ;;  %5360 = vst [vmem:[#allocation4 + $0xa0] sm:$0xff] %v5350_v4 }
 0x7ad   :  { %5361 = vst [vmem:[#allocation4 + $0xa8] sm:$0xff] %v5351_v15  ;;  %v5293_v38 = vpop.f32.mrf.mxu2 }
 0x7ae   :  { %v5316_v37 = vpop.f32.mrf.mxu3  ;;  %5358 = vst [vmem:[#allocation4 + $0x30] sm:$0xff] %v5352_v59  ;;  %v5325_v26 = vadd.f32 %v5293_v38, %v5176_v42  ;;  %v5473_v19 = vpop.f32.mrf.mxu0 }
 0x7af   :  { %v5326_v62 = vadd.f32 %v5316_v37, %v5177_v32  ;;  %v5496_v36 = vpop.f32.mrf.mxu1  ;;  %5359 = vst [vmem:[#allocation4 + $0x38] sm:$0xff] %v5353_v55 }
 0x7b0   :  { %v5346_v1 = vadd.f32 %v15314_v25, %v5325_v26 }
 0x7b1   :  { %v5347_v12 = vadd.f32 %v15314_v25, %v5326_v62 }
 0x7b2   :  { %v5354_v20 = vmax.f32 %v5346_v1, 0.0 }
 0x7b3   :  { %v5355_v56 = vmax.f32 %v5347_v12, 0.0 }
 0x7b4   :  { %5362 = vst [vmem:[#allocation4 + $0xb0] sm:$0xff] %v5354_v20 }
 0x7b5   :  { %5363 = vst [vmem:[#allocation4 + $0xb8] sm:$0xff] %v5355_v56  ;;  %v5519_v24 = vpop.f32.mrf.mxu2 }
 0x7b6   :  { %v5542_v49 = vpop.f32.mrf.mxu3  ;;  %v5476_v18 = vpop.f32.mrf.mxu0 }
 0x7b7   :  { %v5499_v41 = vpop.f32.mrf.mxu1 }
 0x7bd   :  { %v15645_v50 = vpop.f32.mrf.mxu2 }
 0x7be   :  { %v15647_v53 = vpop.f32.mrf.mxu3  ;;  %v5611_v60 = vpop.f32.mrf.mxu0 }
 0x7bf   :  { %v5634_v17 = vpop.f32.mrf.mxu1  ;;  %v5612_v16 = vadd.f32 %v5611_v60, %v5473_v19 }
 0x7c0   :  { %v5635_v51 = vadd.f32 %v5634_v17, %v5496_v36 }
 0x7c5   :  { %v5657_v57 = vpop.f32.mrf.mxu2 }
 0x7c6   :  { %v5680_v33 = vpop.f32.mrf.mxu3  ;;  %v5614_v39 = vpop.f32.mrf.mxu0  ;;  %v5658_v62 = vadd.f32 %v5657_v57, %v5519_v24 }
 0x7c7   :  { %v5637_v61 = vpop.f32.mrf.mxu1  ;;  %v5615_v42 = vadd.f32 %v5614_v39, %v5476_v18  ;;  %v5681_v1 = vadd.f32 %v5680_v33, %v5542_v49  ;;  %v6421_v18 = vpop.permute.xlu0 %6420 }
 0x7c8   :  { %v5638_v12 = vadd.f32 %v5637_v61, %v5499_v41 }
 0x7cd   :  { %v15649_v2 = vpop.f32.mrf.mxu2 }
 0x7ce   :  { %v15651_v25 = vpop.f32.mrf.mxu3  ;;  %v5752_v23 = vpop.f32.mrf.mxu0 }
 0x7cf   :  { %v5775_v27 = vpop.f32.mrf.mxu1  ;;  %v5827_v46 = vadd.f32 %v5752_v23, %v5612_v16 }
 0x7d0   :  { %v5828_v55 = vadd.f32 %v5775_v27, %v5635_v51 }
 0x7d5   :  { %v5798_v29 = vpop.f32.mrf.mxu2 }
 0x7d6   :  { %v5821_v43 = vpop.f32.mrf.mxu3  ;;  %v5755_v30 = vpop.f32.mrf.mxu0  ;;  %v5829_v36 = vadd.f32 %v5798_v29, %v5658_v62 }
 0x7d7   :  { %v5778_v58 = vpop.f32.mrf.mxu1  ;;  %v5831_v20 = vadd.f32 %v5755_v30, %v5615_v42  ;;  %v5830_v60 = vadd.f32 %v5821_v43, %v5681_v1  ;;  %v5661_v43 = vadd.f32 %v15649_v2, %v15645_v50 }
 0x7d8   :  { %v5832_v16 = vadd.f32 %v5778_v58, %v5638_v12 }
 0x7dd   :  { %v15653_v0 = vpop.f32.mrf.mxu2 }
 0x7de   :  { %v15655_v3 = vpop.f32.mrf.mxu3  ;;  %v5861_v5 = vpop.f32.mrf.mxu0 }
 0x7df   :  { %v5884_v21 = vpop.f32.mrf.mxu1  ;;  %v5936_v32 = vadd.f32 %v5861_v5, %v5827_v46 }
 0x7e0   :  { %v5937_v38 = vadd.f32 %v5884_v21, %v5828_v55 }
 0x7e5   :  { %v5907_v8 = vpop.f32.mrf.mxu2 }
 0x7e6   :  { %v5930_v11 = vpop.f32.mrf.mxu3  ;;  %v5864_v31 = vpop.f32.mrf.mxu0  ;;  %v5938_v39 = vadd.f32 %v5907_v8, %v5829_v36 }
 0x7e7   :  { %v5887_v34 = vpop.f32.mrf.mxu1  ;;  %v5939_v5 = vadd.f32 %v5930_v11, %v5830_v60  ;;  %v5940_v21 = vadd.f32 %v5864_v31, %v5831_v20 }
 0x7ed   :  { %v15657_v28 = vpop.f32.mrf.mxu2 }
 0x7ee   :  { %v15659_v45 = vpop.f32.mrf.mxu3  ;;  %v6034_v48 = vpop.f32.mrf.mxu0 }
 0x7ef   :  { %v6057_v63 = vpop.f32.mrf.mxu1  ;;  %v6109_v37 = vadd.f32 %v6034_v48, %v5936_v32  ;;  %v5941_v48 = vadd.f32 %v5887_v34, %v5832_v16 }
 0x7f0   :  { %v6110_v26 = vadd.f32 %v6057_v63, %v5937_v38 }
 0x7f5   :  { %v6080_v52 = vpop.f32.mrf.mxu2 }
 0x7f6   :  { %v6103_v9 = vpop.f32.mrf.mxu3  ;;  %v6037_v47 = vpop.f32.mrf.mxu0  ;;  %v6111_v41 = vadd.f32 %v6080_v52, %v5938_v39  ;;  %v17288_v39 = vld [vmem:[#allocation23_spill] sm:$0xff] }
 0x7f7   :  { %v6060_v10 = vpop.f32.mrf.mxu1  ;;  %v6112_v57 = vadd.f32 %v6103_v9, %v5939_v5  ;;  %v6113_v33 = vadd.f32 %v6037_v47, %v5940_v21  ;;  %v5833_v9 = vadd.f32 %v15653_v0, %v5661_v43  ;;  %v17289_v5 = vld [vmem:[#allocation33_spill] sm:$0xff]  ;;  %v17294_v43 = vld [vmem:[#allocation51_spill] sm:$0xff] }
 0x7f8   :  { %v6114_v61 = vadd.f32 %v6060_v10, %v5941_v48  ;;  %v1434_v21 = vadd.f32 %v17289_v5, %v17288_v39  ;;  %v17290_v48 = vld [vmem:[#allocation29_spill] sm:$0xff] }
 0x7f9   :  { %v5942_v51 = vadd.f32 %v15657_v28, %v5833_v9  ;;  %v17316_v39 = vld [vmem:[#allocation73_spill] sm:$0xff] }
 0x7fd   :  { %v15661_v44 = vpop.f32.mrf.mxu2 }
 0x7fe   :  { %v15663_v22 = vpop.f32.mrf.mxu3  ;;  %v6183_v14 = vpop.f32.mrf.mxu0 }
 0x7ff   :  { %v6206_v13 = vpop.f32.mrf.mxu1  ;;  %v6258_v56 = vadd.f32 %v6183_v14, %v6109_v37 }
 0x800   :  { %v6259_v54 = vadd.f32 %v6206_v13, %v6110_v26  ;;  %v6426_v13 = vpop.permute.xlu1 %6425 }
 0x805   :  { %v6229_v6 = vpop.f32.mrf.mxu2 }
 0x806   :  { %v6252_v4 = vpop.f32.mrf.mxu3  ;;  %v6186_v15 = vpop.f32.mrf.mxu0  ;;  %v6260_v58 = vadd.f32 %v6229_v6, %v6111_v41  ;;  %v17292_v41 = vld [vmem:[#allocation38_spill] sm:$0xff] }
 0x807   :  { %v6209_v59 = vpop.f32.mrf.mxu1  ;;  %v6261_v8 = vadd.f32 %v6252_v4, %v6112_v57  ;;  %v6262_v11 = vadd.f32 %v6186_v15, %v6113_v33  ;;  %v6115_v15 = vadd.f32 %v15661_v44, %v5942_v51  ;;  %v1747_v57 = vadd.f32 %v17292_v41, %v1434_v21  ;;  %v17293_v33 = vld [vmem:[#allocation50_spill] sm:$0xff]  ;;  %v17317_v21 = vld [vmem:[#allocation77_spill] sm:$0xff] }
 0x808   :  { %v6263_v31 = vadd.f32 %v6209_v59, %v6114_v61 }
 0x80d   :  { %v6232_v40 = vpop.f32.mrf.mxu2 }
 0x80e   :  { %v6255_v19 = vpop.f32.mrf.mxu3  ;;  %v6332_v17 = vpop.f32.mrf.mxu0  ;;  %v6264_v37 = vadd.f32 %v6232_v40, %v6115_v15  ;;  %v17306_v15 = vld [vmem:[#allocation48_spill] sm:$0xff] }
 0x80f   :  { %v6355_v23 = vpop.f32.mrf.mxu1  ;;  %v6407_v35 = vadd.f32 %v6332_v17, %v6258_v56 }
 0x810   :  { %v6408_v27 = vadd.f32 %v6355_v23, %v6259_v54  ;;  %v5684_v54 = vadd.f32 %v15651_v25, %v15647_v53 }
 0x811   :  { %v6428_v24 = vadd.f32 %v6421_v18, %v6407_v35 }
 0x812   :  { %v6429_v49 = vadd.f32 %v6421_v18, %v6408_v27  ;;  %v5834_v50 = vadd.f32 %v15655_v3, %v5684_v54  ;;  %v2048_v54 = vadd.f32 %v17294_v43, %v1747_v57  ;;  %v17319_v43 = vld [vmem:[#allocation46_spill] sm:$0xff] }
 0x813   :  { %v15665_v30 = vmax.f32 %v6428_v24, 0.0  ;;  %v17291_v24 = vld [vmem:[#allocation37_spill] sm:$0xff] }
 0x814   :  { %v15667_v29 = vmax.f32 %v6429_v49, 0.0  ;;  %v5943_v46 = vadd.f32 %v15659_v45, %v5834_v50  ;;  %v1746_v49 = vadd.f32 %v17291_v24, %v17290_v48  ;;  %v17299_v50 = vld [vmem:[#allocation74_spill] sm:$0xff] }
 0x815   :  { %v6378_v35 = vpop.f32.mrf.mxu2  ;;  %v15675_v63 = vpack.i.bf16 %v15665_v30, %v17246_v7 }
 0x816   :  { %v6401_v34 = vpop.f32.mrf.mxu3  ;;  %v15678_v52 = vpack.i.bf16 0.0, %v15667_v29  ;;  %v6409_v2 = vadd.f32 %v6378_v35, %v6260_v58  ;;  %v6335_v53 = vpop.f32.mrf.mxu0  ;;  %v6116_v59 = vadd.f32 %v15663_v22, %v5943_v46  ;;  %v11930_v60 = vpack.i.bf16 %v15667_v29, %v15665_v30  ;;  %v17295_v58 = vld [vmem:[#allocation62_spill] sm:$0xff]  ;;  %v17304_v46 = vld [vmem:[#allocation19_spill] sm:$0xff] }
 0x817   :  { %v6410_v47 = vadd.f32 %v6401_v34, %v6261_v8  ;;  %v6358_v25 = vpop.f32.mrf.mxu1  ;;  %v6411_v10 = vadd.f32 %v6335_v53, %v6262_v11  ;;  %11841 = vrot.lane.b32.xlu2 %v15675_v63, %s12531_s7  ;;  %v2047_v61 = vadd.f32 %v17293_v33, %v1746_v49  ;;  %v2349_v8 = vadd.f32 %v17295_v58, %v2048_v54  ;;  %v17296_v11 = vld [vmem:[#allocation63_spill] sm:$0xff]  ;;  %v17297_v35 = vld [vmem:[#allocation22_spill] sm:$0xff]  ;;  %v17298_v34 = vld [vmem:[#allocation32_spill] sm:$0xff] }
 0x818   :  { %v6412_v14 = vadd.f32 %v6358_v25, %v6263_v31  ;;  %11846 = vrot.lane.b32.xlu0 %v15678_v52, %s12531_s7  ;;  %v6430_v0 = vadd.f32 %v6421_v18, %v6409_v2  ;;  %v6265_v28 = vadd.f32 %v6255_v19, %v6116_v59  ;;  %v1429_v9 = vadd.f32 %v17298_v34, %v17297_v35  ;;  %v17301_v25 = vld [vmem:[#allocation28_spill] sm:$0xff]  ;;  %v17322_v34 = vld [vmem:[#allocation66_spill] sm:$0xff] }
 0x819   :  { %v6431_v6 = vadd.f32 %v6421_v18, %v6410_v47  ;;  %v6432_v3 = vadd.f32 %v6426_v13, %v6411_v10  ;;  %v2348_v31 = vadd.f32 %v17296_v11, %v2047_v61  ;;  %v17300_v47 = vld [vmem:[#allocation18_spill] sm:$0xff]  ;;  %v17320_v58 = vld [vmem:[#allocation36_spill] sm:$0xff] }
 0x81a   :  { %v6433_v4 = vadd.f32 %v6426_v13, %v6412_v14  ;;  %v15690_v55 = vmax.f32 %v6430_v0, 0.0  ;;  %v2649_v53 = vadd.f32 %v17300_v47, %v2349_v8  ;;  %v17302_v10 = vld [vmem:[#allocation34_spill] sm:$0xff]  ;;  %v17321_v8 = vld [vmem:[#allocation57_spill] sm:$0xff] }
 0x81b   :  { %v15692_v42 = vmax.f32 %v6431_v6, 0.0  ;;  %v15694_v32 = vmax.f32 %v6432_v3, 0.0  ;;  %v2648_v2 = vadd.f32 %v17299_v50, %v2348_v31  ;;  %v1741_v14 = vadd.f32 %v17302_v10, %v17301_v25  ;;  %v17305_v3 = vld [vmem:[#allocation47_spill] sm:$0xff]  ;;  %v17318_v61 = vld [vmem:[#allocation14_spill] sm:$0xff] }
 0x81c   :  { %v15696_v38 = vmax.f32 %v6433_v4, 0.0  ;;  %v11935_v17 = vpack.i.bf16 %v15690_v55, %v17246_v7  ;;  %v2737_v6 = vadd.f32 %v17304_v46, %v2649_v53  ;;  %v2340_v54 = vadd.f32 %v17319_v43, %v17318_v61  ;;  %v17323_v50 = vld [vmem:[#allocation71_spill] sm:$0xff] }
 0x81d   :  { %v11870_v45 = vpack.i.bf16 %v15692_v42, %v15690_v55  ;;  %v6381_v26 = vpop.f32.mrf.mxu2  ;;  %v11850_v44 = vpack.i.bf16 %v15694_v32, %v17246_v7  ;;  %v11940_v23 = vpack.i.bf16 0.0, %v15692_v42  ;;  %v2736_v0 = vadd.f32 %v17304_v46, %v2648_v2 }
 0x81e   :  { %v6404_v62 = vpop.f32.mrf.mxu3  ;;  %v11860_v22 = vpack.i.bf16 0.0, %v15696_v38  ;;  %v6413_v1 = vadd.f32 %v6381_v26, %v6264_v37  ;;  %v11945_v16 = vpack.i.bf16 %v15696_v38, %v15694_v32  ;;  %v2042_v4 = vadd.f32 %v17305_v3, %v1741_v14  ;;  %v17307_v37 = vld [vmem:[#allocation59_spill] sm:$0xff] }
 0x81f   :  { %v6414_v12 = vadd.f32 %v6404_v62, %v6265_v28  ;;  %11871 = vrot.lane.b32.xlu1 %v11870_v45, %s12531_s7  ;;  %11851 = vrot.lane.b32.xlu2 %v11850_v44, %s12531_s7  ;;  %v17309_v62 = vld [vmem:[#allocation15_spill] sm:$0xff]  ;;  %v2341_v11 = vadd.f32 %v17321_v8, %v17320_v58 }
 0x820   :  { %11861 = vrot.lane.b32.xlu0 %v11860_v22, %s12531_s7  ;;  %v6434_v40 = vadd.f32 %v6426_v13, %v6413_v1  ;;  %v17311_v1 = vld [vmem:[#allocation39_spill] sm:$0xff] }
 0x821   :  { %v6435_v20 = vadd.f32 %v6426_v13, %v6414_v12  ;;  %v17303_v13 = vld [vmem:[#allocation35_spill] sm:$0xff]  ;;  %v17312_v12 = vld [vmem:[#allocation60_spill] sm:$0xff] }
 0x822   :  { %v15706_v56 = vmax.f32 %v6434_v40, 0.0  ;;  %v1742_v51 = vadd.f32 %v17303_v13, %v1429_v9  ;;  %v2346_v40 = vadd.f32 %v17312_v12, %v17311_v1  ;;  %v2640_v9 = vadd.f32 %v17322_v34, %v2340_v54 }
 0x823   :  { %v15708_v19 = vmax.f32 %v6435_v20, 0.0  ;;  %v15783_v20 = vmax.f32 %v2736_v0, 0.0 }
 0x824   :  { %v11950_v27 = vpack.i.bf16 %v15706_v56, %v17246_v7  ;;  %v2043_v59 = vadd.f32 %v17306_v15, %v1742_v51  ;;  %v2646_v5 = vadd.f32 %v17316_v39, %v2346_v40  ;;  %v2728_v51 = vadd.f32 %v17317_v21, %v2640_v9 }
 0x825   :  { %v11875_v36 = vpack.i.bf16 %v15708_v19, %v15706_v56  ;;  %v11955_v18 = vpack.i.bf16 0.0, %v15708_v19  ;;  %v15799_v57 = vpack.i.bf16 %v15783_v20, %v17246_v7 }
 0x826   :  { %v2344_v28 = vadd.f32 %v17307_v37, %v2043_v59  ;;  %v2734_v41 = vadd.f32 %v17304_v46, %v2646_v5  ;;  %v15850_v37 = vmax.f32 %v2728_v51, 0.0 }
 0x827   :  { %11876 = vrot.lane.b32.xlu1 %v11875_v36, %s12531_s7  ;;  %11856 = vrot.lane.b32.xlu2 %v15675_v63, %s12529_s26 }
 0x828   :  { %11866 = vrot.lane.b32.xlu0 %v15678_v52, %s12529_s26  ;;  %v15822_v47 = vmax.f32 %v2734_v41, 0.0 }
 0x82a   :  { %v15846_v59 = vpack.i.bf16 0.0, %v15822_v47 }
 0x82f   :  { %11881 = vrot.lane.b32.xlu1 %v11870_v45, %s12529_s26  ;;  %11886 = vrot.lane.b32.xlu2 %v11850_v44, %s12529_s26 }
 0x830   :  { %11891 = vrot.lane.b32.xlu0 %v11860_v22, %s12529_s26 }
 0x837   :  { %11906 = vrot.lane.b32.xlu1 %v11875_v36, %s12529_s26  ;;  %11896 = vrot.lane.b32.xlu2 %v15675_v63, %s12532_s8 }
 0x838   :  { %11901 = vrot.lane.b32.xlu0 %v15678_v52, %s12532_s8 }
 0x83f   :  { %11911 = vrot.lane.b32.xlu1 %v11870_v45, %s12532_s8  ;;  %11916 = vrot.lane.b32.xlu2 %v11850_v44, %s12532_s8  ;;  %v17308_v45 = vld [vmem:[#allocation61_spill] sm:$0xff] }
 0x840   :  { %11921 = vrot.lane.b32.xlu0 %v11860_v22, %s12532_s8  ;;  %v2343_v26 = vadd.f32 %v17308_v45, %v2042_v4  ;;  %v15840_v4 = vld [vmem:[%s17141_s3 + $0x2f0] sm:$0xff] }
 0x847   :  { %11926 = vrot.lane.b32.xlu1 %v11875_v36, %s12532_s8  ;;  %11931 = vrot.lane.b32.xlu2 %v11930_v60, %s12533_s24 }
 0x848   :  { %11936 = vrot.lane.b32.xlu0 %v11935_v17, %s12533_s24 }
 0x84f   :  { %11941 = vrot.lane.b32.xlu1 %v11940_v23, %s12533_s24  ;;  %11946 = vrot.lane.b32.xlu2 %v11945_v16, %s12533_s24 }
 0x850   :  { %11951 = vrot.lane.b32.xlu0 %v11950_v27, %s12533_s24  ;;  %v17315_v27 = vld [vmem:[#allocation67_spill] sm:$0xff] }
 0x857   :  { %11956 = vrot.lane.b32.xlu1 %v11955_v18, %s12533_s24  ;;  %11961 = vrot.lane.b32.xlu2 %v11930_v60, %s12534_s20 }
 0x858   :  { %11966 = vrot.lane.b32.xlu0 %v11935_v17, %s12534_s20 }
 0x85f   :  { %11971 = vrot.lane.b32.xlu1 %v11940_v23, %s12534_s20  ;;  %11976 = vrot.lane.b32.xlu2 %v11875_v36, %s12534_s20 }
 0x860   :  { %11981 = vrot.lane.b32.xlu0 %v11850_v44, %s12534_s20  ;;  %v17310_v44 = vld [vmem:[#allocation49_spill] sm:$0xff] }
 0x867   :  { %11986 = vrot.lane.b32.xlu1 %v11860_v22, %s12534_s20  ;;  %12001 = vrot.lane.b32.xlu2 %v11875_v36, %s12535_s13  ;;  %v2345_v22 = vadd.f32 %v17310_v44, %v17309_v62  ;;  %v15785_v36 = vmax.f32 %v2737_v6, 0.0  ;;  %v15867_v62 = vld [vmem:[%s17141_s3 + $0x2f8] sm:$0xff] }
 0x868   :  { %11991 = vrot.lane.b32.xlu0 %v11935_v17, %s12535_s13  ;;  %v17313_v17 = vld [vmem:[#allocation72_spill] sm:$0xff] }
 0x869   :  { %v2645_v18 = vadd.f32 %v17315_v27, %v2345_v22  ;;  %v15802_v33 = vpack.i.bf16 0.0, %v15785_v36 }
 0x86b   :  { %v2733_v49 = vadd.f32 %v17304_v46, %v2645_v18 }
 0x86d   :  { %v15820_v2 = vmax.f32 %v2733_v49, 0.0 }
 0x86f   :  { %11996 = vrot.lane.b32.xlu1 %v11940_v23, %s12535_s13  ;;  %12006 = vrot.lane.b32.xlu2 %v11945_v16, %s12535_s13  ;;  %v2643_v23 = vadd.f32 %v17313_v17, %v2343_v26  ;;  %v17314_v16 = vld [vmem:[#allocation25_spill] sm:$0xff]  ;;  %v15835_v3 = vpack.i.bf16 %v15820_v2, %v17246_v7 }
 0x870   :  { %12011 = vrot.lane.b32.xlu0 %v15675_v63, %s12535_s13  ;;  %v2644_v63 = vadd.f32 %v17314_v16, %v2344_v28 }
 0x871   :  { %v15787_v60 = vpop.permute.xlu2 %11841  ;;  %v2731_v48 = vadd.f32 %v17317_v21, %v2643_v23  ;;  %v15889_v23 = vld [vmem:[%s17141_s3 + $0x2e0] sm:$0xff] }
 0x872   :  { %v2732_v24 = vadd.f32 %v17317_v21, %v2644_v63  ;;  %v11844_v25 = vunpack.i.h.bf16 %v15787_v60  ;;  %v11843_v10 = vunpack.i.l.bf16 %v15787_v60 }
 0x873   :  { %v15814_v31 = vmax.f32 %v2731_v48, 0.0 }
 0x874   :  { %v15816_v35 = vmax.f32 %v2732_v24, 0.0  ;;  %v6506_v15 = vsel %vm576_vm3, %v11843_v10, %v11844_v25  ;;  %v15911_v24 = vld [vmem:[%s17141_s3 + $0x2e8] sm:$0xff] }
 0x876   :  { %v15831_v6 = vpack.i.bf16 %v15816_v35, %v15814_v31 }
 0x877   :  { %12016 = vrot.lane.b32.xlu1 %v15678_v52, %s12535_s13  ;;  %12021 = vrot.lane.b32.xlu2 %v15799_v57, %s12529_s26  ;;  %v2641_v52 = vadd.f32 %v17323_v50, %v2341_v11 }
 0x878   :  { %12026 = vrot.lane.b32.xlu0 %v15802_v33, %s12529_s26 }
 0x879   :  { %v11852_v53 = vpop.permute.xlu2 %11851  ;;  %v2729_v46 = vadd.f32 %v17317_v21, %v2641_v52 }
 0x87a   :  { %v11854_v14 = vunpack.i.h.bf16 %v11852_v53  ;;  %v11853_v13 = vunpack.i.l.bf16 %v11852_v53 }
 0x87b   :  { %v15852_v28 = vmax.f32 %v2729_v46, 0.0 }
 0x87c   :  { %v6510_v0 = vsel %vm576_vm3, %v11853_v13, %v11854_v14 }
 0x87d   :  { %6542 = vmatpush.msra.mxu0 %v6510_v0  ;;  %v15862_v26 = vpack.i.bf16 %v15852_v28, %v15850_v37  ;;  %v15946_v0 = vld [vmem:[%s17141_s3 + $0x300] sm:$0xff] }
 0x87f   :  { %12031 = vrot.lane.b32.xlu1 %v15831_v6, %s12529_s26  ;;  %6543 = vmatpush.msra.mxu0 %v6506_v15 }
 0x880   :  { %12036 = vrot.lane.b32.xlu2 %v15835_v3, %s12529_s26  ;;  %12041 = vrot.lane.b32.xlu0 %v15846_v59, %s12529_s26 }
 0x881   :  { %10964 = vmatmul.msk.f32.vlgmr.msra.gmra.mxu0 %vm877_vm4, %v15840_v4  ;;  %v15858_v45 = vpop.permute.xlu2 %11856 }
 0x882   :  { %v11859_v1 = vunpack.i.h.bf16 %v15858_v45  ;;  %v11858_v12 = vunpack.i.l.bf16 %v15858_v45 }
 0x884   :  { %v6644_v16 = vsel %vm62_vm0, %v11858_v12, %v11859_v1 }
 0x887   :  { %12046 = vrot.lane.b32.xlu1 %v15862_v26, %s12529_s26 }
 0x888   :  { %12051 = vrot.lane.b32.xlu2 %v15799_v57, %s12530_s27  ;;  %12056 = vrot.lane.b32.xlu0 %v15802_v33, %s12530_s27 }
 0x889   :  { %10965 = vmatmul.msk.f32.gmra.mxu0 %vm877_vm4, %v15867_v62  ;;  %v15877_v44 = vpop.permute.xlu2 %11886 }
 0x88a   :  { %v11847_v22 = vpop.permute.xlu0 %11846  ;;  %v11889_v40 = vunpack.i.h.bf16 %v15877_v44  ;;  %v11888_v60 = vunpack.i.l.bf16 %v15877_v44 }
 0x88b   :  { %v11848_v39 = vunpack.i.l.bf16 %v11847_v22  ;;  %v11849_v10 = vunpack.i.h.bf16 %v11847_v22 }
 0x88c   :  { %v6648_v17 = vsel %vm62_vm0, %v11888_v60, %v11889_v40 }
 0x88d   :  { %6680 = vmatpush.msrb.mxu0 %v6648_v17  ;;  %v6507_v48 = vsel %vm576_vm3, %v11844_v25, %v11848_v39 }
 0x88f   :  { %12061 = vrot.lane.b32.xlu1 %v15831_v6, %s12530_s27  ;;  %6681 = vmatpush.msrb.mxu0 %v6644_v16 }
 0x890   :  { %12066 = vrot.lane.b32.xlu2 %v15835_v3, %s12530_s27  ;;  %12071 = vrot.lane.b32.xlu0 %v15846_v59, %s12530_s27 }
 0x891   :  { %v11872_v63 = vpop.permute.xlu1 %11871  ;;  %10972 = vmatmul.msk.f32.vlgmr.msrb.gmra.mxu0 %vm877_vm4, %v15889_v23  ;;  %v15902_v27 = vpop.permute.xlu2 %11896 }
 0x892   :  { %v11862_v18 = vpop.permute.xlu0 %11861  ;;  %v11874_v49 = vunpack.i.h.bf16 %v11872_v63  ;;  %v11873_v61 = vunpack.i.l.bf16 %v11872_v63  ;;  %v11899_v50 = vunpack.i.h.bf16 %v15902_v27  ;;  %v11898_v52 = vunpack.i.l.bf16 %v15902_v27 }
 0x893   :  { %v11863_v5 = vunpack.i.l.bf16 %v11862_v18  ;;  %v11864_v43 = vunpack.i.h.bf16 %v11862_v18 }
 0x894   :  { %v6509_v13 = vsel %vm576_vm3, %v11873_v61, %v11874_v49  ;;  %v6508_v51 = vsel %vm576_vm3, %v11849_v10, %v11873_v61  ;;  %v6785_v46 = vsel %vm877_vm4, %v11898_v52, %v11899_v50 }
 0x895   :  { %v6511_v21 = vsel %vm576_vm3, %v11854_v14, %v11863_v5 }
 0x896   :  { %6565 = vmatpush.msrb.mxu1 %v6511_v21 }
 0x897   :  { %12076 = vrot.lane.b32.xlu1 %v15862_v26, %s12530_s27 }
 0x898   :  { %12081 = vrot.lane.b32.xlu2 %v15799_v57, %s12531_s7  ;;  %6566 = vmatpush.msrb.mxu1 %v6507_v48 }
 0x899   :  { %v11877_v41 = vpop.permute.xlu1 %11876  ;;  %12086 = vrot.lane.b32.xlu0 %v15802_v33, %s12531_s7  ;;  %10966 = vmatmul.msk.f32.vlgmr.msrb.gmra.mxu1 %vm877_vm4, %v15840_v4  ;;  %v15921_v8 = vpop.permute.xlu2 %11916 }
 0x89a   :  { %v11879_v54 = vunpack.i.h.bf16 %v11877_v41  ;;  %v11878_v58 = vunpack.i.l.bf16 %v11877_v41  ;;  %10973 = vmatmul.msk.f32.gmra.mxu0 %vm877_vm4, %v15911_v24  ;;  %v15923_v11 = vpop.permute.xlu0 %11866  ;;  %v11919_v34 = vunpack.i.h.bf16 %v15921_v8  ;;  %v11918_v9 = vunpack.i.l.bf16 %v15921_v8 }
 0x89b   :  { %v11868_v60 = vunpack.i.l.bf16 %v15923_v11  ;;  %v11869_v49 = vunpack.i.h.bf16 %v15923_v11  ;;  %v16045_v8 = vpack.i.bf16 %v15814_v31, %v17246_v7 }
 0x89c   :  { %v6512_v53 = vsel %vm576_vm3, %v11864_v43, %v11878_v58  ;;  %v6513_v25 = vsel %vm576_vm3, %v11878_v58, %v11879_v54  ;;  %v6789_v14 = vsel %vm877_vm4, %v11918_v9, %v11919_v34  ;;  %v16014_v58 = vld [vmem:[%s17141_s3 + $0x310] sm:$0xff] }
 0x89d   :  { %6588 = vmatpush.msrb.mxu2 %v6512_v53  ;;  %6611 = vmatpush.msrb.mxu3 %v6513_v25  ;;  %v6645_v16 = vsel %vm62_vm0, %v11859_v1, %v11868_v60 }
 0x89e   :  { %6821 = vmatpush.msra.mxu0 %v6789_v14 }
 0x89f   :  { %6612 = vmatpush.msrb.mxu3 %v6509_v13  ;;  %12091 = vrot.lane.b32.xlu1 %v15831_v6, %s12531_s7 }
 0x8a0   :  { %6589 = vmatpush.msrb.mxu2 %v6508_v51  ;;  %10970 = vmatmul.msk.f32.vlgmr.msrb.gmra.mxu3 %vm877_vm4, %v15840_v4 }
 0x8a1   :  { %10968 = vmatmul.msk.f32.vlgmr.msrb.gmra.mxu2 %vm877_vm4, %v15840_v4  ;;  %6822 = vmatpush.msra.mxu0 %v6785_v46  ;;  %v11882_v15 = vpop.permute.xlu1 %11881  ;;  %v15954_v22 = vpop.permute.xlu2 %11931 }
 0x8a2   :  { %12096 = vrot.lane.b32.xlu2 %v15835_v3, %s12531_s7  ;;  %12101 = vrot.lane.b32.xlu0 %v15846_v59, %s12531_s7  ;;  %v11892_v12 = vpop.permute.xlu0 %11891  ;;  %v11884_v44 = vunpack.i.h.bf16 %v11882_v15  ;;  %v11934_v21 = vunpack.i.h.bf16 %v15954_v22 }
 0x8a3   :  { %10967 = vmatmul.msk.f32.gmra.mxu1 %vm877_vm4, %v15867_v62  ;;  %10982 = vmatmul.msk.f32.vlgmr.msra.gmra.mxu0 %vm877_vm4, %v15946_v0  ;;  %v11893_v4 = vunpack.i.l.bf16 %v11892_v12  ;;  %v11894_v63 = vunpack.i.h.bf16 %v11892_v12 }
 0x8a4   :  { %6930 = vmatpush.msrb.mxu0 %v15694_v32  ;;  %v15976_v32 = vld [vmem:[%s17141_s3 + $0x308] sm:$0xff] }
 0x8a5   :  { %v6649_v17 = vsel %vm62_vm0, %v11889_v40, %v11893_v4  ;;  %v11883_v40 = vunpack.i.l.bf16 %v11882_v15  ;;  %v16072_v15 = vpack.i.bf16 0.0, %v15816_v35 }
 0x8a6   :  { %6931 = vmatpush.msrb.mxu0 %v15665_v30  ;;  %6703 = vmatpush.msra.mxu1 %v6649_v17  ;;  %v16089_v17 = vpack.i.bf16 %v15850_v37, %v17246_v7 }
 0x8a7   :  { %12106 = vrot.lane.b32.xlu1 %v15862_v26, %s12531_s7  ;;  %v6647_v61 = vsel %vm62_vm0, %v11883_v40, %v11884_v44  ;;  %v6646_v43 = vsel %vm62_vm0, %v11869_v49, %v11883_v40 }
 0x8a8   :  { %10971 = vmatmul.msk.f32.gmra.mxu3 %vm877_vm4, %v15867_v62  ;;  %6704 = vmatpush.msra.mxu1 %v6645_v16  ;;  %v16097_v16 = vld [vmem:[%s17141_s3 + $0x320] sm:$0xff] }
 0x8a9   :  { %10969 = vmatmul.msk.f32.gmra.mxu2 %vm877_vm4, %v15867_v62  ;;  %v11907_v30 = vpop.permute.xlu1 %11906  ;;  %v15984_v1 = vpop.permute.xlu2 %11946 }
 0x8aa   :  { %v11909_v18 = vunpack.i.h.bf16 %v11907_v30  ;;  %v11908_v45 = vunpack.i.l.bf16 %v11907_v30  ;;  %12111 = vrot.lane.b32.xlu2 %v15799_v57, %s12532_s8  ;;  %12116 = vrot.lane.b32.xlu0 %v15802_v33, %s12532_s8  ;;  %v15986_v39 = vpop.permute.xlu0 %11901  ;;  %v11949_v62 = vunpack.i.h.bf16 %v15984_v1  ;;  %v11948_v5 = vunpack.i.l.bf16 %v15984_v1 }
 0x8ab   :  { %10974 = vmatmul.msk.f32.vlgmr.msra.gmra.mxu1 %vm877_vm4, %v15889_v23  ;;  %10983 = vmatmul.msk.f32.gmra.mxu0 %vm877_vm4, %v15976_v32  ;;  %v11933_v57 = vunpack.i.l.bf16 %v15954_v22  ;;  %v11903_v52 = vunpack.i.l.bf16 %v15986_v39  ;;  %v11904_v46 = vunpack.i.h.bf16 %v15986_v39  ;;  %v16111_v30 = vpack.i.bf16 0.0, %v15852_v28  ;;  %v16130_v22 = vld [vmem:[%s17141_s3 + $0x328] sm:$0xff] }
 0x8ac   :  { %v6650_v33 = vsel %vm62_vm0, %v11894_v63, %v11908_v45  ;;  %v6651_v48 = vsel %vm62_vm0, %v11908_v45, %v11909_v18  ;;  %v7071_v41 = vsel %vm1468_vm5, %v11948_v5, %v11949_v62 }
 0x8ad   :  { %6726 = vmatpush.msra.mxu2 %v6650_v33  ;;  %6749 = vmatpush.msra.mxu3 %v6651_v48  ;;  %v7067_v54 = vsel %vm1468_vm5, %v11933_v57, %v11934_v21 }
 0x8ae   :  { %7103 = vmatpush.msra.mxu0 %v7071_v41 }
 0x8af   :  { %6750 = vmatpush.msra.mxu3 %v6647_v61  ;;  %12121 = vrot.lane.b32.xlu1 %v15831_v6, %s12532_s8 }
 0x8b0   :  { %6727 = vmatpush.msra.mxu2 %v6646_v43  ;;  %10978 = vmatmul.msk.f32.vlgmr.msra.gmra.mxu3 %vm877_vm4, %v15889_v23 }
 0x8b1   :  { %10976 = vmatmul.msk.f32.vlgmr.msra.gmra.mxu2 %vm877_vm4, %v15889_v23  ;;  %v11912_v11 = vpop.permute.xlu1 %11911  ;;  %7104 = vmatpush.msra.mxu0 %v7067_v54  ;;  %v16022_v6 = vpop.permute.xlu2 %11961 }
 0x8b2   :  { %12126 = vrot.lane.b32.xlu2 %v15835_v3, %s12532_s8  ;;  %12131 = vrot.lane.b32.xlu0 %v15846_v59, %s12532_s8  ;;  %v11922_v9 = vpop.permute.xlu0 %11921  ;;  %v6786_v3 = vsel %vm877_vm4, %v11899_v50, %v11903_v52  ;;  %v16041_v59 = vpack.i.bf16 %v15785_v36, %v15783_v20  ;;  %v11914_v27 = vunpack.i.h.bf16 %v11912_v11  ;;  %v11913_v50 = vunpack.i.l.bf16 %v11912_v11 }
 0x8b3   :  { %10975 = vmatmul.msk.f32.gmra.mxu1 %vm877_vm4, %v15911_v24  ;;  %10992 = vmatmul.msk.f32.vlgmr.msrb.gmra.mxu0 %vm877_vm4, %v16014_v58  ;;  %v11923_v23 = vunpack.i.l.bf16 %v11922_v9  ;;  %v11924_v25 = vunpack.i.h.bf16 %v11922_v9 }
 0x8b4   :  { %v6788_v12 = vsel %vm877_vm4, %v11913_v50, %v11914_v27  ;;  %v6787_v60 = vsel %vm877_vm4, %v11904_v46, %v11913_v50 }
 0x8b5   :  { %v6790_v53 = vsel %vm877_vm4, %v11919_v34, %v11923_v23 }
 0x8b6   :  { %6844 = vmatpush.msrb.mxu1 %v6790_v53 }
 0x8b7   :  { %12136 = vrot.lane.b32.xlu1 %v15862_v26, %s12532_s8  ;;  %v16050_v26 = vld [vmem:[%s17141_s3 + $0x318] sm:$0xff] }
 0x8b8   :  { %10979 = vmatmul.msk.f32.gmra.mxu3 %vm877_vm4, %v15911_v24  ;;  %6845 = vmatpush.msrb.mxu1 %v6786_v3 }
 0x8b9   :  { %10977 = vmatmul.msk.f32.gmra.mxu2 %vm877_vm4, %v15911_v24  ;;  %v11927_v34 = vpop.permute.xlu1 %11926  ;;  %v16059_v13 = vpop.permute.xlu2 %11976 }
 0x8ba   :  { %6953 = vmatpush.msra.mxu1 %v15696_v38  ;;  %v11929_v10 = vunpack.i.h.bf16 %v11927_v34  ;;  %v11928_v14 = vunpack.i.l.bf16 %v11927_v34  ;;  %12141 = vrot.lane.b32.xlu2 %v16041_v59, %s12533_s24  ;;  %v16061_v51 = vpop.permute.xlu0 %11936  ;;  %v11979_v33 = vunpack.i.h.bf16 %v16059_v13  ;;  %v11978_v48 = vunpack.i.l.bf16 %v16059_v13 }
 0x8bb   :  { %12146 = vrot.lane.b32.xlu0 %v16045_v8, %s12533_s24  ;;  %10984 = vmatmul.msk.f32.vlgmr.msrb.gmra.mxu1 %vm877_vm4, %v15946_v0  ;;  %v11964_v34 = vunpack.i.h.bf16 %v16022_v6 }
 0x8bc   :  { %10993 = vmatmul.msk.f32.gmra.mxu0 %vm877_vm4, %v16050_v26  ;;  %6954 = vmatpush.msra.mxu1 %v15667_v29  ;;  %v6791_v38 = vsel %vm877_vm4, %v11924_v25, %v11928_v14  ;;  %v6792_v24 = vsel %vm877_vm4, %v11928_v14, %v11929_v10  ;;  %v16082_v29 = vpack.i.bf16 %v15822_v47, %v15820_v2  ;;  %v11963_v25 = vunpack.i.l.bf16 %v16022_v6 }
 0x8bd   :  { %6867 = vmatpush.msrb.mxu2 %v6791_v38  ;;  %6890 = vmatpush.msrb.mxu3 %v6792_v24  ;;  %v7222_v61 = vsel %vm1769_vm6, %v11978_v48, %v11979_v33 }
 0x8bf   :  { %6891 = vmatpush.msrb.mxu3 %v6788_v12  ;;  %12151 = vrot.lane.b32.xlu1 %v16072_v15, %s12533_s24 }
 0x8c0   :  { %6868 = vmatpush.msrb.mxu2 %v6787_v60  ;;  %10988 = vmatmul.msk.f32.vlgmr.msrb.gmra.mxu3 %vm877_vm4, %v15946_v0 }
 0x8c1   :  { %10986 = vmatmul.msk.f32.vlgmr.msrb.gmra.mxu2 %vm877_vm4, %v15946_v0  ;;  %6999 = vmatpush.msra.mxu3 %v15708_v19  ;;  %v11942_v4 = vpop.permute.xlu1 %11941  ;;  %v16099_v44 = vpop.permute.xlu2 %12001  ;;  %v11938_v19 = vunpack.i.l.bf16 %v16061_v51 }
 0x8c2   :  { %6976 = vmatpush.msra.mxu2 %v15706_v56  ;;  %12156 = vrot.lane.b32.xlu2 %v16082_v29, %s12533_s24  ;;  %v11952_v0 = vpop.permute.xlu0 %11951  ;;  %v11943_v63 = vunpack.i.l.bf16 %v11942_v4  ;;  %v11944_v5 = vunpack.i.h.bf16 %v11942_v4  ;;  %v12004_v12 = vunpack.i.h.bf16 %v16099_v44  ;;  %v12003_v60 = vunpack.i.l.bf16 %v16099_v44 }
 0x8c3   :  { %12161 = vrot.lane.b32.xlu0 %v16089_v17, %s12533_s24  ;;  %10985 = vmatmul.msk.f32.gmra.mxu1 %vm877_vm4, %v15976_v32  ;;  %v11953_v56 = vunpack.i.l.bf16 %v11952_v0  ;;  %v11954_v18 = vunpack.i.h.bf16 %v11952_v0 }
 0x8c4   :  { %6977 = vmatpush.msra.mxu2 %v15690_v55  ;;  %7000 = vmatpush.msra.mxu3 %v15692_v42  ;;  %v7068_v55 = vsel %vm1468_vm5, %v11934_v21, %v11938_v19  ;;  %v7070_v41 = vsel %vm1468_vm5, %v11943_v63, %v11944_v5  ;;  %v11010_v19 = vld [vmem:[%s17141_s3 + $0x330] sm:$0xff] }
 0x8c5   :  { %11002 = vmatmul.msk.f32.vlgmr.msra.gmra.mxu0 %vm877_vm4, %v16097_v16  ;;  %v7072_v40 = vsel %vm1468_vm5, %v11949_v62, %v11953_v56  ;;  %v7216_v56 = vsel %vm1769_vm6, %v11963_v25, %v11964_v34 }
 0x8c6   :  { %7126 = vmatpush.msrb.mxu1 %v7072_v40 }
 0x8c7   :  { %12166 = vrot.lane.b32.xlu1 %v16111_v30, %s12533_s24 }
 0x8c8   :  { %10989 = vmatmul.msk.f32.gmra.mxu3 %vm877_vm4, %v15976_v32  ;;  %7127 = vmatpush.msrb.mxu1 %v7068_v55 }
 0x8c9   :  { %10987 = vmatmul.msk.f32.gmra.mxu2 %vm877_vm4, %v15976_v32  ;;  %v11957_v42 = vpop.permute.xlu1 %11956  ;;  %v16132_v39 = vpop.permute.xlu2 %12006  ;;  %v11939_v32 = vunpack.i.h.bf16 %v16061_v51 }
 0x8ca   :  { %v11959_v45 = vunpack.i.h.bf16 %v11957_v42  ;;  %v11958_v1 = vunpack.i.l.bf16 %v11957_v42  ;;  %12171 = vrot.lane.b32.xlu2 %v16041_v59, %s12534_s20  ;;  %v16134_v62 = vpop.permute.xlu0 %11966  ;;  %v12009_v4 = vunpack.i.h.bf16 %v16132_v39  ;;  %v12008_v0 = vunpack.i.l.bf16 %v16132_v39 }
 0x8cb   :  { %12176 = vrot.lane.b32.xlu0 %v16045_v8, %s12534_s20  ;;  %10994 = vmatmul.msk.f32.vlgmr.msra.gmra.mxu1 %vm877_vm4, %v16014_v58  ;;  %v7069_v49 = vsel %vm1468_vm5, %v11939_v32, %v11943_v63  ;;  %v11969_v54 = vunpack.i.h.bf16 %v16134_v62  ;;  %v11968_v24 = vunpack.i.l.bf16 %v16134_v62  ;;  %v7371_v42 = vsel %vm2070_vm7, %v12003_v60, %v12004_v12 }
 0x8cc   :  { %v7073_v21 = vsel %vm1468_vm5, %v11954_v18, %v11958_v1  ;;  %v7074_v57 = vsel %vm1468_vm5, %v11958_v1, %v11959_v45  ;;  %v7369_v55 = vsel %vm2070_vm7, %v12008_v0, %v12009_v4 }
 0x8cd   :  { %11003 = vmatmul.msk.f32.gmra.mxu0 %vm877_vm4, %v16130_v22  ;;  %7149 = vmatpush.msrb.mxu2 %v7073_v21  ;;  %v7217_v40 = vsel %vm1769_vm6, %v11964_v34, %v11968_v24 }
 0x8ce   :  { %7172 = vmatpush.msrb.mxu3 %v7074_v57  ;;  %v11011_v57 = vld [vmem:[%s17141_s3 + $0x338] sm:$0xff] }
 0x8cf   :  { %12181 = vrot.lane.b32.xlu1 %v16072_v15, %s12534_s20  ;;  %7150 = vmatpush.msrb.mxu2 %v7069_v49 }
 0x8d0   :  { %7173 = vmatpush.msrb.mxu3 %v7070_v41 }
 0x8d1   :  { %10996 = vmatmul.msk.f32.vlgmr.msra.gmra.mxu2 %vm877_vm4, %v16014_v58  ;;  %10998 = vmatmul.msk.f32.vlgmr.msra.gmra.mxu3 %vm877_vm4, %v16014_v58  ;;  %v11972_v43 = vpop.permute.xlu1 %11971  ;;  %v16159_v9 = vpop.permute.xlu2 %12021 }
 0x8d2   :  { %7298 = vmatpush.msra.mxu2 %v7222_v61  ;;  %v11973_v11 = vunpack.i.l.bf16 %v11972_v43  ;;  %12186 = vrot.lane.b32.xlu2 %v16082_v29, %s12534_s20  ;;  %v11982_v52 = vpop.permute.xlu0 %11981  ;;  %v11974_v23 = vunpack.i.h.bf16 %v11972_v43 }
 0x8d3   :  { %12191 = vrot.lane.b32.xlu0 %v16089_v17, %s12534_s20  ;;  %10995 = vmatmul.msk.f32.gmra.mxu1 %vm877_vm4, %v16050_v26  ;;  %v11983_v58 = vunpack.i.l.bf16 %v11982_v52  ;;  %v11984_v10 = vunpack.i.h.bf16 %v11982_v52 }
 0x8d4   :  { %v7218_v53 = vsel %vm1769_vm6, %v11969_v54, %v11973_v11  ;;  %v7219_v27 = vsel %vm1769_vm6, %v11973_v11, %v11974_v23 }
 0x8d5   :  { %7299 = vmatpush.msra.mxu2 %v7218_v53  ;;  %v7223_v3 = vsel %vm1769_vm6, %v11979_v33, %v11983_v58  ;;  %v12024_v58 = vunpack.i.h.bf16 %v16159_v9  ;;  %v12023_v53 = vunpack.i.l.bf16 %v16159_v9 }
 0x8d6   :  { %7321 = vmatpush.msra.mxu3 %v7223_v3 }
 0x8d7   :  { %12196 = vrot.lane.b32.xlu1 %v16111_v30, %s12534_s20  ;;  %v7600_v9 = vsel %vm62_vm0, %v12023_v53, %v12024_v58 }
 0x8d8   :  { %7322 = vmatpush.msra.mxu3 %v7219_v27 }
 0x8d9   :  { %10997 = vmatmul.msk.f32.gmra.mxu2 %vm877_vm4, %v16050_v26  ;;  %10999 = vmatmul.msk.f32.gmra.mxu3 %vm877_vm4, %v16050_v26  ;;  %v11987_v50 = vpop.permute.xlu1 %11986 }
 0x8da   :  { %v11989_v14 = vunpack.i.h.bf16 %v11987_v50  ;;  %v11988_v13 = vunpack.i.l.bf16 %v11987_v50  ;;  %12201 = vrot.lane.b32.xlu2 %v16041_v59, %s12535_s13  ;;  %v16178_v51 = vpop.permute.xlu2 %12036  ;;  %v11992_v38 = vpop.permute.xlu0 %11991 }
 0x8db   :  { %12206 = vrot.lane.b32.xlu0 %v16045_v8, %s12535_s13  ;;  %11004 = vmatmul.msk.f32.vlgmr.msrb.gmra.mxu1 %vm877_vm4, %v16097_v16  ;;  %v11993_v26 = vunpack.i.l.bf16 %v11992_v38  ;;  %v11994_v18 = vunpack.i.h.bf16 %v11992_v38  ;;  %v12039_v33 = vunpack.i.h.bf16 %v16178_v51  ;;  %v12038_v48 = vunpack.i.l.bf16 %v16178_v51  ;;  %v11021_v38 = vld [vmem:[%s17141_s3 + $0x348] sm:$0xff] }
 0x8dc   :  { %v7220_v6 = vsel %vm1769_vm6, %v11984_v10, %v11988_v13  ;;  %v7221_v46 = vsel %vm1769_vm6, %v11988_v13, %v11989_v14 }
 0x8dd   :  { %7252 = vmatpush.msrb.mxu0 %v7220_v6  ;;  %7275 = vmatpush.msra.mxu1 %v7221_v46  ;;  %v7372_v44 = vsel %vm2070_vm7, %v12004_v12, %v11993_v26  ;;  %v7598_v3 = vsel %vm62_vm0, %v12038_v48, %v12039_v33 }
 0x8df   :  { %12211 = vrot.lane.b32.xlu1 %v16072_v15, %s12535_s13  ;;  %7253 = vmatpush.msrb.mxu0 %v7216_v56 }
 0x8e0   :  { %7276 = vmatpush.msra.mxu1 %v7217_v40  ;;  %11012 = vmatmul.msk.f32.vlgmr.msrb.gmra.mxu0 %vm877_vm4, %v11010_v19 }
 0x8e1   :  { %11006 = vmatmul.msk.f32.vlgmr.msrb.gmra.mxu2 %vm877_vm4, %v16097_v16  ;;  %11008 = vmatmul.msk.f32.vlgmr.msrb.gmra.mxu3 %vm877_vm4, %v16097_v16  ;;  %v11997_v63 = vpop.permute.xlu1 %11996 }
 0x8e2   :  { %7401 = vmatpush.msra.mxu0 %v7369_v55  ;;  %7447 = vmatpush.msrb.mxu2 %v7371_v42  ;;  %v11999_v45 = vunpack.i.h.bf16 %v11997_v63  ;;  %v11998_v1 = vunpack.i.l.bf16 %v11997_v63  ;;  %v16206_v39 = vpop.permute.xlu2 %12051  ;;  %v12012_v62 = vpop.permute.xlu0 %12011  ;;  %v11034_v63 = vld [vmem:[%s17141_s3 + $0x370] sm:$0xff] }
 0x8e3   :  { %7470 = vmatpush.msrb.mxu3 %v7372_v44  ;;  %12216 = vrot.lane.b32.xlu2 %v16082_v29, %s12535_s13  ;;  %v12013_v5 = vunpack.i.l.bf16 %v12012_v62  ;;  %v12014_v41 = vunpack.i.h.bf16 %v12012_v62  ;;  %v12054_v44 = vunpack.i.h.bf16 %v16206_v39  ;;  %v12053_v55 = vunpack.i.l.bf16 %v16206_v39 }
 0x8e4   :  { %12221 = vrot.lane.b32.xlu0 %v16089_v17, %s12535_s13  ;;  %11005 = vmatmul.msk.f32.gmra.mxu1 %vm877_vm4, %v16130_v22  ;;  %v7367_v16 = vsel %vm2070_vm7, %v11994_v18, %v11998_v1  ;;  %v7368_v32 = vsel %vm2070_vm7, %v11998_v1, %v11999_v45 }
 0x8e5   :  { %7448 = vmatpush.msrb.mxu2 %v7367_v16  ;;  %7471 = vmatpush.msrb.mxu3 %v7368_v32  ;;  %v7370_v21 = vsel %vm2070_vm7, %v12009_v4, %v12013_v5  ;;  %v7738_v1 = vsel %vm315_vm2, %v12053_v55, %v12054_v44 }
 0x8e6   :  { %7424 = vmatpush.msrb.mxu1 %v7370_v21 }
 0x8e7   :  { %12226 = vrot.lane.b32.xlu1 %v16111_v30, %s12535_s13 }
 0x8e8   :  { %11013 = vmatmul.msk.f32.gmra.mxu0 %vm877_vm4, %v11011_v57 }
 0x8e9   :  { %11007 = vmatmul.msk.f32.gmra.mxu2 %vm877_vm4, %v16130_v22  ;;  %11009 = vmatmul.msk.f32.gmra.mxu3 %vm877_vm4, %v16130_v22  ;;  %v12017_v49 = vpop.permute.xlu1 %12016 }
 0x8ea   :  { %v12019_v61 = vunpack.i.h.bf16 %v12017_v49  ;;  %v12018_v43 = vunpack.i.l.bf16 %v12017_v49  ;;  %v16229_v54 = vpop.permute.xlu2 %12066  ;;  %v12027_v11 = vpop.permute.xlu0 %12026  ;;  %v11035_v49 = vld [vmem:[%s17141_s3 + $0x378] sm:$0xff] }
 0x8eb   :  { %12231 = vrot.lane.b32.xlu2 %v16041_v59, %s12530_s27  ;;  %v12028_v52 = vunpack.i.l.bf16 %v12027_v11  ;;  %v11020_v59 = vld [vmem:[%s17141_s3 + $0x340] sm:$0xff]  ;;  %v12029_v34 = vunpack.i.h.bf16 %v12027_v11  ;;  %v12068_v26 = vunpack.i.l.bf16 %v16229_v54 }
 0x8ec   :  { %12236 = vrot.lane.b32.xlu0 %v16045_v8, %s12530_s27  ;;  %11014 = vmatmul.msk.f32.vlgmr.msra.gmra.mxu1 %vm877_vm4, %v11010_v19  ;;  %v7365_v23 = vsel %vm2070_vm7, %v12014_v41, %v12018_v43  ;;  %v7366_v22 = vsel %vm2070_vm7, %v12018_v43, %v12019_v61 }
 0x8ed   :  { %7402 = vmatpush.msra.mxu0 %v7365_v23  ;;  %7425 = vmatpush.msrb.mxu1 %v7366_v22  ;;  %v7601_v8 = vsel %vm62_vm0, %v12024_v58, %v12028_v52 }
 0x8ef   :  { %7630 = vmatpush.msrb.mxu0 %v7598_v3  ;;  %12241 = vrot.lane.b32.xlu1 %v16072_v15, %s12530_s27 }
 0x8f0   :  { %11022 = vmatmul.msk.f32.vlgmr.msra.gmra.mxu0 %vm877_vm4, %v11020_v59 }
 0x8f1   :  { %11016 = vmatmul.msk.f32.vlgmr.msra.gmra.mxu2 %vm877_vm4, %v11010_v19  ;;  %11018 = vmatmul.msk.f32.vlgmr.msra.gmra.mxu3 %vm877_vm4, %v11010_v19  ;;  %v12032_v27 = vpop.permute.xlu1 %12031 }
 0x8f2   :  { %7676 = vmatpush.msra.mxu2 %v7600_v9  ;;  %7699 = vmatpush.msra.mxu3 %v7601_v8  ;;  %v12034_v50 = vunpack.i.h.bf16 %v12032_v27  ;;  %v12033_v25 = vunpack.i.l.bf16 %v12032_v27  ;;  %v16251_v10 = vpop.permute.xlu2 %12081  ;;  %v12042_v15 = vpop.permute.xlu0 %12041 }
 0x8f3   :  { %12246 = vrot.lane.b32.xlu2 %v16082_v29, %s12530_s27  ;;  %v12043_v14 = vunpack.i.l.bf16 %v12042_v15  ;;  %v11123_v29 = vld [vmem:[%s17142_s4 + $0x68] sm:$0xff]  ;;  %v12044_v46 = vunpack.i.h.bf16 %v12042_v15  ;;  %v12084_v9 = vunpack.i.h.bf16 %v16251_v10  ;;  %v12083_v27 = vunpack.i.l.bf16 %v16251_v10 }
 0x8f4   :  { %12251 = vrot.lane.b32.xlu0 %v16089_v17, %s12530_s27  ;;  %11015 = vmatmul.msk.f32.gmra.mxu1 %vm877_vm4, %v11011_v57  ;;  %v7596_v13 = vsel %vm62_vm0, %v12029_v34, %v12033_v25  ;;  %v7597_v51 = vsel %vm62_vm0, %v12033_v25, %v12034_v50  ;;  %v12069_v17 = vunpack.i.h.bf16 %v16229_v54  ;;  %v11032_v50 = vld [vmem:[%s17141_s3 + $0x360] sm:$0xff] }
 0x8f5   :  { %7677 = vmatpush.msra.mxu2 %v7596_v13  ;;  %7700 = vmatpush.msra.mxu3 %v7597_v51  ;;  %v7599_v24 = vsel %vm62_vm0, %v12039_v33, %v12043_v14  ;;  %v7879_v10 = vsel %vm576_vm3, %v12083_v27, %v12084_v9 }
 0x8f6   :  { %7653 = vmatpush.msra.mxu1 %v7599_v24  ;;  %v7736_v42 = vsel %vm315_vm2, %v12068_v26, %v12069_v17 }
 0x8f7   :  { %12256 = vrot.lane.b32.xlu1 %v16111_v30, %s12530_s27  ;;  %v11122_v30 = vld [vmem:[%s17142_s4 + $0x60] sm:$0xff] }
 0x8f8   :  { %11023 = vmatmul.msk.f32.gmra.mxu0 %vm877_vm4, %v11021_v38 }
 0x8f9   :  { %11017 = vmatmul.msk.f32.gmra.mxu2 %vm877_vm4, %v11011_v57  ;;  %11019 = vmatmul.msk.f32.gmra.mxu3 %vm877_vm4, %v11011_v57  ;;  %v12047_v6 = vpop.permute.xlu1 %12046 }
 0x8fa   :  { %v12049_v12 = vunpack.i.h.bf16 %v12047_v6  ;;  %v12048_v60 = vunpack.i.l.bf16 %v12047_v6  ;;  %v12057_v4 = vpop.permute.xlu0 %12056 }
 0x8fb   :  { %8883 = vperm.xlu2 %11298, %v11123_v29   ;;  %v12058_v19 = vunpack.i.l.bf16 %v12057_v4  ;;  %v12059_v62 = vunpack.i.h.bf16 %v12057_v4 }
 0x8fc   :  { %8878 = vperm.xlu0 %11359, %v11122_v30   ;;  %11024 = vmatmul.msk.f32.vlgmr.msrb.gmra.mxu1 %vm877_vm4, %v11020_v59  ;;  %v16278_v0 = vpop.permute.xlu2 %12096  ;;  %v7594_v56 = vsel %vm62_vm0, %v12044_v46, %v12048_v60  ;;  %v7595_v40 = vsel %vm62_vm0, %v12048_v60, %v12049_v12  ;;  %v11033_v30 = vld [vmem:[%s17141_s3 + $0x368] sm:$0xff] }
 0x8fd   :  { %7631 = vmatpush.msrb.mxu0 %v7594_v56  ;;  %7654 = vmatpush.msra.mxu1 %v7595_v40  ;;  %v7739_v45 = vsel %vm315_vm2, %v12054_v44, %v12058_v19  ;;  %v12099_v43 = vunpack.i.h.bf16 %v16278_v0  ;;  %v12098_v54 = vunpack.i.l.bf16 %v16278_v0 }
 0x8fe   :  { %v16288_v18 = vpop.f32.mrf.mxu0 }
 0x8ff   :  { %7768 = vmatpush.msra.mxu0 %v7736_v42  ;;  %17324 = vst [vmem:[#allocation16_spill] sm:$0xff] %v16288_v18  ;;  %v7877_v34 = vsel %vm576_vm3, %v12098_v54, %v12099_v43 }
 0x900   :  { %11036 = vmatmul.msk.f32.vlgmr.msrb.gmra.mxu0 %vm877_vm4, %v11034_v63 }
 0x901   :  { %11026 = vmatmul.msk.f32.vlgmr.msrb.gmra.mxu2 %vm877_vm4, %v11020_v59  ;;  %11028 = vmatmul.msk.f32.vlgmr.msrb.gmra.mxu3 %vm877_vm4, %v11020_v59  ;;  %v12062_v39 = vpop.permute.xlu1 %12061 }
 0x902   :  { %7814 = vmatpush.msrb.mxu2 %v7738_v1  ;;  %7837 = vmatpush.msrb.mxu3 %v7739_v45  ;;  %v12064_v5 = vunpack.i.h.bf16 %v12062_v39  ;;  %v12063_v16 = vunpack.i.l.bf16 %v12062_v39  ;;  %v12072_v32 = vpop.permute.xlu0 %12071 }
 0x903   :  { %v12073_v57 = vunpack.i.l.bf16 %v12072_v32  ;;  %v12074_v52 = vunpack.i.h.bf16 %v12072_v32 }
 0x904   :  { %11025 = vmatmul.msk.f32.gmra.mxu1 %vm877_vm4, %v11021_v38  ;;  %v16296_v21 = vpop.permute.xlu2 %12111  ;;  %v7734_v33 = vsel %vm315_vm2, %v12059_v62, %v12063_v16  ;;  %v7735_v48 = vsel %vm315_vm2, %v12063_v16, %v12064_v5  ;;  %v11052_v5 = vld [vmem:[%s17141_s3 + $0x380] sm:$0xff] }
 0x905   :  { %7815 = vmatpush.msrb.mxu2 %v7734_v33  ;;  %7838 = vmatpush.msrb.mxu3 %v7735_v48  ;;  %v7737_v61 = vsel %vm315_vm2, %v12069_v17, %v12073_v57  ;;  %v12114_v45 = vunpack.i.h.bf16 %v16296_v21  ;;  %v12113_v1 = vunpack.i.l.bf16 %v16296_v21 }
 0x906   :  { %v16303_v41 = vpop.f32.mrf.mxu0  ;;  %7791 = vmatpush.msrb.mxu1 %v7737_v61 }
 0x907   :  { %17325 = vst [vmem:[#allocation20_spill] sm:$0xff] %v16303_v41  ;;  %v8028_v21 = vsel %vm877_vm4, %v12113_v1, %v12114_v45 }
 0x908   :  { %11037 = vmatmul.msk.f32.gmra.mxu0 %vm877_vm4, %v11035_v49 }
 0x909   :  { %11027 = vmatmul.msk.f32.gmra.mxu2 %vm877_vm4, %v11021_v38  ;;  %11029 = vmatmul.msk.f32.gmra.mxu3 %vm877_vm4, %v11021_v38  ;;  %v12077_v11 = vpop.permute.xlu1 %12076 }
 0x90a   :  { %v12079_v23 = vunpack.i.h.bf16 %v12077_v11  ;;  %v12078_v22 = vunpack.i.l.bf16 %v12077_v11 }
 0x90b   :  { %v12087_v58 = vpop.permute.xlu0 %12086 }
 0x90c   :  { %11038 = vmatmul.msk.f32.vlgmr.msra.gmra.mxu1 %vm877_vm4, %v11034_v63  ;;  %v16312_v53 = vpop.permute.xlu2 %12126  ;;  %v12088_v3 = vunpack.i.l.bf16 %v12087_v58  ;;  %v7732_v59 = vsel %vm315_vm2, %v12074_v52, %v12078_v22  ;;  %v7733_v8 = vsel %vm315_vm2, %v12078_v22, %v12079_v23  ;;  %v12089_v13 = vunpack.i.h.bf16 %v12087_v58 }
 0x90d   :  { %7769 = vmatpush.msra.mxu0 %v7732_v59  ;;  %7792 = vmatpush.msrb.mxu1 %v7733_v8  ;;  %v12129_v60 = vunpack.i.h.bf16 %v16312_v53  ;;  %v12128_v4 = vunpack.i.l.bf16 %v16312_v53  ;;  %v11053_v53 = vld [vmem:[%s17141_s3 + $0x388] sm:$0xff] }
 0x90e   :  { %v16322_v25 = vpop.f32.mrf.mxu0  ;;  %v7880_v15 = vsel %vm576_vm3, %v12084_v9, %v12088_v3 }
 0x90f   :  { %7909 = vmatpush.msrb.mxu0 %v7877_v34  ;;  %17326 = vst [vmem:[#allocation30_spill] sm:$0xff] %v16322_v25  ;;  %v8026_v62 = vsel %vm877_vm4, %v12128_v4, %v12129_v60 }
 0x910   :  { %11044 = vmatmul.msk.f32.vlgmr.msra.gmra.mxu0 %vm877_vm4, %v11032_v50 }
 0x911   :  { %11040 = vmatmul.msk.f32.vlgmr.msra.gmra.mxu2 %vm877_vm4, %v11034_v63  ;;  %11042 = vmatmul.msk.f32.vlgmr.msra.gmra.mxu3 %vm877_vm4, %v11034_v63  ;;  %v12092_v14 = vpop.permute.xlu1 %12091 }
 0x912   :  { %7955 = vmatpush.msra.mxu2 %v7879_v10  ;;  %7978 = vmatpush.msra.mxu3 %v7880_v15  ;;  %v12094_v51 = vunpack.i.h.bf16 %v12092_v14  ;;  %v12093_v38 = vunpack.i.l.bf16 %v12092_v14 }
 0x914   :  { %11039 = vmatmul.msk.f32.gmra.mxu1 %vm877_vm4, %v11035_v49  ;;  %v12102_v24 = vpop.permute.xlu0 %12101  ;;  %v7875_v29 = vsel %vm576_vm3, %v12089_v13, %v12093_v38  ;;  %v7876_v17 = vsel %vm576_vm3, %v12093_v38, %v12094_v51  ;;  %v16332_v26 = vpop.permute.xlu2 %12141 }
 0x915   :  { %v12103_v6 = vunpack.i.l.bf16 %v12102_v24  ;;  %7956 = vmatpush.msra.mxu2 %v7875_v29  ;;  %7979 = vmatpush.msra.mxu3 %v7876_v17  ;;  %v12104_v56 = vunpack.i.h.bf16 %v12102_v24  ;;  %v11062_v24 = vld [vmem:[%s17141_s3 + $0x390] sm:$0xff] }
 0x916   :  { %v16337_v46 = vpop.f32.mrf.mxu1 }
 0x917   :  { %17327 = vst [vmem:[#allocation26_spill] sm:$0xff] %v16337_v46  ;;  %v7878_v12 = vsel %vm576_vm3, %v12099_v43, %v12103_v6  ;;  %v16343_v0 = vpop.f32.mrf.mxu0 }
 0x918   :  { %7932 = vmatpush.msra.mxu1 %v7878_v12  ;;  %11045 = vmatmul.msk.f32.gmra.mxu0 %vm877_vm4, %v11033_v30  ;;  %17328 = vst [vmem:[#allocation7_spill] sm:$0xff] %v16343_v0 }
 0x919   :  { %11041 = vmatmul.msk.f32.gmra.mxu2 %vm877_vm4, %v11035_v49  ;;  %11043 = vmatmul.msk.f32.gmra.mxu3 %vm877_vm4, %v11035_v49  ;;  %v12107_v19 = vpop.permute.xlu1 %12106 }
 0x91a   :  { %v12109_v40 = vunpack.i.h.bf16 %v12107_v19  ;;  %v12108_v44 = vunpack.i.l.bf16 %v12107_v19 }
 0x91c   :  { %11046 = vmatmul.msk.f32.vlgmr.msrb.gmra.mxu1 %vm877_vm4, %v11032_v50  ;;  %v12117_v55 = vpop.permute.xlu0 %12116  ;;  %v7873_v42 = vsel %vm576_vm3, %v12104_v56, %v12108_v44  ;;  %v7874_v63 = vsel %vm576_vm3, %v12108_v44, %v12109_v40  ;;  %v16356_v16 = vpop.permute.xlu2 %12156 }
 0x91d   :  { %v12118_v39 = vunpack.i.l.bf16 %v12117_v55  ;;  %7910 = vmatpush.msrb.mxu0 %v7873_v42  ;;  %7933 = vmatpush.msra.mxu1 %v7874_v63  ;;  %v12119_v48 = vunpack.i.h.bf16 %v12117_v55  ;;  %v12159_v29 = vunpack.i.h.bf16 %v16356_v16  ;;  %v12158_v17 = vunpack.i.l.bf16 %v16356_v16 }
 0x91f   :  { %8058 = vmatpush.msra.mxu0 %v8026_v62  ;;  %v8029_v32 = vsel %vm877_vm4, %v12114_v45, %v12118_v39  ;;  %v12144_v39 = vunpack.i.h.bf16 %v16332_v26  ;;  %v12143_v62 = vunpack.i.l.bf16 %v16332_v26 }
 0x920   :  { %v16359_v57 = vpop.f32.mrf.mxu1  ;;  %11054 = vmatmul.msk.f32.vlgmr.msrb.gmra.mxu0 %vm877_vm4, %v11052_v5  ;;  %v16365_v43 = vpop.f32.mrf.mxu0 }
 0x921   :  { %17329 = vst [vmem:[#allocation8_spill] sm:$0xff] %v16359_v57  ;;  %11048 = vmatmul.msk.f32.vlgmr.msrb.gmra.mxu2 %vm877_vm4, %v11032_v50  ;;  %11050 = vmatmul.msk.f32.vlgmr.msrb.gmra.mxu3 %vm877_vm4, %v11032_v50  ;;  %v12122_v33 = vpop.permute.xlu1 %12121 }
 0x922   :  { %8104 = vmatpush.msrb.mxu2 %v8028_v21  ;;  %8127 = vmatpush.msrb.mxu3 %v8029_v32  ;;  %v12124_v49 = vunpack.i.h.bf16 %v12122_v33  ;;  %v12123_v61 = vunpack.i.l.bf16 %v12122_v33  ;;  %17330 = vst [vmem:[#allocation41_spill] sm:$0xff] %v16365_v43  ;;  %v16436_v21 = vld [vmem:[%s17141_s3 + $0x3a0] sm:$0xff] }
 0x923   :  { %v6614_v54 = vpop.f32.mrf.mxu3 }
 0x924   :  { %11047 = vmatmul.msk.f32.gmra.mxu1 %vm877_vm4, %v11033_v30  ;;  %v12132_v11 = vpop.permute.xlu0 %12131  ;;  %v8024_v52 = vsel %vm877_vm4, %v12119_v48, %v12123_v61  ;;  %v8025_v23 = vsel %vm877_vm4, %v12123_v61, %v12124_v49  ;;  %v6591_v58 = vpop.f32.mrf.mxu2 }
 0x925   :  { %v12133_v22 = vunpack.i.l.bf16 %v12132_v11  ;;  %8105 = vmatpush.msrb.mxu2 %v8024_v52  ;;  %8128 = vmatpush.msrb.mxu3 %v8025_v23  ;;  %v16377_v8 = vpop.permute.xlu2 %12171  ;;  %v12134_v27 = vunpack.i.h.bf16 %v12132_v11 }
 0x927   :  { %v8027_v3 = vsel %vm877_vm4, %v12129_v60, %v12133_v22  ;;  %v8310_v22 = vsel %vm1468_vm5, %v12143_v62, %v12144_v39 }
 0x928   :  { %v16374_v59 = vpop.f32.mrf.mxu1  ;;  %8081 = vmatpush.msrb.mxu1 %v8027_v3  ;;  %11055 = vmatmul.msk.f32.gmra.mxu0 %vm877_vm4, %v11053_v53  ;;  %v16386_v51 = vpop.f32.mrf.mxu0 }
 0x929   :  { %17331 = vst [vmem:[#allocation42_spill] sm:$0xff] %v16374_v59  ;;  %11049 = vmatmul.msk.f32.gmra.mxu2 %vm877_vm4, %v11033_v30  ;;  %11051 = vmatmul.msk.f32.gmra.mxu3 %vm877_vm4, %v11033_v30  ;;  %v12137_v9 = vpop.permute.xlu1 %12136 }
 0x92a   :  { %v12139_v34 = vunpack.i.h.bf16 %v12137_v9  ;;  %v12138_v50 = vunpack.i.l.bf16 %v12137_v9  ;;  %17332 = vst [vmem:[#allocation24_spill] sm:$0xff] %v16386_v51 }
 0x92b   :  { %v6617_v15 = vpop.f32.mrf.mxu3 }
 0x92c   :  { %11056 = vmatmul.msk.f32.vlgmr.msra.gmra.mxu1 %vm877_vm4, %v11052_v5  ;;  %v8022_v14 = vsel %vm877_vm4, %v12134_v27, %v12138_v50  ;;  %v8023_v13 = vsel %vm877_vm4, %v12138_v50, %v12139_v34  ;;  %v6594_v38 = vpop.f32.mrf.mxu2 }
 0x92d   :  { %v16382_v10 = vpop.permute.xlu0 %12146  ;;  %8059 = vmatpush.msra.mxu0 %v8022_v14  ;;  %8082 = vmatpush.msrb.mxu1 %v8023_v13  ;;  %v16406_v12 = vpop.permute.xlu2 %12186 }
 0x92e   :  { %v12189_v33 = vunpack.i.h.bf16 %v16406_v12  ;;  %v12188_v48 = vunpack.i.l.bf16 %v16406_v12  ;;  %v12149_v52 = vunpack.i.h.bf16 %v16382_v10 }
 0x92f   :  { %8167 = vmatpush.msrb.mxu0 %v15820_v2  ;;  %8190 = vmatpush.msra.mxu1 %v15822_v47  ;;  %v8308_v2 = vsel %vm1468_vm5, %v12158_v17, %v12159_v29 }
 0x930   :  { %v16395_v6 = vpop.f32.mrf.mxu1  ;;  %11064 = vmatmul.msk.f32.vlgmr.msra.gmra.mxu0 %vm877_vm4, %v11062_v24  ;;  %v16415_v19 = vpop.f32.mrf.mxu0  ;;  %v8457_v3 = vsel %vm1769_vm6, %v12188_v48, %v12189_v33 }
 0x931   :  { %17333 = vst [vmem:[#allocation52_spill] sm:$0xff] %v16395_v6  ;;  %8191 = vmatpush.msra.mxu1 %v15852_v28  ;;  %11058 = vmatmul.msk.f32.vlgmr.msra.gmra.mxu2 %vm877_vm4, %v11052_v5  ;;  %v16401_v30 = vpop.permute.xlu1 %12151 }
 0x932   :  { %11060 = vmatmul.msk.f32.vlgmr.msra.gmra.mxu3 %vm877_vm4, %v11052_v5  ;;  %8168 = vmatpush.msrb.mxu0 %v15850_v37  ;;  %17334 = vst [vmem:[#allocation10_spill] sm:$0xff] %v16415_v19  ;;  %v12148_v5 = vunpack.i.l.bf16 %v16382_v10  ;;  %v12153_v26 = vunpack.i.l.bf16 %v16401_v30  ;;  %v16462_v10 = vld [vmem:[%s17141_s3 + $0x3a8] sm:$0xff] }
 0x933   :  { %8213 = vmatpush.msra.mxu2 %v15783_v20  ;;  %8236 = vmatpush.msra.mxu3 %v15785_v36  ;;  %v6752_v47 = vpop.f32.mrf.mxu3  ;;  %v11063_v20 = vld [vmem:[%s17141_s3 + $0x398] sm:$0xff] }
 0x934   :  { %8340 = vmatpush.msra.mxu0 %v8308_v2  ;;  %11057 = vmatmul.msk.f32.gmra.mxu1 %vm877_vm4, %v11053_v53  ;;  %v6753_v28 = vadd.f32 %v6752_v47, %v6614_v54  ;;  %v6729_v4 = vpop.f32.mrf.mxu2  ;;  %v12154_v54 = vunpack.i.h.bf16 %v16401_v30  ;;  %v8306_v9 = vsel %vm1468_vm5, %v12149_v52, %v12153_v26 }
 0x935   :  { %8214 = vmatpush.msra.mxu2 %v15814_v31  ;;  %8237 = vmatpush.msra.mxu3 %v15816_v35  ;;  %v12162_v60 = vpop.permute.xlu0 %12161  ;;  %v6730_v37 = vadd.f32 %v6729_v4, %v6591_v58  ;;  %v16429_v16 = vpop.permute.xlu2 %12201  ;;  %v8311_v58 = vsel %vm1468_vm5, %v12144_v39, %v12148_v5 }
 0x936   :  { %v12163_v56 = vunpack.i.l.bf16 %v12162_v60  ;;  %v12164_v35 = vunpack.i.h.bf16 %v12162_v60  ;;  %v8307_v34 = vsel %vm1468_vm5, %v12153_v26, %v12154_v54 }
 0x938   :  { %v16417_v36 = vpop.f32.mrf.mxu1  ;;  %11065 = vmatmul.msk.f32.gmra.mxu0 %vm877_vm4, %v11063_v20  ;;  %v8309_v42 = vsel %vm1468_vm5, %v12159_v29, %v12163_v56 }
 0x939   :  { %17335 = vst [vmem:[#allocation40_spill] sm:$0xff] %v16417_v36  ;;  %11059 = vmatmul.msk.f32.gmra.mxu2 %vm877_vm4, %v11053_v53  ;;  %v12167_v31 = vpop.permute.xlu1 %12166  ;;  %v16447_v23 = vpop.f32.mrf.mxu0 }
 0x93a   :  { %11061 = vmatmul.msk.f32.gmra.mxu3 %vm877_vm4, %v11053_v53  ;;  %v12169_v40 = vunpack.i.h.bf16 %v12167_v31  ;;  %v12168_v44 = vunpack.i.l.bf16 %v12167_v31  ;;  %17337 = vst [vmem:[#allocation55_spill] sm:$0xff] %v16447_v23  ;;  %v12174_v31 = vunpack.i.h.bf16 %v16377_v8 }
 0x93b   :  { %v6755_v55 = vpop.f32.mrf.mxu3 }
 0x93c   :  { %11066 = vmatmul.msk.f32.vlgmr.msrb.gmra.mxu1 %vm877_vm4, %v11062_v24  ;;  %v6756_v63 = vadd.f32 %v6755_v55, %v6617_v15  ;;  %v8304_v45 = vsel %vm1468_vm5, %v12164_v35, %v12168_v44  ;;  %v8305_v1 = vsel %vm1468_vm5, %v12168_v44, %v12169_v40  ;;  %v6732_v49 = vpop.f32.mrf.mxu2  ;;  %v16487_v44 = vld [vmem:[%s17141_s3 + $0x3b0] sm:$0xff] }
 0x93d   :  { %8363 = vmatpush.msrb.mxu1 %v8309_v42  ;;  %v16431_v32 = vpop.permute.xlu0 %12176  ;;  %8341 = vmatpush.msra.mxu0 %v8304_v45  ;;  %v6733_v61 = vadd.f32 %v6732_v49, %v6594_v38  ;;  %v16464_v13 = vpop.permute.xlu2 %12216 }
 0x93e   :  { %v12178_v35 = vunpack.i.l.bf16 %v16431_v32  ;;  %v12219_v55 = vunpack.i.h.bf16 %v16464_v13  ;;  %v12218_v42 = vunpack.i.l.bf16 %v16464_v13  ;;  %v12179_v62 = vunpack.i.h.bf16 %v16431_v32 }
 0x93f   :  { %8364 = vmatpush.msrb.mxu1 %v8305_v1 }
 0x940   :  { %v16442_v11 = vpop.f32.mrf.mxu1  ;;  %11074 = vmatmul.msk.f32.vlgmr.msrb.gmra.mxu0 %vm877_vm4, %v16436_v21  ;;  %v8460_v48 = vsel %vm1769_vm6, %v12174_v31, %v12178_v35  ;;  %v8606_v26 = vsel %vm2070_vm7, %v12218_v42, %v12219_v55 }
 0x941   :  { %17336 = vst [vmem:[#allocation53_spill] sm:$0xff] %v16442_v11  ;;  %11068 = vmatmul.msk.f32.vlgmr.msrb.gmra.mxu2 %vm877_vm4, %v11062_v24  ;;  %v16453_v53 = vpop.permute.xlu1 %12181  ;;  %8489 = vmatpush.msrb.mxu0 %v8457_v3 }
 0x942   :  { %11070 = vmatmul.msk.f32.vlgmr.msrb.gmra.mxu3 %vm877_vm4, %v11062_v24  ;;  %8386 = vmatpush.msrb.mxu2 %v8310_v22  ;;  %v16472_v47 = vpop.f32.mrf.mxu0  ;;  %v12183_v45 = vunpack.i.l.bf16 %v16453_v53  ;;  %v11083_v22 = vld [vmem:[%s17141_s3 + $0x3b8] sm:$0xff] }
 0x943   :  { %8409 = vmatpush.msrb.mxu3 %v8311_v58  ;;  %v6893_v27 = vpop.f32.mrf.mxu3  ;;  %17339 = vst [vmem:[#allocation21_spill] sm:$0xff] %v16472_v47 }
 0x944   :  { %11067 = vmatmul.msk.f32.gmra.mxu1 %vm877_vm4, %v11063_v20  ;;  %8387 = vmatpush.msrb.mxu2 %v8306_v9  ;;  %v6902_v50 = vadd.f32 %v6893_v27, %v6753_v28  ;;  %v6870_v14 = vpop.f32.mrf.mxu2  ;;  %v8455_v32 = vsel %vm1769_vm6, %v12179_v62, %v12183_v45 }
 0x945   :  { %8410 = vmatpush.msrb.mxu3 %v8307_v34  ;;  %v12192_v15 = vpop.permute.xlu0 %12191  ;;  %v6901_v38 = vadd.f32 %v6870_v14, %v6730_v37  ;;  %v16498_v5 = vpop.permute.xlu2 %12231 }
 0x946   :  { %v12193_v24 = vunpack.i.l.bf16 %v12192_v15  ;;  %v12194_v30 = vunpack.i.h.bf16 %v12192_v15 }
 0x948   :  { %v16466_v29 = vpop.f32.mrf.mxu1  ;;  %11075 = vmatmul.msk.f32.gmra.mxu0 %vm877_vm4, %v16462_v10  ;;  %v8458_v60 = vsel %vm1769_vm6, %v12189_v33, %v12193_v24 }
 0x949   :  { %17338 = vst [vmem:[#allocation17_spill] sm:$0xff] %v16466_v29  ;;  %11069 = vmatmul.msk.f32.gmra.mxu2 %vm877_vm4, %v11063_v20  ;;  %v12197_v17 = vpop.permute.xlu1 %12196 }
 0x94a   :  { %11071 = vmatmul.msk.f32.gmra.mxu3 %vm877_vm4, %v11063_v20  ;;  %v12199_v2 = vunpack.i.h.bf16 %v12197_v17  ;;  %v12198_v12 = vunpack.i.l.bf16 %v12197_v17  ;;  %v12173_v20 = vunpack.i.l.bf16 %v16377_v8  ;;  %v12184_v8 = vunpack.i.h.bf16 %v16453_v53  ;;  %v16513_v54 = vpop.f32.mrf.mxu0 }
 0x94b   :  { %v6896_v28 = vpop.f32.mrf.mxu3  ;;  %17341 = vst [vmem:[#allocation64_spill] sm:$0xff] %v16513_v54 }
 0x94c   :  { %11076 = vmatmul.msk.f32.vlgmr.msra.gmra.mxu1 %vm877_vm4, %v16436_v21  ;;  %v6906_v4 = vadd.f32 %v6896_v28, %v6756_v63  ;;  %v8453_v37 = vsel %vm1769_vm6, %v12194_v30, %v12198_v12  ;;  %v8454_v56 = vsel %vm1769_vm6, %v12198_v12, %v12199_v2  ;;  %v6873_v63 = vpop.f32.mrf.mxu2  ;;  %v8459_v33 = vsel %vm1769_vm6, %v12173_v20, %v12174_v31 }
 0x94d   :  { %8512 = vmatpush.msra.mxu1 %v8458_v60  ;;  %v16482_v40 = vpop.permute.xlu0 %12206  ;;  %8490 = vmatpush.msrb.mxu0 %v8453_v37  ;;  %v6905_v1 = vadd.f32 %v6873_v63, %v6733_v61  ;;  %v8456_v61 = vsel %vm1769_vm6, %v12183_v45, %v12184_v8  ;;  %v12247_v13 = vpop.permute.xlu2 %12246  ;;  %v12204_v2 = vunpack.i.h.bf16 %v16429_v16  ;;  %v12203_v12 = vunpack.i.l.bf16 %v16429_v16  ;;  %v11092_v37 = vld [vmem:[%s17141_s3 + $0x3c0] sm:$0xff] }
 0x94e   :  { %v12248_v31 = vunpack.i.l.bf16 %v12247_v13  ;;  %v12209_v42 = vunpack.i.h.bf16 %v16482_v40 }
 0x94f   :  { %8513 = vmatpush.msra.mxu1 %v8454_v56  ;;  %v12249_v56 = vunpack.i.h.bf16 %v12247_v13  ;;  %v8608_v45 = vsel %vm2070_vm7, %v12203_v12, %v12204_v2 }
 0x950   :  { %v16493_v39 = vpop.f32.mrf.mxu1  ;;  %11084 = vmatmul.msk.f32.vlgmr.msra.gmra.mxu0 %vm877_vm4, %v16487_v44 }
 0x951   :  { %17340 = vst [vmem:[#allocation31_spill] sm:$0xff] %v16493_v39  ;;  %11078 = vmatmul.msk.f32.vlgmr.msra.gmra.mxu2 %vm877_vm4, %v16436_v21  ;;  %v16506_v49 = vpop.permute.xlu1 %12211  ;;  %8638 = vmatpush.msra.mxu0 %v8606_v26  ;;  %v8755_v62 = vsel %vm315_vm2, %v12248_v31, %v12249_v56 }
 0x952   :  { %11080 = vmatmul.msk.f32.vlgmr.msra.gmra.mxu3 %vm877_vm4, %v16436_v21  ;;  %8535 = vmatpush.msra.mxu2 %v8459_v33 }
 0x953   :  { %8558 = vmatpush.msra.mxu3 %v8460_v48 }
 0x954   :  { %11077 = vmatmul.msk.f32.gmra.mxu1 %vm877_vm4, %v16462_v10  ;;  %8536 = vmatpush.msra.mxu2 %v8455_v32  ;;  %v7002_v21 = vpop.f32.mrf.mxu3  ;;  %v6979_v53 = vpop.f32.mrf.mxu2 }
 0x955   :  { %8559 = vmatpush.msra.mxu3 %v8456_v61  ;;  %v16515_v52 = vadd.f32 %v7002_v21, %v6902_v50  ;;  %v16520_v3 = vadd.f32 %v6979_v53, %v6901_v38 }
 0x956   :  { %v12222_v58 = vpop.permute.xlu0 %12221 }
 0x957   :  { %17342 = vst [vmem:[#allocation27_spill] sm:$0xff] %v16515_v52  ;;  %v12223_v9 = vunpack.i.l.bf16 %v12222_v58  ;;  %v12224_v50 = vunpack.i.h.bf16 %v12222_v58 }
 0x958   :  { %17343 = vst [vmem:[#allocation9_spill] sm:$0xff] %v16520_v3  ;;  %v16522_v27 = vpop.f32.mrf.mxu1  ;;  %11085 = vmatmul.msk.f32.gmra.mxu0 %vm877_vm4, %v11083_v22 }
 0x959   :  { %17344 = vst [vmem:[#allocation68_spill] sm:$0xff] %v16522_v27  ;;  %11079 = vmatmul.msk.f32.gmra.mxu2 %vm877_vm4, %v16462_v10  ;;  %v12227_v34 = vpop.permute.xlu1 %12226  ;;  %v8607_v38 = vsel %vm2070_vm7, %v12219_v55, %v12223_v9  ;;  %v12213_v55 = vunpack.i.l.bf16 %v16506_v49 }
 0x95a   :  { %11081 = vmatmul.msk.f32.gmra.mxu3 %vm877_vm4, %v16462_v10  ;;  %v12229_v15 = vunpack.i.h.bf16 %v12227_v34  ;;  %v12228_v14 = vunpack.i.l.bf16 %v12227_v34  ;;  %v12208_v10 = vunpack.i.l.bf16 %v16482_v40 }
 0x95b   :  { %v8604_v40 = vsel %vm2070_vm7, %v12209_v42, %v12213_v55 }
 0x95c   :  { %11086 = vmatmul.msk.f32.vlgmr.msrb.gmra.mxu1 %vm877_vm4, %v16487_v44  ;;  %v7005_v24 = vpop.f32.mrf.mxu3  ;;  %v8602_v17 = vsel %vm2070_vm7, %v12224_v50, %v12228_v14  ;;  %v8603_v30 = vsel %vm2070_vm7, %v12228_v14, %v12229_v15  ;;  %v6982_v35 = vpop.f32.mrf.mxu2 }
 0x95d   :  { %8661 = vmatpush.msrb.mxu1 %v8607_v38  ;;  %v16537_v28 = vadd.f32 %v7005_v24, %v6906_v4  ;;  %v16539_v60 = vpop.f32.mrf.mxu0  ;;  %8639 = vmatpush.msra.mxu0 %v8602_v17  ;;  %v16547_v16 = vadd.f32 %v6982_v35, %v6905_v1  ;;  %v12214_v4 = vunpack.i.h.bf16 %v16506_v49  ;;  %v8609_v1 = vsel %vm2070_vm7, %v12204_v2, %v12208_v10  ;;  %v11093_v49 = vld [vmem:[%s17141_s3 + $0x3c8] sm:$0xff] }
 0x95e   :  { %17346 = vst [vmem:[#allocation11_spill] sm:$0xff] %v16539_v60  ;;  %v16544_v20 = vpop.permute.xlu0 %12236  ;;  %v12234_v38 = vunpack.i.h.bf16 %v16498_v5  ;;  %v12233_v24 = vunpack.i.l.bf16 %v16498_v5 }
 0x95f   :  { %17345 = vst [vmem:[#allocation75_spill] sm:$0xff] %v16537_v28  ;;  %8662 = vmatpush.msrb.mxu1 %v8603_v30  ;;  %v8605_v33 = vsel %vm2070_vm7, %v12213_v55, %v12214_v4  ;;  %v11102_v30 = vld [vmem:[%s17141_s3 + $0x3d0] sm:$0xff] }
 0x960   :  { %17347 = vst [vmem:[#allocation44_spill] sm:$0xff] %v16547_v16  ;;  %11094 = vmatmul.msk.f32.vlgmr.msrb.gmra.mxu0 %vm877_vm4, %v11092_v37  ;;  %v8757_v31 = vsel %vm315_vm2, %v12233_v24, %v12234_v38 }
 0x961   :  { %v16552_v63 = vpop.f32.mrf.mxu1  ;;  %11088 = vmatmul.msk.f32.vlgmr.msrb.gmra.mxu2 %vm877_vm4, %v16487_v44  ;;  %v12242_v8 = vpop.permute.xlu1 %12241  ;;  %8787 = vmatpush.msrb.mxu0 %v8755_v62 }
 0x962   :  { %17348 = vst [vmem:[#allocation45_spill] sm:$0xff] %v16552_v63  ;;  %11090 = vmatmul.msk.f32.vlgmr.msrb.gmra.mxu3 %vm877_vm4, %v16487_v44  ;;  %8684 = vmatpush.msrb.mxu2 %v8608_v45  ;;  %v12243_v12 = vunpack.i.l.bf16 %v12242_v8  ;;  %v12244_v10 = vunpack.i.h.bf16 %v12242_v8 }
 0x963   :  { %8707 = vmatpush.msrb.mxu3 %v8609_v1 }
 0x964   :  { %11087 = vmatmul.msk.f32.gmra.mxu1 %vm877_vm4, %v11083_v22  ;;  %8685 = vmatpush.msrb.mxu2 %v8604_v40  ;;  %v16564_v48 = vpop.f32.mrf.mxu3  ;;  %v16571_v32 = vpop.f32.mrf.mxu2  ;;  %v8754_v4 = vsel %vm315_vm2, %v12243_v12, %v12244_v10  ;;  %v11112_v40 = vld [vmem:[%s17141_s3 + $0x3e0] sm:$0xff] }
 0x965   :  { %17349 = vst [vmem:[#allocation58_spill] sm:$0xff] %v16564_v48  ;;  %8708 = vmatpush.msrb.mxu3 %v8605_v33  ;;  %v16566_v44 = vpop.f32.mrf.mxu0 }
 0x966   :  { %17350 = vst [vmem:[#allocation13_spill] sm:$0xff] %v16566_v44  ;;  %v12252_v26 = vpop.permute.xlu0 %12251 }
 0x967   :  { %17351 = vst [vmem:[#allocation43_spill] sm:$0xff] %v16571_v32  ;;  %v12253_v61 = vunpack.i.l.bf16 %v12252_v26  ;;  %v12254_v53 = vunpack.i.h.bf16 %v12252_v26 }
 0x968   :  { %11095 = vmatmul.msk.f32.gmra.mxu0 %vm877_vm4, %v11093_v49 }
 0x969   :  { %v16574_v21 = vpop.f32.mrf.mxu1  ;;  %11089 = vmatmul.msk.f32.gmra.mxu2 %vm877_vm4, %v11083_v22  ;;  %v12257_v58 = vpop.permute.xlu1 %12256  ;;  %v8756_v50 = vsel %vm315_vm2, %v12249_v56, %v12253_v61  ;;  %v12239_v56 = vunpack.i.h.bf16 %v16544_v20 }
 0x96a   :  { %17352 = vst [vmem:[#allocation12_spill] sm:$0xff] %v16574_v21  ;;  %11091 = vmatmul.msk.f32.gmra.mxu3 %vm877_vm4, %v11083_v22  ;;  %v12259_v9 = vunpack.i.h.bf16 %v12257_v58  ;;  %v12258_v34 = vunpack.i.l.bf16 %v12257_v58  ;;  %v12238_v22 = vunpack.i.l.bf16 %v16544_v20  ;;  %v11113_v58 = vld [vmem:[%s17141_s3 + $0x3e8] sm:$0xff] }
 0x96b   :  { %v8753_v55 = vsel %vm315_vm2, %v12239_v56, %v12243_v12 }
 0x96c   :  { %11096 = vmatmul.msk.f32.vlgmr.msra.gmra.mxu1 %vm877_vm4, %v11092_v37  ;;  %v16580_v15 = vpop.f32.mrf.mxu3  ;;  %v8751_v14 = vsel %vm315_vm2, %v12254_v53, %v12258_v34  ;;  %v8752_v13 = vsel %vm315_vm2, %v12258_v34, %v12259_v9  ;;  %v16592_v2 = vpop.f32.mrf.mxu2  ;;  %v8758_v35 = vsel %vm315_vm2, %v12234_v38, %v12238_v22 }
 0x96d   :  { %17353 = vst [vmem:[#allocation54_spill] sm:$0xff] %v16580_v15  ;;  %8810 = vmatpush.msra.mxu1 %v8756_v50  ;;  %v16587_v17 = vpop.f32.mrf.mxu0  ;;  %8788 = vmatpush.msrb.mxu0 %v8751_v14 }
 0x96e   :  { %17354 = vst [vmem:[#allocation56_spill] sm:$0xff] %v16587_v17 }
 0x96f   :  { %17355 = vst [vmem:[#allocation70_spill] sm:$0xff] %v16592_v2  ;;  %8811 = vmatpush.msra.mxu1 %v8752_v13 }
 0x970   :  { %11104 = vmatmul.msk.f32.vlgmr.msra.gmra.mxu0 %vm877_vm4, %v11102_v30 }
 0x971   :  { %v16596_v5 = vpop.f32.mrf.mxu1  ;;  %11098 = vmatmul.msk.f32.vlgmr.msra.gmra.mxu2 %vm877_vm4, %v11092_v37 }
 0x972   :  { %17356 = vst [vmem:[#allocation65_spill] sm:$0xff] %v16596_v5  ;;  %11100 = vmatmul.msk.f32.vlgmr.msra.gmra.mxu3 %vm877_vm4, %v11092_v37  ;;  %8833 = vmatpush.msra.mxu2 %v8757_v31  ;;  %v11103_v37 = vld [vmem:[%s17141_s3 + $0x3d8] sm:$0xff] }
 0x973   :  { %8856 = vmatpush.msra.mxu3 %v8758_v35 }
 0x974   :  { %11097 = vmatmul.msk.f32.gmra.mxu1 %vm877_vm4, %v11093_v49  ;;  %8834 = vmatpush.msra.mxu2 %v8753_v55  ;;  %v16605_v20 = vpop.f32.mrf.mxu3  ;;  %v16612_v45 = vpop.f32.mrf.mxu2 }
 0x975   :  { %17357 = vst [vmem:[#allocation69_spill] sm:$0xff] %v16605_v20  ;;  %8857 = vmatpush.msra.mxu3 %v8754_v4  ;;  %v16607_v42 = vpop.f32.mrf.mxu0 }
 0x976   :  { %17358 = vst [vmem:[#allocation76_spill] sm:$0xff] %v16607_v42 }
 0x977   :  { %17359 = vst [vmem:[#allocation23_spill] sm:$0xff] %v16612_v45 }
 0x978   :  { %11105 = vmatmul.msk.f32.gmra.mxu0 %vm877_vm4, %v11103_v37 }
 0x979   :  { %v16615_v1 = vpop.f32.mrf.mxu1  ;;  %11099 = vmatmul.msk.f32.gmra.mxu2 %vm877_vm4, %v11093_v49 }
 0x97a   :  { %17360 = vst [vmem:[#allocation33_spill] sm:$0xff] %v16615_v1  ;;  %11101 = vmatmul.msk.f32.gmra.mxu3 %vm877_vm4, %v11093_v49 }
 0x97c   :  { %11106 = vmatmul.msk.f32.vlgmr.msrb.gmra.mxu1 %vm877_vm4, %v11102_v30  ;;  %v16620_v8 = vpop.f32.mrf.mxu3  ;;  %v16627_v33 = vpop.f32.mrf.mxu2 }
 0x97d   :  { %17361 = vst [vmem:[#allocation29_spill] sm:$0xff] %v16620_v8  ;;  %v16622_v62 = vpop.f32.mrf.mxu0 }
 0x97e   :  { %17362 = vst [vmem:[#allocation37_spill] sm:$0xff] %v16627_v33 }
 0x980   :  { %11114 = vmatmul.msk.f32.vlgmr.msrb.gmra.mxu0 %vm877_vm4, %v11112_v40 }
 0x981   :  { %v16630_v26 = vpop.f32.mrf.mxu1  ;;  %11108 = vmatmul.msk.f32.vlgmr.msrb.gmra.mxu2 %vm877_vm4, %v11102_v30 }
 0x982   :  { %17363 = vst [vmem:[#allocation38_spill] sm:$0xff] %v16630_v26  ;;  %11110 = vmatmul.msk.f32.vlgmr.msrb.gmra.mxu3 %vm877_vm4, %v11102_v30 }
 0x984   :  { %11107 = vmatmul.msk.f32.gmra.mxu1 %vm877_vm4, %v11103_v37  ;;  %v16635_v49 = vpop.f32.mrf.mxu3  ;;  %v16642_v53 = vpop.f32.mrf.mxu2 }
 0x985   :  { %17364 = vst [vmem:[#allocation50_spill] sm:$0xff] %v16635_v49  ;;  %v16637_v61 = vpop.f32.mrf.mxu0 }
 0x986   :  { %17365 = vst [vmem:[#allocation51_spill] sm:$0xff] %v16642_v53 }
 0x988   :  { %11115 = vmatmul.msk.f32.gmra.mxu0 %vm877_vm4, %v11113_v58 }
 0x989   :  { %v16645_v9 = vpop.f32.mrf.mxu1  ;;  %11109 = vmatmul.msk.f32.gmra.mxu2 %vm877_vm4, %v11103_v37 }
 0x98a   :  { %11111 = vmatmul.msk.f32.gmra.mxu3 %vm877_vm4, %v11103_v37 }
 0x98c   :  { %11116 = vmatmul.msk.f32.vlgmr.msra.gmra.mxu1 %vm877_vm4, %v11112_v40  ;;  %v16650_v34 = vpop.f32.mrf.mxu3  ;;  %v16654_v14 = vpop.f32.mrf.mxu2 }
 0x98d   :  { %17366 = vst [vmem:[#allocation62_spill] sm:$0xff] %v16650_v34  ;;  %v16652_v50 = vpop.f32.mrf.mxu0 }
 0x98e   :  { %17367 = vst [vmem:[#allocation63_spill] sm:$0xff] %v16654_v14 }
 0x991   :  { %v16656_v13 = vpop.f32.mrf.mxu1  ;;  %11118 = vmatmul.msk.f32.vlgmr.msra.gmra.mxu2 %vm877_vm4, %v11112_v40 }
 0x992   :  { %11120 = vmatmul.msk.f32.vlgmr.msra.gmra.mxu3 %vm877_vm4, %v11112_v40 }
 0x994   :  { %11117 = vmatmul.msk.f32.gmra.mxu1 %vm877_vm4, %v11113_v58  ;;  %v7702_v38 = vpop.f32.mrf.mxu3  ;;  %v7679_v22 = vpop.f32.mrf.mxu2 }
 0x995   :  { %v16661_v24 = vpop.f32.mrf.mxu0 }
 0x999   :  { %v7794_v30 = vpop.f32.mrf.mxu1  ;;  %11119 = vmatmul.msk.f32.gmra.mxu2 %vm877_vm4, %v11113_v58 }
 0x99a   :  { %11121 = vmatmul.msk.f32.gmra.mxu3 %vm877_vm4, %v11113_v58  ;;  %v7795_v41 = vadd.f32 %v7794_v30, %v16645_v9 }
 0x99c   :  { %v16665_v12 = vpop.f32.mrf.mxu3  ;;  %v16669_v56 = vpop.f32.mrf.mxu2 }
 0x99d   :  { %v16667_v10 = vpop.f32.mrf.mxu0 }
 0x9a1   :  { %v7797_v31 = vpop.f32.mrf.mxu1 }
 0x9a4   :  { %v7840_v35 = vpop.f32.mrf.mxu3  ;;  %v7817_v55 = vpop.f32.mrf.mxu2 }
 0x9a5   :  { %v16671_v4 = vpop.f32.mrf.mxu0  ;;  %v7841_v57 = vadd.f32 %v7840_v35, %v7702_v38  ;;  %v7818_v7 = vadd.f32 %v7817_v55, %v7679_v22  ;;  %v7798_v38 = vadd.f32 %v7797_v31, %v16656_v13 }
 0x9a9   :  { %v7935_v37 = vpop.f32.mrf.mxu1 }
 0x9ac   :  { %v7843_v40 = vpop.f32.mrf.mxu3  ;;  %v16673_v49 = vpop.f32.mrf.mxu2 }
 0x9ad   :  { %v16675_v53 = vpop.f32.mrf.mxu0  ;;  %v7844_v9 = vadd.f32 %v7843_v40, %v16665_v12 }
 0x9b1   :  { %v16677_v1 = vpop.f32.mrf.mxu1 }
 0x9b4   :  { %v7958_v17 = vpop.f32.mrf.mxu2 }
 0x9b5   :  { %v7981_v58 = vpop.f32.mrf.mxu3  ;;  %v16679_v45 = vpop.f32.mrf.mxu0 }
 0x9b9   :  { %v8084_v20 = vpop.f32.mrf.mxu1 }
 0x9bc   :  { %v7961_v60 = vpop.f32.mrf.mxu2 }
 0x9bd   :  { %v7984_v21 = vpop.f32.mrf.mxu3  ;;  %v8170_v3 = vpop.f32.mrf.mxu0 }
 0x9c1   :  { %v16681_v32 = vpop.f32.mrf.mxu1 }
 0x9c4   :  { %v8107_v52 = vpop.f32.mrf.mxu2 }
 0x9c5   :  { %v8130_v48 = vpop.f32.mrf.mxu3  ;;  %v16683_v29 = vpop.f32.mrf.mxu0 }
 0x9c6   :  { %17368 = vst [vmem:[#allocation22_spill] sm:$0xff] %v16683_v29  ;;  %v7988_v29 = vadd.f32 %v7935_v37, %v7795_v41 }
 0x9c8   :  { %v8137_v22 = vadd.f32 %v8084_v20, %v7988_v29 }
 0x9c9   :  { %v8193_v27 = vpop.f32.mrf.mxu1 }
 0x9cc   :  { %v16685_v19 = vpop.f32.mrf.mxu2 }
 0x9cd   :  { %v8133_v47 = vpop.f32.mrf.mxu3  ;;  %v8343_v46 = vpop.f32.mrf.mxu0 }
 0x9d1   :  { %v16687_v36 = vpop.f32.mrf.mxu1 }
 0x9d4   :  { %v8216_v59 = vpop.f32.mrf.mxu2 }
 0x9d5   :  { %v8239_v43 = vpop.f32.mrf.mxu3  ;;  %v16693_v26 = vpop.f32.mrf.mxu0 }
 0x9d6   :  { %17371 = vst [vmem:[#allocation18_spill] sm:$0xff] %v16693_v26  ;;  %v7990_v26 = vadd.f32 %v7981_v58, %v7841_v57 }
 0x9d9   :  { %v8366_v25 = vpop.f32.mrf.mxu1 }
 0x9dc   :  { %v16689_v34 = vpop.f32.mrf.mxu2 }
 0x9dd   :  { %v8242_v18 = vpop.f32.mrf.mxu3  ;;  %17369 = vst [vmem:[#allocation32_spill] sm:$0xff] %v16689_v34  ;;  %v8492_v5 = vpop.f32.mrf.mxu0 }
 0x9e1   :  { %v16691_v14 = vpop.f32.mrf.mxu1 }
 0x9e2   :  { %17370 = vst [vmem:[#allocation74_spill] sm:$0xff] %v16691_v14 }
 0x9e4   :  { %v8389_v8 = vpop.f32.mrf.mxu2 }
 0x9e5   :  { %v8412_v42 = vpop.f32.mrf.mxu3  ;;  %v16701_v16 = vpop.f32.mrf.mxu0 }
 0x9e6   :  { %17375 = vst [vmem:[#allocation19_spill] sm:$0xff] %v16701_v16 }
 0x9e9   :  { %v8515_v33 = vpop.f32.mrf.mxu1 }
 0x9ec   :  { %v16697_v15 = vpop.f32.mrf.mxu2 }
 0x9ed   :  { %v16695_v44 = vpop.f32.mrf.mxu3  ;;  %17373 = vst [vmem:[#allocation34_spill] sm:$0xff] %v16697_v15  ;;  %v8641_v11 = vpop.f32.mrf.mxu0  ;;  %v7989_v15 = vadd.f32 %v7958_v17, %v7818_v7  ;;  %v7821_v7 = vadd.f32 %v16673_v49, %v16669_v56 }
 0x9ee   :  { %17372 = vst [vmem:[#allocation28_spill] sm:$0xff] %v16695_v44 }
 0x9f1   :  { %v16699_v28 = vpop.f32.mrf.mxu1 }
 0x9f2   :  { %17374 = vst [vmem:[#allocation35_spill] sm:$0xff] %v16699_v28  ;;  %v7772_v28 = vadd.f32 %v16652_v50, %v16622_v62  ;;  %v7775_v62 = vadd.f32 %v16661_v24, %v16637_v61  ;;  %v17380_v24 = vld [vmem:[#allocation22_spill] sm:$0xff] }
 0x9f4   :  { %v8538_v63 = vpop.f32.mrf.mxu2  ;;  %v7987_v34 = vadd.f32 %v16667_v10, %v7772_v28  ;;  %v7991_v20 = vadd.f32 %v16671_v4, %v7775_v62 }
 0x9f5   :  { %v8561_v2 = vpop.f32.mrf.mxu3  ;;  %v16712_v16 = vpop.f32.mrf.mxu0  ;;  %v17379_v50 = vld [vmem:[#allocation28_spill] sm:$0xff] }
 0x9f6   :  { %v8136_v41 = vadd.f32 %v16675_v53, %v7987_v34 }
 0x9f8   :  { %v8245_v17 = vadd.f32 %v8170_v3, %v8136_v41  ;;  %v8140_v3 = vadd.f32 %v16679_v45, %v7991_v20 }
 0x9f9   :  { %v8664_v39 = vpop.f32.mrf.mxu1  ;;  %v17385_v40 = vld [vmem:[#allocation35_spill] sm:$0xff] }
 0x9fa   :  { %v8418_v61 = vadd.f32 %v8343_v46, %v8245_v17  ;;  %v8249_v12 = vadd.f32 %v17380_v24, %v8140_v3 }
 0x9fc   :  { %v16705_v23 = vpop.f32.mrf.mxu2 }
 0x9fd   :  { %v16703_v54 = vpop.f32.mrf.mxu3  ;;  %17377 = vst [vmem:[#allocation48_spill] sm:$0xff] %v16705_v23  ;;  %v8138_v23 = vadd.f32 %v8107_v52, %v7989_v15  ;;  %v7994_v52 = vadd.f32 %v7984_v21, %v7844_v9  ;;  %v7993_v15 = vadd.f32 %v7961_v60, %v7821_v7  ;;  %v8790_v21 = vpop.f32.mrf.mxu0 }
 0x9fe   :  { %17376 = vst [vmem:[#allocation47_spill] sm:$0xff] %v16703_v54  ;;  %v8139_v54 = vadd.f32 %v8130_v48, %v7990_v26  ;;  %v7992_v48 = vadd.f32 %v16677_v1, %v7798_v38  ;;  %v8879_v60 = vpop.permute.xlu0 %8878 }
 0x9ff   :  { %v8247_v57 = vadd.f32 %v8216_v59, %v8138_v23  ;;  %v8143_v29 = vadd.f32 %v8133_v47, %v7994_v52  ;;  %v8142_v49 = vadd.f32 %v16685_v19, %v7993_v15  ;;  %v17378_v47 = vld [vmem:[#allocation32_spill] sm:$0xff]  ;;  %v8884_v52 = vpop.permute.xlu2 %8883 }
 0xa00   :  { %v8248_v44 = vadd.f32 %v8239_v43, %v8139_v54  ;;  %v8246_v43 = vadd.f32 %v8193_v27, %v8137_v22 }
 0xa01   :  { %v16707_v0 = vpop.f32.mrf.mxu1  ;;  %v8420_v54 = vadd.f32 %v8389_v8, %v8247_v57  ;;  %v8252_v8 = vadd.f32 %v8242_v18, %v8143_v29  ;;  %v17381_v18 = vld [vmem:[#allocation74_spill] sm:$0xff] }
 0xa02   :  { %v8421_v30 = vadd.f32 %v8412_v42, %v8248_v44  ;;  %v8419_v59 = vadd.f32 %v8366_v25, %v8246_v43  ;;  %v8141_v42 = vadd.f32 %v16681_v32, %v7992_v48 }
 0xa03   :  { %v8569_v23 = vadd.f32 %v8538_v63, %v8420_v54  ;;  %v8567_v63 = vadd.f32 %v8492_v5, %v8418_v61  ;;  %v8425_v32 = vadd.f32 %v17379_v50, %v8252_v8  ;;  %v17384_v5 = vld [vmem:[#allocation18_spill] sm:$0xff] }
 0xa04   :  { %v8687_v6 = vpop.f32.mrf.mxu2  ;;  %v8570_v28 = vadd.f32 %v8561_v2, %v8421_v30  ;;  %v8568_v2 = vadd.f32 %v8515_v33, %v8419_v59  ;;  %v8250_v25 = vadd.f32 %v16687_v36, %v8141_v42  ;;  %v8422_v37 = vadd.f32 %v17384_v5, %v8249_v12  ;;  %v17387_v30 = vld [vmem:[#allocation19_spill] sm:$0xff]  ;;  %v11214_v5 = vld [vmem:[%s17142_s4 + $0x70] sm:$0xff] }
 0xa05   :  { %v8710_v51 = vpop.f32.mrf.mxu3  ;;  %v8718_v53 = vadd.f32 %v8687_v6, %v8569_v23  ;;  %v17382_v6 = vld [vmem:[#allocation34_spill] sm:$0xff]  ;;  %v8716_v56 = vadd.f32 %v8641_v11, %v8567_v63  ;;  %v17383_v31 = vld [vmem:[#allocation47_spill] sm:$0xff]  ;;  %v8793_v17 = vpop.f32.mrf.mxu0 }
 0xa06   :  { %v8719_v44 = vadd.f32 %v8710_v51, %v8570_v28  ;;  %v8251_v51 = vadd.f32 %v17378_v47, %v8142_v49  ;;  %v8717_v13 = vadd.f32 %v8664_v39, %v8568_v2  ;;  %v8423_v33 = vadd.f32 %v17381_v18, %v8250_v25  ;;  %v17386_v39 = vld [vmem:[#allocation48_spill] sm:$0xff] }
 0xa07   :  { %v8574_v45 = vadd.f32 %v17383_v31, %v8425_v32  ;;  %v8865_v9 = vadd.f32 %v8790_v21, %v8716_v56  ;;  %v8571_v62 = vadd.f32 %v17387_v30, %v8422_v37 }
 0xa08   :  { %v8424_v10 = vadd.f32 %v17382_v6, %v8251_v51  ;;  %v8572_v58 = vadd.f32 %v17385_v40, %v8423_v33 }
 0xa09   :  { %v8813_v26 = vpop.f32.mrf.mxu1  ;;  %v8720_v15 = vadd.f32 %v16712_v16, %v8571_v62 }
 0xa0a   :  { %v8866_v55 = vadd.f32 %v8813_v26, %v8717_v13  ;;  %v8573_v38 = vadd.f32 %v17386_v39, %v8424_v10  ;;  %v8721_v11 = vadd.f32 %v16707_v0, %v8572_v58  ;;  %v11126_v58 = vld [vmem:[%s17141_s3 + $0x400] sm:$0xff] }
 0xa0b   :  { %v8869_v0 = vadd.f32 %v8793_v17, %v8720_v15  ;;  %v11127_v17 = vld [vmem:[%s17141_s3 + $0x408] sm:$0xff] }
 0xa0c   :  { %v8690_v35 = vpop.f32.mrf.mxu2  ;;  %v8887_v43 = vadd.f32 %v8879_v60, %v8866_v55 }
 0xa0d   :  { %v8713_v14 = vpop.f32.mrf.mxu3  ;;  %v8722_v54 = vadd.f32 %v8690_v35, %v8573_v38  ;;  %v8890_v21 = vadd.f32 %v8884_v52, %v8869_v0 }
 0xa0e   :  { %v8723_v22 = vadd.f32 %v8713_v14, %v8574_v45  ;;  %v8886_v14 = vadd.f32 %v8879_v60, %v8865_v9 }
 0xa10   :  { %v16751_v35 = vmax.f32 %v8886_v14, 0.0 }
 0xa11   :  { %v8816_v7 = vpop.f32.mrf.mxu1 }
 0xa12   :  { %v8870_v29 = vadd.f32 %v8816_v7, %v8721_v11 }
 0xa14   :  { %v8836_v34 = vpop.f32.mrf.mxu2  ;;  %v8891_v49 = vadd.f32 %v8884_v52, %v8870_v29 }
 0xa15   :  { %v8859_v27 = vpop.f32.mrf.mxu3  ;;  %v8867_v19 = vadd.f32 %v8836_v34, %v8718_v53 }
 0xa16   :  { %v8868_v1 = vadd.f32 %v8859_v27, %v8719_v44  ;;  %v16747_v44 = vmax.f32 %v8887_v43, 0.0  ;;  %v17388_v27 = vmov 0.0   ;;  %v16761_v53 = vmax.f32 %v8891_v49, 0.0 }
 0xa17   :  { %v8888_v36 = vadd.f32 %v8879_v60, %v8867_v19  ;;  %v12400_v34 = vpack.i.bf16 %v16751_v35, %v17388_v27 }
 0xa18   :  { %v8889_v46 = vadd.f32 %v8879_v60, %v8868_v1  ;;  %v12285_v2 = vpack.i.bf16 %v16747_v44, %v16751_v35  ;;  %v16765_v1 = vmax.f32 %v8890_v21, 0.0  ;;  %v12280_v60 = vpack.i.bf16 0.0, %v16761_v53 }
 0xa19   :  { %v16739_v57 = vmax.f32 %v8888_v36, 0.0  ;;  %v12405_v63 = vpack.i.bf16 0.0, %v16747_v44 }
 0xa1a   :  { %v16734_v4 = vmax.f32 %v8889_v46, 0.0  ;;  %v12270_v3 = vpack.i.bf16 %v16765_v1, %v17388_v27  ;;  %v12395_v50 = vpack.i.bf16 %v16761_v53, %v16765_v1 }
 0xa1b   :  { %v12380_v47 = vpack.i.bf16 %v16739_v57, %v17388_v27 }
 0xa1c   :  { %v12260_v48 = vpack.i.bf16 %v16734_v4, %v16739_v57  ;;  %v8839_v26 = vpop.f32.mrf.mxu2  ;;  %v12385_v25 = vpack.i.bf16 0.0, %v16734_v4 }
 0xa1d   :  { %v8862_v41 = vpop.f32.mrf.mxu3  ;;  %v8871_v59 = vadd.f32 %v8839_v26, %v8722_v54 }
 0xa1e   :  { %v8872_v28 = vadd.f32 %v8862_v41, %v8723_v22  ;;  %12261 = vrot.lane.b32.xlu0 %v12260_v48, %s12529_s26  ;;  %v11031_v41 = vld [vmem:[%s17142_s4 + $0x58] sm:$0xff] }
 0xa1f   :  { %v8892_v20 = vadd.f32 %v8884_v52, %v8871_v59 }
 0xa20   :  { %v8893_v23 = vadd.f32 %v8884_v52, %v8872_v28  ;;  %v11030_v28 = vld [vmem:[%s17142_s4 + $0x50] sm:$0xff] }
 0xa21   :  { %v16753_v61 = vmax.f32 %v8892_v20, 0.0 }
 0xa22   :  { %v16749_v42 = vmax.f32 %v8893_v23, 0.0 }
 0xa23   :  { %v12265_v8 = vpack.i.bf16 %v16753_v61, %v17388_v27 }
 0xa24   :  { %v12275_v16 = vpack.i.bf16 0.0, %v16749_v42  ;;  %v12390_v51 = vpack.i.bf16 %v16749_v42, %v16753_v61 }
 0xa25   :  { %12266 = vrot.lane.b32.xlu1 %v12265_v8, %s12529_s26 }
 0xa26   :  { %12276 = vrot.lane.b32.xlu2 %v12275_v16, %s12529_s26  ;;  %12286 = vrot.lane.b32.xlu0 %v12285_v2, %s12529_s26 }
 0xa2d   :  { %12271 = vrot.lane.b32.xlu1 %v12270_v3, %s12529_s26 }
 0xa2e   :  { %12281 = vrot.lane.b32.xlu2 %v12280_v60, %s12529_s26  ;;  %12291 = vrot.lane.b32.xlu0 %v12260_v48, %s12530_s27 }
 0xa35   :  { %12296 = vrot.lane.b32.xlu1 %v12265_v8, %s12530_s27 }
 0xa36   :  { %12306 = vrot.lane.b32.xlu2 %v12275_v16, %s12530_s27  ;;  %12316 = vrot.lane.b32.xlu0 %v12285_v2, %s12530_s27 }
 0xa3d   :  { %12301 = vrot.lane.b32.xlu1 %v12270_v3, %s12530_s27 }
 0xa3e   :  { %12311 = vrot.lane.b32.xlu2 %v12280_v60, %s12530_s27  ;;  %12321 = vrot.lane.b32.xlu0 %v12260_v48, %s12531_s7 }
 0xa45   :  { %12326 = vrot.lane.b32.xlu1 %v12265_v8, %s12531_s7 }
 0xa46   :  { %12336 = vrot.lane.b32.xlu2 %v12275_v16, %s12531_s7  ;;  %12346 = vrot.lane.b32.xlu0 %v12285_v2, %s12531_s7 }
 0xa4d   :  { %12331 = vrot.lane.b32.xlu1 %v12270_v3, %s12531_s7 }
 0xa4e   :  { %12341 = vrot.lane.b32.xlu2 %v12280_v60, %s12531_s7  ;;  %12351 = vrot.lane.b32.xlu0 %v12260_v48, %s12532_s8 }
 0xa55   :  { %12356 = vrot.lane.b32.xlu1 %v12265_v8, %s12532_s8  ;;  %v11215_v8 = vld [vmem:[%s17142_s4 + $0x78] sm:$0xff] }
 0xa56   :  { %12366 = vrot.lane.b32.xlu2 %v12275_v16, %s12532_s8  ;;  %12376 = vrot.lane.b32.xlu0 %v12285_v2, %s12532_s8 }
 0xa5d   :  { %12361 = vrot.lane.b32.xlu1 %v12270_v3, %s12532_s8  ;;  %v11124_v3 = vld [vmem:[%s17141_s3 + $0x3f0] sm:$0xff] }
 0xa5e   :  { %12371 = vrot.lane.b32.xlu2 %v12280_v60, %s12532_s8  ;;  %12386 = vrot.lane.b32.xlu0 %v12385_v25, %s12533_s24 }
 0xa65   :  { %12391 = vrot.lane.b32.xlu1 %v12390_v51, %s12533_s24 }
 0xa66   :  { %12381 = vrot.lane.b32.xlu2 %v12380_v47, %s12533_s24  ;;  %12406 = vrot.lane.b32.xlu0 %v12405_v63, %s12533_s24 }
 0xa6d   :  { %12396 = vrot.lane.b32.xlu1 %v12395_v50, %s12533_s24 }
 0xa6e   :  { %12401 = vrot.lane.b32.xlu2 %v12400_v34, %s12533_s24  ;;  %12416 = vrot.lane.b32.xlu0 %v12385_v25, %s12534_s20 }
 0xa75   :  { %12421 = vrot.lane.b32.xlu1 %v12390_v51, %s12534_s20 }
 0xa76   :  { %12411 = vrot.lane.b32.xlu2 %v12380_v47, %s12534_s20  ;;  %12436 = vrot.lane.b32.xlu0 %v12405_v63, %s12534_s20 }
 0xa7d   :  { %12426 = vrot.lane.b32.xlu1 %v12395_v50, %s12534_s20 }
 0xa7e   :  { %12431 = vrot.lane.b32.xlu2 %v12400_v34, %s12534_s20  ;;  %12446 = vrot.lane.b32.xlu0 %v12385_v25, %s12535_s13 }
 0xa80   :  { %v12277_v32 = vpop.permute.xlu2 %12276 }
 0xa81   :  { %v12278_v12 = vunpack.i.l.bf16 %v12277_v32  ;;  %v12279_v45 = vunpack.i.h.bf16 %v12277_v32 }
 0xa85   :  { %12451 = vrot.lane.b32.xlu1 %v12390_v51, %s12535_s13 }
 0xa86   :  { %12441 = vrot.lane.b32.xlu2 %v12380_v47, %s12535_s13  ;;  %12466 = vrot.lane.b32.xlu0 %v12405_v63, %s12535_s13 }
 0xa88   :  { %v12282_v13 = vpop.permute.xlu2 %12281 }
 0xa89   :  { %v12283_v38 = vunpack.i.l.bf16 %v12282_v13  ;;  %v12284_v52 = vunpack.i.h.bf16 %v12282_v13 }
 0xa8d   :  { %12456 = vrot.lane.b32.xlu1 %v12395_v50, %s12535_s13 }
 0xa8e   :  { %12461 = vrot.lane.b32.xlu2 %v12400_v34, %s12535_s13  ;;  %12476 = vrot.lane.b32.xlu0 %v12385_v25, %s12530_s27 }
 0xa90   :  { %v16819_v19 = vpop.permute.xlu2 %12306  ;;  %v12262_v46 = vpop.permute.xlu0 %12261 }
 0xa91   :  { %v12264_v6 = vunpack.i.h.bf16 %v12262_v46  ;;  %v12263_v10 = vunpack.i.l.bf16 %v12262_v46  ;;  %v12308_v14 = vunpack.i.l.bf16 %v16819_v19  ;;  %v12309_v16 = vunpack.i.h.bf16 %v16819_v19 }
 0xa93   :  { %v8966_v37 = vsel %vm62_vm0, %v12279_v45, %v12263_v10  ;;  %v8967_v40 = vsel %vm62_vm0, %v12263_v10, %v12264_v6  ;;  %v11125_v6 = vld [vmem:[%s17141_s3 + $0x3f8] sm:$0xff] }
 0xa95   :  { %12481 = vrot.lane.b32.xlu1 %v12390_v51, %s12530_s27 }
 0xa96   :  { %12471 = vrot.lane.b32.xlu2 %v12380_v47, %s12530_s27  ;;  %12496 = vrot.lane.b32.xlu0 %v12405_v63, %s12530_s27 }
 0xa97   :  { %v12267_v18 = vpop.permute.xlu1 %12266 }
 0xa98   :  { %v16824_v24 = vpop.permute.xlu2 %12311  ;;  %v12287_v33 = vpop.permute.xlu0 %12286  ;;  %v12269_v56 = vunpack.i.h.bf16 %v12267_v18  ;;  %v12268_v31 = vunpack.i.l.bf16 %v12267_v18 }
 0xa99   :  { %v12289_v30 = vunpack.i.h.bf16 %v12287_v33  ;;  %v12288_v62 = vunpack.i.l.bf16 %v12287_v33  ;;  %v12313_v47 = vunpack.i.l.bf16 %v16824_v24  ;;  %v12314_v19 = vunpack.i.h.bf16 %v16824_v24 }
 0xa9a   :  { %v8970_v55 = vsel %vm62_vm0, %v12268_v31, %v12269_v56  ;;  %v8971_v36 = vsel %vm62_vm0, %v12269_v56, %v12278_v12 }
 0xa9b   :  { %9046 = vmatpush.msrb.mxu2 %v8970_v55  ;;  %9069 = vmatpush.msrb.mxu3 %v8971_v36  ;;  %v8964_v48 = vsel %vm62_vm0, %v12284_v52, %v12288_v62  ;;  %v8965_v15 = vsel %vm62_vm0, %v12288_v62, %v12289_v30 }
 0xa9d   :  { %9047 = vmatpush.msrb.mxu2 %v8966_v37  ;;  %9070 = vmatpush.msrb.mxu3 %v8967_v40 }
 0xa9e   :  { %12491 = vrot.lane.b32.xlu2 %v12400_v34, %s12530_s27  ;;  %12486 = vrot.lane.b32.xlu1 %v12395_v50, %s12530_s27 }
 0xa9f   :  { %10248 = vperm.xlu0 %11359, %v11214_v5   ;;  %11132 = vmatmul.msk.f32.vlgmr.msrb.gmra.mxu2 %vm877_vm4, %v11126_v58  ;;  %v12272_v9 = vpop.permute.xlu1 %12271 }
 0xaa0   :  { %v16837_v39 = vpop.permute.xlu2 %12336  ;;  %11134 = vmatmul.msk.f32.vlgmr.msrb.gmra.mxu3 %vm877_vm4, %v11126_v58  ;;  %v12292_v22 = vpop.permute.xlu0 %12291  ;;  %v12274_v11 = vunpack.i.h.bf16 %v12272_v9  ;;  %v12273_v7 = vunpack.i.l.bf16 %v12272_v9 }
 0xaa1   :  { %v12294_v23 = vunpack.i.h.bf16 %v12292_v22  ;;  %v12293_v0 = vunpack.i.l.bf16 %v12292_v22  ;;  %v12338_v24 = vunpack.i.l.bf16 %v16837_v39  ;;  %v12339_v37 = vunpack.i.h.bf16 %v16837_v39  ;;  %v11144_v22 = vld [vmem:[%s17141_s3 + $0x410] sm:$0xff] }
 0xaa2   :  { %v8968_v43 = vsel %vm62_vm0, %v12273_v7, %v12274_v11  ;;  %v8969_v54 = vsel %vm62_vm0, %v12274_v11, %v12283_v38 }
 0xaa3   :  { %9000 = vmatpush.msra.mxu0 %v8968_v43  ;;  %9023 = vmatpush.msrb.mxu1 %v8969_v54  ;;  %v9104_v2 = vsel %vm315_vm2, %v12309_v16, %v12293_v0  ;;  %v9105_v60 = vsel %vm315_vm2, %v12293_v0, %v12294_v23 }
 0xaa5   :  { %9001 = vmatpush.msra.mxu0 %v8964_v48  ;;  %9024 = vmatpush.msrb.mxu1 %v8965_v15 }
 0xaa6   :  { %7497 = vperm.xlu2 %11298, %v11031_v41   ;;  %7492 = vperm.xlu1 %11297, %v11030_v28  }
 0xaa7   :  { %11128 = vmatmul.msk.f32.vlgmr.msra.gmra.mxu0 %vm877_vm4, %v11126_v58  ;;  %11130 = vmatmul.msk.f32.vlgmr.msrb.gmra.mxu1 %vm877_vm4, %v11126_v58  ;;  %v12297_v29 = vpop.permute.xlu1 %12296 }
 0xaa8   :  { %v16855_v26 = vpop.permute.xlu2 %12341  ;;  %11133 = vmatmul.msk.f32.gmra.mxu2 %vm877_vm4, %v11127_v17  ;;  %v12317_v59 = vpop.permute.xlu0 %12316  ;;  %11135 = vmatmul.msk.f32.gmra.mxu3 %vm877_vm4, %v11127_v17  ;;  %v12299_v20 = vunpack.i.h.bf16 %v12297_v29  ;;  %v12298_v49 = vunpack.i.l.bf16 %v12297_v29 }
 0xaa9   :  { %v12319_v34 = vunpack.i.h.bf16 %v12317_v59  ;;  %v12318_v50 = vunpack.i.l.bf16 %v12317_v59  ;;  %v12343_v39 = vunpack.i.l.bf16 %v16855_v26  ;;  %v12344_v54 = vunpack.i.h.bf16 %v16855_v26 }
 0xaaa   :  { %v9108_v21 = vsel %vm315_vm2, %v12298_v49, %v12299_v20  ;;  %v9109_v27 = vsel %vm315_vm2, %v12299_v20, %v12308_v14  ;;  %v11145_v14 = vld [vmem:[%s17141_s3 + $0x418] sm:$0xff] }
 0xaab   :  { %9184 = vmatpush.msra.mxu2 %v9108_v21  ;;  %9207 = vmatpush.msra.mxu3 %v9109_v27  ;;  %v9102_v18 = vsel %vm315_vm2, %v12314_v19, %v12318_v50  ;;  %v9103_v33 = vsel %vm315_vm2, %v12318_v50, %v12319_v34 }
 0xaad   :  { %9185 = vmatpush.msra.mxu2 %v9104_v2  ;;  %9208 = vmatpush.msra.mxu3 %v9105_v60 }
 0xaae   :  { %10253 = vperm.xlu1 %11297, %v11215_v8  }
 0xaaf   :  { %11129 = vmatmul.msk.f32.gmra.mxu0 %vm877_vm4, %v11127_v17  ;;  %11131 = vmatmul.msk.f32.gmra.mxu1 %vm877_vm4, %v11127_v17  ;;  %v12302_v51 = vpop.permute.xlu1 %12301 }
 0xab0   :  { %v16873_v25 = vpop.permute.xlu2 %12366  ;;  %11140 = vmatmul.msk.f32.vlgmr.msra.gmra.mxu2 %vm877_vm4, %v11124_v3  ;;  %v12322_v63 = vpop.permute.xlu0 %12321  ;;  %11142 = vmatmul.msk.f32.vlgmr.msra.gmra.mxu3 %vm877_vm4, %v11124_v3  ;;  %v12304_v32 = vunpack.i.h.bf16 %v12302_v51  ;;  %v12303_v13 = vunpack.i.l.bf16 %v12302_v51 }
 0xab1   :  { %v12324_v45 = vunpack.i.h.bf16 %v12322_v63  ;;  %v12323_v55 = vunpack.i.l.bf16 %v12322_v63  ;;  %v12368_v26 = vunpack.i.l.bf16 %v16873_v25  ;;  %v12369_v21 = vunpack.i.h.bf16 %v16873_v25 }
 0xab2   :  { %v9106_v46 = vsel %vm315_vm2, %v12303_v13, %v12304_v32  ;;  %v9107_v12 = vsel %vm315_vm2, %v12304_v32, %v12313_v47 }
 0xab3   :  { %9138 = vmatpush.msrb.mxu0 %v9106_v46  ;;  %9161 = vmatpush.msra.mxu1 %v9107_v12  ;;  %v9245_v38 = vsel %vm576_vm3, %v12339_v37, %v12323_v55  ;;  %v9246_v9 = vsel %vm576_vm3, %v12323_v55, %v12324_v45 }
 0xab5   :  { %9139 = vmatpush.msrb.mxu0 %v9102_v18  ;;  %9162 = vmatpush.msra.mxu1 %v9103_v33  ;;  %v11155_v18 = vld [vmem:[%s17141_s3 + $0x428] sm:$0xff] }
 0xab7   :  { %11136 = vmatmul.msk.f32.vlgmr.msrb.gmra.mxu0 %vm877_vm4, %v11124_v3  ;;  %11138 = vmatmul.msk.f32.vlgmr.msra.gmra.mxu1 %vm877_vm4, %v11124_v3  ;;  %v12327_v56 = vpop.permute.xlu1 %12326  ;;  %v11154_v3 = vld [vmem:[%s17141_s3 + $0x420] sm:$0xff] }
 0xab8   :  { %v16888_v10 = vpop.permute.xlu2 %12371  ;;  %11141 = vmatmul.msk.f32.gmra.mxu2 %vm877_vm4, %v11125_v6  ;;  %v12347_v31 = vpop.permute.xlu0 %12346  ;;  %11143 = vmatmul.msk.f32.gmra.mxu3 %vm877_vm4, %v11125_v6  ;;  %v12329_v36 = vunpack.i.h.bf16 %v12327_v56  ;;  %v12328_v5 = vunpack.i.l.bf16 %v12327_v56 }
 0xab9   :  { %v12349_v7 = vunpack.i.h.bf16 %v12347_v31  ;;  %v12348_v41 = vunpack.i.l.bf16 %v12347_v31  ;;  %v12373_v63 = vunpack.i.l.bf16 %v16888_v10 }
 0xaba   :  { %v9249_v40 = vsel %vm576_vm3, %v12328_v5, %v12329_v36  ;;  %v9250_v58 = vsel %vm576_vm3, %v12329_v36, %v12338_v24 }
 0xabb   :  { %9325 = vmatpush.msrb.mxu2 %v9249_v40  ;;  %9348 = vmatpush.msrb.mxu3 %v9250_v58  ;;  %v9243_v15 = vsel %vm576_vm3, %v12344_v54, %v12348_v41  ;;  %v9244_v17 = vsel %vm576_vm3, %v12348_v41, %v12349_v7  ;;  %v11165_v41 = vld [vmem:[%s17141_s3 + $0x438] sm:$0xff] }
 0xabd   :  { %9326 = vmatpush.msrb.mxu2 %v9245_v38  ;;  %9349 = vmatpush.msrb.mxu3 %v9246_v9 }
 0xabf   :  { %11137 = vmatmul.msk.f32.gmra.mxu0 %vm877_vm4, %v11125_v6  ;;  %11139 = vmatmul.msk.f32.gmra.mxu1 %vm877_vm4, %v11125_v6  ;;  %v12332_v62 = vpop.permute.xlu1 %12331 }
 0xac0   :  { %v16903_v30 = vpop.permute.xlu2 %12381  ;;  %11150 = vmatmul.msk.f32.vlgmr.msrb.gmra.mxu2 %vm877_vm4, %v11144_v22  ;;  %v12352_v11 = vpop.permute.xlu0 %12351  ;;  %11152 = vmatmul.msk.f32.vlgmr.msrb.gmra.mxu3 %vm877_vm4, %v11144_v22  ;;  %v12334_v52 = vunpack.i.h.bf16 %v12332_v62  ;;  %v12333_v43 = vunpack.i.l.bf16 %v12332_v62 }
 0xac1   :  { %v12354_v0 = vunpack.i.h.bf16 %v12352_v11  ;;  %v12353_v20 = vunpack.i.l.bf16 %v12352_v11  ;;  %v12383_v6 = vunpack.i.l.bf16 %v16903_v30  ;;  %v12384_v45 = vunpack.i.h.bf16 %v16903_v30 }
 0xac2   :  { %v9247_v28 = vsel %vm576_vm3, %v12333_v43, %v12334_v52  ;;  %v9248_v48 = vsel %vm576_vm3, %v12334_v52, %v12343_v39 }
 0xac3   :  { %9279 = vmatpush.msra.mxu0 %v9247_v28  ;;  %9302 = vmatpush.msrb.mxu1 %v9248_v48  ;;  %v9394_v2 = vsel %vm877_vm4, %v12369_v21, %v12353_v20  ;;  %v9395_v60 = vsel %vm877_vm4, %v12353_v20, %v12354_v0  ;;  %v11174_v20 = vld [vmem:[%s17141_s3 + $0x440] sm:$0xff] }
 0xac4   :  { %v17390_v21 = vld [vmem:[#allocation7_spill] sm:$0xff] }
 0xac5   :  { %9280 = vmatpush.msra.mxu0 %v9243_v15  ;;  %9303 = vmatpush.msrb.mxu1 %v9244_v17 }
 0xac7   :  { %11146 = vmatmul.msk.f32.vlgmr.msra.gmra.mxu0 %vm877_vm4, %v11144_v22  ;;  %11148 = vmatmul.msk.f32.vlgmr.msrb.gmra.mxu1 %vm877_vm4, %v11144_v22  ;;  %v12357_v59 = vpop.permute.xlu1 %12356 }
 0xac8   :  { %v16918_v29 = vpop.permute.xlu2 %12401  ;;  %11151 = vmatmul.msk.f32.gmra.mxu2 %vm877_vm4, %v11145_v14  ;;  %v12377_v23 = vpop.permute.xlu0 %12376  ;;  %11153 = vmatmul.msk.f32.gmra.mxu3 %vm877_vm4, %v11145_v14  ;;  %v12359_v49 = vunpack.i.h.bf16 %v12357_v59  ;;  %v12358_v16 = vunpack.i.l.bf16 %v12357_v59 }
 0xac9   :  { %v12378_v34 = vunpack.i.l.bf16 %v12377_v23  ;;  %v12379_v13 = vunpack.i.h.bf16 %v12377_v23  ;;  %v12404_v30 = vunpack.i.h.bf16 %v16918_v29 }
 0xaca   :  { %v9398_v27 = vsel %vm877_vm4, %v12358_v16, %v12359_v49  ;;  %v9399_v8 = vsel %vm877_vm4, %v12359_v49, %v12368_v26  ;;  %v17389_v16 = vld [vmem:[#allocation20_spill] sm:$0xff] }
 0xacb   :  { %9474 = vmatpush.msra.mxu2 %v9398_v27  ;;  %9497 = vmatpush.msra.mxu3 %v9399_v8  ;;  %v6687_v27 = vadd.f32 %v17390_v21, %v17389_v16  ;;  %v17409_v21 = vld [vmem:[#allocation63_spill] sm:$0xff] }
 0xacd   :  { %9475 = vmatpush.msra.mxu2 %v9394_v2  ;;  %9498 = vmatpush.msra.mxu3 %v9395_v60 }
 0xacf   :  { %11147 = vmatmul.msk.f32.gmra.mxu0 %vm877_vm4, %v11145_v14  ;;  %9583 = vmatpush.msrb.mxu2 %v16753_v61  ;;  %v12362_v25 = vpop.permute.xlu1 %12361  ;;  %v12374_v61 = vunpack.i.h.bf16 %v16888_v10 }
 0xad0   :  { %v16933_v47 = vpop.permute.xlu2 %12411  ;;  %11149 = vmatmul.msk.f32.gmra.mxu1 %vm877_vm4, %v11145_v14  ;;  %11160 = vmatmul.msk.f32.vlgmr.msra.gmra.mxu2 %vm877_vm4, %v11154_v3  ;;  %v12387_v51 = vpop.permute.xlu0 %12386  ;;  %v12364_v50 = vunpack.i.h.bf16 %v12362_v25  ;;  %v12363_v32 = vunpack.i.l.bf16 %v12362_v25 }
 0xad1   :  { %11162 = vmatmul.msk.f32.vlgmr.msra.gmra.mxu3 %vm877_vm4, %v11154_v3  ;;  %9584 = vmatpush.msrb.mxu2 %v16739_v57  ;;  %v9392_v12 = vsel %vm877_vm4, %v12374_v61, %v12378_v34  ;;  %v9393_v57 = vsel %vm877_vm4, %v12378_v34, %v12379_v13  ;;  %v12388_v10 = vunpack.i.l.bf16 %v12387_v51  ;;  %v12389_v31 = vunpack.i.h.bf16 %v12387_v51  ;;  %v17392_v34 = vld [vmem:[#allocation52_spill] sm:$0xff] }
 0xad2   :  { %9606 = vmatpush.msrb.mxu3 %v16749_v42  ;;  %v9396_v19 = vsel %vm877_vm4, %v12363_v32, %v12364_v50  ;;  %v9397_v46 = vsel %vm877_vm4, %v12364_v50, %v12373_v63  ;;  %v12413_v43 = vunpack.i.l.bf16 %v16933_v47  ;;  %v17391_v63 = vld [vmem:[#allocation8_spill] sm:$0xff] }
 0xad3   :  { %9428 = vmatpush.msrb.mxu0 %v9396_v19  ;;  %9451 = vmatpush.msra.mxu1 %v9397_v46  ;;  %v9676_v5 = vsel %vm1468_vm5, %v12384_v45, %v12388_v10  ;;  %v6710_v50 = vadd.f32 %v17392_v34, %v17391_v63  ;;  %v17393_v19 = vld [vmem:[#allocation24_spill] sm:$0xff] }
 0xad4   :  { %9607 = vmatpush.msrb.mxu3 %v16734_v4  ;;  %v6903_v46 = vadd.f32 %v17393_v19, %v6687_v27 }
 0xad5   :  { %9429 = vmatpush.msrb.mxu0 %v9392_v12  ;;  %9452 = vmatpush.msra.mxu1 %v9393_v57  ;;  %v11175_v57 = vld [vmem:[%s17141_s3 + $0x448] sm:$0xff] }
 0xad7   :  { %11156 = vmatmul.msk.f32.vlgmr.msrb.gmra.mxu0 %vm877_vm4, %v11154_v3  ;;  %v12392_v4 = vpop.permute.xlu1 %12391  ;;  %9560 = vmatpush.msrb.mxu1 %v16761_v53  ;;  %v9677_v53 = vsel %vm1468_vm5, %v12388_v10, %v12389_v31 }
 0xad8   :  { %v16952_v42 = vpop.permute.xlu2 %12431  ;;  %11158 = vmatmul.msk.f32.vlgmr.msra.gmra.mxu1 %vm877_vm4, %v11154_v3  ;;  %11161 = vmatmul.msk.f32.gmra.mxu2 %vm877_vm4, %v11155_v18  ;;  %v12407_v33 = vpop.permute.xlu0 %12406  ;;  %v12394_v24 = vunpack.i.h.bf16 %v12392_v4  ;;  %v12393_v56 = vunpack.i.l.bf16 %v12392_v4  ;;  %v17394_v4 = vld [vmem:[#allocation53_spill] sm:$0xff] }
 0xad9   :  { %11163 = vmatmul.msk.f32.gmra.mxu3 %vm877_vm4, %v11155_v18  ;;  %9537 = vmatpush.msra.mxu0 %v16765_v1  ;;  %v11164_v1 = vld [vmem:[%s17141_s3 + $0x430] sm:$0xff]  ;;  %v12409_v58 = vunpack.i.h.bf16 %v12407_v33  ;;  %v12408_v38 = vunpack.i.l.bf16 %v12407_v33  ;;  %v12433_v8 = vunpack.i.l.bf16 %v16952_v42  ;;  %v12434_v32 = vunpack.i.h.bf16 %v16952_v42 }
 0xada   :  { %v9680_v55 = vsel %vm1468_vm5, %v12393_v56, %v12394_v24  ;;  %v9681_v36 = vsel %vm1468_vm5, %v12394_v24, %v12383_v6  ;;  %9561 = vmatpush.msrb.mxu1 %v16747_v44  ;;  %v6904_v33 = vadd.f32 %v17394_v4, %v6710_v50  ;;  %v17395_v6 = vld [vmem:[#allocation55_spill] sm:$0xff] }
 0xadb   :  { %9538 = vmatpush.msra.mxu0 %v16751_v35  ;;  %9756 = vmatpush.msra.mxu2 %v9680_v55  ;;  %v12403_v35 = vunpack.i.l.bf16 %v16918_v29  ;;  %v9674_v11 = vsel %vm1468_vm5, %v12404_v30, %v12408_v38  ;;  %v9675_v7 = vsel %vm1468_vm5, %v12408_v38, %v12409_v58  ;;  %v12414_v29 = vunpack.i.h.bf16 %v16933_v47  ;;  %v17396_v24 = vld [vmem:[#allocation31_spill] sm:$0xff]  ;;  %v17399_v58 = vld [vmem:[#allocation44_spill] sm:$0xff]  ;;  %v17400_v38 = vld [vmem:[#allocation70_spill] sm:$0xff] }
 0xadc   :  { %9779 = vmatpush.msra.mxu3 %v9681_v36  ;;  %v7012_v10 = vadd.f32 %v17395_v6, %v6903_v46  ;;  %v7013_v56 = vadd.f32 %v17396_v24, %v6904_v33  ;;  %v17402_v30 = vld [vmem:[#allocation54_spill] sm:$0xff] }
 0xadd   :  { %9757 = vmatpush.msra.mxu2 %v9676_v5 }
 0xade   :  { %9780 = vmatpush.msra.mxu3 %v9677_v53  ;;  %v17397_v53 = vld [vmem:[#allocation64_spill] sm:$0xff] }
 0xadf   :  { %11157 = vmatmul.msk.f32.gmra.mxu0 %vm877_vm4, %v11155_v18  ;;  %v12397_v44 = vpop.permute.xlu1 %12396 }
 0xae0   :  { %v16971_v37 = vpop.permute.xlu2 %12441  ;;  %11159 = vmatmul.msk.f32.gmra.mxu1 %vm877_vm4, %v11155_v18  ;;  %11170 = vmatmul.msk.f32.vlgmr.msrb.gmra.mxu2 %vm877_vm4, %v11164_v1  ;;  %v12417_v40 = vpop.permute.xlu0 %12416  ;;  %v12399_v9 = vunpack.i.h.bf16 %v12397_v44  ;;  %v12398_v22 = vunpack.i.l.bf16 %v12397_v44  ;;  %v17398_v44 = vld [vmem:[#allocation45_spill] sm:$0xff] }
 0xae1   :  { %11172 = vmatmul.msk.f32.vlgmr.msrb.gmra.mxu3 %vm877_vm4, %v11164_v1  ;;  %v12419_v48 = vunpack.i.h.bf16 %v12417_v40  ;;  %v12418_v15 = vunpack.i.l.bf16 %v12417_v40  ;;  %v12443_v31 = vunpack.i.l.bf16 %v16971_v37  ;;  %v7186_v40 = vadd.f32 %v17398_v44, %v7013_v56  ;;  %v11185_v56 = vld [vmem:[%s17141_s3 + $0x458] sm:$0xff] }
 0xae2   :  { %v9678_v39 = vsel %vm1468_vm5, %v12398_v22, %v12399_v9  ;;  %v9679_v62 = vsel %vm1468_vm5, %v12399_v9, %v12403_v35  ;;  %v7185_v35 = vadd.f32 %v17397_v53, %v7012_v10  ;;  %v7187_v9 = vadd.f32 %v17400_v38, %v17399_v58  ;;  %v17401_v22 = vld [vmem:[#allocation75_spill] sm:$0xff]  ;;  %v17413_v44 = vld [vmem:[#allocation26_spill] sm:$0xff] }
 0xae3   :  { %9710 = vmatpush.msrb.mxu0 %v9678_v39  ;;  %9733 = vmatpush.msra.mxu1 %v9679_v62  ;;  %v9825_v23 = vsel %vm1769_vm6, %v12414_v29, %v12418_v15  ;;  %v9826_v0 = vsel %vm1769_vm6, %v12418_v15, %v12419_v48  ;;  %v7188_v39 = vadd.f32 %v17402_v30, %v17401_v22  ;;  %v12444_v62 = vunpack.i.h.bf16 %v16971_v37  ;;  %v17405_v15 = vld [vmem:[#allocation37_spill] sm:$0xff] }
 0xae4   :  { %v11184_v37 = vld [vmem:[%s17141_s3 + $0x450] sm:$0xff] }
 0xae5   :  { %9711 = vmatpush.msrb.mxu0 %v9674_v11  ;;  %9734 = vmatpush.msra.mxu1 %v9675_v7  ;;  %v17415_v30 = vld [vmem:[#allocation41_spill] sm:$0xff] }
 0xae7   :  { %11166 = vmatmul.msk.f32.vlgmr.msra.gmra.mxu0 %vm877_vm4, %v11164_v1  ;;  %v12422_v54 = vpop.permute.xlu1 %12421 }
 0xae8   :  { %v16986_v52 = vpop.permute.xlu2 %12461  ;;  %11168 = vmatmul.msk.f32.vlgmr.msrb.gmra.mxu1 %vm877_vm4, %v11164_v1  ;;  %11171 = vmatmul.msk.f32.gmra.mxu2 %vm877_vm4, %v11165_v41  ;;  %v12437_v28 = vpop.permute.xlu0 %12436  ;;  %v12424_v17 = vunpack.i.h.bf16 %v12422_v54  ;;  %v12423_v14 = vunpack.i.l.bf16 %v12422_v54 }
 0xae9   :  { %11173 = vmatmul.msk.f32.gmra.mxu3 %vm877_vm4, %v11165_v41  ;;  %v12439_v60 = vunpack.i.h.bf16 %v12437_v28  ;;  %v12438_v3 = vunpack.i.l.bf16 %v12437_v28  ;;  %v17404_v28 = vld [vmem:[#allocation65_spill] sm:$0xff] }
 0xaea   :  { %v9829_v26 = vsel %vm1769_vm6, %v12423_v14, %v12424_v17  ;;  %v9830_v59 = vsel %vm1769_vm6, %v12424_v17, %v12413_v43  ;;  %v17403_v43 = vld [vmem:[#allocation13_spill] sm:$0xff]  ;;  %v7335_v48 = vadd.f32 %v17404_v28, %v7186_v40  ;;  %v7336_v17 = vadd.f32 %v17405_v15, %v7187_v9  ;;  %v17414_v40 = vld [vmem:[#allocation42_spill] sm:$0xff] }
 0xaeb   :  { %9905 = vmatpush.msrb.mxu2 %v9829_v26  ;;  %9928 = vmatpush.msrb.mxu3 %v9830_v59  ;;  %v9823_v12 = vsel %vm1769_vm6, %v12434_v32, %v12438_v3  ;;  %v9824_v18 = vsel %vm1769_vm6, %v12438_v3, %v12439_v60  ;;  %v7334_v54 = vadd.f32 %v17403_v43, %v7185_v35  ;;  %v17406_v14 = vld [vmem:[#allocation29_spill] sm:$0xff]  ;;  %v12463_v60 = vunpack.i.l.bf16 %v16986_v52 }
 0xaec   :  { %v7337_v29 = vadd.f32 %v17406_v14, %v7188_v39  ;;  %v7485_v27 = vadd.f32 %v17409_v21, %v7336_v17  ;;  %v6707_v58 = vadd.f32 %v17414_v40, %v17413_v44  ;;  %v17421_v21 = vld [vmem:[#allocation27_spill] sm:$0xff]  ;;  %v11204_v40 = vld [vmem:[%s17141_s3 + $0x470] sm:$0xff] }
 0xaed   :  { %9906 = vmatpush.msrb.mxu2 %v9825_v23  ;;  %9929 = vmatpush.msrb.mxu3 %v9826_v0  ;;  %v17407_v23 = vld [vmem:[#allocation76_spill] sm:$0xff] }
 0xaee   :  { %v7483_v0 = vadd.f32 %v17407_v23, %v7334_v54  ;;  %v17417_v54 = vld [vmem:[#allocation10_spill] sm:$0xff]  ;;  %v17419_v23 = vld [vmem:[#allocation21_spill] sm:$0xff] }
 0xaef   :  { %11167 = vmatmul.msk.f32.gmra.mxu0 %vm877_vm4, %v11165_v41  ;;  %v12427_v2 = vpop.permute.xlu1 %12426 }
 0xaf0   :  { %v17001_v49 = vpop.permute.xlu2 %12471  ;;  %11169 = vmatmul.msk.f32.gmra.mxu1 %vm877_vm4, %v11165_v41  ;;  %11180 = vmatmul.msk.f32.vlgmr.msra.gmra.mxu2 %vm877_vm4, %v11174_v20  ;;  %v12429_v47 = vunpack.i.h.bf16 %v12427_v2  ;;  %v12428_v25 = vunpack.i.l.bf16 %v12427_v2  ;;  %v12447_v51 = vpop.permute.xlu0 %12446 }
 0xaf1   :  { %11182 = vmatmul.msk.f32.vlgmr.msra.gmra.mxu3 %vm877_vm4, %v11174_v20  ;;  %v12449_v55 = vunpack.i.h.bf16 %v12447_v51  ;;  %v12448_v36 = vunpack.i.l.bf16 %v12447_v51  ;;  %v12474_v38 = vunpack.i.h.bf16 %v17001_v49 }
 0xaf2   :  { %v9827_v13 = vsel %vm1769_vm6, %v12428_v25, %v12429_v47  ;;  %v9828_v61 = vsel %vm1769_vm6, %v12429_v47, %v12433_v8  ;;  %v17410_v8 = vld [vmem:[#allocation62_spill] sm:$0xff] }
 0xaf3   :  { %9859 = vmatpush.msra.mxu0 %v9827_v13  ;;  %9882 = vmatpush.msrb.mxu1 %v9828_v61  ;;  %v9974_v26 = vsel %vm2070_vm7, %v12444_v62, %v12448_v36  ;;  %v9975_v59 = vsel %vm2070_vm7, %v12448_v36, %v12449_v55  ;;  %v7486_v2 = vadd.f32 %v17410_v8, %v7337_v29  ;;  %v12473_v55 = vunpack.i.l.bf16 %v17001_v49 }
 0xaf5   :  { %9860 = vmatpush.msra.mxu0 %v9823_v12  ;;  %9883 = vmatpush.msrb.mxu1 %v9824_v18  ;;  %v12464_v18 = vunpack.i.h.bf16 %v16986_v52  ;;  %v17411_v52 = vld [vmem:[#allocation16_spill] sm:$0xff] }
 0xaf7   :  { %11176 = vmatmul.msk.f32.vlgmr.msrb.gmra.mxu0 %vm877_vm4, %v11174_v20  ;;  %v12452_v45 = vpop.permute.xlu1 %12451 }
 0xaf8   :  { %v17023_v42 = vpop.permute.xlu2 %12491  ;;  %11178 = vmatmul.msk.f32.vlgmr.msra.gmra.mxu1 %vm877_vm4, %v11174_v20  ;;  %11181 = vmatmul.msk.f32.gmra.mxu2 %vm877_vm4, %v11175_v57  ;;  %v12454_v5 = vunpack.i.h.bf16 %v12452_v45  ;;  %v12453_v1 = vunpack.i.l.bf16 %v12452_v45  ;;  %v12467_v11 = vpop.permute.xlu0 %12466  ;;  %v17408_v20 = vld [vmem:[#allocation38_spill] sm:$0xff] }
 0xaf9   :  { %11183 = vmatmul.msk.f32.gmra.mxu3 %vm877_vm4, %v11175_v57  ;;  %v7484_v16 = vadd.f32 %v17408_v20, %v7335_v48  ;;  %v12469_v47 = vunpack.i.h.bf16 %v12467_v11  ;;  %v12468_v50 = vunpack.i.l.bf16 %v12467_v11  ;;  %v17418_v48 = vld [vmem:[#allocation17_spill] sm:$0xff]  ;;  %v12493_v17 = vunpack.i.l.bf16 %v17023_v42  ;;  %v17420_v20 = vld [vmem:[#allocation68_spill] sm:$0xff] }
 0xafa   :  { %v9978_v7 = vsel %vm2070_vm7, %v12453_v1, %v12454_v5  ;;  %v9979_v41 = vsel %vm2070_vm7, %v12454_v5, %v12443_v31  ;;  %v17412_v31 = vld [vmem:[#allocation30_spill] sm:$0xff] }
 0xafb   :  { %10054 = vmatpush.msra.mxu2 %v9978_v7  ;;  %10077 = vmatpush.msra.mxu3 %v9979_v41  ;;  %v9972_v10 = vsel %vm2070_vm7, %v12464_v18, %v12468_v50  ;;  %v9973_v24 = vsel %vm2070_vm7, %v12468_v50, %v12469_v47  ;;  %v6684_v45 = vadd.f32 %v17412_v31, %v17411_v52  ;;  %v11194_v7 = vld [vmem:[%s17141_s3 + $0x460] sm:$0xff]  ;;  %v17416_v41 = vld [vmem:[#allocation40_spill] sm:$0xff]  ;;  %v12494_v47 = vunpack.i.h.bf16 %v17023_v42 }
 0xafc   :  { %v6900_v49 = vadd.f32 %v17416_v41, %v6707_v58  ;;  %v17426_v50 = vld [vmem:[#allocation12_spill] sm:$0xff] }
 0xafd   :  { %10055 = vmatpush.msra.mxu2 %v9974_v26  ;;  %10078 = vmatpush.msra.mxu3 %v9975_v59  ;;  %v6899_v39 = vadd.f32 %v17415_v30, %v6684_v45  ;;  %v11195_v42 = vld [vmem:[%s17141_s3 + $0x468] sm:$0xff]  ;;  %v11205_v30 = vld [vmem:[%s17141_s3 + $0x478] sm:$0xff]  ;;  %s12538_s3 = smov [#allocation4]  }
 0xafe   :  { %v7009_v15 = vadd.f32 %v17418_v48, %v6900_v49  ;;  %s10284_s28 = sshll.u32 %s12538_s3, 4  ;;  %s10285_s28 = int_to_ptr.vmem [resolvable:$true] %s10284_s28 }
 0xaff   :  { %11177 = vmatmul.msk.f32.gmra.mxu0 %vm877_vm4, %v11175_v57  ;;  %v12457_v25 = vpop.permute.xlu1 %12456  ;;  %v7008_v28 = vadd.f32 %v17417_v54, %v6899_v39 }
 0xb00   :  { %v7498_v3 = vpop.permute.xlu2 %7497  ;;  %11179 = vmatmul.msk.f32.gmra.mxu1 %vm877_vm4, %v11175_v57  ;;  %11190 = vmatmul.msk.f32.vlgmr.msrb.gmra.mxu2 %vm877_vm4, %v11184_v37  ;;  %v12459_v32 = vunpack.i.h.bf16 %v12457_v25  ;;  %v12458_v13 = vunpack.i.l.bf16 %v12457_v25  ;;  %v12477_v6 = vpop.permute.xlu0 %12476 }
 0xb01   :  { %v7504_v51 = vadd.f32 %v7498_v3, %v7483_v0  ;;  %v7505_v63 = vadd.f32 %v7498_v3, %v7484_v16  ;;  %v7506_v34 = vadd.f32 %v7498_v3, %v7485_v27  ;;  %11192 = vmatmul.msk.f32.vlgmr.msrb.gmra.mxu3 %vm877_vm4, %v11184_v37  ;;  %v7507_v61 = vadd.f32 %v7498_v3, %v7486_v2  ;;  %v17422_v27 = vld [vmem:[#allocation58_spill] sm:$0xff]  ;;  %v17423_v2 = vld [vmem:[#allocation9_spill] sm:$0xff] }
 0xb02   :  { %v9976_v57 = vsel %vm2070_vm7, %v12458_v13, %v12459_v32  ;;  %v9977_v33 = vsel %vm2070_vm7, %v12459_v32, %v12463_v60  ;;  %v12479_v5 = vunpack.i.h.bf16 %v12477_v6  ;;  %v12478_v1 = vunpack.i.l.bf16 %v12477_v6  ;;  %v17424_v60 = vld [vmem:[#allocation43_spill] sm:$0xff] }
 0xb03   :  { %v7512_v19 = vmax.f32 %v7504_v51, 0.0  ;;  %v7513_v46 = vmax.f32 %v7505_v63, 0.0  ;;  %v7514_v12 = vmax.f32 %v7506_v34, 0.0  ;;  %v7515_v4 = vmax.f32 %v7507_v61, 0.0  ;;  %10008 = vmatpush.msrb.mxu0 %v9976_v57  ;;  %10031 = vmatpush.msra.mxu1 %v9977_v33  ;;  %v17425_v63 = vld [vmem:[#allocation11_spill] sm:$0xff]  ;;  %v17430_v33 = vld [vmem:[#allocation33_spill] sm:$0xff] }
 0xb04   :  { %v10123_v62 = vsel %vm315_vm2, %v12474_v38, %v12478_v1  ;;  %v10124_v11 = vsel %vm315_vm2, %v12478_v1, %v12479_v5  ;;  %v7181_v0 = vadd.f32 %v17419_v23, %v7008_v28  ;;  %v7182_v16 = vadd.f32 %v17420_v20, %v7009_v15  ;;  %v17427_v13 = vld [vmem:[#allocation23_spill] sm:$0xff] }
 0xb05   :  { %7518 = vst [vmem:[#allocation4 + $0x50] sm:$0xff] %v7512_v19  ;;  %10009 = vmatpush.msrb.mxu0 %v9972_v10  ;;  %10032 = vmatpush.msra.mxu1 %v9973_v24  ;;  %v7184_v8 = vadd.f32 %v17422_v27, %v17421_v21  ;;  %v7183_v3 = vadd.f32 %v17424_v60, %v17423_v2  ;;  %v17428_v19 = vld [vmem:[#allocation69_spill] sm:$0xff]  ;;  %v17431_v10 = vld [vmem:[#allocation51_spill] sm:$0xff] }
 0xb06   :  { %7519 = vst [vmem:[#allocation4 + $0x58] sm:$0xff] %v7513_v46  ;;  %v7330_v34 = vadd.f32 %v17425_v63, %v7181_v0  ;;  %v7331_v32 = vadd.f32 %v17426_v50, %v7182_v16 }
 0xb07   :  { %7522 = vst [vmem:[#allocation4 + $0xd0] sm:$0xff] %v7514_v12  ;;  %11186 = vmatmul.msk.f32.vlgmr.msra.gmra.mxu0 %vm877_vm4, %v11184_v37  ;;  %v12482_v36 = vpop.permute.xlu1 %12481  ;;  %v7332_v61 = vadd.f32 %v17427_v13, %v7183_v3  ;;  %v7333_v46 = vadd.f32 %v17428_v19, %v7184_v8 }
 0xb08   :  { %7523 = vst [vmem:[#allocation4 + $0xd8] sm:$0xff] %v7515_v4  ;;  %11188 = vmatmul.msk.f32.vlgmr.msrb.gmra.mxu1 %vm877_vm4, %v11184_v37  ;;  %11191 = vmatmul.msk.f32.gmra.mxu2 %vm877_vm4, %v11185_v56  ;;  %v12484_v53 = vunpack.i.h.bf16 %v12482_v36  ;;  %v12483_v35 = vunpack.i.l.bf16 %v12482_v36  ;;  %v12497_v43 = vpop.permute.xlu0 %12496  ;;  %v17429_v4 = vld [vmem:[#allocation56_spill] sm:$0xff]  ;;  %v7480_v6 = vadd.f32 %v17430_v33, %v7331_v32 }
 0xb09   :  { %11193 = vmatmul.msk.f32.gmra.mxu3 %vm877_vm4, %v11185_v56  ;;  %v12499_v29 = vunpack.i.h.bf16 %v12497_v43  ;;  %v12498_v26 = vunpack.i.l.bf16 %v12497_v43  ;;  %v7479_v57 = vadd.f32 %v17429_v4, %v7330_v34  ;;  %v7481_v24 = vadd.f32 %v17431_v10, %v7332_v61 }
 0xb0a   :  { %v10127_v9 = vsel %vm315_vm2, %v12483_v35, %v12484_v53  ;;  %v10128_v22 = vsel %vm315_vm2, %v12484_v53, %v12473_v55 }
 0xb0b   :  { %10203 = vmatpush.msrb.mxu2 %v10127_v9  ;;  %10226 = vmatpush.msrb.mxu3 %v10128_v22  ;;  %v10121_v12 = vsel %vm315_vm2, %v12494_v47, %v12498_v26  ;;  %v10122_v18 = vsel %vm315_vm2, %v12498_v26, %v12499_v29 }
 0xb0d   :  { %10204 = vmatpush.msrb.mxu2 %v10123_v62  ;;  %10227 = vmatpush.msrb.mxu3 %v10124_v11 }
 0xb0f   :  { %11187 = vmatmul.msk.f32.gmra.mxu0 %vm877_vm4, %v11185_v56 }
 0xb10   :  { %11189 = vmatmul.msk.f32.gmra.mxu1 %vm877_vm4, %v11185_v56  ;;  %11200 = vmatmul.msk.f32.vlgmr.msra.gmra.mxu2 %vm877_vm4, %v11194_v7  ;;  %v12487_v14 = vpop.permute.xlu1 %12486  ;;  %v17432_v56 = vld [vmem:[#allocation50_spill] sm:$0xff] }
 0xb11   :  { %11202 = vmatmul.msk.f32.vlgmr.msra.gmra.mxu3 %vm877_vm4, %v11194_v7  ;;  %v12489_v59 = vunpack.i.h.bf16 %v12487_v14  ;;  %v12488_v37 = vunpack.i.l.bf16 %v12487_v14  ;;  %v7482_v52 = vadd.f32 %v17432_v56, %v7333_v46 }
 0xb13   :  { %v10125_v25 = vsel %vm315_vm2, %v12488_v37, %v12489_v59  ;;  %v10126_v51 = vsel %vm315_vm2, %v12489_v59, %v12493_v17 }
 0xb14   :  { %10157 = vmatpush.msra.mxu0 %v10125_v25  ;;  %10180 = vmatpush.msrb.mxu1 %v10126_v51 }
 0xb16   :  { %10158 = vmatpush.msra.mxu0 %v10121_v12  ;;  %10181 = vmatpush.msrb.mxu1 %v10122_v18 }
 0xb17   :  { %11196 = vmatmul.msk.f32.vlgmr.msrb.gmra.mxu0 %vm877_vm4, %v11194_v7 }
 0xb18   :  { %11198 = vmatmul.msk.f32.vlgmr.msra.gmra.mxu1 %vm877_vm4, %v11194_v7  ;;  %11201 = vmatmul.msk.f32.gmra.mxu2 %vm877_vm4, %v11195_v42  ;;  %v7493_v31 = vpop.permute.xlu1 %7492 }
 0xb19   :  { %11203 = vmatmul.msk.f32.gmra.mxu3 %vm877_vm4, %v11195_v42  ;;  %v7500_v45 = vadd.f32 %v7493_v31, %v7479_v57  ;;  %v7501_v55 = vadd.f32 %v7493_v31, %v7480_v6  ;;  %v7502_v36 = vadd.f32 %v7493_v31, %v7481_v24  ;;  %v7503_v5 = vadd.f32 %v7493_v31, %v7482_v52 }
 0xb1b   :  { %v7508_v1 = vmax.f32 %v7500_v45, 0.0  ;;  %v7509_v53 = vmax.f32 %v7501_v55, 0.0  ;;  %v7510_v35 = vmax.f32 %v7502_v36, 0.0  ;;  %v7511_v44 = vmax.f32 %v7503_v5, 0.0 }
 0xb1d   :  { %7516 = vst [vmem:[#allocation4 + $0x40] sm:$0xff] %v7508_v1 }
 0xb1e   :  { %7517 = vst [vmem:[#allocation4 + $0x48] sm:$0xff] %v7509_v53 }
 0xb1f   :  { %7520 = vst [vmem:[#allocation4 + $0xc0] sm:$0xff] %v7510_v35  ;;  %11197 = vmatmul.msk.f32.gmra.mxu0 %vm877_vm4, %v11195_v42 }
 0xb20   :  { %11199 = vmatmul.msk.f32.gmra.mxu1 %vm877_vm4, %v11195_v42  ;;  %7521 = vst [vmem:[#allocation4 + $0xc8] sm:$0xff] %v7511_v44  ;;  %11210 = vmatmul.msk.f32.vlgmr.msrb.gmra.mxu2 %vm877_vm4, %v11204_v40 }
 0xb21   :  { %11212 = vmatmul.msk.f32.vlgmr.msrb.gmra.mxu3 %vm877_vm4, %v11204_v40 }
 0xb22   :  { %v9049_v58 = vpop.f32.mrf.mxu2 }
 0xb23   :  { %v9072_v38 = vpop.f32.mrf.mxu3 }
 0xb24   :  { %v9003_v9 = vpop.f32.mrf.mxu0  ;;  %v9026_v22 = vpop.f32.mrf.mxu1 }
 0xb27   :  { %11206 = vmatmul.msk.f32.vlgmr.msra.gmra.mxu0 %vm877_vm4, %v11204_v40 }
 0xb28   :  { %11208 = vmatmul.msk.f32.vlgmr.msrb.gmra.mxu1 %vm877_vm4, %v11204_v40  ;;  %11211 = vmatmul.msk.f32.gmra.mxu2 %vm877_vm4, %v11205_v30 }
 0xb29   :  { %11213 = vmatmul.msk.f32.gmra.mxu3 %vm877_vm4, %v11205_v30 }
 0xb2b   :  { %v9052_v39 = vpop.f32.mrf.mxu2  ;;  %v9075_v62 = vpop.f32.mrf.mxu3 }
 0xb2c   :  { %v9006_v11 = vpop.f32.mrf.mxu0  ;;  %v9029_v7 = vpop.f32.mrf.mxu1 }
 0xb2f   :  { %11207 = vmatmul.msk.f32.gmra.mxu0 %vm877_vm4, %v11205_v30 }
 0xb30   :  { %11209 = vmatmul.msk.f32.gmra.mxu1 %vm877_vm4, %v11205_v30 }
 0xb33   :  { %v9187_v41 = vpop.f32.mrf.mxu2  ;;  %v9210_v43 = vpop.f32.mrf.mxu3 }
 0xb34   :  { %v9188_v49 = vadd.f32 %v9187_v41, %v9049_v58  ;;  %v9141_v54 = vpop.f32.mrf.mxu0  ;;  %v9211_v28 = vadd.f32 %v9210_v43, %v9072_v38  ;;  %v9164_v15 = vpop.f32.mrf.mxu1 }
 0xb35   :  { %v9142_v48 = vadd.f32 %v9141_v54, %v9003_v9  ;;  %v9165_v17 = vadd.f32 %v9164_v15, %v9026_v22 }
 0xb3b   :  { %v9190_v14 = vpop.f32.mrf.mxu2  ;;  %v9213_v26 = vpop.f32.mrf.mxu3 }
 0xb3c   :  { %v9191_v29 = vadd.f32 %v9190_v14, %v9052_v39  ;;  %v9144_v59 = vpop.f32.mrf.mxu0  ;;  %v9214_v37 = vadd.f32 %v9213_v26, %v9075_v62  ;;  %v9167_v0 = vpop.f32.mrf.mxu1 }
 0xb3d   :  { %v9145_v23 = vadd.f32 %v9144_v59, %v9006_v11  ;;  %v9168_v20 = vadd.f32 %v9167_v0, %v9029_v7 }
 0xb43   :  { %v9328_v16 = vpop.f32.mrf.mxu2  ;;  %v9351_v27 = vpop.f32.mrf.mxu3 }
 0xb44   :  { %v9359_v21 = vadd.f32 %v9328_v16, %v9188_v49  ;;  %v9282_v8 = vpop.f32.mrf.mxu0  ;;  %v9360_v2 = vadd.f32 %v9351_v27, %v9211_v28  ;;  %v9305_v3 = vpop.f32.mrf.mxu1 }
 0xb45   :  { %v9357_v60 = vadd.f32 %v9282_v8, %v9142_v48  ;;  %v9358_v47 = vadd.f32 %v9305_v3, %v9165_v17 }
 0xb4b   :  { %v9331_v25 = vpop.f32.mrf.mxu2  ;;  %v9354_v63 = vpop.f32.mrf.mxu3 }
 0xb4c   :  { %v9363_v51 = vadd.f32 %v9331_v25, %v9191_v29  ;;  %v9285_v34 = vpop.f32.mrf.mxu0  ;;  %v9364_v50 = vadd.f32 %v9354_v63, %v9214_v37 }
 0xb4d   :  { %v9361_v32 = vadd.f32 %v9285_v34, %v9145_v23  ;;  %v9308_v13 = vpop.f32.mrf.mxu1 }
 0xb4e   :  { %v9362_v61 = vadd.f32 %v9308_v13, %v9168_v20 }
 0xb53   :  { %v9477_v19 = vpop.f32.mrf.mxu2 }
 0xb54   :  { %v9508_v46 = vadd.f32 %v9477_v19, %v9359_v21  ;;  %v9500_v12 = vpop.f32.mrf.mxu3  ;;  %v9431_v18 = vpop.f32.mrf.mxu0 }
 0xb55   :  { %v9509_v42 = vadd.f32 %v9500_v12, %v9360_v2  ;;  %v9506_v4 = vadd.f32 %v9431_v18, %v9357_v60  ;;  %v9454_v57 = vpop.f32.mrf.mxu1 }
 0xb56   :  { %v9507_v33 = vadd.f32 %v9454_v57, %v9358_v47 }
 0xb5b   :  { %v9480_v6 = vpop.f32.mrf.mxu2 }
 0xb5c   :  { %v9512_v10 = vadd.f32 %v9480_v6, %v9363_v51  ;;  %v9503_v24 = vpop.f32.mrf.mxu3  ;;  %v9434_v56 = vpop.f32.mrf.mxu0 }
 0xb5d   :  { %v9513_v52 = vadd.f32 %v9503_v24, %v9364_v50  ;;  %v9510_v31 = vadd.f32 %v9434_v56, %v9361_v32  ;;  %v9457_v45 = vpop.f32.mrf.mxu1  ;;  %v10249_v6 = vpop.permute.xlu0 %10248 }
 0xb5e   :  { %v9511_v55 = vadd.f32 %v9457_v45, %v9362_v61 }
 0xb63   :  { %v9586_v36 = vpop.f32.mrf.mxu2 }
 0xb64   :  { %v9609_v5 = vpop.f32.mrf.mxu3  ;;  %v9540_v1 = vpop.f32.mrf.mxu0  ;;  %v9617_v0 = vadd.f32 %v9586_v36, %v9508_v46 }
 0xb65   :  { %v9563_v53 = vpop.f32.mrf.mxu1  ;;  %v9618_v20 = vadd.f32 %v9609_v5, %v9509_v42  ;;  %v9615_v27 = vadd.f32 %v9540_v1, %v9506_v4 }
 0xb66   :  { %v9616_v8 = vadd.f32 %v9563_v53, %v9507_v33 }
 0xb6b   :  { %v9589_v35 = vpop.f32.mrf.mxu2 }
 0xb6c   :  { %v9612_v44 = vpop.f32.mrf.mxu3  ;;  %v9543_v40 = vpop.f32.mrf.mxu0  ;;  %v9621_v46 = vadd.f32 %v9589_v35, %v9512_v10 }
 0xb6d   :  { %v9566_v58 = vpop.f32.mrf.mxu1  ;;  %v9622_v18 = vadd.f32 %v9612_v44, %v9513_v52  ;;  %v9619_v24 = vadd.f32 %v9543_v40, %v9510_v31 }
 0xb6e   :  { %v9620_v56 = vadd.f32 %v9566_v58, %v9511_v55 }
 0xb73   :  { %v9759_v38 = vpop.f32.mrf.mxu2 }
 0xb74   :  { %v9782_v9 = vpop.f32.mrf.mxu3  ;;  %v9713_v22 = vpop.f32.mrf.mxu0  ;;  %v9790_v2 = vadd.f32 %v9759_v38, %v9617_v0 }
 0xb75   :  { %v9736_v30 = vpop.f32.mrf.mxu1  ;;  %v9791_v60 = vadd.f32 %v9782_v9, %v9618_v20  ;;  %v9788_v3 = vadd.f32 %v9713_v22, %v9615_v27 }
 0xb76   :  { %v9789_v47 = vadd.f32 %v9736_v30, %v9616_v8 }
 0xb7b   :  { %v9762_v39 = vpop.f32.mrf.mxu2 }
 0xb7c   :  { %v9785_v62 = vpop.f32.mrf.mxu3  ;;  %v9716_v11 = vpop.f32.mrf.mxu0  ;;  %v9794_v5 = vadd.f32 %v9762_v39, %v9621_v46 }
 0xb7d   :  { %v9739_v7 = vpop.f32.mrf.mxu1  ;;  %v9795_v1 = vadd.f32 %v9785_v62, %v9622_v18  ;;  %v9792_v9 = vadd.f32 %v9716_v11, %v9619_v24 }
 0xb7e   :  { %v9793_v22 = vadd.f32 %v9739_v7, %v9620_v56 }
 0xb83   :  { %v9908_v41 = vpop.f32.mrf.mxu2 }
 0xb84   :  { %v9931_v49 = vpop.f32.mrf.mxu3  ;;  %v9862_v43 = vpop.f32.mrf.mxu0  ;;  %v9939_v25 = vadd.f32 %v9908_v41, %v9790_v2 }
 0xb85   :  { %v9885_v54 = vpop.f32.mrf.mxu1  ;;  %v9940_v51 = vadd.f32 %v9931_v49, %v9791_v60  ;;  %v9937_v63 = vadd.f32 %v9862_v43, %v9788_v3 }
 0xb86   :  { %v9938_v34 = vadd.f32 %v9885_v54, %v9789_v47 }
 0xb8b   :  { %v9911_v28 = vpop.f32.mrf.mxu2 }
 0xb8c   :  { %v9934_v48 = vpop.f32.mrf.mxu3  ;;  %v9865_v15 = vpop.f32.mrf.mxu0  ;;  %v9943_v49 = vadd.f32 %v9911_v28, %v9794_v5 }
 0xb8d   :  { %v9888_v17 = vpop.f32.mrf.mxu1  ;;  %v9944_v10 = vadd.f32 %v9934_v48, %v9795_v1  ;;  %v9941_v44 = vadd.f32 %v9865_v15, %v9792_v9  ;;  %v10254_v48 = vpop.permute.xlu1 %10253 }
 0xb8e   :  { %v9942_v43 = vadd.f32 %v9888_v17, %v9793_v22 }
 0xb93   :  { %v10057_v14 = vpop.f32.mrf.mxu2 }
 0xb94   :  { %v10080_v29 = vpop.f32.mrf.mxu3  ;;  %v10011_v26 = vpop.f32.mrf.mxu0  ;;  %v10088_v50 = vadd.f32 %v10057_v14, %v9939_v25 }
 0xb95   :  { %v10034_v59 = vpop.f32.mrf.mxu1  ;;  %v10089_v32 = vadd.f32 %v10080_v29, %v9940_v51  ;;  %v10086_v13 = vadd.f32 %v10011_v26, %v9937_v63 }
 0xb96   :  { %v10087_v61 = vadd.f32 %v10034_v59, %v9938_v34 }
 0xb9b   :  { %v10060_v37 = vpop.f32.mrf.mxu2 }
 0xb9c   :  { %v10083_v23 = vpop.f32.mrf.mxu3  ;;  %v10014_v16 = vpop.f32.mrf.mxu0  ;;  %v10092_v31 = vadd.f32 %v10060_v37, %v9943_v49 }
 0xb9d   :  { %v10037_v21 = vpop.f32.mrf.mxu1  ;;  %v10093_v55 = vadd.f32 %v10083_v23, %v9944_v10  ;;  %v10090_v40 = vadd.f32 %v10014_v16, %v9941_v44 }
 0xb9e   :  { %v10091_v58 = vadd.f32 %v10037_v21, %v9942_v43 }
 0xba3   :  { %v10206_v19 = vpop.f32.mrf.mxu2 }
 0xba4   :  { %v10229_v12 = vpop.f32.mrf.mxu3  ;;  %v10237_v42 = vadd.f32 %v10206_v19, %v10088_v50  ;;  %v10160_v4 = vpop.f32.mrf.mxu0 }
 0xba5   :  { %v10238_v57 = vadd.f32 %v10229_v12, %v10089_v32  ;;  %v10183_v33 = vpop.f32.mrf.mxu1  ;;  %v10235_v45 = vadd.f32 %v10160_v4, %v10086_v13 }
 0xba6   :  { %v10236_v36 = vadd.f32 %v10183_v33, %v10087_v61  ;;  %v10258_v53 = vadd.f32 %v10249_v6, %v10237_v42 }
 0xba7   :  { %v10259_v38 = vadd.f32 %v10249_v6, %v10238_v57  ;;  %v10256_v30 = vadd.f32 %v10249_v6, %v10235_v45 }
 0xba8   :  { %v10257_v41 = vadd.f32 %v10249_v6, %v10236_v36  ;;  %v10266_v52 = vmax.f32 %v10258_v53, 0.0 }
 0xba9   :  { %v10267_v35 = vmax.f32 %v10259_v38, 0.0  ;;  %v10264_v54 = vmax.f32 %v10256_v30, 0.0 }
 0xbaa   :  { %v10265_v14 = vmax.f32 %v10257_v41, 0.0  ;;  %10276 = vst [vmem:[#allocation4 + $0xe0] sm:$0xff] %v10266_v52 }
 0xbab   :  { %10277 = vst [vmem:[#allocation4 + $0xe8] sm:$0xff] %v10267_v35  ;;  %v10209_v39 = vpop.f32.mrf.mxu2 }
 0xbac   :  { %v10232_v62 = vpop.f32.mrf.mxu3  ;;  %10272 = vst [vmem:[#allocation4 + $0x60] sm:$0xff] %v10264_v54  ;;  %v10241_v11 = vadd.f32 %v10209_v39, %v10092_v31  ;;  %v10163_v29 = vpop.f32.mrf.mxu0 }
 0xbad   :  { %v10242_v7 = vadd.f32 %v10232_v62, %v10093_v55  ;;  %v10186_v28 = vpop.f32.mrf.mxu1  ;;  %10273 = vst [vmem:[#allocation4 + $0x68] sm:$0xff] %v10265_v14  ;;  %v10239_v26 = vadd.f32 %v10163_v29, %v10090_v40 }
 0xbae   :  { %v10240_v15 = vadd.f32 %v10186_v28, %v10091_v58  ;;  %v10262_v17 = vadd.f32 %v10254_v48, %v10241_v11 }
 0xbaf   :  { %v10263_v59 = vadd.f32 %v10254_v48, %v10242_v7  ;;  %v10260_v0 = vadd.f32 %v10254_v48, %v10239_v26 }
 0xbb0   :  { %v10261_v37 = vadd.f32 %v10254_v48, %v10240_v15  ;;  %v10270_v23 = vmax.f32 %v10262_v17, 0.0 }
 0xbb1   :  { %v10271_v20 = vmax.f32 %v10263_v59, 0.0  ;;  %v10268_v16 = vmax.f32 %v10260_v0, 0.0 }
 0xbb2   :  { %v10269_v21 = vmax.f32 %v10261_v37, 0.0  ;;  %10278 = vst [vmem:[#allocation4 + $0xf0] sm:$0xff] %v10270_v23 }
 0xbb3   :  { %10279 = vst [vmem:[#allocation4 + $0xf8] sm:$0xff] %v10271_v20 }
 0xbb4   :  { %10274 = vst [vmem:[#allocation4 + $0x70] sm:$0xff] %v10268_v16 }
 0xbb5   :  { %10275 = vst [vmem:[#allocation4 + $0x78] sm:$0xff] %v10269_v21 }
 0xbb6   :  { %10292 = dma.vmem_to_hbm [thread:$0]  %s10285_s28, 4096, %s10287_s6, [#allocation5], %s12539_s9, %s12539_s9, %s12532_s8  }
 0xbb7   :  { %12527 = dma.done.wait [#allocation5], 4096  }
 0xbb8   :  { %12528 = vsyncadd [#allocation5], 4294963200 }
 0xbb9   :  { %10297 = vsyncpa [#allocation5], 1 }

</bundles_post_ra>
